<compile_context>
chip_gen: v7x
topology: tpu7x:2x2x1
jax: 0.10.0
libtpu: 0.0.40
codegen_flags: <defaults>
</compile_context>

<pallas_src>
import functools

import jax
import jax.numpy as jnp
from jax.experimental import pallas as pl
from jax.experimental.pallas import tpu as pltpu

OUTPUT_SIZE = 2
VMEM_LIMIT = 64 * 1024 * 1024  # explicit budget; actual tiles use far less.


def _round_up(x, m):
    return (x + m - 1) // m * m


def _pad_and_tile(d, align, max_tile):
    """Return (padded_dim, tile) with tile | padded_dim and tile % align == 0."""
    p = _round_up(d, align)
    if p <= max_tile:
        return p, p
    return _round_up(d, max_tile), max_tile


def _choose_tk(Kp):
    for cand in (512, 256):
        if Kp % cand == 0:
            return cand
    return 128


# --------------------------------------------------------------------------
# Pallas kernels
# --------------------------------------------------------------------------
def _matmul_kernel(x_ref, w_ref, b_ref, o_ref, *, relu):
    """bf16 x bf16 -> f32, accumulated directly into the resident output block."""
    @pl.when(pl.program_id(2) == 0)
    def _():
        o_ref[...] = jnp.zeros_like(o_ref)

    o_ref[...] += jnp.dot(x_ref[...], w_ref[...],
                          preferred_element_type=jnp.float32)

    @pl.when(pl.program_id(2) == pl.num_programs(2) - 1)
    def _():
        y = o_ref[...] + b_ref[...]
        if relu:
            y = jnp.maximum(y, 0.0)
        o_ref[...] = y


def _matmul_res_kernel(x_ref, w_ref, b_ref, res_ref, o_ref, *, relu):
    """Same as _matmul_kernel, plus fused residual add before the ReLU."""
    @pl.when(pl.program_id(2) == 0)
    def _():
        o_ref[...] = jnp.zeros_like(o_ref)

    o_ref[...] += jnp.dot(x_ref[...], w_ref[...],
                          preferred_element_type=jnp.float32)

    @pl.when(pl.program_id(2) == pl.num_programs(2) - 1)
    def _():
        y = o_ref[...] + b_ref[...] + res_ref[...]
        if relu:
            y = jnp.maximum(y, 0.0)
        o_ref[...] = y


def pallas_matmul(x, w_p, b_p, n_out, *, relu=False, residual=None):
    """(M,K) @ pre-padded bf16 (Kp,Np) + bias [+ residual] [+ReLU] -> f32 (M,n_out)."""
    M, K = x.shape
    Kp, Np = w_p.shape

    Mp, tm = _pad_and_tile(M, 8, 512)
    tn = Np if Np <= 512 else 512
    assert Np % tn == 0
    tk = _choose_tk(Kp)

    xp = jnp.zeros((Mp, Kp), jnp.bfloat16).at[:M, :K].set(x.astype(jnp.bfloat16))

    in_specs = [
        pl.BlockSpec((tm, tk), lambda i, j, k: (i, k)),
        pl.BlockSpec((tk, tn), lambda i, j, k: (k, j)),
        pl.BlockSpec((1, tn), lambda i, j, k: (0, j)),
    ]
    args = [xp, w_p, b_p]

    if residual is not None:
        rp = jnp.zeros((Mp, Np), jnp.float32).at[:M, :n_out].set(
            residual.astype(jnp.float32))
        in_specs.append(pl.BlockSpec((tm, tn), lambda i, j, k: (i, j)))
        args.append(rp)
        kernel = functools.partial(_matmul_res_kernel, relu=relu)
    else:
        kernel = functools.partial(_matmul_kernel, relu=relu)

    out = pl.pallas_call(
        kernel,
        out_shape=jax.ShapeDtypeStruct((Mp, Np), jnp.float32),
        grid_spec=pltpu.PrefetchScalarGridSpec(
            num_scalar_prefetch=0,
            grid=(Mp // tm, Np // tn, Kp // tk),
            in_specs=in_specs,
            out_specs=pl.BlockSpec((tm, tn), lambda i, j, k: (i, j)),
        ),
        compiler_params=pltpu.CompilerParams(
            dimension_semantics=("parallel", "parallel", "arbitrary"),
            vmem_limit_bytes=VMEM_LIMIT),
    )(*args)
    return out[:M, :n_out]


def _maxpool_kernel(p_ref, o_ref):
    # p_ref: (9, tm, C) — lane-dense leading-index layout, clean full-vreg loads.
    y = p_ref[0]
    for i in range(1, p_ref.shape[0]):
        y = jnp.maximum(y, p_ref[i])
    o_ref[...] = y


def pallas_maxpool3x3s2(x_nhwc):
    """MaxPool2d(kernel=3, stride=2, padding=1), NHWC, f32."""
    N, H, W, C = x_nhwc.shape
    k, s, pad = 3, 2, 1
    neg = jnp.finfo(jnp.float32).min
    xp = jnp.pad(x_nhwc, ((0, 0), (pad, pad), (pad, pad), (0, 0)),
                 constant_values=neg)
    Hp, Wp = H + 2 * pad, W + 2 * pad
    oh = (Hp - k) // s + 1
    ow = (Wp - k) // s + 1
    M = N * oh * ow
    cols = [xp[:, i:i + s * oh:s, j:j + s * ow:s, :].reshape(M, C)
            for i in range(k) for j in range(k)]
    patches = jnp.stack(cols, axis=0)                       # (9, M, C)

    Mp, tm = _pad_and_tile(M, 8, 512)
    if Mp != M:
        patches = jnp.zeros((k * k, Mp, C), jnp.float32).at[:, :M, :].set(patches)

    out = pl.pallas_call(
        _maxpool_kernel,
        out_shape=jax.ShapeDtypeStruct((Mp, C), jnp.float32),
        grid_spec=pltpu.PrefetchScalarGridSpec(
            num_scalar_prefetch=0,
            grid=(Mp // tm,),
            in_specs=[pl.BlockSpec((k * k, tm, C), lambda i: (0, i, 0))],
            out_specs=pl.BlockSpec((tm, C), lambda i: (i, 0)),
        ),
        compiler_params=pltpu.CompilerParams(
            dimension_semantics=("parallel",),
            vmem_limit_bytes=VMEM_LIMIT),
    )(patches)
    return out[:M].reshape(N, oh, ow, C)


def _fc_head_kernel(x_ref, w1_ref, b1_ref, w2_ref, b2_ref, w3_ref, b3_ref, o_ref):
    """Fused fc1+ReLU -> fc2+ReLU -> fc3 in one kernel (all weights VMEM-resident)."""
    h = jnp.dot(x_ref[...], w1_ref[...], preferred_element_type=jnp.float32)
    h = jnp.maximum(h + b1_ref[...], 0.0).astype(jnp.bfloat16)
    h = jnp.dot(h, w2_ref[...], preferred_element_type=jnp.float32)
    h = jnp.maximum(h + b2_ref[...], 0.0).astype(jnp.bfloat16)
    o_ref[...] = jnp.dot(h, w3_ref[...],
                         preferred_element_type=jnp.float32) + b3_ref[...]


def pallas_fc_head(feat, head):
    B, F = feat.shape
    Kp1 = head["w1"].shape[0]
    Np3 = head["w3"].shape[1]
    Bp = _round_up(B, 8)
    xp = jnp.zeros((Bp, Kp1), jnp.bfloat16).at[:B, :F].set(feat.astype(jnp.bfloat16))
    out = pl.pallas_call(
        _fc_head_kernel,
        out_shape=jax.ShapeDtypeStruct((Bp, Np3), jnp.float32),
        compiler_params=pltpu.CompilerParams(vmem_limit_bytes=VMEM_LIMIT),
    )(xp, head["w1"], head["b1"], head["w2"], head["b2"], head["w3"], head["b3"])
    return out[:B, :head["n_out"]]


# --------------------------------------------------------------------------
# JAX glue: im2col, conv+BN folding, ResNet18 structure
# --------------------------------------------------------------------------
def _im2col(x_nhwc, k, stride, pad):
    N, H, W, C = x_nhwc.shape
    xp = jnp.pad(x_nhwc, ((0, 0), (pad, pad), (pad, pad), (0, 0)))
    Hp, Wp = H + 2 * pad, W + 2 * pad
    oh = (Hp - k) // stride + 1
    ow = (Wp - k) // stride + 1
    cols = []
    for i in range(k):
        for j in range(k):
            cols.append(xp[:, i:i + stride * oh:stride,
                           j:j + stride * ow:stride, :])
    patches = jnp.concatenate(cols, axis=-1)      # order: (kh, kw, cin)
    return patches.reshape(N * oh * ow, k * k * C), oh, ow


def conv_bn(x, p, stride, *, relu, residual=None):
    N = x.shape[0]
    # Cast before im2col so the 9x-duplicated patch tensor lives in HBM as bf16.
    patches, oh, ow = _im2col(x.astype(jnp.bfloat16), p["k"], stride, p["pad"])
    res2d = residual.reshape(N * oh * ow, -1) if residual is not None else None
    y = pallas_matmul(patches, p["w"], p["b"], p["cout"],
                      relu=relu, residual=res2d)
    return y.reshape(N, oh, ow, p["cout"])


def basic_block(x, blk):
    stride = blk["stride"]
    identity = x
    if blk["down"] is not None:
        identity = conv_bn(x, blk["down"], stride, relu=False)
    y = conv_bn(x, blk["c1"], stride, relu=True)
    y = conv_bn(y, blk["c2"], 1, relu=True, residual=identity)
    return y


class _KeyGen:
    def __init__(self, seed):
        self.key = jax.random.PRNGKey(seed)

    def __call__(self):
        self.key, sub = jax.random.split(self.key)
        return sub


def _make_conv_bn(kg, cin, cout, k, pad):
    fan_in = cin * k * k
    w = jax.random.normal(kg(), (cout, cin, k, k), jnp.float32) * jnp.sqrt(2.0 / fan_in)
    gamma = 1.0 + 0.1 * jax.random.normal(kg(), (cout,), jnp.float32)
    beta = 0.1 * jax.random.normal(kg(), (cout,), jnp.float32)
    mean = 0.1 * jax.random.normal(kg(), (cout,), jnp.float32)
    var = 1.0 + 0.1 * jax.random.uniform(kg(), (cout,), jnp.float32)
    scale = gamma / jnp.sqrt(var + 1e-5)
    w_f = w * scale[:, None, None, None]
    b_f = beta - mean * scale
    # (Cout, Cin, KH, KW) -> (KH, KW, Cin, Cout) -> (KH*KW*Cin, Cout)
    w_mat = jnp.transpose(w_f, (2, 3, 1, 0)).reshape(k * k * cin, cout)
    K = k * k * cin
    Kp, Np = _round_up(K, 128), _round_up(cout, 128)
    wp = jnp.zeros((Kp, Np), jnp.bfloat16).at[:K, :cout].set(w_mat.astype(jnp.bfloat16))
    bp = jnp.zeros((1, Np), jnp.float32).at[0, :cout].set(b_f)
    return {"w": wp, "b": bp, "k": k, "pad": pad, "cout": cout}


def _make_fc(kg, cin, cout):
    w = jax.random.normal(kg(), (cin, cout), jnp.float32) / jnp.sqrt(jnp.float32(cin))
    b = 0.01 * jax.random.normal(kg(), (cout,), jnp.float32)
    Kp, Np = _round_up(cin, 128), _round_up(cout, 128)
    wp = jnp.zeros((Kp, Np), jnp.bfloat16).at[:cin, :cout].set(w.astype(jnp.bfloat16))
    bp = jnp.zeros((1, Np), jnp.float32).at[0, :cout].set(b)
    return wp, bp


def build_params(seed=42):
    kg = _KeyGen(seed)
    P = {"conv1": _make_conv_bn(kg, 3, 64, 7, 3)}

    def layer(cin, cout, stride):
        b1 = {"c1": _make_conv_bn(kg, cin, cout, 3, 1),
              "c2": _make_conv_bn(kg, cout, cout, 3, 1),
              "down": (_make_conv_bn(kg, cin, cout, 1, 0)
                       if (stride != 1 or cin != cout) else None),
              "stride": stride}
        b2 = {"c1": _make_conv_bn(kg, cout, cout, 3, 1),
              "c2": _make_conv_bn(kg, cout, cout, 3, 1),
              "down": None, "stride": 1}
        return [b1, b2]

    P["layer1"] = layer(64, 64, 1)
    P["layer2"] = layer(64, 128, 2)
    P["layer3"] = layer(128, 256, 2)
    P["layer4"] = layer(256, 512, 2)

    # fc head: Dropout -> Linear(512,128) -> ReLU -> Dropout -> Linear(128,64)
    #          -> ReLU -> Dropout -> Linear(64, OUTPUT_SIZE)
    w1, b1 = _make_fc(kg, 512, 128)
    w2, b2 = _make_fc(kg, 128, 64)
    w3, b3 = _make_fc(kg, 64, OUTPUT_SIZE)
    P["head"] = {"w1": w1, "b1": b1, "w2": w2, "b2": b2,
                 "w3": w3, "b3": b3, "n_out": OUTPUT_SIZE}
    return P


def e2e_cnn_forward(params, x_nchw):
    # ResNet18 backbone (fc replaced by the custom head), eval semantics.
    x = jnp.transpose(x_nchw, (0, 2, 3, 1)).astype(jnp.float32)  # NCHW -> NHWC
    x = conv_bn(x, params["conv1"], stride=2, relu=True)
    x = pallas_maxpool3x3s2(x)
    for name in ("layer1", "layer2", "layer3", "layer4"):
        for blk in params[name]:
            x = basic_block(x, blk)
    feat = jnp.mean(x, axis=(1, 2))                               # adaptive avgpool -> (B, 512)
    # Dropout layers are identity at inference time.
    return pallas_fc_head(feat, params["head"])


if __name__ == "__main__":
    key = jax.random.PRNGKey(0)
    B = 2
    x = jax.random.normal(key, (B, 3, 32, 32), jnp.float32)       # NCHW, like torch

    params = build_params(seed=42)
    fwd = jax.jit(functools.partial(e2e_cnn_forward, params))
    out = fwd(x)
    jax.block_until_ready(out)
    assert out.shape == (B, OUTPUT_SIZE) and out.dtype == jnp.float32
    print("KERNEL_OK")
</pallas_src>

<mosaic_0001>
module attributes {stable_mosaic.version = 11 : i64} {
  func.func @_matmul_kernel(%arg0: i32, %arg1: i32, %arg2: i32, %arg3: memref<512x256xbf16, #tpu.memory_space<vmem>>, %arg4: memref<256x128xbf16, #tpu.memory_space<vmem>>, %arg5: memref<1x128xf32, #tpu.memory_space<vmem>>, %arg6: memref<512x128xf32, #tpu.memory_space<vmem>>) attributes {dimension_semantics = [#tpu.dimension_semantics<parallel>, #tpu.dimension_semantics<parallel>, #tpu.dimension_semantics<arbitrary>], iteration_bounds = array<i64: 1, 1, 1>, scalar_prefetch = 0 : i64, scratch_operands = 0 : i64, tpu.core_type = #tpu.core_type<tc>, window_params = [{transform_indices = @transform_0, window_bounds = array<i64: 512, 256>}, {transform_indices = @transform_1, window_bounds = array<i64: 256, 128>}, {transform_indices = @transform_2, window_bounds = array<i64: 1, 128>}, {transform_indices = @transform_3, window_bounds = array<i64: 512, 128>}]} {
    %c0_i32 = arith.constant 0 : i32
    %0 = arith.cmpi eq, %arg2, %c0_i32 : i32
    %1 = arith.extui %0 : i1 to i32
    %c0_i32_0 = arith.constant 0 : i32
    %2 = arith.cmpi ne, %1, %c0_i32_0 : i32
    scf.if %2 {
      %cst_10 = arith.constant 0.000000e+00 : f32
      %12 = vector.broadcast %cst_10 : f32 to vector<512x128xf32>
      %c0_11 = arith.constant 0 : index
      %c0_12 = arith.constant 0 : index
      %13 = vector.load %arg6[%c0_11, %c0_12] : memref<512x128xf32, #tpu.memory_space<vmem>>, vector<512x128xf32>
      tpu.vector_store %arg6[%c0_11, %c0_12], %12 {strides = array<i32>} : memref<512x128xf32, #tpu.memory_space<vmem>>, vector<512x128xf32>,
    } else {
    }
    %c0 = arith.constant 0 : index
    %c0_1 = arith.constant 0 : index
    %3 = vector.load %arg6[%c0, %c0_1] : memref<512x128xf32, #tpu.memory_space<vmem>>, vector<512x128xf32>
    %c0_2 = arith.constant 0 : index
    %c0_3 = arith.constant 0 : index
    %4 = vector.load %arg3[%c0_2, %c0_3] : memref<512x256xbf16, #tpu.memory_space<vmem>>, vector<512x256xbf16>
    %c0_4 = arith.constant 0 : index
    %c0_5 = arith.constant 0 : index
    %5 = vector.load %arg4[%c0_4, %c0_5] : memref<256x128xbf16, #tpu.memory_space<vmem>>, vector<256x128xbf16>
    %cst = arith.constant dense<0.000000e+00> : vector<512x128xf32>
    %6 = tpu.matmul %4, %5, %cst {dimension_numbers = #tpu.dot_dimension_numbers<[1], [0], [0], [1], [0, 0, 1, 1], [], []>} : vector<512x256xbf16>, vector<256x128xbf16>, vector<512x128xf32> -> vector<512x128xf32>
    %7 = arith.addf %3, %6 : vector<512x128xf32>
    %c0_6 = arith.constant 0 : index
    %c0_7 = arith.constant 0 : index
    %8 = vector.load %arg6[%c0_6, %c0_7] : memref<512x128xf32, #tpu.memory_space<vmem>>, vector<512x128xf32>
    tpu.vector_store %arg6[%c0_6, %c0_7], %7 {strides = array<i32>} : memref<512x128xf32, #tpu.memory_space<vmem>>, vector<512x128xf32>,
    %c0_i32_8 = arith.constant 0 : i32
    %9 = arith.cmpi eq, %arg2, %c0_i32_8 : i32
    %10 = arith.extui %9 : i1 to i32
    %c0_i32_9 = arith.constant 0 : i32
    %11 = arith.cmpi ne, %10, %c0_i32_9 : i32
    scf.if %11 {
      %c0_10 = arith.constant 0 : index
      %c0_11 = arith.constant 0 : index
      %12 = vector.load %arg6[%c0_10, %c0_11] : memref<512x128xf32, #tpu.memory_space<vmem>>, vector<512x128xf32>
      %c0_12 = arith.constant 0 : index
      %c0_13 = arith.constant 0 : index
      %13 = vector.load %arg5[%c0_12, %c0_13] : memref<1x128xf32, #tpu.memory_space<vmem>>, vector<1x128xf32>
      %14 = vector.broadcast %13 : vector<1x128xf32> to vector<512x128xf32>
      %15 = arith.addf %12, %14 : vector<512x128xf32>
      %cst_14 = arith.constant 0.000000e+00 : f32
      %16 = vector.broadcast %cst_14 : f32 to vector<512x128xf32>
      %17 = arith.maximumf %15, %16 : vector<512x128xf32>
      %c0_15 = arith.constant 0 : index
      %c0_16 = arith.constant 0 : index
      %18 = vector.load %arg6[%c0_15, %c0_16] : memref<512x128xf32, #tpu.memory_space<vmem>>, vector<512x128xf32>
      tpu.vector_store %arg6[%c0_15, %c0_16], %17 {strides = array<i32>} : memref<512x128xf32, #tpu.memory_space<vmem>>, vector<512x128xf32>,
    } else {
    }
    return
  }
  func.func @transform_0(%arg0: i32, %arg1: i32, %arg2: i32) -> (i32, i32) {
    %c0_i32 = arith.constant 0 : i32
    return %arg0, %arg2 : i32, i32
  }
  func.func @transform_1(%arg0: i32, %arg1: i32, %arg2: i32) -> (i32, i32) {
    %c0_i32 = arith.constant 0 : i32
    return %arg2, %arg1 : i32, i32
  }
  func.func @transform_2(%arg0: i32, %arg1: i32, %arg2: i32) -> (i32, i32) {
    %c0_i32 = arith.constant 0 : i32
    %c0_i32_0 = arith.constant 0 : i32
    return %c0_i32, %arg1 : i32, i32
  }
  func.func @transform_3(%arg0: i32, %arg1: i32, %arg2: i32) -> (i32, i32) {
    %c0_i32 = arith.constant 0 : i32
    return %arg0, %arg1 : i32, i32
  }
}

module attributes {stable_mosaic.version = 11 : i64} {
  func.func @_maxpool_kernel(%arg0: i32, %arg1: memref<9x128x64xf32, #tpu.memory_space<vmem>>, %arg2: memref<128x64xf32, #tpu.memory_space<vmem>>) attributes {dimension_semantics = [#tpu.dimension_semantics<parallel>], iteration_bounds = array<i64: 1>, scalar_prefetch = 0 : i64, scratch_operands = 0 : i64, tpu.core_type = #tpu.core_type<tc>, window_params = [{transform_indices = @transform_0, window_bounds = array<i64: 9, 128, 64>}, {transform_indices = @transform_1, window_bounds = array<i64: 128, 64>}]} {
    %c0 = arith.constant 0 : index
    %c0_0 = arith.constant 0 : index
    %c0_1 = arith.constant 0 : index
    %0 = vector.load %arg1[%c0, %c0_0, %c0_1] : memref<9x128x64xf32, #tpu.memory_space<vmem>>, vector<1x128x64xf32>
    %1 = vector.shape_cast %0 : vector<1x128x64xf32> to vector<128x64xf32>
    %c1 = arith.constant 1 : index
    %c0_2 = arith.constant 0 : index
    %c0_3 = arith.constant 0 : index
    %2 = vector.load %arg1[%c1, %c0_2, %c0_3] : memref<9x128x64xf32, #tpu.memory_space<vmem>>, vector<1x128x64xf32>
    %3 = vector.shape_cast %2 : vector<1x128x64xf32> to vector<128x64xf32>
    %4 = arith.maximumf %1, %3 : vector<128x64xf32>
    %c2 = arith.constant 2 : index
    %c0_4 = arith.constant 0 : index
    %c0_5 = arith.constant 0 : index
    %5 = vector.load %arg1[%c2, %c0_4, %c0_5] : memref<9x128x64xf32, #tpu.memory_space<vmem>>, vector<1x128x64xf32>
    %6 = vector.shape_cast %5 : vector<1x128x64xf32> to vector<128x64xf32>
    %7 = arith.maximumf %4, %6 : vector<128x64xf32>
    %c3 = arith.constant 3 : index
    %c0_6 = arith.constant 0 : index
    %c0_7 = arith.constant 0 : index
    %8 = vector.load %arg1[%c3, %c0_6, %c0_7] : memref<9x128x64xf32, #tpu.memory_space<vmem>>, vector<1x128x64xf32>
    %9 = vector.shape_cast %8 : vector<1x128x64xf32> to vector<128x64xf32>
    %10 = arith.maximumf %7, %9 : vector<128x64xf32>
    %c4 = arith.constant 4 : index
    %c0_8 = arith.constant 0 : index
    %c0_9 = arith.constant 0 : index
    %11 = vector.load %arg1[%c4, %c0_8, %c0_9] : memref<9x128x64xf32, #tpu.memory_space<vmem>>, vector<1x128x64xf32>
    %12 = vector.shape_cast %11 : vector<1x128x64xf32> to vector<128x64xf32>
    %13 = arith.maximumf %10, %12 : vector<128x64xf32>
    %c5 = arith.constant 5 : index
    %c0_10 = arith.constant 0 : index
    %c0_11 = arith.constant 0 : index
    %14 = vector.load %arg1[%c5, %c0_10, %c0_11] : memref<9x128x64xf32, #tpu.memory_space<vmem>>, vector<1x128x64xf32>
    %15 = vector.shape_cast %14 : vector<1x128x64xf32> to vector<128x64xf32>
    %16 = arith.maximumf %13, %15 : vector<128x64xf32>
    %c6 = arith.constant 6 : index
    %c0_12 = arith.constant 0 : index
    %c0_13 = arith.constant 0 : index
    %17 = vector.load %arg1[%c6, %c0_12, %c0_13] : memref<9x128x64xf32, #tpu.memory_space<vmem>>, vector<1x128x64xf32>
    %18 = vector.shape_cast %17 : vector<1x128x64xf32> to vector<128x64xf32>
    %19 = arith.maximumf %16, %18 : vector<128x64xf32>
    %c7 = arith.constant 7 : index
    %c0_14 = arith.constant 0 : index
    %c0_15 = arith.constant 0 : index
    %20 = vector.load %arg1[%c7, %c0_14, %c0_15] : memref<9x128x64xf32, #tpu.memory_space<vmem>>, vector<1x128x64xf32>
    %21 = vector.shape_cast %20 : vector<1x128x64xf32> to vector<128x64xf32>
    %22 = arith.maximumf %19, %21 : vector<128x64xf32>
    %c8 = arith.constant 8 : index
    %c0_16 = arith.constant 0 : index
    %c0_17 = arith.constant 0 : index
    %23 = vector.load %arg1[%c8, %c0_16, %c0_17] : memref<9x128x64xf32, #tpu.memory_space<vmem>>, vector<1x128x64xf32>
    %24 = vector.shape_cast %23 : vector<1x128x64xf32> to vector<128x64xf32>
    %25 = arith.maximumf %22, %24 : vector<128x64xf32>
    %c0_18 = arith.constant 0 : index
    %c0_19 = arith.constant 0 : index
    %26 = vector.load %arg2[%c0_18, %c0_19] : memref<128x64xf32, #tpu.memory_space<vmem>>, vector<128x64xf32>
    tpu.vector_store %arg2[%c0_18, %c0_19], %25 {strides = array<i32>} : memref<128x64xf32, #tpu.memory_space<vmem>>, vector<128x64xf32>,
    return
  }
  func.func @transform_0(%arg0: i32) -> (i32, i32, i32) {
    %c0_i32 = arith.constant 0 : i32
    %c0_i32_0 = arith.constant 0 : i32
    %c0_i32_1 = arith.constant 0 : i32
    return %c0_i32, %arg0, %c0_i32_0 : i32, i32, i32
  }
  func.func @transform_1(%arg0: i32) -> (i32, i32) {
    %c0_i32 = arith.constant 0 : i32
    %c0_i32_0 = arith.constant 0 : i32
    return %arg0, %c0_i32 : i32, i32
  }
}

module attributes {stable_mosaic.version = 11 : i64} {
  func.func @_matmul_kernel(%arg0: i32, %arg1: i32, %arg2: i32, %arg3: memref<128x128xbf16, #tpu.memory_space<vmem>>, %arg4: memref<128x128xbf16, #tpu.memory_space<vmem>>, %arg5: memref<1x128xf32, #tpu.memory_space<vmem>>, %arg6: memref<128x128xf32, #tpu.memory_space<vmem>>) attributes {dimension_semantics = [#tpu.dimension_semantics<parallel>, #tpu.dimension_semantics<parallel>, #tpu.dimension_semantics<arbitrary>], iteration_bounds = array<i64: 1, 1, 5>, scalar_prefetch = 0 : i64, scratch_operands = 0 : i64, tpu.core_type = #tpu.core_type<tc>, window_params = [{transform_indices = @transform_0, window_bounds = array<i64: 128, 128>}, {transform_indices = @transform_1, window_bounds = array<i64: 128, 128>}, {transform_indices = @transform_2, window_bounds = array<i64: 1, 128>}, {transform_indices = @transform_3, window_bounds = array<i64: 128, 128>}]} {
    %c0_i32 = arith.constant 0 : i32
    %0 = arith.cmpi eq, %arg2, %c0_i32 : i32
    %1 = arith.extui %0 : i1 to i32
    %c0_i32_0 = arith.constant 0 : i32
    %2 = arith.cmpi ne, %1, %c0_i32_0 : i32
    scf.if %2 {
      %cst_9 = arith.constant 0.000000e+00 : f32
      %12 = vector.broadcast %cst_9 : f32 to vector<128x128xf32>
      %c0_10 = arith.constant 0 : index
      %c0_11 = arith.constant 0 : index
      %13 = vector.load %arg6[%c0_10, %c0_11] : memref<128x128xf32, #tpu.memory_space<vmem>>, vector<128x128xf32>
      tpu.vector_store %arg6[%c0_10, %c0_11], %12 {strides = array<i32>} : memref<128x128xf32, #tpu.memory_space<vmem>>, vector<128x128xf32>,
    } else {
    }
    %c0 = arith.constant 0 : index
    %c0_1 = arith.constant 0 : index
    %3 = vector.load %arg6[%c0, %c0_1] : memref<128x128xf32, #tpu.memory_space<vmem>>, vector<128x128xf32>
    %c0_2 = arith.constant 0 : index
    %c0_3 = arith.constant 0 : index
    %4 = vector.load %arg3[%c0_2, %c0_3] : memref<128x128xbf16, #tpu.memory_space<vmem>>, vector<128x128xbf16>
    %c0_4 = arith.constant 0 : index
    %c0_5 = arith.constant 0 : index
    %5 = vector.load %arg4[%c0_4, %c0_5] : memref<128x128xbf16, #tpu.memory_space<vmem>>, vector<128x128xbf16>
    %cst = arith.constant dense<0.000000e+00> : vector<128x128xf32>
    %6 = tpu.matmul %4, %5, %cst {dimension_numbers = #tpu.dot_dimension_numbers<[1], [0], [0], [1], [0, 0, 1, 1], [], []>} : vector<128x128xbf16>, vector<128x128xbf16>, vector<128x128xf32> -> vector<128x128xf32>
    %7 = arith.addf %3, %6 : vector<128x128xf32>
    %c0_6 = arith.constant 0 : index
    %c0_7 = arith.constant 0 : index
    %8 = vector.load %arg6[%c0_6, %c0_7] : memref<128x128xf32, #tpu.memory_space<vmem>>, vector<128x128xf32>
    tpu.vector_store %arg6[%c0_6, %c0_7], %7 {strides = array<i32>} : memref<128x128xf32, #tpu.memory_space<vmem>>, vector<128x128xf32>,
    %c4_i32 = arith.constant 4 : i32
    %9 = arith.cmpi eq, %arg2, %c4_i32 : i32
    %10 = arith.extui %9 : i1 to i32
    %c0_i32_8 = arith.constant 0 : i32
    %11 = arith.cmpi ne, %10, %c0_i32_8 : i32
    scf.if %11 {
      %c0_9 = arith.constant 0 : index
      %c0_10 = arith.constant 0 : index
      %12 = vector.load %arg6[%c0_9, %c0_10] : memref<128x128xf32, #tpu.memory_space<vmem>>, vector<128x128xf32>
      %c0_11 = arith.constant 0 : index
      %c0_12 = arith.constant 0 : index
      %13 = vector.load %arg5[%c0_11, %c0_12] : memref<1x128xf32, #tpu.memory_space<vmem>>, vector<1x128xf32>
      %14 = vector.broadcast %13 : vector<1x128xf32> to vector<128x128xf32>
      %15 = arith.addf %12, %14 : vector<128x128xf32>
      %cst_13 = arith.constant 0.000000e+00 : f32
      %16 = vector.broadcast %cst_13 : f32 to vector<128x128xf32>
      %17 = arith.maximumf %15, %16 : vector<128x128xf32>
      %c0_14 = arith.constant 0 : index
      %c0_15 = arith.constant 0 : index
      %18 = vector.load %arg6[%c0_14, %c0_15] : memref<128x128xf32, #tpu.memory_space<vmem>>, vector<128x128xf32>
      tpu.vector_store %arg6[%c0_14, %c0_15], %17 {strides = array<i32>} : memref<128x128xf32, #tpu.memory_space<vmem>>, vector<128x128xf32>,
    } else {
    }
    return
  }
  func.func @transform_0(%arg0: i32, %arg1: i32, %arg2: i32) -> (i32, i32) {
    %c0_i32 = arith.constant 0 : i32
    return %arg0, %arg2 : i32, i32
  }
  func.func @transform_1(%arg0: i32, %arg1: i32, %arg2: i32) -> (i32, i32) {
    %c0_i32 = arith.constant 0 : i32
    return %arg2, %arg1 : i32, i32
  }
  func.func @transform_2(%arg0: i32, %arg1: i32, %arg2: i32) -> (i32, i32) {
    %c0_i32 = arith.constant 0 : i32
    %c0_i32_0 = arith.constant 0 : i32
    return %c0_i32, %arg1 : i32, i32
  }
  func.func @transform_3(%arg0: i32, %arg1: i32, %arg2: i32) -> (i32, i32) {
    %c0_i32 = arith.constant 0 : i32
    return %arg0, %arg1 : i32, i32
  }
}

module attributes {stable_mosaic.version = 11 : i64} {
  func.func @_matmul_res_kernel(%arg0: i32, %arg1: i32, %arg2: i32, %arg3: memref<128x128xbf16, #tpu.memory_space<vmem>>, %arg4: memref<128x128xbf16, #tpu.memory_space<vmem>>, %arg5: memref<1x128xf32, #tpu.memory_space<vmem>>, %arg6: memref<128x128xf32, #tpu.memory_space<vmem>>, %arg7: memref<128x128xf32, #tpu.memory_space<vmem>>) attributes {dimension_semantics = [#tpu.dimension_semantics<parallel>, #tpu.dimension_semantics<parallel>, #tpu.dimension_semantics<arbitrary>], iteration_bounds = array<i64: 1, 1, 5>, scalar_prefetch = 0 : i64, scratch_operands = 0 : i64, tpu.core_type = #tpu.core_type<tc>, window_params = [{transform_indices = @transform_0, window_bounds = array<i64: 128, 128>}, {transform_indices = @transform_1, window_bounds = array<i64: 128, 128>}, {transform_indices = @transform_2, window_bounds = array<i64: 1, 128>}, {transform_indices = @transform_3, window_bounds = array<i64: 128, 128>}, {transform_indices = @transform_4, window_bounds = array<i64: 128, 128>}]} {
    %c0_i32 = arith.constant 0 : i32
    %0 = arith.cmpi eq, %arg2, %c0_i32 : i32
    %1 = arith.extui %0 : i1 to i32
    %c0_i32_0 = arith.constant 0 : i32
    %2 = arith.cmpi ne, %1, %c0_i32_0 : i32
    scf.if %2 {
      %cst_9 = arith.constant 0.000000e+00 : f32
      %12 = vector.broadcast %cst_9 : f32 to vector<128x128xf32>
      %c0_10 = arith.constant 0 : index
      %c0_11 = arith.constant 0 : index
      %13 = vector.load %arg7[%c0_10, %c0_11] : memref<128x128xf32, #tpu.memory_space<vmem>>, vector<128x128xf32>
      tpu.vector_store %arg7[%c0_10, %c0_11], %12 {strides = array<i32>} : memref<128x128xf32, #tpu.memory_space<vmem>>, vector<128x128xf32>,
    } else {
    }
    %c0 = arith.constant 0 : index
    %c0_1 = arith.constant 0 : index
    %3 = vector.load %arg7[%c0, %c0_1] : memref<128x128xf32, #tpu.memory_space<vmem>>, vector<128x128xf32>
    %c0_2 = arith.constant 0 : index
    %c0_3 = arith.constant 0 : index
    %4 = vector.load %arg3[%c0_2, %c0_3] : memref<128x128xbf16, #tpu.memory_space<vmem>>, vector<128x128xbf16>
    %c0_4 = arith.constant 0 : index
    %c0_5 = arith.constant 0 : index
    %5 = vector.load %arg4[%c0_4, %c0_5] : memref<128x128xbf16, #tpu.memory_space<vmem>>, vector<128x128xbf16>
    %cst = arith.constant dense<0.000000e+00> : vector<128x128xf32>
    %6 = tpu.matmul %4, %5, %cst {dimension_numbers = #tpu.dot_dimension_numbers<[1], [0], [0], [1], [0, 0, 1, 1], [], []>} : vector<128x128xbf16>, vector<128x128xbf16>, vector<128x128xf32> -> vector<128x128xf32>
    %7 = arith.addf %3, %6 : vector<128x128xf32>
    %c0_6 = arith.constant 0 : index
    %c0_7 = arith.constant 0 : index
    %8 = vector.load %arg7[%c0_6, %c0_7] : memref<128x128xf32, #tpu.memory_space<vmem>>, vector<128x128xf32>
    tpu.vector_store %arg7[%c0_6, %c0_7], %7 {strides = array<i32>} : memref<128x128xf32, #tpu.memory_space<vmem>>, vector<128x128xf32>,
    %c4_i32 = arith.constant 4 : i32
    %9 = arith.cmpi eq, %arg2, %c4_i32 : i32
    %10 = arith.extui %9 : i1 to i32
    %c0_i32_8 = arith.constant 0 : i32
    %11 = arith.cmpi ne, %10, %c0_i32_8 : i32
    scf.if %11 {
      %c0_9 = arith.constant 0 : index
      %c0_10 = arith.constant 0 : index
      %12 = vector.load %arg7[%c0_9, %c0_10] : memref<128x128xf32, #tpu.memory_space<vmem>>, vector<128x128xf32>
      %c0_11 = arith.constant 0 : index
      %c0_12 = arith.constant 0 : index
      %13 = vector.load %arg5[%c0_11, %c0_12] : memref<1x128xf32, #tpu.memory_space<vmem>>, vector<1x128xf32>
      %14 = vector.broadcast %13 : vector<1x128xf32> to vector<128x128xf32>
      %15 = arith.addf %12, %14 : vector<128x128xf32>
      %c0_13 = arith.constant 0 : index
      %c0_14 = arith.constant 0 : index
      %16 = vector.load %arg6[%c0_13, %c0_14] : memref<128x128xf32, #tpu.memory_space<vmem>>, vector<128x128xf32>
      %17 = arith.addf %15, %16 : vector<128x128xf32>
      %cst_15 = arith.constant 0.000000e+00 : f32
      %18 = vector.broadcast %cst_15 : f32 to vector<128x128xf32>
      %19 = arith.maximumf %17, %18 : vector<128x128xf32>
      %c0_16 = arith.constant 0 : index
      %c0_17 = arith.constant 0 : index
      %20 = vector.load %arg7[%c0_16, %c0_17] : memref<128x128xf32, #tpu.memory_space<vmem>>, vector<128x128xf32>
      tpu.vector_store %arg7[%c0_16, %c0_17], %19 {strides = array<i32>} : memref<128x128xf32, #tpu.memory_space<vmem>>, vector<128x128xf32>,
    } else {
    }
    return
  }
  func.func @transform_0(%arg0: i32, %arg1: i32, %arg2: i32) -> (i32, i32) {
    %c0_i32 = arith.constant 0 : i32
    return %arg0, %arg2 : i32, i32
  }
  func.func @transform_1(%arg0: i32, %arg1: i32, %arg2: i32) -> (i32, i32) {
    %c0_i32 = arith.constant 0 : i32
    return %arg2, %arg1 : i32, i32
  }
  func.func @transform_2(%arg0: i32, %arg1: i32, %arg2: i32) -> (i32, i32) {
    %c0_i32 = arith.constant 0 : i32
    %c0_i32_0 = arith.constant 0 : i32
    return %c0_i32, %arg1 : i32, i32
  }
  func.func @transform_3(%arg0: i32, %arg1: i32, %arg2: i32) -> (i32, i32) {
    %c0_i32 = arith.constant 0 : i32
    return %arg0, %arg1 : i32, i32
  }
  func.func @transform_4(%arg0: i32, %arg1: i32, %arg2: i32) -> (i32, i32) {
    %c0_i32 = arith.constant 0 : i32
    return %arg0, %arg1 : i32, i32
  }
}

module attributes {stable_mosaic.version = 11 : i64} {
  func.func @_matmul_kernel(%arg0: i32, %arg1: i32, %arg2: i32, %arg3: memref<32x128xbf16, #tpu.memory_space<vmem>>, %arg4: memref<128x128xbf16, #tpu.memory_space<vmem>>, %arg5: memref<1x128xf32, #tpu.memory_space<vmem>>, %arg6: memref<32x128xf32, #tpu.memory_space<vmem>>) attributes {dimension_semantics = [#tpu.dimension_semantics<parallel>, #tpu.dimension_semantics<parallel>, #tpu.dimension_semantics<arbitrary>], iteration_bounds = array<i64: 1, 1, 5>, scalar_prefetch = 0 : i64, scratch_operands = 0 : i64, tpu.core_type = #tpu.core_type<tc>, window_params = [{transform_indices = @transform_0, window_bounds = array<i64: 32, 128>}, {transform_indices = @transform_1, window_bounds = array<i64: 128, 128>}, {transform_indices = @transform_2, window_bounds = array<i64: 1, 128>}, {transform_indices = @transform_3, window_bounds = array<i64: 32, 128>}]} {
    %c0_i32 = arith.constant 0 : i32
    %0 = arith.cmpi eq, %arg2, %c0_i32 : i32
    %1 = arith.extui %0 : i1 to i32
    %c0_i32_0 = arith.constant 0 : i32
    %2 = arith.cmpi ne, %1, %c0_i32_0 : i32
    scf.if %2 {
      %cst_9 = arith.constant 0.000000e+00 : f32
      %12 = vector.broadcast %cst_9 : f32 to vector<32x128xf32>
      %c0_10 = arith.constant 0 : index
      %c0_11 = arith.constant 0 : index
      %13 = vector.load %arg6[%c0_10, %c0_11] : memref<32x128xf32, #tpu.memory_space<vmem>>, vector<32x128xf32>
      tpu.vector_store %arg6[%c0_10, %c0_11], %12 {strides = array<i32>} : memref<32x128xf32, #tpu.memory_space<vmem>>, vector<32x128xf32>,
    } else {
    }
    %c0 = arith.constant 0 : index
    %c0_1 = arith.constant 0 : index
    %3 = vector.load %arg6[%c0, %c0_1] : memref<32x128xf32, #tpu.memory_space<vmem>>, vector<32x128xf32>
    %c0_2 = arith.constant 0 : index
    %c0_3 = arith.constant 0 : index
    %4 = vector.load %arg3[%c0_2, %c0_3] : memref<32x128xbf16, #tpu.memory_space<vmem>>, vector<32x128xbf16>
    %c0_4 = arith.constant 0 : index
    %c0_5 = arith.constant 0 : index
    %5 = vector.load %arg4[%c0_4, %c0_5] : memref<128x128xbf16, #tpu.memory_space<vmem>>, vector<128x128xbf16>
    %cst = arith.constant dense<0.000000e+00> : vector<32x128xf32>
    %6 = tpu.matmul %4, %5, %cst {dimension_numbers = #tpu.dot_dimension_numbers<[1], [0], [0], [1], [0, 0, 1, 1], [], []>} : vector<32x128xbf16>, vector<128x128xbf16>, vector<32x128xf32> -> vector<32x128xf32>
    %7 = arith.addf %3, %6 : vector<32x128xf32>
    %c0_6 = arith.constant 0 : index
    %c0_7 = arith.constant 0 : index
    %8 = vector.load %arg6[%c0_6, %c0_7] : memref<32x128xf32, #tpu.memory_space<vmem>>, vector<32x128xf32>
    tpu.vector_store %arg6[%c0_6, %c0_7], %7 {strides = array<i32>} : memref<32x128xf32, #tpu.memory_space<vmem>>, vector<32x128xf32>,
    %c4_i32 = arith.constant 4 : i32
    %9 = arith.cmpi eq, %arg2, %c4_i32 : i32
    %10 = arith.extui %9 : i1 to i32
    %c0_i32_8 = arith.constant 0 : i32
    %11 = arith.cmpi ne, %10, %c0_i32_8 : i32
    scf.if %11 {
      %c0_9 = arith.constant 0 : index
      %c0_10 = arith.constant 0 : index
      %12 = vector.load %arg6[%c0_9, %c0_10] : memref<32x128xf32, #tpu.memory_space<vmem>>, vector<32x128xf32>
      %c0_11 = arith.constant 0 : index
      %c0_12 = arith.constant 0 : index
      %13 = vector.load %arg5[%c0_11, %c0_12] : memref<1x128xf32, #tpu.memory_space<vmem>>, vector<1x128xf32>
      %14 = vector.broadcast %13 : vector<1x128xf32> to vector<32x128xf32>
      %15 = arith.addf %12, %14 : vector<32x128xf32>
      %cst_13 = arith.constant 0.000000e+00 : f32
      %16 = vector.broadcast %cst_13 : f32 to vector<32x128xf32>
      %17 = arith.maximumf %15, %16 : vector<32x128xf32>
      %c0_14 = arith.constant 0 : index
      %c0_15 = arith.constant 0 : index
      %18 = vector.load %arg6[%c0_14, %c0_15] : memref<32x128xf32, #tpu.memory_space<vmem>>, vector<32x128xf32>
      tpu.vector_store %arg6[%c0_14, %c0_15], %17 {strides = array<i32>} : memref<32x128xf32, #tpu.memory_space<vmem>>, vector<32x128xf32>,
    } else {
    }
    return
  }
  func.func @transform_0(%arg0: i32, %arg1: i32, %arg2: i32) -> (i32, i32) {
    %c0_i32 = arith.constant 0 : i32
    return %arg0, %arg2 : i32, i32
  }
  func.func @transform_1(%arg0: i32, %arg1: i32, %arg2: i32) -> (i32, i32) {
    %c0_i32 = arith.constant 0 : i32
    return %arg2, %arg1 : i32, i32
  }
  func.func @transform_2(%arg0: i32, %arg1: i32, %arg2: i32) -> (i32, i32) {
    %c0_i32 = arith.constant 0 : i32
    %c0_i32_0 = arith.constant 0 : i32
    return %c0_i32, %arg1 : i32, i32
  }
  func.func @transform_3(%arg0: i32, %arg1: i32, %arg2: i32) -> (i32, i32) {
    %c0_i32 = arith.constant 0 : i32
    return %arg0, %arg1 : i32, i32
  }
}

module attributes {stable_mosaic.version = 11 : i64} {
  func.func @_matmul_res_kernel(%arg0: i32, %arg1: i32, %arg2: i32, %arg3: memref<32x128xbf16, #tpu.memory_space<vmem>>, %arg4: memref<128x128xbf16, #tpu.memory_space<vmem>>, %arg5: memref<1x128xf32, #tpu.memory_space<vmem>>, %arg6: memref<32x128xf32, #tpu.memory_space<vmem>>, %arg7: memref<32x128xf32, #tpu.memory_space<vmem>>) attributes {dimension_semantics = [#tpu.dimension_semantics<parallel>, #tpu.dimension_semantics<parallel>, #tpu.dimension_semantics<arbitrary>], iteration_bounds = array<i64: 1, 1, 9>, scalar_prefetch = 0 : i64, scratch_operands = 0 : i64, tpu.core_type = #tpu.core_type<tc>, window_params = [{transform_indices = @transform_0, window_bounds = array<i64: 32, 128>}, {transform_indices = @transform_1, window_bounds = array<i64: 128, 128>}, {transform_indices = @transform_2, window_bounds = array<i64: 1, 128>}, {transform_indices = @transform_3, window_bounds = array<i64: 32, 128>}, {transform_indices = @transform_4, window_bounds = array<i64: 32, 128>}]} {
    %c0_i32 = arith.constant 0 : i32
    %0 = arith.cmpi eq, %arg2, %c0_i32 : i32
    %1 = arith.extui %0 : i1 to i32
    %c0_i32_0 = arith.constant 0 : i32
    %2 = arith.cmpi ne, %1, %c0_i32_0 : i32
    scf.if %2 {
      %cst_9 = arith.constant 0.000000e+00 : f32
      %12 = vector.broadcast %cst_9 : f32 to vector<32x128xf32>
      %c0_10 = arith.constant 0 : index
      %c0_11 = arith.constant 0 : index
      %13 = vector.load %arg7[%c0_10, %c0_11] : memref<32x128xf32, #tpu.memory_space<vmem>>, vector<32x128xf32>
      tpu.vector_store %arg7[%c0_10, %c0_11], %12 {strides = array<i32>} : memref<32x128xf32, #tpu.memory_space<vmem>>, vector<32x128xf32>,
    } else {
    }
    %c0 = arith.constant 0 : index
    %c0_1 = arith.constant 0 : index
    %3 = vector.load %arg7[%c0, %c0_1] : memref<32x128xf32, #tpu.memory_space<vmem>>, vector<32x128xf32>
    %c0_2 = arith.constant 0 : index
    %c0_3 = arith.constant 0 : index
    %4 = vector.load %arg3[%c0_2, %c0_3] : memref<32x128xbf16, #tpu.memory_space<vmem>>, vector<32x128xbf16>
    %c0_4 = arith.constant 0 : index
    %c0_5 = arith.constant 0 : index
    %5 = vector.load %arg4[%c0_4, %c0_5] : memref<128x128xbf16, #tpu.memory_space<vmem>>, vector<128x128xbf16>
    %cst = arith.constant dense<0.000000e+00> : vector<32x128xf32>
    %6 = tpu.matmul %4, %5, %cst {dimension_numbers = #tpu.dot_dimension_numbers<[1], [0], [0], [1], [0, 0, 1, 1], [], []>} : vector<32x128xbf16>, vector<128x128xbf16>, vector<32x128xf32> -> vector<32x128xf32>
    %7 = arith.addf %3, %6 : vector<32x128xf32>
    %c0_6 = arith.constant 0 : index
    %c0_7 = arith.constant 0 : index
    %8 = vector.load %arg7[%c0_6, %c0_7] : memref<32x128xf32, #tpu.memory_space<vmem>>, vector<32x128xf32>
    tpu.vector_store %arg7[%c0_6, %c0_7], %7 {strides = array<i32>} : memref<32x128xf32, #tpu.memory_space<vmem>>, vector<32x128xf32>,
    %c8_i32 = arith.constant 8 : i32
    %9 = arith.cmpi eq, %arg2, %c8_i32 : i32
    %10 = arith.extui %9 : i1 to i32
    %c0_i32_8 = arith.constant 0 : i32
    %11 = arith.cmpi ne, %10, %c0_i32_8 : i32
    scf.if %11 {
      %c0_9 = arith.constant 0 : index
      %c0_10 = arith.constant 0 : index
      %12 = vector.load %arg7[%c0_9, %c0_10] : memref<32x128xf32, #tpu.memory_space<vmem>>, vector<32x128xf32>
      %c0_11 = arith.constant 0 : index
      %c0_12 = arith.constant 0 : index
      %13 = vector.load %arg5[%c0_11, %c0_12] : memref<1x128xf32, #tpu.memory_space<vmem>>, vector<1x128xf32>
      %14 = vector.broadcast %13 : vector<1x128xf32> to vector<32x128xf32>
      %15 = arith.addf %12, %14 : vector<32x128xf32>
      %c0_13 = arith.constant 0 : index
      %c0_14 = arith.constant 0 : index
      %16 = vector.load %arg6[%c0_13, %c0_14] : memref<32x128xf32, #tpu.memory_space<vmem>>, vector<32x128xf32>
      %17 = arith.addf %15, %16 : vector<32x128xf32>
      %cst_15 = arith.constant 0.000000e+00 : f32
      %18 = vector.broadcast %cst_15 : f32 to vector<32x128xf32>
      %19 = arith.maximumf %17, %18 : vector<32x128xf32>
      %c0_16 = arith.constant 0 : index
      %c0_17 = arith.constant 0 : index
      %20 = vector.load %arg7[%c0_16, %c0_17] : memref<32x128xf32, #tpu.memory_space<vmem>>, vector<32x128xf32>
      tpu.vector_store %arg7[%c0_16, %c0_17], %19 {strides = array<i32>} : memref<32x128xf32, #tpu.memory_space<vmem>>, vector<32x128xf32>,
    } else {
    }
    return
  }
  func.func @transform_0(%arg0: i32, %arg1: i32, %arg2: i32) -> (i32, i32) {
    %c0_i32 = arith.constant 0 : i32
    return %arg0, %arg2 : i32, i32
  }
  func.func @transform_1(%arg0: i32, %arg1: i32, %arg2: i32) -> (i32, i32) {
    %c0_i32 = arith.constant 0 : i32
    return %arg2, %arg1 : i32, i32
  }
  func.func @transform_2(%arg0: i32, %arg1: i32, %arg2: i32) -> (i32, i32) {
    %c0_i32 = arith.constant 0 : i32
    %c0_i32_0 = arith.constant 0 : i32
    return %c0_i32, %arg1 : i32, i32
  }
  func.func @transform_3(%arg0: i32, %arg1: i32, %arg2: i32) -> (i32, i32) {
    %c0_i32 = arith.constant 0 : i32
    return %arg0, %arg1 : i32, i32
  }
  func.func @transform_4(%arg0: i32, %arg1: i32, %arg2: i32) -> (i32, i32) {
    %c0_i32 = arith.constant 0 : i32
    return %arg0, %arg1 : i32, i32
  }
}

module attributes {stable_mosaic.version = 11 : i64} {
  func.func @_matmul_kernel(%arg0: i32, %arg1: i32, %arg2: i32, %arg3: memref<32x128xbf16, #tpu.memory_space<vmem>>, %arg4: memref<128x128xbf16, #tpu.memory_space<vmem>>, %arg5: memref<1x128xf32, #tpu.memory_space<vmem>>, %arg6: memref<32x128xf32, #tpu.memory_space<vmem>>) attributes {dimension_semantics = [#tpu.dimension_semantics<parallel>, #tpu.dimension_semantics<parallel>, #tpu.dimension_semantics<arbitrary>], iteration_bounds = array<i64: 1, 1, 9>, scalar_prefetch = 0 : i64, scratch_operands = 0 : i64, tpu.core_type = #tpu.core_type<tc>, window_params = [{transform_indices = @transform_0, window_bounds = array<i64: 32, 128>}, {transform_indices = @transform_1, window_bounds = array<i64: 128, 128>}, {transform_indices = @transform_2, window_bounds = array<i64: 1, 128>}, {transform_indices = @transform_3, window_bounds = array<i64: 32, 128>}]} {
    %c0_i32 = arith.constant 0 : i32
    %0 = arith.cmpi eq, %arg2, %c0_i32 : i32
    %1 = arith.extui %0 : i1 to i32
    %c0_i32_0 = arith.constant 0 : i32
    %2 = arith.cmpi ne, %1, %c0_i32_0 : i32
    scf.if %2 {
      %cst_9 = arith.constant 0.000000e+00 : f32
      %12 = vector.broadcast %cst_9 : f32 to vector<32x128xf32>
      %c0_10 = arith.constant 0 : index
      %c0_11 = arith.constant 0 : index
      %13 = vector.load %arg6[%c0_10, %c0_11] : memref<32x128xf32, #tpu.memory_space<vmem>>, vector<32x128xf32>
      tpu.vector_store %arg6[%c0_10, %c0_11], %12 {strides = array<i32>} : memref<32x128xf32, #tpu.memory_space<vmem>>, vector<32x128xf32>,
    } else {
    }
    %c0 = arith.constant 0 : index
    %c0_1 = arith.constant 0 : index
    %3 = vector.load %arg6[%c0, %c0_1] : memref<32x128xf32, #tpu.memory_space<vmem>>, vector<32x128xf32>
    %c0_2 = arith.constant 0 : index
    %c0_3 = arith.constant 0 : index
    %4 = vector.load %arg3[%c0_2, %c0_3] : memref<32x128xbf16, #tpu.memory_space<vmem>>, vector<32x128xbf16>
    %c0_4 = arith.constant 0 : index
    %c0_5 = arith.constant 0 : index
    %5 = vector.load %arg4[%c0_4, %c0_5] : memref<128x128xbf16, #tpu.memory_space<vmem>>, vector<128x128xbf16>
    %cst = arith.constant dense<0.000000e+00> : vector<32x128xf32>
    %6 = tpu.matmul %4, %5, %cst {dimension_numbers = #tpu.dot_dimension_numbers<[1], [0], [0], [1], [0, 0, 1, 1], [], []>} : vector<32x128xbf16>, vector<128x128xbf16>, vector<32x128xf32> -> vector<32x128xf32>
    %7 = arith.addf %3, %6 : vector<32x128xf32>
    %c0_6 = arith.constant 0 : index
    %c0_7 = arith.constant 0 : index
    %8 = vector.load %arg6[%c0_6, %c0_7] : memref<32x128xf32, #tpu.memory_space<vmem>>, vector<32x128xf32>
    tpu.vector_store %arg6[%c0_6, %c0_7], %7 {strides = array<i32>} : memref<32x128xf32, #tpu.memory_space<vmem>>, vector<32x128xf32>,
    %c8_i32 = arith.constant 8 : i32
    %9 = arith.cmpi eq, %arg2, %c8_i32 : i32
    %10 = arith.extui %9 : i1 to i32
    %c0_i32_8 = arith.constant 0 : i32
    %11 = arith.cmpi ne, %10, %c0_i32_8 : i32
    scf.if %11 {
      %c0_9 = arith.constant 0 : index
      %c0_10 = arith.constant 0 : index
      %12 = vector.load %arg6[%c0_9, %c0_10] : memref<32x128xf32, #tpu.memory_space<vmem>>, vector<32x128xf32>
      %c0_11 = arith.constant 0 : index
      %c0_12 = arith.constant 0 : index
      %13 = vector.load %arg5[%c0_11, %c0_12] : memref<1x128xf32, #tpu.memory_space<vmem>>, vector<1x128xf32>
      %14 = vector.broadcast %13 : vector<1x128xf32> to vector<32x128xf32>
      %15 = arith.addf %12, %14 : vector<32x128xf32>
      %cst_13 = arith.constant 0.000000e+00 : f32
      %16 = vector.broadcast %cst_13 : f32 to vector<32x128xf32>
      %17 = arith.maximumf %15, %16 : vector<32x128xf32>
      %c0_14 = arith.constant 0 : index
      %c0_15 = arith.constant 0 : index
      %18 = vector.load %arg6[%c0_14, %c0_15] : memref<32x128xf32, #tpu.memory_space<vmem>>, vector<32x128xf32>
      tpu.vector_store %arg6[%c0_14, %c0_15], %17 {strides = array<i32>} : memref<32x128xf32, #tpu.memory_space<vmem>>, vector<32x128xf32>,
    } else {
    }
    return
  }
  func.func @transform_0(%arg0: i32, %arg1: i32, %arg2: i32) -> (i32, i32) {
    %c0_i32 = arith.constant 0 : i32
    return %arg0, %arg2 : i32, i32
  }
  func.func @transform_1(%arg0: i32, %arg1: i32, %arg2: i32) -> (i32, i32) {
    %c0_i32 = arith.constant 0 : i32
    return %arg2, %arg1 : i32, i32
  }
  func.func @transform_2(%arg0: i32, %arg1: i32, %arg2: i32) -> (i32, i32) {
    %c0_i32 = arith.constant 0 : i32
    %c0_i32_0 = arith.constant 0 : i32
    return %c0_i32, %arg1 : i32, i32
  }
  func.func @transform_3(%arg0: i32, %arg1: i32, %arg2: i32) -> (i32, i32) {
    %c0_i32 = arith.constant 0 : i32
    return %arg0, %arg1 : i32, i32
  }
}

module attributes {stable_mosaic.version = 11 : i64} {
  func.func @_matmul_kernel(%arg0: i32, %arg1: i32, %arg2: i32, %arg3: memref<32x128xbf16, #tpu.memory_space<vmem>>, %arg4: memref<128x128xbf16, #tpu.memory_space<vmem>>, %arg5: memref<1x128xf32, #tpu.memory_space<vmem>>, %arg6: memref<32x128xf32, #tpu.memory_space<vmem>>) attributes {dimension_semantics = [#tpu.dimension_semantics<parallel>, #tpu.dimension_semantics<parallel>, #tpu.dimension_semantics<arbitrary>], iteration_bounds = array<i64: 1, 1, 1>, scalar_prefetch = 0 : i64, scratch_operands = 0 : i64, tpu.core_type = #tpu.core_type<tc>, window_params = [{transform_indices = @transform_0, window_bounds = array<i64: 32, 128>}, {transform_indices = @transform_1, window_bounds = array<i64: 128, 128>}, {transform_indices = @transform_2, window_bounds = array<i64: 1, 128>}, {transform_indices = @transform_3, window_bounds = array<i64: 32, 128>}]} {
    %c0_i32 = arith.constant 0 : i32
    %0 = arith.cmpi eq, %arg2, %c0_i32 : i32
    %1 = arith.extui %0 : i1 to i32
    %c0_i32_0 = arith.constant 0 : i32
    %2 = arith.cmpi ne, %1, %c0_i32_0 : i32
    scf.if %2 {
      %cst_10 = arith.constant 0.000000e+00 : f32
      %12 = vector.broadcast %cst_10 : f32 to vector<32x128xf32>
      %c0_11 = arith.constant 0 : index
      %c0_12 = arith.constant 0 : index
      %13 = vector.load %arg6[%c0_11, %c0_12] : memref<32x128xf32, #tpu.memory_space<vmem>>, vector<32x128xf32>
      tpu.vector_store %arg6[%c0_11, %c0_12], %12 {strides = array<i32>} : memref<32x128xf32, #tpu.memory_space<vmem>>, vector<32x128xf32>,
    } else {
    }
    %c0 = arith.constant 0 : index
    %c0_1 = arith.constant 0 : index
    %3 = vector.load %arg6[%c0, %c0_1] : memref<32x128xf32, #tpu.memory_space<vmem>>, vector<32x128xf32>
    %c0_2 = arith.constant 0 : index
    %c0_3 = arith.constant 0 : index
    %4 = vector.load %arg3[%c0_2, %c0_3] : memref<32x128xbf16, #tpu.memory_space<vmem>>, vector<32x128xbf16>
    %c0_4 = arith.constant 0 : index
    %c0_5 = arith.constant 0 : index
    %5 = vector.load %arg4[%c0_4, %c0_5] : memref<128x128xbf16, #tpu.memory_space<vmem>>, vector<128x128xbf16>
    %cst = arith.constant dense<0.000000e+00> : vector<32x128xf32>
    %6 = tpu.matmul %4, %5, %cst {dimension_numbers = #tpu.dot_dimension_numbers<[1], [0], [0], [1], [0, 0, 1, 1], [], []>} : vector<32x128xbf16>, vector<128x128xbf16>, vector<32x128xf32> -> vector<32x128xf32>
    %7 = arith.addf %3, %6 : vector<32x128xf32>
    %c0_6 = arith.constant 0 : index
    %c0_7 = arith.constant 0 : index
    %8 = vector.load %arg6[%c0_6, %c0_7] : memref<32x128xf32, #tpu.memory_space<vmem>>, vector<32x128xf32>
    tpu.vector_store %arg6[%c0_6, %c0_7], %7 {strides = array<i32>} : memref<32x128xf32, #tpu.memory_space<vmem>>, vector<32x128xf32>,
    %c0_i32_8 = arith.constant 0 : i32
    %9 = arith.cmpi eq, %arg2, %c0_i32_8 : i32
    %10 = arith.extui %9 : i1 to i32
    %c0_i32_9 = arith.constant 0 : i32
    %11 = arith.cmpi ne, %10, %c0_i32_9 : i32
    scf.if %11 {
      %c0_10 = arith.constant 0 : index
      %c0_11 = arith.constant 0 : index
      %12 = vector.load %arg6[%c0_10, %c0_11] : memref<32x128xf32, #tpu.memory_space<vmem>>, vector<32x128xf32>
      %c0_12 = arith.constant 0 : index
      %c0_13 = arith.constant 0 : index
      %13 = vector.load %arg5[%c0_12, %c0_13] : memref<1x128xf32, #tpu.memory_space<vmem>>, vector<1x128xf32>
      %14 = vector.broadcast %13 : vector<1x128xf32> to vector<32x128xf32>
      %15 = arith.addf %12, %14 : vector<32x128xf32>
      %c0_14 = arith.constant 0 : index
      %c0_15 = arith.constant 0 : index
      %16 = vector.load %arg6[%c0_14, %c0_15] : memref<32x128xf32, #tpu.memory_space<vmem>>, vector<32x128xf32>
      tpu.vector_store %arg6[%c0_14, %c0_15], %15 {strides = array<i32>} : memref<32x128xf32, #tpu.memory_space<vmem>>, vector<32x128xf32>,
    } else {
    }
    return
  }
  func.func @transform_0(%arg0: i32, %arg1: i32, %arg2: i32) -> (i32, i32) {
    %c0_i32 = arith.constant 0 : i32
    return %arg0, %arg2 : i32, i32
  }
  func.func @transform_1(%arg0: i32, %arg1: i32, %arg2: i32) -> (i32, i32) {
    %c0_i32 = arith.constant 0 : i32
    return %arg2, %arg1 : i32, i32
  }
  func.func @transform_2(%arg0: i32, %arg1: i32, %arg2: i32) -> (i32, i32) {
    %c0_i32 = arith.constant 0 : i32
    %c0_i32_0 = arith.constant 0 : i32
    return %c0_i32, %arg1 : i32, i32
  }
  func.func @transform_3(%arg0: i32, %arg1: i32, %arg2: i32) -> (i32, i32) {
    %c0_i32 = arith.constant 0 : i32
    return %arg0, %arg1 : i32, i32
  }
}

module attributes {stable_mosaic.version = 11 : i64} {
  func.func @_matmul_kernel(%arg0: i32, %arg1: i32, %arg2: i32, %arg3: memref<8x128xbf16, #tpu.memory_space<vmem>>, %arg4: memref<128x256xbf16, #tpu.memory_space<vmem>>, %arg5: memref<1x256xf32, #tpu.memory_space<vmem>>, %arg6: memref<8x256xf32, #tpu.memory_space<vmem>>) attributes {dimension_semantics = [#tpu.dimension_semantics<parallel>, #tpu.dimension_semantics<parallel>, #tpu.dimension_semantics<arbitrary>], iteration_bounds = array<i64: 1, 1, 9>, scalar_prefetch = 0 : i64, scratch_operands = 0 : i64, tpu.core_type = #tpu.core_type<tc>, window_params = [{transform_indices = @transform_0, window_bounds = array<i64: 8, 128>}, {transform_indices = @transform_1, window_bounds = array<i64: 128, 256>}, {transform_indices = @transform_2, window_bounds = array<i64: 1, 256>}, {transform_indices = @transform_3, window_bounds = array<i64: 8, 256>}]} {
    %c0_i32 = arith.constant 0 : i32
    %0 = arith.cmpi eq, %arg2, %c0_i32 : i32
    %1 = arith.extui %0 : i1 to i32
    %c0_i32_0 = arith.constant 0 : i32
    %2 = arith.cmpi ne, %1, %c0_i32_0 : i32
    scf.if %2 {
      %cst_9 = arith.constant 0.000000e+00 : f32
      %12 = vector.broadcast %cst_9 : f32 to vector<8x256xf32>
      %c0_10 = arith.constant 0 : index
      %c0_11 = arith.constant 0 : index
      %13 = vector.load %arg6[%c0_10, %c0_11] : memref<8x256xf32, #tpu.memory_space<vmem>>, vector<8x256xf32>
      tpu.vector_store %arg6[%c0_10, %c0_11], %12 {strides = array<i32>} : memref<8x256xf32, #tpu.memory_space<vmem>>, vector<8x256xf32>,
    } else {
    }
    %c0 = arith.constant 0 : index
    %c0_1 = arith.constant 0 : index
    %3 = vector.load %arg6[%c0, %c0_1] : memref<8x256xf32, #tpu.memory_space<vmem>>, vector<8x256xf32>
    %c0_2 = arith.constant 0 : index
    %c0_3 = arith.constant 0 : index
    %4 = vector.load %arg3[%c0_2, %c0_3] : memref<8x128xbf16, #tpu.memory_space<vmem>>, vector<8x128xbf16>
    %c0_4 = arith.constant 0 : index
    %c0_5 = arith.constant 0 : index
    %5 = vector.load %arg4[%c0_4, %c0_5] : memref<128x256xbf16, #tpu.memory_space<vmem>>, vector<128x256xbf16>
    %cst = arith.constant dense<0.000000e+00> : vector<8x256xf32>
    %6 = tpu.matmul %4, %5, %cst {dimension_numbers = #tpu.dot_dimension_numbers<[1], [0], [0], [1], [0, 0, 1, 1], [], []>} : vector<8x128xbf16>, vector<128x256xbf16>, vector<8x256xf32> -> vector<8x256xf32>
    %7 = arith.addf %3, %6 : vector<8x256xf32>
    %c0_6 = arith.constant 0 : index
    %c0_7 = arith.constant 0 : index
    %8 = vector.load %arg6[%c0_6, %c0_7] : memref<8x256xf32, #tpu.memory_space<vmem>>, vector<8x256xf32>
    tpu.vector_store %arg6[%c0_6, %c0_7], %7 {strides = array<i32>} : memref<8x256xf32, #tpu.memory_space<vmem>>, vector<8x256xf32>,
    %c8_i32 = arith.constant 8 : i32
    %9 = arith.cmpi eq, %arg2, %c8_i32 : i32
    %10 = arith.extui %9 : i1 to i32
    %c0_i32_8 = arith.constant 0 : i32
    %11 = arith.cmpi ne, %10, %c0_i32_8 : i32
    scf.if %11 {
      %c0_9 = arith.constant 0 : index
      %c0_10 = arith.constant 0 : index
      %12 = vector.load %arg6[%c0_9, %c0_10] : memref<8x256xf32, #tpu.memory_space<vmem>>, vector<8x256xf32>
      %c0_11 = arith.constant 0 : index
      %c0_12 = arith.constant 0 : index
      %13 = vector.load %arg5[%c0_11, %c0_12] : memref<1x256xf32, #tpu.memory_space<vmem>>, vector<1x256xf32>
      %14 = vector.broadcast %13 : vector<1x256xf32> to vector<8x256xf32>
      %15 = arith.addf %12, %14 : vector<8x256xf32>
      %cst_13 = arith.constant 0.000000e+00 : f32
      %16 = vector.broadcast %cst_13 : f32 to vector<8x256xf32>
      %17 = arith.maximumf %15, %16 : vector<8x256xf32>
      %c0_14 = arith.constant 0 : index
      %c0_15 = arith.constant 0 : index
      %18 = vector.load %arg6[%c0_14, %c0_15] : memref<8x256xf32, #tpu.memory_space<vmem>>, vector<8x256xf32>
      tpu.vector_store %arg6[%c0_14, %c0_15], %17 {strides = array<i32>} : memref<8x256xf32, #tpu.memory_space<vmem>>, vector<8x256xf32>,
    } else {
    }
    return
  }
  func.func @transform_0(%arg0: i32, %arg1: i32, %arg2: i32) -> (i32, i32) {
    %c0_i32 = arith.constant 0 : i32
    return %arg0, %arg2 : i32, i32
  }
  func.func @transform_1(%arg0: i32, %arg1: i32, %arg2: i32) -> (i32, i32) {
    %c0_i32 = arith.constant 0 : i32
    return %arg2, %arg1 : i32, i32
  }
  func.func @transform_2(%arg0: i32, %arg1: i32, %arg2: i32) -> (i32, i32) {
    %c0_i32 = arith.constant 0 : i32
    %c0_i32_0 = arith.constant 0 : i32
    return %c0_i32, %arg1 : i32, i32
  }
  func.func @transform_3(%arg0: i32, %arg1: i32, %arg2: i32) -> (i32, i32) {
    %c0_i32 = arith.constant 0 : i32
    return %arg0, %arg1 : i32, i32
  }
}

module attributes {stable_mosaic.version = 11 : i64} {
  func.func @_matmul_res_kernel(%arg0: i32, %arg1: i32, %arg2: i32, %arg3: memref<8x256xbf16, #tpu.memory_space<vmem>>, %arg4: memref<256x256xbf16, #tpu.memory_space<vmem>>, %arg5: memref<1x256xf32, #tpu.memory_space<vmem>>, %arg6: memref<8x256xf32, #tpu.memory_space<vmem>>, %arg7: memref<8x256xf32, #tpu.memory_space<vmem>>) attributes {dimension_semantics = [#tpu.dimension_semantics<parallel>, #tpu.dimension_semantics<parallel>, #tpu.dimension_semantics<arbitrary>], iteration_bounds = array<i64: 1, 1, 9>, scalar_prefetch = 0 : i64, scratch_operands = 0 : i64, tpu.core_type = #tpu.core_type<tc>, window_params = [{transform_indices = @transform_0, window_bounds = array<i64: 8, 256>}, {transform_indices = @transform_1, window_bounds = array<i64: 256, 256>}, {transform_indices = @transform_2, window_bounds = array<i64: 1, 256>}, {transform_indices = @transform_3, window_bounds = array<i64: 8, 256>}, {transform_indices = @transform_4, window_bounds = array<i64: 8, 256>}]} {
    %c0_i32 = arith.constant 0 : i32
    %0 = arith.cmpi eq, %arg2, %c0_i32 : i32
    %1 = arith.extui %0 : i1 to i32
    %c0_i32_0 = arith.constant 0 : i32
    %2 = arith.cmpi ne, %1, %c0_i32_0 : i32
    scf.if %2 {
      %cst_9 = arith.constant 0.000000e+00 : f32
      %12 = vector.broadcast %cst_9 : f32 to vector<8x256xf32>
      %c0_10 = arith.constant 0 : index
      %c0_11 = arith.constant 0 : index
      %13 = vector.load %arg7[%c0_10, %c0_11] : memref<8x256xf32, #tpu.memory_space<vmem>>, vector<8x256xf32>
      tpu.vector_store %arg7[%c0_10, %c0_11], %12 {strides = array<i32>} : memref<8x256xf32, #tpu.memory_space<vmem>>, vector<8x256xf32>,
    } else {
    }
    %c0 = arith.constant 0 : index
    %c0_1 = arith.constant 0 : index
    %3 = vector.load %arg7[%c0, %c0_1] : memref<8x256xf32, #tpu.memory_space<vmem>>, vector<8x256xf32>
    %c0_2 = arith.constant 0 : index
    %c0_3 = arith.constant 0 : index
    %4 = vector.load %arg3[%c0_2, %c0_3] : memref<8x256xbf16, #tpu.memory_space<vmem>>, vector<8x256xbf16>
    %c0_4 = arith.constant 0 : index
    %c0_5 = arith.constant 0 : index
    %5 = vector.load %arg4[%c0_4, %c0_5] : memref<256x256xbf16, #tpu.memory_space<vmem>>, vector<256x256xbf16>
    %cst = arith.constant dense<0.000000e+00> : vector<8x256xf32>
    %6 = tpu.matmul %4, %5, %cst {dimension_numbers = #tpu.dot_dimension_numbers<[1], [0], [0], [1], [0, 0, 1, 1], [], []>} : vector<8x256xbf16>, vector<256x256xbf16>, vector<8x256xf32> -> vector<8x256xf32>
    %7 = arith.addf %3, %6 : vector<8x256xf32>
    %c0_6 = arith.constant 0 : index
    %c0_7 = arith.constant 0 : index
    %8 = vector.load %arg7[%c0_6, %c0_7] : memref<8x256xf32, #tpu.memory_space<vmem>>, vector<8x256xf32>
    tpu.vector_store %arg7[%c0_6, %c0_7], %7 {strides = array<i32>} : memref<8x256xf32, #tpu.memory_space<vmem>>, vector<8x256xf32>,
    %c8_i32 = arith.constant 8 : i32
    %9 = arith.cmpi eq, %arg2, %c8_i32 : i32
    %10 = arith.extui %9 : i1 to i32
    %c0_i32_8 = arith.constant 0 : i32
    %11 = arith.cmpi ne, %10, %c0_i32_8 : i32
    scf.if %11 {
      %c0_9 = arith.constant 0 : index
      %c0_10 = arith.constant 0 : index
      %12 = vector.load %arg7[%c0_9, %c0_10] : memref<8x256xf32, #tpu.memory_space<vmem>>, vector<8x256xf32>
      %c0_11 = arith.constant 0 : index
      %c0_12 = arith.constant 0 : index
      %13 = vector.load %arg5[%c0_11, %c0_12] : memref<1x256xf32, #tpu.memory_space<vmem>>, vector<1x256xf32>
      %14 = vector.broadcast %13 : vector<1x256xf32> to vector<8x256xf32>
      %15 = arith.addf %12, %14 : vector<8x256xf32>
      %c0_13 = arith.constant 0 : index
      %c0_14 = arith.constant 0 : index
      %16 = vector.load %arg6[%c0_13, %c0_14] : memref<8x256xf32, #tpu.memory_space<vmem>>, vector<8x256xf32>
      %17 = arith.addf %15, %16 : vector<8x256xf32>
      %cst_15 = arith.constant 0.000000e+00 : f32
      %18 = vector.broadcast %cst_15 : f32 to vector<8x256xf32>
      %19 = arith.maximumf %17, %18 : vector<8x256xf32>
      %c0_16 = arith.constant 0 : index
      %c0_17 = arith.constant 0 : index
      %20 = vector.load %arg7[%c0_16, %c0_17] : memref<8x256xf32, #tpu.memory_space<vmem>>, vector<8x256xf32>
      tpu.vector_store %arg7[%c0_16, %c0_17], %19 {strides = array<i32>} : memref<8x256xf32, #tpu.memory_space<vmem>>, vector<8x256xf32>,
    } else {
    }
    return
  }
  func.func @transform_0(%arg0: i32, %arg1: i32, %arg2: i32) -> (i32, i32) {
    %c0_i32 = arith.constant 0 : i32
    return %arg0, %arg2 : i32, i32
  }
  func.func @transform_1(%arg0: i32, %arg1: i32, %arg2: i32) -> (i32, i32) {
    %c0_i32 = arith.constant 0 : i32
    return %arg2, %arg1 : i32, i32
  }
  func.func @transform_2(%arg0: i32, %arg1: i32, %arg2: i32) -> (i32, i32) {
    %c0_i32 = arith.constant 0 : i32
    %c0_i32_0 = arith.constant 0 : i32
    return %c0_i32, %arg1 : i32, i32
  }
  func.func @transform_3(%arg0: i32, %arg1: i32, %arg2: i32) -> (i32, i32) {
    %c0_i32 = arith.constant 0 : i32
    return %arg0, %arg1 : i32, i32
  }
  func.func @transform_4(%arg0: i32, %arg1: i32, %arg2: i32) -> (i32, i32) {
    %c0_i32 = arith.constant 0 : i32
    return %arg0, %arg1 : i32, i32
  }
}

module attributes {stable_mosaic.version = 11 : i64} {
  func.func @_matmul_kernel(%arg0: i32, %arg1: i32, %arg2: i32, %arg3: memref<8x256xbf16, #tpu.memory_space<vmem>>, %arg4: memref<256x256xbf16, #tpu.memory_space<vmem>>, %arg5: memref<1x256xf32, #tpu.memory_space<vmem>>, %arg6: memref<8x256xf32, #tpu.memory_space<vmem>>) attributes {dimension_semantics = [#tpu.dimension_semantics<parallel>, #tpu.dimension_semantics<parallel>, #tpu.dimension_semantics<arbitrary>], iteration_bounds = array<i64: 1, 1, 9>, scalar_prefetch = 0 : i64, scratch_operands = 0 : i64, tpu.core_type = #tpu.core_type<tc>, window_params = [{transform_indices = @transform_0, window_bounds = array<i64: 8, 256>}, {transform_indices = @transform_1, window_bounds = array<i64: 256, 256>}, {transform_indices = @transform_2, window_bounds = array<i64: 1, 256>}, {transform_indices = @transform_3, window_bounds = array<i64: 8, 256>}]} {
    %c0_i32 = arith.constant 0 : i32
    %0 = arith.cmpi eq, %arg2, %c0_i32 : i32
    %1 = arith.extui %0 : i1 to i32
    %c0_i32_0 = arith.constant 0 : i32
    %2 = arith.cmpi ne, %1, %c0_i32_0 : i32
    scf.if %2 {
      %cst_9 = arith.constant 0.000000e+00 : f32
      %12 = vector.broadcast %cst_9 : f32 to vector<8x256xf32>
      %c0_10 = arith.constant 0 : index
      %c0_11 = arith.constant 0 : index
      %13 = vector.load %arg6[%c0_10, %c0_11] : memref<8x256xf32, #tpu.memory_space<vmem>>, vector<8x256xf32>
      tpu.vector_store %arg6[%c0_10, %c0_11], %12 {strides = array<i32>} : memref<8x256xf32, #tpu.memory_space<vmem>>, vector<8x256xf32>,
    } else {
    }
    %c0 = arith.constant 0 : index
    %c0_1 = arith.constant 0 : index
    %3 = vector.load %arg6[%c0, %c0_1] : memref<8x256xf32, #tpu.memory_space<vmem>>, vector<8x256xf32>
    %c0_2 = arith.constant 0 : index
    %c0_3 = arith.constant 0 : index
    %4 = vector.load %arg3[%c0_2, %c0_3] : memref<8x256xbf16, #tpu.memory_space<vmem>>, vector<8x256xbf16>
    %c0_4 = arith.constant 0 : index
    %c0_5 = arith.constant 0 : index
    %5 = vector.load %arg4[%c0_4, %c0_5] : memref<256x256xbf16, #tpu.memory_space<vmem>>, vector<256x256xbf16>
    %cst = arith.constant dense<0.000000e+00> : vector<8x256xf32>
    %6 = tpu.matmul %4, %5, %cst {dimension_numbers = #tpu.dot_dimension_numbers<[1], [0], [0], [1], [0, 0, 1, 1], [], []>} : vector<8x256xbf16>, vector<256x256xbf16>, vector<8x256xf32> -> vector<8x256xf32>
    %7 = arith.addf %3, %6 : vector<8x256xf32>
    %c0_6 = arith.constant 0 : index
    %c0_7 = arith.constant 0 : index
    %8 = vector.load %arg6[%c0_6, %c0_7] : memref<8x256xf32, #tpu.memory_space<vmem>>, vector<8x256xf32>
    tpu.vector_store %arg6[%c0_6, %c0_7], %7 {strides = array<i32>} : memref<8x256xf32, #tpu.memory_space<vmem>>, vector<8x256xf32>,
    %c8_i32 = arith.constant 8 : i32
    %9 = arith.cmpi eq, %arg2, %c8_i32 : i32
    %10 = arith.extui %9 : i1 to i32
    %c0_i32_8 = arith.constant 0 : i32
    %11 = arith.cmpi ne, %10, %c0_i32_8 : i32
    scf.if %11 {
      %c0_9 = arith.constant 0 : index
      %c0_10 = arith.constant 0 : index
      %12 = vector.load %arg6[%c0_9, %c0_10] : memref<8x256xf32, #tpu.memory_space<vmem>>, vector<8x256xf32>
      %c0_11 = arith.constant 0 : index
      %c0_12 = arith.constant 0 : index
      %13 = vector.load %arg5[%c0_11, %c0_12] : memref<1x256xf32, #tpu.memory_space<vmem>>, vector<1x256xf32>
      %14 = vector.broadcast %13 : vector<1x256xf32> to vector<8x256xf32>
      %15 = arith.addf %12, %14 : vector<8x256xf32>
      %cst_13 = arith.constant 0.000000e+00 : f32
      %16 = vector.broadcast %cst_13 : f32 to vector<8x256xf32>
      %17 = arith.maximumf %15, %16 : vector<8x256xf32>
      %c0_14 = arith.constant 0 : index
      %c0_15 = arith.constant 0 : index
      %18 = vector.load %arg6[%c0_14, %c0_15] : memref<8x256xf32, #tpu.memory_space<vmem>>, vector<8x256xf32>
      tpu.vector_store %arg6[%c0_14, %c0_15], %17 {strides = array<i32>} : memref<8x256xf32, #tpu.memory_space<vmem>>, vector<8x256xf32>,
    } else {
    }
    return
  }
  func.func @transform_0(%arg0: i32, %arg1: i32, %arg2: i32) -> (i32, i32) {
    %c0_i32 = arith.constant 0 : i32
    return %arg0, %arg2 : i32, i32
  }
  func.func @transform_1(%arg0: i32, %arg1: i32, %arg2: i32) -> (i32, i32) {
    %c0_i32 = arith.constant 0 : i32
    return %arg2, %arg1 : i32, i32
  }
  func.func @transform_2(%arg0: i32, %arg1: i32, %arg2: i32) -> (i32, i32) {
    %c0_i32 = arith.constant 0 : i32
    %c0_i32_0 = arith.constant 0 : i32
    return %c0_i32, %arg1 : i32, i32
  }
  func.func @transform_3(%arg0: i32, %arg1: i32, %arg2: i32) -> (i32, i32) {
    %c0_i32 = arith.constant 0 : i32
    return %arg0, %arg1 : i32, i32
  }
}

module attributes {stable_mosaic.version = 11 : i64} {
  func.func @_matmul_kernel(%arg0: i32, %arg1: i32, %arg2: i32, %arg3: memref<8x128xbf16, #tpu.memory_space<vmem>>, %arg4: memref<128x256xbf16, #tpu.memory_space<vmem>>, %arg5: memref<1x256xf32, #tpu.memory_space<vmem>>, %arg6: memref<8x256xf32, #tpu.memory_space<vmem>>) attributes {dimension_semantics = [#tpu.dimension_semantics<parallel>, #tpu.dimension_semantics<parallel>, #tpu.dimension_semantics<arbitrary>], iteration_bounds = array<i64: 1, 1, 1>, scalar_prefetch = 0 : i64, scratch_operands = 0 : i64, tpu.core_type = #tpu.core_type<tc>, window_params = [{transform_indices = @transform_0, window_bounds = array<i64: 8, 128>}, {transform_indices = @transform_1, window_bounds = array<i64: 128, 256>}, {transform_indices = @transform_2, window_bounds = array<i64: 1, 256>}, {transform_indices = @transform_3, window_bounds = array<i64: 8, 256>}]} {
    %c0_i32 = arith.constant 0 : i32
    %0 = arith.cmpi eq, %arg2, %c0_i32 : i32
    %1 = arith.extui %0 : i1 to i32
    %c0_i32_0 = arith.constant 0 : i32
    %2 = arith.cmpi ne, %1, %c0_i32_0 : i32
    scf.if %2 {
      %cst_10 = arith.constant 0.000000e+00 : f32
      %12 = vector.broadcast %cst_10 : f32 to vector<8x256xf32>
      %c0_11 = arith.constant 0 : index
      %c0_12 = arith.constant 0 : index
      %13 = vector.load %arg6[%c0_11, %c0_12] : memref<8x256xf32, #tpu.memory_space<vmem>>, vector<8x256xf32>
      tpu.vector_store %arg6[%c0_11, %c0_12], %12 {strides = array<i32>} : memref<8x256xf32, #tpu.memory_space<vmem>>, vector<8x256xf32>,
    } else {
    }
    %c0 = arith.constant 0 : index
    %c0_1 = arith.constant 0 : index
    %3 = vector.load %arg6[%c0, %c0_1] : memref<8x256xf32, #tpu.memory_space<vmem>>, vector<8x256xf32>
    %c0_2 = arith.constant 0 : index
    %c0_3 = arith.constant 0 : index
    %4 = vector.load %arg3[%c0_2, %c0_3] : memref<8x128xbf16, #tpu.memory_space<vmem>>, vector<8x128xbf16>
    %c0_4 = arith.constant 0 : index
    %c0_5 = arith.constant 0 : index
    %5 = vector.load %arg4[%c0_4, %c0_5] : memref<128x256xbf16, #tpu.memory_space<vmem>>, vector<128x256xbf16>
    %cst = arith.constant dense<0.000000e+00> : vector<8x256xf32>
    %6 = tpu.matmul %4, %5, %cst {dimension_numbers = #tpu.dot_dimension_numbers<[1], [0], [0], [1], [0, 0, 1, 1], [], []>} : vector<8x128xbf16>, vector<128x256xbf16>, vector<8x256xf32> -> vector<8x256xf32>
    %7 = arith.addf %3, %6 : vector<8x256xf32>
    %c0_6 = arith.constant 0 : index
    %c0_7 = arith.constant 0 : index
    %8 = vector.load %arg6[%c0_6, %c0_7] : memref<8x256xf32, #tpu.memory_space<vmem>>, vector<8x256xf32>
    tpu.vector_store %arg6[%c0_6, %c0_7], %7 {strides = array<i32>} : memref<8x256xf32, #tpu.memory_space<vmem>>, vector<8x256xf32>,
    %c0_i32_8 = arith.constant 0 : i32
    %9 = arith.cmpi eq, %arg2, %c0_i32_8 : i32
    %10 = arith.extui %9 : i1 to i32
    %c0_i32_9 = arith.constant 0 : i32
    %11 = arith.cmpi ne, %10, %c0_i32_9 : i32
    scf.if %11 {
      %c0_10 = arith.constant 0 : index
      %c0_11 = arith.constant 0 : index
      %12 = vector.load %arg6[%c0_10, %c0_11] : memref<8x256xf32, #tpu.memory_space<vmem>>, vector<8x256xf32>
      %c0_12 = arith.constant 0 : index
      %c0_13 = arith.constant 0 : index
      %13 = vector.load %arg5[%c0_12, %c0_13] : memref<1x256xf32, #tpu.memory_space<vmem>>, vector<1x256xf32>
      %14 = vector.broadcast %13 : vector<1x256xf32> to vector<8x256xf32>
      %15 = arith.addf %12, %14 : vector<8x256xf32>
      %c0_14 = arith.constant 0 : index
      %c0_15 = arith.constant 0 : index
      %16 = vector.load %arg6[%c0_14, %c0_15] : memref<8x256xf32, #tpu.memory_space<vmem>>, vector<8x256xf32>
      tpu.vector_store %arg6[%c0_14, %c0_15], %15 {strides = array<i32>} : memref<8x256xf32, #tpu.memory_space<vmem>>, vector<8x256xf32>,
    } else {
    }
    return
  }
  func.func @transform_0(%arg0: i32, %arg1: i32, %arg2: i32) -> (i32, i32) {
    %c0_i32 = arith.constant 0 : i32
    return %arg0, %arg2 : i32, i32
  }
  func.func @transform_1(%arg0: i32, %arg1: i32, %arg2: i32) -> (i32, i32) {
    %c0_i32 = arith.constant 0 : i32
    return %arg2, %arg1 : i32, i32
  }
  func.func @transform_2(%arg0: i32, %arg1: i32, %arg2: i32) -> (i32, i32) {
    %c0_i32 = arith.constant 0 : i32
    %c0_i32_0 = arith.constant 0 : i32
    return %c0_i32, %arg1 : i32, i32
  }
  func.func @transform_3(%arg0: i32, %arg1: i32, %arg2: i32) -> (i32, i32) {
    %c0_i32 = arith.constant 0 : i32
    return %arg0, %arg1 : i32, i32
  }
}

module attributes {stable_mosaic.version = 11 : i64} {
  func.func @_matmul_kernel(%arg0: i32, %arg1: i32, %arg2: i32, %arg3: memref<8x256xbf16, #tpu.memory_space<vmem>>, %arg4: memref<256x512xbf16, #tpu.memory_space<vmem>>, %arg5: memref<1x512xf32, #tpu.memory_space<vmem>>, %arg6: memref<8x512xf32, #tpu.memory_space<vmem>>) attributes {dimension_semantics = [#tpu.dimension_semantics<parallel>, #tpu.dimension_semantics<parallel>, #tpu.dimension_semantics<arbitrary>], iteration_bounds = array<i64: 1, 1, 9>, scalar_prefetch = 0 : i64, scratch_operands = 0 : i64, tpu.core_type = #tpu.core_type<tc>, window_params = [{transform_indices = @transform_0, window_bounds = array<i64: 8, 256>}, {transform_indices = @transform_1, window_bounds = array<i64: 256, 512>}, {transform_indices = @transform_2, window_bounds = array<i64: 1, 512>}, {transform_indices = @transform_3, window_bounds = array<i64: 8, 512>}]} {
    %c0_i32 = arith.constant 0 : i32
    %0 = arith.cmpi eq, %arg2, %c0_i32 : i32
    %1 = arith.extui %0 : i1 to i32
    %c0_i32_0 = arith.constant 0 : i32
    %2 = arith.cmpi ne, %1, %c0_i32_0 : i32
    scf.if %2 {
      %cst_9 = arith.constant 0.000000e+00 : f32
      %12 = vector.broadcast %cst_9 : f32 to vector<8x512xf32>
      %c0_10 = arith.constant 0 : index
      %c0_11 = arith.constant 0 : index
      %13 = vector.load %arg6[%c0_10, %c0_11] : memref<8x512xf32, #tpu.memory_space<vmem>>, vector<8x512xf32>
      tpu.vector_store %arg6[%c0_10, %c0_11], %12 {strides = array<i32>} : memref<8x512xf32, #tpu.memory_space<vmem>>, vector<8x512xf32>,
    } else {
    }
    %c0 = arith.constant 0 : index
    %c0_1 = arith.constant 0 : index
    %3 = vector.load %arg6[%c0, %c0_1] : memref<8x512xf32, #tpu.memory_space<vmem>>, vector<8x512xf32>
    %c0_2 = arith.constant 0 : index
    %c0_3 = arith.constant 0 : index
    %4 = vector.load %arg3[%c0_2, %c0_3] : memref<8x256xbf16, #tpu.memory_space<vmem>>, vector<8x256xbf16>
    %c0_4 = arith.constant 0 : index
    %c0_5 = arith.constant 0 : index
    %5 = vector.load %arg4[%c0_4, %c0_5] : memref<256x512xbf16, #tpu.memory_space<vmem>>, vector<256x512xbf16>
    %cst = arith.constant dense<0.000000e+00> : vector<8x512xf32>
    %6 = tpu.matmul %4, %5, %cst {dimension_numbers = #tpu.dot_dimension_numbers<[1], [0], [0], [1], [0, 0, 1, 1], [], []>} : vector<8x256xbf16>, vector<256x512xbf16>, vector<8x512xf32> -> vector<8x512xf32>
    %7 = arith.addf %3, %6 : vector<8x512xf32>
    %c0_6 = arith.constant 0 : index
    %c0_7 = arith.constant 0 : index
    %8 = vector.load %arg6[%c0_6, %c0_7] : memref<8x512xf32, #tpu.memory_space<vmem>>, vector<8x512xf32>
    tpu.vector_store %arg6[%c0_6, %c0_7], %7 {strides = array<i32>} : memref<8x512xf32, #tpu.memory_space<vmem>>, vector<8x512xf32>,
    %c8_i32 = arith.constant 8 : i32
    %9 = arith.cmpi eq, %arg2, %c8_i32 : i32
    %10 = arith.extui %9 : i1 to i32
    %c0_i32_8 = arith.constant 0 : i32
    %11 = arith.cmpi ne, %10, %c0_i32_8 : i32
    scf.if %11 {
      %c0_9 = arith.constant 0 : index
      %c0_10 = arith.constant 0 : index
      %12 = vector.load %arg6[%c0_9, %c0_10] : memref<8x512xf32, #tpu.memory_space<vmem>>, vector<8x512xf32>
      %c0_11 = arith.constant 0 : index
      %c0_12 = arith.constant 0 : index
      %13 = vector.load %arg5[%c0_11, %c0_12] : memref<1x512xf32, #tpu.memory_space<vmem>>, vector<1x512xf32>
      %14 = vector.broadcast %13 : vector<1x512xf32> to vector<8x512xf32>
      %15 = arith.addf %12, %14 : vector<8x512xf32>
      %cst_13 = arith.constant 0.000000e+00 : f32
      %16 = vector.broadcast %cst_13 : f32 to vector<8x512xf32>
      %17 = arith.maximumf %15, %16 : vector<8x512xf32>
      %c0_14 = arith.constant 0 : index
      %c0_15 = arith.constant 0 : index
      %18 = vector.load %arg6[%c0_14, %c0_15] : memref<8x512xf32, #tpu.memory_space<vmem>>, vector<8x512xf32>
      tpu.vector_store %arg6[%c0_14, %c0_15], %17 {strides = array<i32>} : memref<8x512xf32, #tpu.memory_space<vmem>>, vector<8x512xf32>,
    } else {
    }
    return
  }
  func.func @transform_0(%arg0: i32, %arg1: i32, %arg2: i32) -> (i32, i32) {
    %c0_i32 = arith.constant 0 : i32
    return %arg0, %arg2 : i32, i32
  }
  func.func @transform_1(%arg0: i32, %arg1: i32, %arg2: i32) -> (i32, i32) {
    %c0_i32 = arith.constant 0 : i32
    return %arg2, %arg1 : i32, i32
  }
  func.func @transform_2(%arg0: i32, %arg1: i32, %arg2: i32) -> (i32, i32) {
    %c0_i32 = arith.constant 0 : i32
    %c0_i32_0 = arith.constant 0 : i32
    return %c0_i32, %arg1 : i32, i32
  }
  func.func @transform_3(%arg0: i32, %arg1: i32, %arg2: i32) -> (i32, i32) {
    %c0_i32 = arith.constant 0 : i32
    return %arg0, %arg1 : i32, i32
  }
}

module attributes {stable_mosaic.version = 11 : i64} {
  func.func @_matmul_kernel(%arg0: i32, %arg1: i32, %arg2: i32, %arg3: memref<8x256xbf16, #tpu.memory_space<vmem>>, %arg4: memref<256x512xbf16, #tpu.memory_space<vmem>>, %arg5: memref<1x512xf32, #tpu.memory_space<vmem>>, %arg6: memref<8x512xf32, #tpu.memory_space<vmem>>) attributes {dimension_semantics = [#tpu.dimension_semantics<parallel>, #tpu.dimension_semantics<parallel>, #tpu.dimension_semantics<arbitrary>], iteration_bounds = array<i64: 1, 1, 1>, scalar_prefetch = 0 : i64, scratch_operands = 0 : i64, tpu.core_type = #tpu.core_type<tc>, window_params = [{transform_indices = @transform_0, window_bounds = array<i64: 8, 256>}, {transform_indices = @transform_1, window_bounds = array<i64: 256, 512>}, {transform_indices = @transform_2, window_bounds = array<i64: 1, 512>}, {transform_indices = @transform_3, window_bounds = array<i64: 8, 512>}]} {
    %c0_i32 = arith.constant 0 : i32
    %0 = arith.cmpi eq, %arg2, %c0_i32 : i32
    %1 = arith.extui %0 : i1 to i32
    %c0_i32_0 = arith.constant 0 : i32
    %2 = arith.cmpi ne, %1, %c0_i32_0 : i32
    scf.if %2 {
      %cst_10 = arith.constant 0.000000e+00 : f32
      %12 = vector.broadcast %cst_10 : f32 to vector<8x512xf32>
      %c0_11 = arith.constant 0 : index
      %c0_12 = arith.constant 0 : index
      %13 = vector.load %arg6[%c0_11, %c0_12] : memref<8x512xf32, #tpu.memory_space<vmem>>, vector<8x512xf32>
      tpu.vector_store %arg6[%c0_11, %c0_12], %12 {strides = array<i32>} : memref<8x512xf32, #tpu.memory_space<vmem>>, vector<8x512xf32>,
    } else {
    }
    %c0 = arith.constant 0 : index
    %c0_1 = arith.constant 0 : index
    %3 = vector.load %arg6[%c0, %c0_1] : memref<8x512xf32, #tpu.memory_space<vmem>>, vector<8x512xf32>
    %c0_2 = arith.constant 0 : index
    %c0_3 = arith.constant 0 : index
    %4 = vector.load %arg3[%c0_2, %c0_3] : memref<8x256xbf16, #tpu.memory_space<vmem>>, vector<8x256xbf16>
    %c0_4 = arith.constant 0 : index
    %c0_5 = arith.constant 0 : index
    %5 = vector.load %arg4[%c0_4, %c0_5] : memref<256x512xbf16, #tpu.memory_space<vmem>>, vector<256x512xbf16>
    %cst = arith.constant dense<0.000000e+00> : vector<8x512xf32>
    %6 = tpu.matmul %4, %5, %cst {dimension_numbers = #tpu.dot_dimension_numbers<[1], [0], [0], [1], [0, 0, 1, 1], [], []>} : vector<8x256xbf16>, vector<256x512xbf16>, vector<8x512xf32> -> vector<8x512xf32>
    %7 = arith.addf %3, %6 : vector<8x512xf32>
    %c0_6 = arith.constant 0 : index
    %c0_7 = arith.constant 0 : index
    %8 = vector.load %arg6[%c0_6, %c0_7] : memref<8x512xf32, #tpu.memory_space<vmem>>, vector<8x512xf32>
    tpu.vector_store %arg6[%c0_6, %c0_7], %7 {strides = array<i32>} : memref<8x512xf32, #tpu.memory_space<vmem>>, vector<8x512xf32>,
    %c0_i32_8 = arith.constant 0 : i32
    %9 = arith.cmpi eq, %arg2, %c0_i32_8 : i32
    %10 = arith.extui %9 : i1 to i32
    %c0_i32_9 = arith.constant 0 : i32
    %11 = arith.cmpi ne, %10, %c0_i32_9 : i32
    scf.if %11 {
      %c0_10 = arith.constant 0 : index
      %c0_11 = arith.constant 0 : index
      %12 = vector.load %arg6[%c0_10, %c0_11] : memref<8x512xf32, #tpu.memory_space<vmem>>, vector<8x512xf32>
      %c0_12 = arith.constant 0 : index
      %c0_13 = arith.constant 0 : index
      %13 = vector.load %arg5[%c0_12, %c0_13] : memref<1x512xf32, #tpu.memory_space<vmem>>, vector<1x512xf32>
      %14 = vector.broadcast %13 : vector<1x512xf32> to vector<8x512xf32>
      %15 = arith.addf %12, %14 : vector<8x512xf32>
      %c0_14 = arith.constant 0 : index
      %c0_15 = arith.constant 0 : index
      %16 = vector.load %arg6[%c0_14, %c0_15] : memref<8x512xf32, #tpu.memory_space<vmem>>, vector<8x512xf32>
      tpu.vector_store %arg6[%c0_14, %c0_15], %15 {strides = array<i32>} : memref<8x512xf32, #tpu.memory_space<vmem>>, vector<8x512xf32>,
    } else {
    }
    return
  }
  func.func @transform_0(%arg0: i32, %arg1: i32, %arg2: i32) -> (i32, i32) {
    %c0_i32 = arith.constant 0 : i32
    return %arg0, %arg2 : i32, i32
  }
  func.func @transform_1(%arg0: i32, %arg1: i32, %arg2: i32) -> (i32, i32) {
    %c0_i32 = arith.constant 0 : i32
    return %arg2, %arg1 : i32, i32
  }
  func.func @transform_2(%arg0: i32, %arg1: i32, %arg2: i32) -> (i32, i32) {
    %c0_i32 = arith.constant 0 : i32
    %c0_i32_0 = arith.constant 0 : i32
    return %c0_i32, %arg1 : i32, i32
  }
  func.func @transform_3(%arg0: i32, %arg1: i32, %arg2: i32) -> (i32, i32) {
    %c0_i32 = arith.constant 0 : i32
    return %arg0, %arg1 : i32, i32
  }
}

module attributes {stable_mosaic.version = 11 : i64} {
  func.func @_matmul_res_kernel(%arg0: i32, %arg1: i32, %arg2: i32, %arg3: memref<8x512xbf16, #tpu.memory_space<vmem>>, %arg4: memref<512x512xbf16, #tpu.memory_space<vmem>>, %arg5: memref<1x512xf32, #tpu.memory_space<vmem>>, %arg6: memref<8x512xf32, #tpu.memory_space<vmem>>, %arg7: memref<8x512xf32, #tpu.memory_space<vmem>>) attributes {dimension_semantics = [#tpu.dimension_semantics<parallel>, #tpu.dimension_semantics<parallel>, #tpu.dimension_semantics<arbitrary>], iteration_bounds = array<i64: 1, 1, 9>, scalar_prefetch = 0 : i64, scratch_operands = 0 : i64, tpu.core_type = #tpu.core_type<tc>, window_params = [{transform_indices = @transform_0, window_bounds = array<i64: 8, 512>}, {transform_indices = @transform_1, window_bounds = array<i64: 512, 512>}, {transform_indices = @transform_2, window_bounds = array<i64: 1, 512>}, {transform_indices = @transform_3, window_bounds = array<i64: 8, 512>}, {transform_indices = @transform_4, window_bounds = array<i64: 8, 512>}]} {
    %c0_i32 = arith.constant 0 : i32
    %0 = arith.cmpi eq, %arg2, %c0_i32 : i32
    %1 = arith.extui %0 : i1 to i32
    %c0_i32_0 = arith.constant 0 : i32
    %2 = arith.cmpi ne, %1, %c0_i32_0 : i32
    scf.if %2 {
      %cst_9 = arith.constant 0.000000e+00 : f32
      %12 = vector.broadcast %cst_9 : f32 to vector<8x512xf32>
      %c0_10 = arith.constant 0 : index
      %c0_11 = arith.constant 0 : index
      %13 = vector.load %arg7[%c0_10, %c0_11] : memref<8x512xf32, #tpu.memory_space<vmem>>, vector<8x512xf32>
      tpu.vector_store %arg7[%c0_10, %c0_11], %12 {strides = array<i32>} : memref<8x512xf32, #tpu.memory_space<vmem>>, vector<8x512xf32>,
    } else {
    }
    %c0 = arith.constant 0 : index
    %c0_1 = arith.constant 0 : index
    %3 = vector.load %arg7[%c0, %c0_1] : memref<8x512xf32, #tpu.memory_space<vmem>>, vector<8x512xf32>
    %c0_2 = arith.constant 0 : index
    %c0_3 = arith.constant 0 : index
    %4 = vector.load %arg3[%c0_2, %c0_3] : memref<8x512xbf16, #tpu.memory_space<vmem>>, vector<8x512xbf16>
    %c0_4 = arith.constant 0 : index
    %c0_5 = arith.constant 0 : index
    %5 = vector.load %arg4[%c0_4, %c0_5] : memref<512x512xbf16, #tpu.memory_space<vmem>>, vector<512x512xbf16>
    %cst = arith.constant dense<0.000000e+00> : vector<8x512xf32>
    %6 = tpu.matmul %4, %5, %cst {dimension_numbers = #tpu.dot_dimension_numbers<[1], [0], [0], [1], [0, 0, 1, 1], [], []>} : vector<8x512xbf16>, vector<512x512xbf16>, vector<8x512xf32> -> vector<8x512xf32>
    %7 = arith.addf %3, %6 : vector<8x512xf32>
    %c0_6 = arith.constant 0 : index
    %c0_7 = arith.constant 0 : index
    %8 = vector.load %arg7[%c0_6, %c0_7] : memref<8x512xf32, #tpu.memory_space<vmem>>, vector<8x512xf32>
    tpu.vector_store %arg7[%c0_6, %c0_7], %7 {strides = array<i32>} : memref<8x512xf32, #tpu.memory_space<vmem>>, vector<8x512xf32>,
    %c8_i32 = arith.constant 8 : i32
    %9 = arith.cmpi eq, %arg2, %c8_i32 : i32
    %10 = arith.extui %9 : i1 to i32
    %c0_i32_8 = arith.constant 0 : i32
    %11 = arith.cmpi ne, %10, %c0_i32_8 : i32
    scf.if %11 {
      %c0_9 = arith.constant 0 : index
      %c0_10 = arith.constant 0 : index
      %12 = vector.load %arg7[%c0_9, %c0_10] : memref<8x512xf32, #tpu.memory_space<vmem>>, vector<8x512xf32>
      %c0_11 = arith.constant 0 : index
      %c0_12 = arith.constant 0 : index
      %13 = vector.load %arg5[%c0_11, %c0_12] : memref<1x512xf32, #tpu.memory_space<vmem>>, vector<1x512xf32>
      %14 = vector.broadcast %13 : vector<1x512xf32> to vector<8x512xf32>
      %15 = arith.addf %12, %14 : vector<8x512xf32>
      %c0_13 = arith.constant 0 : index
      %c0_14 = arith.constant 0 : index
      %16 = vector.load %arg6[%c0_13, %c0_14] : memref<8x512xf32, #tpu.memory_space<vmem>>, vector<8x512xf32>
      %17 = arith.addf %15, %16 : vector<8x512xf32>
      %cst_15 = arith.constant 0.000000e+00 : f32
      %18 = vector.broadcast %cst_15 : f32 to vector<8x512xf32>
      %19 = arith.maximumf %17, %18 : vector<8x512xf32>
      %c0_16 = arith.constant 0 : index
      %c0_17 = arith.constant 0 : index
      %20 = vector.load %arg7[%c0_16, %c0_17] : memref<8x512xf32, #tpu.memory_space<vmem>>, vector<8x512xf32>
      tpu.vector_store %arg7[%c0_16, %c0_17], %19 {strides = array<i32>} : memref<8x512xf32, #tpu.memory_space<vmem>>, vector<8x512xf32>,
    } else {
    }
    return
  }
  func.func @transform_0(%arg0: i32, %arg1: i32, %arg2: i32) -> (i32, i32) {
    %c0_i32 = arith.constant 0 : i32
    return %arg0, %arg2 : i32, i32
  }
  func.func @transform_1(%arg0: i32, %arg1: i32, %arg2: i32) -> (i32, i32) {
    %c0_i32 = arith.constant 0 : i32
    return %arg2, %arg1 : i32, i32
  }
  func.func @transform_2(%arg0: i32, %arg1: i32, %arg2: i32) -> (i32, i32) {
    %c0_i32 = arith.constant 0 : i32
    %c0_i32_0 = arith.constant 0 : i32
    return %c0_i32, %arg1 : i32, i32
  }
  func.func @transform_3(%arg0: i32, %arg1: i32, %arg2: i32) -> (i32, i32) {
    %c0_i32 = arith.constant 0 : i32
    return %arg0, %arg1 : i32, i32
  }
  func.func @transform_4(%arg0: i32, %arg1: i32, %arg2: i32) -> (i32, i32) {
    %c0_i32 = arith.constant 0 : i32
    return %arg0, %arg1 : i32, i32
  }
}

module attributes {stable_mosaic.version = 11 : i64} {
  func.func @_matmul_kernel(%arg0: i32, %arg1: i32, %arg2: i32, %arg3: memref<8x512xbf16, #tpu.memory_space<vmem>>, %arg4: memref<512x512xbf16, #tpu.memory_space<vmem>>, %arg5: memref<1x512xf32, #tpu.memory_space<vmem>>, %arg6: memref<8x512xf32, #tpu.memory_space<vmem>>) attributes {dimension_semantics = [#tpu.dimension_semantics<parallel>, #tpu.dimension_semantics<parallel>, #tpu.dimension_semantics<arbitrary>], iteration_bounds = array<i64: 1, 1, 9>, scalar_prefetch = 0 : i64, scratch_operands = 0 : i64, tpu.core_type = #tpu.core_type<tc>, window_params = [{transform_indices = @transform_0, window_bounds = array<i64: 8, 512>}, {transform_indices = @transform_1, window_bounds = array<i64: 512, 512>}, {transform_indices = @transform_2, window_bounds = array<i64: 1, 512>}, {transform_indices = @transform_3, window_bounds = array<i64: 8, 512>}]} {
    %c0_i32 = arith.constant 0 : i32
    %0 = arith.cmpi eq, %arg2, %c0_i32 : i32
    %1 = arith.extui %0 : i1 to i32
    %c0_i32_0 = arith.constant 0 : i32
    %2 = arith.cmpi ne, %1, %c0_i32_0 : i32
    scf.if %2 {
      %cst_9 = arith.constant 0.000000e+00 : f32
      %12 = vector.broadcast %cst_9 : f32 to vector<8x512xf32>
      %c0_10 = arith.constant 0 : index
      %c0_11 = arith.constant 0 : index
      %13 = vector.load %arg6[%c0_10, %c0_11] : memref<8x512xf32, #tpu.memory_space<vmem>>, vector<8x512xf32>
      tpu.vector_store %arg6[%c0_10, %c0_11], %12 {strides = array<i32>} : memref<8x512xf32, #tpu.memory_space<vmem>>, vector<8x512xf32>,
    } else {
    }
    %c0 = arith.constant 0 : index
    %c0_1 = arith.constant 0 : index
    %3 = vector.load %arg6[%c0, %c0_1] : memref<8x512xf32, #tpu.memory_space<vmem>>, vector<8x512xf32>
    %c0_2 = arith.constant 0 : index
    %c0_3 = arith.constant 0 : index
    %4 = vector.load %arg3[%c0_2, %c0_3] : memref<8x512xbf16, #tpu.memory_space<vmem>>, vector<8x512xbf16>
    %c0_4 = arith.constant 0 : index
    %c0_5 = arith.constant 0 : index
    %5 = vector.load %arg4[%c0_4, %c0_5] : memref<512x512xbf16, #tpu.memory_space<vmem>>, vector<512x512xbf16>
    %cst = arith.constant dense<0.000000e+00> : vector<8x512xf32>
    %6 = tpu.matmul %4, %5, %cst {dimension_numbers = #tpu.dot_dimension_numbers<[1], [0], [0], [1], [0, 0, 1, 1], [], []>} : vector<8x512xbf16>, vector<512x512xbf16>, vector<8x512xf32> -> vector<8x512xf32>
    %7 = arith.addf %3, %6 : vector<8x512xf32>
    %c0_6 = arith.constant 0 : index
    %c0_7 = arith.constant 0 : index
    %8 = vector.load %arg6[%c0_6, %c0_7] : memref<8x512xf32, #tpu.memory_space<vmem>>, vector<8x512xf32>
    tpu.vector_store %arg6[%c0_6, %c0_7], %7 {strides = array<i32>} : memref<8x512xf32, #tpu.memory_space<vmem>>, vector<8x512xf32>,
    %c8_i32 = arith.constant 8 : i32
    %9 = arith.cmpi eq, %arg2, %c8_i32 : i32
    %10 = arith.extui %9 : i1 to i32
    %c0_i32_8 = arith.constant 0 : i32
    %11 = arith.cmpi ne, %10, %c0_i32_8 : i32
    scf.if %11 {
      %c0_9 = arith.constant 0 : index
      %c0_10 = arith.constant 0 : index
      %12 = vector.load %arg6[%c0_9, %c0_10] : memref<8x512xf32, #tpu.memory_space<vmem>>, vector<8x512xf32>
      %c0_11 = arith.constant 0 : index
      %c0_12 = arith.constant 0 : index
      %13 = vector.load %arg5[%c0_11, %c0_12] : memref<1x512xf32, #tpu.memory_space<vmem>>, vector<1x512xf32>
      %14 = vector.broadcast %13 : vector<1x512xf32> to vector<8x512xf32>
      %15 = arith.addf %12, %14 : vector<8x512xf32>
      %cst_13 = arith.constant 0.000000e+00 : f32
      %16 = vector.broadcast %cst_13 : f32 to vector<8x512xf32>
      %17 = arith.maximumf %15, %16 : vector<8x512xf32>
      %c0_14 = arith.constant 0 : index
      %c0_15 = arith.constant 0 : index
      %18 = vector.load %arg6[%c0_14, %c0_15] : memref<8x512xf32, #tpu.memory_space<vmem>>, vector<8x512xf32>
      tpu.vector_store %arg6[%c0_14, %c0_15], %17 {strides = array<i32>} : memref<8x512xf32, #tpu.memory_space<vmem>>, vector<8x512xf32>,
    } else {
    }
    return
  }
  func.func @transform_0(%arg0: i32, %arg1: i32, %arg2: i32) -> (i32, i32) {
    %c0_i32 = arith.constant 0 : i32
    return %arg0, %arg2 : i32, i32
  }
  func.func @transform_1(%arg0: i32, %arg1: i32, %arg2: i32) -> (i32, i32) {
    %c0_i32 = arith.constant 0 : i32
    return %arg2, %arg1 : i32, i32
  }
  func.func @transform_2(%arg0: i32, %arg1: i32, %arg2: i32) -> (i32, i32) {
    %c0_i32 = arith.constant 0 : i32
    %c0_i32_0 = arith.constant 0 : i32
    return %c0_i32, %arg1 : i32, i32
  }
  func.func @transform_3(%arg0: i32, %arg1: i32, %arg2: i32) -> (i32, i32) {
    %c0_i32 = arith.constant 0 : i32
    return %arg0, %arg1 : i32, i32
  }
}

module attributes {stable_mosaic.version = 11 : i64} {
  func.func @_fc_head_kernel(%arg0: memref<8x512xbf16, #tpu.memory_space<vmem>>, %arg1: memref<512x128xbf16, #tpu.memory_space<vmem>>, %arg2: memref<1x128xf32, #tpu.memory_space<vmem>>, %arg3: memref<128x128xbf16, #tpu.memory_space<vmem>>, %arg4: memref<1x128xf32, #tpu.memory_space<vmem>>, %arg5: memref<128x128xbf16, #tpu.memory_space<vmem>>, %arg6: memref<1x128xf32, #tpu.memory_space<vmem>>, %arg7: memref<8x128xf32, #tpu.memory_space<vmem>>) attributes {dimension_semantics = [], scalar_prefetch = 0 : i64, scratch_operands = 0 : i64, tpu.core_type = #tpu.core_type<tc>} {
    %c0 = arith.constant 0 : index
    %c0_0 = arith.constant 0 : index
    %0 = vector.load %arg0[%c0, %c0_0] : memref<8x512xbf16, #tpu.memory_space<vmem>>, vector<8x512xbf16>
    %c0_1 = arith.constant 0 : index
    %c0_2 = arith.constant 0 : index
    %1 = vector.load %arg1[%c0_1, %c0_2] : memref<512x128xbf16, #tpu.memory_space<vmem>>, vector<512x128xbf16>
    %cst = arith.constant dense<0.000000e+00> : vector<8x128xf32>
    %2 = tpu.matmul %0, %1, %cst {dimension_numbers = #tpu.dot_dimension_numbers<[1], [0], [0], [1], [0, 0, 1, 1], [], []>} : vector<8x512xbf16>, vector<512x128xbf16>, vector<8x128xf32> -> vector<8x128xf32>
    %c0_3 = arith.constant 0 : index
    %c0_4 = arith.constant 0 : index
    %3 = vector.load %arg2[%c0_3, %c0_4] : memref<1x128xf32, #tpu.memory_space<vmem>>, vector<1x128xf32>
    %4 = vector.broadcast %3 : vector<1x128xf32> to vector<8x128xf32>
    %5 = arith.addf %2, %4 : vector<8x128xf32>
    %cst_5 = arith.constant 0.000000e+00 : f32
    %6 = vector.broadcast %cst_5 : f32 to vector<8x128xf32>
    %7 = arith.maximumf %5, %6 : vector<8x128xf32>
    %8 = arith.truncf %7 : vector<8x128xf32> to vector<8x128xbf16>
    %c0_6 = arith.constant 0 : index
    %c0_7 = arith.constant 0 : index
    %9 = vector.load %arg3[%c0_6, %c0_7] : memref<128x128xbf16, #tpu.memory_space<vmem>>, vector<128x128xbf16>
    %cst_8 = arith.constant dense<0.000000e+00> : vector<8x128xf32>
    %10 = tpu.matmul %8, %9, %cst_8 {dimension_numbers = #tpu.dot_dimension_numbers<[1], [0], [0], [1], [0, 0, 1, 1], [], []>} : vector<8x128xbf16>, vector<128x128xbf16>, vector<8x128xf32> -> vector<8x128xf32>
    %c0_9 = arith.constant 0 : index
    %c0_10 = arith.constant 0 : index
    %11 = vector.load %arg4[%c0_9, %c0_10] : memref<1x128xf32, #tpu.memory_space<vmem>>, vector<1x128xf32>
    %12 = vector.broadcast %11 : vector<1x128xf32> to vector<8x128xf32>
    %13 = arith.addf %10, %12 : vector<8x128xf32>
    %cst_11 = arith.constant 0.000000e+00 : f32
    %14 = vector.broadcast %cst_11 : f32 to vector<8x128xf32>
    %15 = arith.maximumf %13, %14 : vector<8x128xf32>
    %16 = arith.truncf %15 : vector<8x128xf32> to vector<8x128xbf16>
    %c0_12 = arith.constant 0 : index
    %c0_13 = arith.constant 0 : index
    %17 = vector.load %arg5[%c0_12, %c0_13] : memref<128x128xbf16, #tpu.memory_space<vmem>>, vector<128x128xbf16>
    %cst_14 = arith.constant dense<0.000000e+00> : vector<8x128xf32>
    %18 = tpu.matmul %16, %17, %cst_14 {dimension_numbers = #tpu.dot_dimension_numbers<[1], [0], [0], [1], [0, 0, 1, 1], [], []>} : vector<8x128xbf16>, vector<128x128xbf16>, vector<8x128xf32> -> vector<8x128xf32>
    %c0_15 = arith.constant 0 : index
    %c0_16 = arith.constant 0 : index
    %19 = vector.load %arg6[%c0_15, %c0_16] : memref<1x128xf32, #tpu.memory_space<vmem>>, vector<1x128xf32>
    %20 = vector.broadcast %19 : vector<1x128xf32> to vector<8x128xf32>
    %21 = arith.addf %18, %20 : vector<8x128xf32>
    %c0_17 = arith.constant 0 : index
    %c0_18 = arith.constant 0 : index
    %22 = vector.load %arg7[%c0_17, %c0_18] : memref<8x128xf32, #tpu.memory_space<vmem>>, vector<8x128xf32>
    tpu.vector_store %arg7[%c0_17, %c0_18], %21 {strides = array<i32>} : memref<8x128xf32, #tpu.memory_space<vmem>>, vector<8x128xf32>,
    return
  }
}

</mosaic_0001>

<bundles_post_ra>
// kernel: e2e_cnn_forward.23
= control target key start
LH: loop header
LB: loop body
LE: loop exit
PB: predicated region body
PF: predicated region fallthrough
CT: control target
= control target key end

     0   :  { %6 = vsyncpa [#allocation3], 0  ;;  %s449_s0 = inlined_call_operand.hbm [shape: f32[9,128,64], index: 0, kind: input, shape index: {}]   ;;  %s450_s1 = inlined_call_operand.hbm [shape: f32[128,64], index: 1, kind: output, shape index: {}]  }
   0x1   :  { %7 = vsyncpa [#allocation4], 0  ;;  %s389_s6 = smov [#allocation2]   ;;  %s341_s10 = scalar_lea.hbm %s449_s0, 18432 }
   0x2   :  { %s13_s7 = sshll.u32 %s389_s6, 4  ;;  %p342_p0 = scmp.ne.s32.totalorder %s449_s0, %s341_s10  ;;  %s14_s7 = int_to_ptr.vmem [resolvable:$true] %s13_s7 }
   0x3   :  { %p345_p1 = scmp.lt.u32.totalorder %s341_s10, %s449_s0 }
   0x5   :  { %p347_p2 = pnand %p345_p1, %p342_p0 }
   0x7   :  { %350 = shalt.err (!%p347_p2)
}
   0x8   :  { %s351_s15 = scalar_lea.vmem %s14_s7, 18432  ;;  %p356_p4 = scmp.lt.s32.totalorder %s14_s7, %s14_s7 }
   0x9   :  { %p352_p3 = scmp.ne.s32.totalorder %s14_s7, %s351_s15  ;;  %p357_p5 = scmp.lt.s32.totalorder %s351_s15, %s351_s15 }
   0xb   :  { %p358_p6 = por %p357_p5, %p356_p4 }
   0xd   :  { %p359_p7 = pnand %p358_p6, %p352_p3 }
   0xf   :  { %362 = shalt.err (!%p359_p7)
}
  0x10   :  { %s390_s16 = smov 128   ;;  %s391_s17 = smov 8  }
  0x11   :  { %19 = dma.hbm_to_vmem [thread:$0]  %s449_s0, 18432, %s14_s7, [#allocation3], %s390_s16, %s390_s16, %s391_s17  }
  0x12   :  { %385 = dma.done.wait [#allocation3], 18432  }
  0x13   :  { %386 = vsyncadd [#allocation3], 4294948864  ;;  %v23_v0 = vld [vmem:[#allocation2] sm:$0xff]  ;;  %v24_v6 = vld [vmem:[#allocation2 + $0x8] sm:$0xff]  ;;  %vm303_vm0 = vcmask 523264   ;;  %s392_s0 = smov [#allocation5]  }
  0x14   :  { %v40_v1 = vld [vmem:[#allocation2 + $0x80] sm:$0xff]  ;;  %v41_v7 = vld [vmem:[#allocation2 + $0x88] sm:$0xff]  ;;  %v25_v15 = vld [vmem:[#allocation2 + $0x10] sm:$0xff]  ;;  %s325_s20 = sshll.u32 %s392_s0, 4  ;;  %s326_s20 = int_to_ptr.vmem [resolvable:$true] %s325_s20 }
  0x15   :  { %v73_v2 = vld [vmem:[#allocation2 + $0x100] sm:$0xff]  ;;  %v56_v3 = vmax.f32 %v23_v0, %v40_v1  ;;  %v74_v8 = vld [vmem:[#allocation2 + $0x108] sm:$0xff]  ;;  %v57_v10 = vmax.f32 %v24_v6, %v41_v7  ;;  %v42_v16 = vld [vmem:[#allocation2 + $0x90] sm:$0xff]  ;;  %s363_s21 = scalar_lea.vmem %s326_s20, 2048  ;;  %p368_p9 = scmp.lt.s32.totalorder %s326_s20, %s326_s20 }
  0x16   :  { %v106_v4 = vld [vmem:[#allocation2 + $0x180] sm:$0xff]  ;;  %v107_v13 = vld [vmem:[#allocation2 + $0x188] sm:$0xff]  ;;  %v75_v17 = vld [vmem:[#allocation2 + $0x110] sm:$0xff]  ;;  %v58_v20 = vmax.f32 %v25_v15, %v42_v16  ;;  %p364_p8 = scmp.ne.s32.totalorder %s326_s20, %s363_s21  ;;  %p369_p10 = scmp.lt.s32.totalorder %s363_s21, %s363_s21 }
  0x17   :  { %v89_v5 = vmax.f32 %v56_v3, %v73_v2  ;;  %v139_v9 = vld [vmem:[#allocation2 + $0x200] sm:$0xff]  ;;  %v90_v14 = vmax.f32 %v57_v10, %v74_v8  ;;  %v140_v19 = vld [vmem:[#allocation2 + $0x208] sm:$0xff]  ;;  %v108_v24 = vld [vmem:[#allocation2 + $0x190] sm:$0xff] }
  0x18   :  { %v172_v12 = vld [vmem:[#allocation2 + $0x280] sm:$0xff]  ;;  %v173_v23 = vld [vmem:[#allocation2 + $0x288] sm:$0xff]  ;;  %v91_v26 = vmax.f32 %v58_v20, %v75_v17  ;;  %v26_v27 = vld [vmem:[#allocation2 + $0x18] sm:$0xff]  ;;  %p370_p11 = por %p369_p10, %p368_p9 }
  0x19   :  { %v122_v11 = vmax.f32 %v89_v5, %v106_v4  ;;  %v205_v21 = vld [vmem:[#allocation2 + $0x300] sm:$0xff]  ;;  %v123_v22 = vmax.f32 %v90_v14, %v107_v13  ;;  %v43_v28 = vld [vmem:[#allocation2 + $0x98] sm:$0xff]  ;;  %v141_v33 = vld [vmem:[#allocation2 + $0x210] sm:$0xff] }
  0x1a   :  { %v76_v29 = vld [vmem:[#allocation2 + $0x118] sm:$0xff]  ;;  %v238_v30 = vld [vmem:[#allocation2 + $0x380] sm:$0xff]  ;;  %v59_v34 = vmax.f32 %v26_v27, %v43_v28  ;;  %v206_v36 = vld [vmem:[#allocation2 + $0x308] sm:$0xff]  ;;  %v124_v37 = vmax.f32 %v91_v26, %v108_v24  ;;  %p371_p12 = pnand %p370_p11, %p364_p8 }
  0x1b   :  { %v155_v18 = vmax.f32 %v122_v11, %v139_v9  ;;  %v271_v31 = vld [vmem:[#allocation2 + $0x400] sm:$0xff]  ;;  %v156_v32 = vmax.f32 %v123_v22, %v140_v19  ;;  %v174_v38 = vld [vmem:[#allocation2 + $0x290] sm:$0xff]  ;;  %v109_v39 = vld [vmem:[#allocation2 + $0x198] sm:$0xff] }
  0x1c   :  { %v92_v41 = vmax.f32 %v59_v34, %v76_v29  ;;  %v27_v42 = vld [vmem:[#allocation2 + $0x20] sm:$0xff]  ;;  %v239_v46 = vld [vmem:[#allocation2 + $0x388] sm:$0xff]  ;;  %v157_v48 = vmax.f32 %v124_v37, %v141_v33  ;;  %v142_v49 = vld [vmem:[#allocation2 + $0x218] sm:$0xff] }
  0x1d   :  { %v188_v25 = vmax.f32 %v155_v18, %v172_v12  ;;  %v189_v40 = vmax.f32 %v156_v32, %v173_v23  ;;  %v44_v43 = vld [vmem:[#allocation2 + $0xa0] sm:$0xff]  ;;  %v272_v47 = vld [vmem:[#allocation2 + $0x408] sm:$0xff]  ;;  %v207_v52 = vld [vmem:[#allocation2 + $0x310] sm:$0xff] }
  0x1e   :  { %v77_v44 = vld [vmem:[#allocation2 + $0x120] sm:$0xff]  ;;  %v60_v50 = vmax.f32 %v27_v42, %v44_v43  ;;  %v125_v53 = vmax.f32 %v92_v41, %v109_v39  ;;  %v175_v54 = vld [vmem:[#allocation2 + $0x298] sm:$0xff]  ;;  %v190_v57 = vmax.f32 %v157_v48, %v174_v38  ;;  %v28_v59 = vld [vmem:[#allocation2 + $0x28] sm:$0xff] }
  0x1f   :  { %v221_v35 = vmax.f32 %v188_v25, %v205_v21  ;;  %v222_v51 = vmax.f32 %v189_v40, %v206_v36  ;;  %v110_v55 = vld [vmem:[#allocation2 + $0x1a0] sm:$0xff]  ;;  %v45_v60 = vld [vmem:[#allocation2 + $0xa8] sm:$0xff]  ;;  %v240_v63 = vld [vmem:[#allocation2 + $0x390] sm:$0xff] }
  0x20   :  { %v93_v58 = vmax.f32 %v60_v50, %v77_v44  ;;  %v78_v61 = vld [vmem:[#allocation2 + $0x128] sm:$0xff]  ;;  %v273_v0 = vld [vmem:[#allocation2 + $0x410] sm:$0xff]  ;;  %v158_v1 = vmax.f32 %v125_v53, %v142_v49  ;;  %v143_v2 = vld [vmem:[#allocation2 + $0x220] sm:$0xff]  ;;  %v61_v3 = vmax.f32 %v28_v59, %v45_v60  ;;  %v223_v4 = vmax.f32 %v190_v57, %v207_v52 }
  0x21   :  { %v254_v45 = vmax.f32 %v221_v35, %v238_v30  ;;  %v255_v62 = vmax.f32 %v222_v51, %v239_v46  ;;  %v208_v5 = vld [vmem:[#allocation2 + $0x318] sm:$0xff]  ;;  %v176_v7 = vld [vmem:[#allocation2 + $0x2a0] sm:$0xff]  ;;  %v111_v8 = vld [vmem:[#allocation2 + $0x1a8] sm:$0xff] }
  0x22   :  { %v126_v6 = vmax.f32 %v93_v58, %v110_v55  ;;  %v191_v10 = vmax.f32 %v158_v1, %v175_v54  ;;  %v94_v11 = vmax.f32 %v61_v3, %v78_v61  ;;  %v29_v12 = vld [vmem:[#allocation2 + $0x30] sm:$0xff]  ;;  %v256_v15 = vmax.f32 %v223_v4, %v240_v63  ;;  %v241_v16 = vld [vmem:[#allocation2 + $0x398] sm:$0xff]  ;;  %v144_v19 = vld [vmem:[#allocation2 + $0x228] sm:$0xff] }
  0x23   :  { %v287_v56 = vmax.f32 %v254_v45, %v271_v31  ;;  %v288_v9 = vmax.f32 %v255_v62, %v272_v47  ;;  %v46_v13 = vld [vmem:[#allocation2 + $0xb0] sm:$0xff]  ;;  %v274_v17 = vld [vmem:[#allocation2 + $0x418] sm:$0xff]  ;;  %v209_v22 = vld [vmem:[#allocation2 + $0x320] sm:$0xff] }
  0x24   :  { %v79_v14 = vld [vmem:[#allocation2 + $0x130] sm:$0xff]  ;;  %v159_v18 = vmax.f32 %v126_v6, %v143_v2  ;;  %v62_v20 = vmax.f32 %v29_v12, %v46_v13  ;;  %v224_v21 = vmax.f32 %v191_v10, %v208_v5  ;;  %v127_v23 = vmax.f32 %v94_v11, %v111_v8  ;;  %v177_v24 = vld [vmem:[#allocation2 + $0x2a8] sm:$0xff]  ;;  %v30_v29 = vld [vmem:[#allocation2 + $0x38] sm:$0xff] }
  0x25   :  { %304 = vst.msk [vmem:[#allocation5] sm:$0xff] %vm303_vm0, %v287_v56  ;;  %305 = vst.msk [vmem:[#allocation5 + $0x8] sm:$0xff] %vm303_vm0, %v288_v9  ;;  %v112_v25 = vld [vmem:[#allocation2 + $0x1b0] sm:$0xff]  ;;  %v289_v26 = vmax.f32 %v256_v15, %v273_v0  ;;  %v47_v30 = vld [vmem:[#allocation2 + $0xb8] sm:$0xff] }
  0x26   :  { %v192_v27 = vmax.f32 %v159_v18, %v176_v7  ;;  %v95_v28 = vmax.f32 %v62_v20, %v79_v14  ;;  %v80_v31 = vld [vmem:[#allocation2 + $0x138] sm:$0xff]  ;;  %v257_v32 = vmax.f32 %v224_v21, %v241_v16  ;;  %v242_v33 = vld [vmem:[#allocation2 + $0x3a0] sm:$0xff]  ;;  %v160_v35 = vmax.f32 %v127_v23, %v144_v19  ;;  %v145_v36 = vld [vmem:[#allocation2 + $0x230] sm:$0xff] }
  0x27   :  { %v275_v34 = vld [vmem:[#allocation2 + $0x420] sm:$0xff]  ;;  %v63_v37 = vmax.f32 %v30_v29, %v47_v30  ;;  %306 = vst.msk [vmem:[#allocation5 + $0x10] sm:$0xff] %vm303_vm0, %v289_v26  ;;  %v210_v39 = vld [vmem:[#allocation2 + $0x328] sm:$0xff]  ;;  %v178_v41 = vld [vmem:[#allocation2 + $0x2b0] sm:$0xff] }
  0x28   :  { %v225_v38 = vmax.f32 %v192_v27, %v209_v22  ;;  %v128_v40 = vmax.f32 %v95_v28, %v112_v25  ;;  %v113_v42 = vld [vmem:[#allocation2 + $0x1b8] sm:$0xff]  ;;  %v290_v43 = vmax.f32 %v257_v32, %v274_v17  ;;  %v193_v44 = vmax.f32 %v160_v35, %v177_v24  ;;  %v31_v46 = vld [vmem:[#allocation2 + $0x40] sm:$0xff]  ;;  %v243_v50 = vld [vmem:[#allocation2 + $0x3a8] sm:$0xff] }
  0x29   :  { %v96_v45 = vmax.f32 %v63_v37, %v80_v31  ;;  %v48_v47 = vld [vmem:[#allocation2 + $0xc0] sm:$0xff]  ;;  %v276_v51 = vld [vmem:[#allocation2 + $0x428] sm:$0xff]  ;;  %v146_v53 = vld [vmem:[#allocation2 + $0x238] sm:$0xff] }
  0x2a   :  { %v81_v48 = vld [vmem:[#allocation2 + $0x140] sm:$0xff]  ;;  %v258_v49 = vmax.f32 %v225_v38, %v242_v33  ;;  %v161_v52 = vmax.f32 %v128_v40, %v145_v36  ;;  %v64_v54 = vmax.f32 %v31_v46, %v48_v47  ;;  %307 = vst.msk [vmem:[#allocation5 + $0x18] sm:$0xff] %vm303_vm0, %v290_v43  ;;  %v226_v55 = vmax.f32 %v193_v44, %v210_v39  ;;  %v211_v56 = vld [vmem:[#allocation2 + $0x330] sm:$0xff]  ;;  %v179_v58 = vld [vmem:[#allocation2 + $0x2b8] sm:$0xff] }
  0x2b   :  { %v129_v57 = vmax.f32 %v96_v45, %v113_v42  ;;  %v114_v59 = vld [vmem:[#allocation2 + $0x1c0] sm:$0xff]  ;;  %v32_v63 = vld [vmem:[#allocation2 + $0x48] sm:$0xff]  ;;  %v244_v3 = vld [vmem:[#allocation2 + $0x3b0] sm:$0xff] }
  0x2c   :  { %v291_v60 = vmax.f32 %v258_v49, %v275_v34  ;;  %v194_v61 = vmax.f32 %v161_v52, %v178_v41  ;;  %v97_v62 = vmax.f32 %v64_v54, %v81_v48  ;;  %v49_v0 = vld [vmem:[#allocation2 + $0xc8] sm:$0xff]  ;;  %v259_v2 = vmax.f32 %v226_v55, %v243_v50  ;;  %v277_v4 = vld [vmem:[#allocation2 + $0x430] sm:$0xff]  ;;  %v147_v6 = vld [vmem:[#allocation2 + $0x240] sm:$0xff] }
  0x2d   :  { %v82_v1 = vld [vmem:[#allocation2 + $0x148] sm:$0xff]  ;;  %v162_v5 = vmax.f32 %v129_v57, %v146_v53  ;;  %v65_v7 = vmax.f32 %v32_v63, %v49_v0  ;;  %v212_v9 = vld [vmem:[#allocation2 + $0x338] sm:$0xff]  ;;  %v180_v11 = vld [vmem:[#allocation2 + $0x2c0] sm:$0xff] }
  0x2e   :  { %308 = vst.msk [vmem:[#allocation5 + $0x20] sm:$0xff] %vm303_vm0, %v291_v60  ;;  %v227_v8 = vmax.f32 %v194_v61, %v211_v56  ;;  %v130_v10 = vmax.f32 %v97_v62, %v114_v59  ;;  %v115_v12 = vld [vmem:[#allocation2 + $0x1c8] sm:$0xff]  ;;  %v292_v13 = vmax.f32 %v259_v2, %v276_v51  ;;  %v33_v16 = vld [vmem:[#allocation2 + $0x50] sm:$0xff]  ;;  %v245_v20 = vld [vmem:[#allocation2 + $0x3b8] sm:$0xff] }
  0x2f   :  { %v195_v14 = vmax.f32 %v162_v5, %v179_v58  ;;  %v98_v15 = vmax.f32 %v65_v7, %v82_v1  ;;  %v50_v17 = vld [vmem:[#allocation2 + $0xd0] sm:$0xff]  ;;  %v278_v21 = vld [vmem:[#allocation2 + $0x438] sm:$0xff]  ;;  %v148_v23 = vld [vmem:[#allocation2 + $0x248] sm:$0xff] }
  0x30   :  { %v83_v18 = vld [vmem:[#allocation2 + $0x150] sm:$0xff]  ;;  %v260_v19 = vmax.f32 %v227_v8, %v244_v3  ;;  %v163_v22 = vmax.f32 %v130_v10, %v147_v6  ;;  %v66_v24 = vmax.f32 %v33_v16, %v50_v17  ;;  %309 = vst.msk [vmem:[#allocation5 + $0x28] sm:$0xff] %vm303_vm0, %v292_v13  ;;  %v213_v26 = vld [vmem:[#allocation2 + $0x340] sm:$0xff]  ;;  %v181_v28 = vld [vmem:[#allocation2 + $0x2c8] sm:$0xff] }
  0x31   :  { %v228_v25 = vmax.f32 %v195_v14, %v212_v9  ;;  %v131_v27 = vmax.f32 %v98_v15, %v115_v12  ;;  %v116_v29 = vld [vmem:[#allocation2 + $0x1d0] sm:$0xff]  ;;  %v34_v33 = vld [vmem:[#allocation2 + $0x58] sm:$0xff]  ;;  %v246_v37 = vld [vmem:[#allocation2 + $0x3c0] sm:$0xff] }
  0x32   :  { %v293_v30 = vmax.f32 %v260_v19, %v277_v4  ;;  %v196_v31 = vmax.f32 %v163_v22, %v180_v11  ;;  %v99_v32 = vmax.f32 %v66_v24, %v83_v18  ;;  %v51_v34 = vld [vmem:[#allocation2 + $0xd8] sm:$0xff]  ;;  %v279_v38 = vld [vmem:[#allocation2 + $0x440] sm:$0xff]  ;;  %v149_v40 = vld [vmem:[#allocation2 + $0x250] sm:$0xff] }
  0x33   :  { %v84_v35 = vld [vmem:[#allocation2 + $0x158] sm:$0xff]  ;;  %v261_v36 = vmax.f32 %v228_v25, %v245_v20  ;;  %v164_v39 = vmax.f32 %v131_v27, %v148_v23  ;;  %v67_v41 = vmax.f32 %v34_v33, %v51_v34  ;;  %v214_v43 = vld [vmem:[#allocation2 + $0x348] sm:$0xff]  ;;  %v182_v45 = vld [vmem:[#allocation2 + $0x2d0] sm:$0xff] }
  0x34   :  { %310 = vst.msk [vmem:[#allocation5 + $0x30] sm:$0xff] %vm303_vm0, %v293_v30  ;;  %v229_v42 = vmax.f32 %v196_v31, %v213_v26  ;;  %v132_v44 = vmax.f32 %v99_v32, %v116_v29  ;;  %v117_v46 = vld [vmem:[#allocation2 + $0x1d8] sm:$0xff]  ;;  %v35_v50 = vld [vmem:[#allocation2 + $0x60] sm:$0xff]  ;;  %v247_v54 = vld [vmem:[#allocation2 + $0x3c8] sm:$0xff] }
  0x35   :  { %v294_v47 = vmax.f32 %v261_v36, %v278_v21  ;;  %v197_v48 = vmax.f32 %v164_v39, %v181_v28  ;;  %v100_v49 = vmax.f32 %v67_v41, %v84_v35  ;;  %v52_v51 = vld [vmem:[#allocation2 + $0xe0] sm:$0xff]  ;;  %v280_v55 = vld [vmem:[#allocation2 + $0x448] sm:$0xff]  ;;  %v150_v57 = vld [vmem:[#allocation2 + $0x258] sm:$0xff] }
  0x36   :  { %v85_v52 = vld [vmem:[#allocation2 + $0x160] sm:$0xff]  ;;  %v262_v53 = vmax.f32 %v229_v42, %v246_v37  ;;  %v165_v56 = vmax.f32 %v132_v44, %v149_v40  ;;  %v68_v58 = vmax.f32 %v35_v50, %v52_v51  ;;  %v215_v60 = vld [vmem:[#allocation2 + $0x350] sm:$0xff]  ;;  %v183_v62 = vld [vmem:[#allocation2 + $0x2d8] sm:$0xff] }
  0x37   :  { %311 = vst.msk [vmem:[#allocation5 + $0x38] sm:$0xff] %vm303_vm0, %v294_v47  ;;  %v230_v59 = vmax.f32 %v197_v48, %v214_v43  ;;  %v133_v61 = vmax.f32 %v100_v49, %v117_v46  ;;  %v118_v63 = vld [vmem:[#allocation2 + $0x1e0] sm:$0xff]  ;;  %v36_v3 = vld [vmem:[#allocation2 + $0x68] sm:$0xff]  ;;  %v248_v7 = vld [vmem:[#allocation2 + $0x3d0] sm:$0xff] }
  0x38   :  { %v295_v0 = vmax.f32 %v262_v53, %v279_v38  ;;  %v198_v1 = vmax.f32 %v165_v56, %v182_v45  ;;  %v101_v2 = vmax.f32 %v68_v58, %v85_v52  ;;  %v53_v4 = vld [vmem:[#allocation2 + $0xe8] sm:$0xff]  ;;  %v281_v8 = vld [vmem:[#allocation2 + $0x450] sm:$0xff]  ;;  %v151_v10 = vld [vmem:[#allocation2 + $0x260] sm:$0xff] }
  0x39   :  { %v86_v5 = vld [vmem:[#allocation2 + $0x168] sm:$0xff]  ;;  %v263_v6 = vmax.f32 %v230_v59, %v247_v54  ;;  %v166_v9 = vmax.f32 %v133_v61, %v150_v57  ;;  %v69_v11 = vmax.f32 %v36_v3, %v53_v4  ;;  %v216_v13 = vld [vmem:[#allocation2 + $0x358] sm:$0xff]  ;;  %v184_v15 = vld [vmem:[#allocation2 + $0x2e0] sm:$0xff] }
  0x3a   :  { %312 = vst.msk [vmem:[#allocation5 + $0x40] sm:$0xff] %vm303_vm0, %v295_v0  ;;  %v231_v12 = vmax.f32 %v198_v1, %v215_v60  ;;  %v134_v14 = vmax.f32 %v101_v2, %v118_v63  ;;  %v119_v16 = vld [vmem:[#allocation2 + $0x1e8] sm:$0xff]  ;;  %v37_v20 = vld [vmem:[#allocation2 + $0x70] sm:$0xff]  ;;  %v249_v24 = vld [vmem:[#allocation2 + $0x3d8] sm:$0xff] }
  0x3b   :  { %v296_v17 = vmax.f32 %v263_v6, %v280_v55  ;;  %v199_v18 = vmax.f32 %v166_v9, %v183_v62  ;;  %v102_v19 = vmax.f32 %v69_v11, %v86_v5  ;;  %v54_v21 = vld [vmem:[#allocation2 + $0xf0] sm:$0xff]  ;;  %v282_v25 = vld [vmem:[#allocation2 + $0x458] sm:$0xff]  ;;  %v152_v27 = vld [vmem:[#allocation2 + $0x268] sm:$0xff] }
  0x3c   :  { %v87_v22 = vld [vmem:[#allocation2 + $0x170] sm:$0xff]  ;;  %v264_v23 = vmax.f32 %v231_v12, %v248_v7  ;;  %v167_v26 = vmax.f32 %v134_v14, %v151_v10  ;;  %v70_v28 = vmax.f32 %v37_v20, %v54_v21  ;;  %v217_v30 = vld [vmem:[#allocation2 + $0x360] sm:$0xff]  ;;  %v185_v32 = vld [vmem:[#allocation2 + $0x2e8] sm:$0xff] }
  0x3d   :  { %313 = vst.msk [vmem:[#allocation5 + $0x48] sm:$0xff] %vm303_vm0, %v296_v17  ;;  %v232_v29 = vmax.f32 %v199_v18, %v216_v13  ;;  %v135_v31 = vmax.f32 %v102_v19, %v119_v16  ;;  %v120_v33 = vld [vmem:[#allocation2 + $0x1f0] sm:$0xff]  ;;  %v38_v37 = vld [vmem:[#allocation2 + $0x78] sm:$0xff]  ;;  %v250_v41 = vld [vmem:[#allocation2 + $0x3e0] sm:$0xff] }
  0x3e   :  { %v297_v34 = vmax.f32 %v264_v23, %v281_v8  ;;  %v200_v35 = vmax.f32 %v167_v26, %v184_v15  ;;  %v103_v36 = vmax.f32 %v70_v28, %v87_v22  ;;  %v55_v38 = vld [vmem:[#allocation2 + $0xf8] sm:$0xff]  ;;  %v153_v43 = vld [vmem:[#allocation2 + $0x270] sm:$0xff]  ;;  %v218_v46 = vld [vmem:[#allocation2 + $0x368] sm:$0xff] }
  0x3f   :  { %v88_v39 = vld [vmem:[#allocation2 + $0x178] sm:$0xff]  ;;  %v265_v40 = vmax.f32 %v232_v29, %v249_v24  ;;  %v168_v42 = vmax.f32 %v135_v31, %v152_v27  ;;  %v71_v44 = vmax.f32 %v38_v37, %v55_v38  ;;  %v283_v50 = vld [vmem:[#allocation2 + $0x460] sm:$0xff]  ;;  %v186_v52 = vld [vmem:[#allocation2 + $0x2f0] sm:$0xff] }
  0x40   :  { %314 = vst.msk [vmem:[#allocation5 + $0x50] sm:$0xff] %vm303_vm0, %v297_v34  ;;  %v233_v45 = vmax.f32 %v200_v35, %v217_v30  ;;  %v136_v47 = vmax.f32 %v103_v36, %v120_v33  ;;  %v121_v48 = vld [vmem:[#allocation2 + $0x1f8] sm:$0xff]  ;;  %v251_v55 = vld [vmem:[#allocation2 + $0x3e8] sm:$0xff]  ;;  %v219_v59 = vld [vmem:[#allocation2 + $0x370] sm:$0xff] }
  0x41   :  { %v298_v49 = vmax.f32 %v265_v40, %v282_v25  ;;  %v201_v51 = vmax.f32 %v168_v42, %v185_v32  ;;  %v104_v53 = vmax.f32 %v71_v44, %v88_v39  ;;  %v154_v57 = vld [vmem:[#allocation2 + $0x278] sm:$0xff]  ;;  %v284_v62 = vld [vmem:[#allocation2 + $0x468] sm:$0xff]  ;;  %v252_v2 = vld [vmem:[#allocation2 + $0x3f0] sm:$0xff] }
  0x42   :  { %v266_v54 = vmax.f32 %v233_v45, %v250_v41  ;;  %v169_v56 = vmax.f32 %v136_v47, %v153_v43  ;;  %v187_v0 = vld [vmem:[#allocation2 + $0x2f8] sm:$0xff]  ;;  %v285_v7 = vld [vmem:[#allocation2 + $0x470] sm:$0xff] }
  0x43   :  { %315 = vst.msk [vmem:[#allocation5 + $0x58] sm:$0xff] %vm303_vm0, %v298_v49  ;;  %v234_v58 = vmax.f32 %v201_v51, %v218_v46  ;;  %v137_v60 = vmax.f32 %v104_v53, %v121_v48  ;;  %v220_v5 = vld [vmem:[#allocation2 + $0x378] sm:$0xff] }
  0x44   :  { %v299_v61 = vmax.f32 %v266_v54, %v283_v50  ;;  %v202_v63 = vmax.f32 %v169_v56, %v186_v52  ;;  %v253_v10 = vld [vmem:[#allocation2 + $0x3f8] sm:$0xff] }
  0x45   :  { %v267_v1 = vmax.f32 %v234_v58, %v251_v55  ;;  %v170_v3 = vmax.f32 %v137_v60, %v154_v57  ;;  %v286_v13 = vld [vmem:[#allocation2 + $0x478] sm:$0xff] }
  0x46   :  { %316 = vst.msk [vmem:[#allocation5 + $0x60] sm:$0xff] %vm303_vm0, %v299_v61  ;;  %v235_v4 = vmax.f32 %v202_v63, %v219_v59 }
  0x47   :  { %v300_v6 = vmax.f32 %v267_v1, %v284_v62  ;;  %v203_v8 = vmax.f32 %v170_v3, %v187_v0 }
  0x48   :  { %v268_v9 = vmax.f32 %v235_v4, %v252_v2 }
  0x49   :  { %317 = vst.msk [vmem:[#allocation5 + $0x68] sm:$0xff] %vm303_vm0, %v300_v6  ;;  %v236_v11 = vmax.f32 %v203_v8, %v220_v5 }
  0x4a   :  { %v301_v12 = vmax.f32 %v268_v9, %v285_v7 }
  0x4b   :  { %v269_v14 = vmax.f32 %v236_v11, %v253_v10 }
  0x4c   :  { %318 = vst.msk [vmem:[#allocation5 + $0x70] sm:$0xff] %vm303_vm0, %v301_v12 }
  0x4d   :  { %v302_v15 = vmax.f32 %v269_v14, %v286_v13 }
  0x4f   :  { %319 = vst.msk [vmem:[#allocation5 + $0x78] sm:$0xff] %vm303_vm0, %v302_v15 }
  0x50   :  { %374 = shalt.err (!%p371_p12)
}
  0x51   :  { %s375_s24 = scalar_lea.hbm %s450_s1, 2048 }
  0x52   :  { %p376_p13 = scmp.ne.s32.totalorder %s450_s1, %s375_s24  ;;  %p379_p0 = scmp.lt.u32.totalorder %s375_s24, %s450_s1 }
  0x54   :  { %p381_p1 = pnand %p379_p0, %p376_p13 }
  0x56   :  { %384 = shalt.err (!%p381_p1)
}
  0x57   :  { %331 = dma.vmem_to_hbm [thread:$0]  %s326_s20, 2048, %s450_s1, [#allocation4], %s390_s16, %s390_s16, %s391_s17  }
  0x58   :  { %387 = dma.done.wait [#allocation4], 2048  }
  0x59   :  { %388 = vsyncadd [#allocation4], 4294965248 }
  0x5a   :  { %335 = vsyncpa [#allocation3], 1 }
  0x5b   :  { %336 = vsyncpa [#allocation4], 1 }

// kernel: e2e_cnn_forward.22
= control target key start
LH: loop header
LB: loop body
LE: loop exit
PB: predicated region body
PF: predicated region fallthrough
CT: control target
= control target key end

     0   :  { %8 = vsyncpa [#allocation3], 0  ;;  %s1910_s0 = inlined_call_operand.hbm [shape: bf16[512,256], index: 0, kind: input, shape index: {}]   ;;  %s1911_s1 = inlined_call_operand.hbm [shape: bf16[256,128], index: 1, kind: input, shape index: {}]   ;;  %s1912_s2 = inlined_call_operand.hbm [shape: f32[1,128], index: 2, kind: input, shape index: {}]   ;;  %s1913_s3 = inlined_call_operand.hbm [shape: f32[512,128], index: 3, kind: output, shape index: {}]  }
   0x1   :  { %9 = vsyncpa [#allocation6], 0 }
   0x2   :  { %10 = vsyncpa [#allocation4], 0  ;;  %s1729_s12 = smov [#allocation5]   ;;  %s1635_s16 = scalar_lea.hbm %s1911_s1, 2048 }
   0x3   :  { %s28_s13 = sshll.u32 %s1729_s12, 4  ;;  %p1636_p0 = scmp.ne.s32.totalorder %s1911_s1, %s1635_s16  ;;  %s29_s13 = int_to_ptr.vmem [resolvable:$true] %s28_s13 }
   0x4   :  { %p1639_p1 = scmp.lt.u32.totalorder %s1635_s16, %s1911_s1 }
   0x6   :  { %p1641_p2 = pnand %p1639_p1, %p1636_p0 }
   0x8   :  { %1644 = shalt.err (!%p1641_p2)
}
   0x9   :  { %s1645_s21 = scalar_lea.vmem %s29_s13, 2048  ;;  %p1650_p4 = scmp.lt.s32.totalorder %s29_s13, %s29_s13 }
   0xa   :  { %p1646_p3 = scmp.ne.s32.totalorder %s29_s13, %s1645_s21  ;;  %p1651_p5 = scmp.lt.s32.totalorder %s1645_s21, %s1645_s21 }
   0xc   :  { %p1652_p6 = por %p1651_p5, %p1650_p4 }
   0xe   :  { %p1653_p7 = pnand %p1652_p6, %p1646_p3 }
  0x10   :  { %1656 = shalt.err (!%p1653_p7)
}
  0x11   :  { %s1730_s22 = smov 64   ;;  %s1731_s23 = smov 4  }
  0x12   :  { %34 = dma.hbm_to_vmem [thread:$0]  %s1911_s1, 2048, %s29_s13, [#allocation6], %s1730_s22, %s1730_s22, %s1731_s23  }
  0x13   :  { %s1732_s26 = smov [#allocation2]   ;;  %s1657_s30 = scalar_lea.hbm %s1910_s0, 8192 }
  0x14   :  { %s16_s27 = sshll.u32 %s1732_s26, 4  ;;  %p1658_p8 = scmp.ne.s32.totalorder %s1910_s0, %s1657_s30  ;;  %s17_s27 = int_to_ptr.vmem [resolvable:$true] %s16_s27 }
  0x15   :  { %p1661_p9 = scmp.lt.u32.totalorder %s1657_s30, %s1910_s0 }
  0x17   :  { %p1663_p10 = pnand %p1661_p9, %p1658_p8 }
  0x19   :  { %1666 = shalt.err (!%p1663_p10)
}
  0x1a   :  { %s1667_s8 = scalar_lea.vmem %s17_s27, 8192  ;;  %p1672_p12 = scmp.lt.s32.totalorder %s17_s27, %s17_s27 }
  0x1b   :  { %p1668_p11 = scmp.ne.s32.totalorder %s17_s27, %s1667_s8  ;;  %p1673_p13 = scmp.lt.s32.totalorder %s1667_s8, %s1667_s8 }
  0x1d   :  { %p1674_p0 = por %p1673_p13, %p1672_p12 }
  0x1f   :  { %p1675_p1 = pnand %p1674_p0, %p1668_p11 }
  0x21   :  { %1678 = shalt.err (!%p1675_p1)
}
  0x22   :  { %s1733_s1 = smov 128   ;;  %s1734_s9 = smov 8  }
  0x23   :  { %22 = dma.hbm_to_vmem [thread:$0]  %s1910_s0, 8192, %s17_s27, [#allocation3], %s1733_s1, %s1733_s1, %s1734_s9  }
  0x24   :  { %s1735_s12 = smov [#allocation7]   ;;  %s1679_s16 = scalar_lea.hbm %s1912_s2, 16 }
  0x25   :  { %s41_s13 = sshll.u32 %s1735_s12, 4  ;;  %p1680_p2 = scmp.ne.s32.totalorder %s1912_s2, %s1679_s16  ;;  %s42_s13 = int_to_ptr.vmem [resolvable:$true] %s41_s13 }
  0x26   :  { %p1683_p3 = scmp.lt.u32.totalorder %s1679_s16, %s1912_s2 }
  0x28   :  { %p1685_p4 = pnand %p1683_p3, %p1680_p2 }
  0x2a   :  { %1688 = shalt.err (!%p1685_p4)
}
  0x2b   :  { %s1689_s21 = scalar_lea.vmem %s42_s13, 16  ;;  %s1693_s0 = scalar_lea.vmem %s42_s13, 32 }
  0x2c   :  { %p1690_p5 = scmp.ne.s32.totalorder %s42_s13, %s1689_s21  ;;  %p1694_p6 = scmp.lt.s32.totalorder %s42_s13, %s42_s13 }
  0x2d   :  { %p1695_p7 = scmp.lt.s32.totalorder %s1693_s0, %s1689_s21 }
  0x2f   :  { %p1696_p8 = por %p1695_p7, %p1694_p6 }
  0x31   :  { %p1697_p9 = pnand %p1696_p8, %p1690_p5 }
  0x33   :  { %1700 = shalt.err (!%p1697_p9)
}
  0x34   :  { %44 = dma.hbm_to_vmem [thread:$0]  %s1912_s2, 16, %s42_s13, [#allocation6]  }
  0x35   :  { %1723 = dma.done.wait [#allocation3], 8192  }
  0x36   :  { %1724 = vsyncadd [#allocation3], 4294959104 }
  0x37   :  { %1725 = dma.done.wait [#allocation6], 2064  }
  0x38   :  { %1726 = vsyncadd [#allocation6], 4294965232  ;;  %v1736_v0 = vmov 0   ;;  %v1523_v1 = vld [vmem:[#allocation5] sm:$0xff]   ;;  %v1524_v2 = vld [vmem:[#allocation5 + $0x8] sm:$0xff]   ;;  %s1737_s2 = smov [#allocation8]  }
  0x39   :  { %699 = vmatprep.subr.bf16.mxu0 %v1736_v0  ;;  %1481 = vmatprep.subr.bf16.mxu1 %v1736_v0  ;;  %v1525_v3 = vld [vmem:[#allocation5 + $0x10] sm:$0xff]   ;;  %v1526_v4 = vld [vmem:[#allocation5 + $0x18] sm:$0xff]   ;;  %v1527_v5 = vld [vmem:[#allocation5 + $0x20] sm:$0xff]   ;;  %s1387_s24 = sshll.u32 %s1737_s2, 4  ;;  %s1388_s24 = int_to_ptr.vmem [resolvable:$true] %s1387_s24 }
  0x3a   :  { %700 = vmatpush1.bf16.msra.mxu0 %v1523_v1  ;;  %1497 = vmatpush1.bf16.msra.mxu1 %v1523_v1  ;;  %v1541_v6 = vld [vmem:[#allocation2 + $0x4] ss:$8 sps:$4 sm:$0xff]   ;;  %v1529_v9 = vld [vmem:[#allocation5 + $0x30] sm:$0xff]   ;;  %v1530_v10 = vld [vmem:[#allocation5 + $0x38] sm:$0xff]   ;;  %s1701_s25 = scalar_lea.vmem %s1388_s24, 8192  ;;  %p1706_p11 = scmp.lt.s32.totalorder %s1388_s24, %s1388_s24 }
  0x3b   :  { %701 = vmatprep.subr.bf16.mxu0 %v1736_v0  ;;  %1482 = vmatprep.subr.bf16.mxu1 %v1736_v0  ;;  %v1528_v7 = vld [vmem:[#allocation5 + $0x28] sm:$0xff]   ;;  %v1531_v11 = vld [vmem:[#allocation5 + $0x40] sm:$0xff]   ;;  %v1533_v13 = vld [vmem:[#allocation5 + $0x50] sm:$0xff]   ;;  %p1702_p10 = scmp.ne.s32.totalorder %s1388_s24, %s1701_s25  ;;  %p1707_p12 = scmp.lt.s32.totalorder %s1701_s25, %s1701_s25 }
  0x3c   :  { %v1544_v8 = vld [vmem:[#allocation2 + $0x104] ss:$8 sps:$4 sm:$0xff]   ;;  %731 = vmatprep.mubr.bf16.mxu0 %v1541_v6  ;;  %v1534_v14 = vld [vmem:[#allocation5 + $0x58] sm:$0xff]   ;;  %v1537_v17 = vld [vmem:[#allocation5 + $0x70] sm:$0xff]  }
  0x3d   :  { %859 = vmatprep.mubr.bf16.mxu1 %v1544_v8  ;;  %v1532_v12 = vld [vmem:[#allocation5 + $0x48] sm:$0xff]   ;;  %v1535_v15 = vld [vmem:[#allocation5 + $0x60] sm:$0xff]   ;;  %v1538_v18 = vld [vmem:[#allocation5 + $0x78] sm:$0xff]   ;;  %p1708_p13 = por %p1707_p12, %p1706_p11 }
  0x3e   :  { %702 = vmatpush1.bf16.msra.mxu0 %v1524_v2  ;;  %1498 = vmatpush1.bf16.msra.mxu1 %v1524_v2  ;;  %v1536_v16 = vld [vmem:[#allocation5 + $0x68] sm:$0xff]   ;;  %v1545_v21 = vld [vmem:[#allocation2 + $0x14] ss:$8 sps:$4 sm:$0xff]   ;;  %v1549_v23 = vld [vmem:[#allocation2 + $0x10] ss:$8 sps:$4 sm:$0xff]  }
  0x3f   :  { %703 = vmatprep.subr.bf16.mxu0 %v1736_v0  ;;  %1483 = vmatprep.subr.bf16.mxu1 %v1736_v0  ;;  %v1539_v19 = vld [vmem:[#allocation2] ss:$8 sps:$4 sm:$0xff]   ;;  %v1547_v22 = vld [vmem:[#allocation2 + $0x114] ss:$8 sps:$4 sm:$0xff]   ;;  %v1550_v24 = vld [vmem:[#allocation2 + $0x110] ss:$8 sps:$4 sm:$0xff]   ;;  %p1709_p0 = pnand %p1708_p13, %p1702_p10 }
  0x40   :  { %v1542_v20 = vld [vmem:[#allocation2 + $0x100] ss:$8 sps:$4 sm:$0xff]   ;;  %v1551_v25 = vld [vmem:[#allocation2 + $0x24] ss:$8 sps:$4 sm:$0xff]   ;;  %v1557_v29 = vld [vmem:[#allocation2 + $0x34] ss:$8 sps:$4 sm:$0xff]  }
  0x41   :  { %v1553_v26 = vld [vmem:[#allocation2 + $0x124] ss:$8 sps:$4 sm:$0xff]   ;;  %v1555_v27 = vld [vmem:[#allocation2 + $0x20] ss:$8 sps:$4 sm:$0xff]   ;;  %v1559_v30 = vld [vmem:[#allocation2 + $0x134] ss:$8 sps:$4 sm:$0xff]  }
  0x42   :  { %704 = vmatpush1.bf16.msra.mxu0 %v1525_v3  ;;  %1499 = vmatpush1.bf16.msra.mxu1 %v1525_v3  ;;  %v1556_v28 = vld [vmem:[#allocation2 + $0x120] ss:$8 sps:$4 sm:$0xff]   ;;  %v1561_v31 = vld [vmem:[#allocation2 + $0x30] ss:$8 sps:$4 sm:$0xff]   ;;  %v1563_v33 = vld [vmem:[#allocation2 + $0x44] ss:$8 sps:$4 sm:$0xff]  }
  0x43   :  { %705 = vmatprep.subr.bf16.mxu0 %v1736_v0  ;;  %1484 = vmatprep.subr.bf16.mxu1 %v1736_v0  ;;  %v1562_v32 = vld [vmem:[#allocation2 + $0x130] ss:$8 sps:$4 sm:$0xff]   ;;  %v1565_v34 = vld [vmem:[#allocation2 + $0x144] ss:$8 sps:$4 sm:$0xff]   ;;  %v1567_v35 = vld [vmem:[#allocation2 + $0x40] ss:$8 sps:$4 sm:$0xff]  }
  0x44   :  { %v1568_v36 = vld [vmem:[#allocation2 + $0x140] ss:$8 sps:$4 sm:$0xff]   ;;  %v1569_v37 = vld [vmem:[#allocation2 + $0x54] ss:$8 sps:$4 sm:$0xff]   ;;  %v1573_v39 = vld [vmem:[#allocation2 + $0x50] ss:$8 sps:$4 sm:$0xff]  }
  0x45   :  { %v1571_v38 = vld [vmem:[#allocation2 + $0x154] ss:$8 sps:$4 sm:$0xff]   ;;  %v1574_v40 = vld [vmem:[#allocation2 + $0x150] ss:$8 sps:$4 sm:$0xff]   ;;  %v1575_v41 = vld [vmem:[#allocation2 + $0x64] ss:$8 sps:$4 sm:$0xff]  }
  0x46   :  { %706 = vmatpush1.bf16.msra.mxu0 %v1526_v4  ;;  %1500 = vmatpush1.bf16.msra.mxu1 %v1526_v4  ;;  %v1577_v42 = vld [vmem:[#allocation2 + $0x164] ss:$8 sps:$4 sm:$0xff]   ;;  %v1579_v43 = vld [vmem:[#allocation2 + $0x60] ss:$8 sps:$4 sm:$0xff]   ;;  %v1581_v45 = vld [vmem:[#allocation2 + $0x74] ss:$8 sps:$4 sm:$0xff]  }
  0x47   :  { %707 = vmatprep.subr.bf16.mxu0 %v1736_v0  ;;  %1485 = vmatprep.subr.bf16.mxu1 %v1736_v0  ;;  %v1580_v44 = vld [vmem:[#allocation2 + $0x160] ss:$8 sps:$4 sm:$0xff]   ;;  %v1583_v46 = vld [vmem:[#allocation2 + $0x174] ss:$8 sps:$4 sm:$0xff]   ;;  %v1585_v47 = vld [vmem:[#allocation2 + $0x70] ss:$8 sps:$4 sm:$0xff]  }
  0x48   :  { %v1586_v48 = vld [vmem:[#allocation2 + $0x170] ss:$8 sps:$4 sm:$0xff]   ;;  %v1587_v49 = vld [vmem:[#allocation2 + $0x84] ss:$8 sps:$4 sm:$0xff]   ;;  %v1591_v51 = vld [vmem:[#allocation2 + $0x80] ss:$8 sps:$4 sm:$0xff]  }
  0x49   :  { %v1589_v50 = vld [vmem:[#allocation2 + $0x184] ss:$8 sps:$4 sm:$0xff]   ;;  %v1592_v52 = vld [vmem:[#allocation2 + $0x180] ss:$8 sps:$4 sm:$0xff]   ;;  %v1593_v53 = vld [vmem:[#allocation2 + $0x94] ss:$8 sps:$4 sm:$0xff]  }
  0x4a   :  { %708 = vmatpush1.bf16.msra.mxu0 %v1527_v5  ;;  %1501 = vmatpush1.bf16.msra.mxu1 %v1527_v5  ;;  %v1595_v54 = vld [vmem:[#allocation2 + $0x194] ss:$8 sps:$4 sm:$0xff]   ;;  %v1597_v55 = vld [vmem:[#allocation2 + $0x90] ss:$8 sps:$4 sm:$0xff]   ;;  %v1599_v57 = vld [vmem:[#allocation2 + $0xa4] ss:$8 sps:$4 sm:$0xff]  }
  0x4b   :  { %709 = vmatprep.subr.bf16.mxu0 %v1736_v0  ;;  %1486 = vmatprep.subr.bf16.mxu1 %v1736_v0  ;;  %v1598_v56 = vld [vmem:[#allocation2 + $0x190] ss:$8 sps:$4 sm:$0xff]   ;;  %v1601_v58 = vld [vmem:[#allocation2 + $0x1a4] ss:$8 sps:$4 sm:$0xff]   ;;  %v1603_v59 = vld [vmem:[#allocation2 + $0xa0] ss:$8 sps:$4 sm:$0xff]  }
  0x4c   :  { %v1604_v60 = vld [vmem:[#allocation2 + $0x1a0] ss:$8 sps:$4 sm:$0xff]   ;;  %v1605_v61 = vld [vmem:[#allocation2 + $0xb4] ss:$8 sps:$4 sm:$0xff]   ;;  %v1609_v63 = vld [vmem:[#allocation2 + $0xb0] ss:$8 sps:$4 sm:$0xff]  }
  0x4d   :  { %v1607_v62 = vld [vmem:[#allocation2 + $0x1b4] ss:$8 sps:$4 sm:$0xff]   ;;  %v1611_v1 = vld [vmem:[#allocation2 + $0xc4] ss:$8 sps:$4 sm:$0xff]   ;;  %v1615_v3 = vld [vmem:[#allocation2 + $0xc0] ss:$8 sps:$4 sm:$0xff]  }
  0x4e   :  { %710 = vmatpush1.bf16.msra.mxu0 %v1528_v7  ;;  %1502 = vmatpush1.bf16.msra.mxu1 %v1528_v7  ;;  %v1613_v2 = vld [vmem:[#allocation2 + $0x1c4] ss:$8 sps:$4 sm:$0xff]   ;;  %v1616_v4 = vld [vmem:[#allocation2 + $0x1c0] ss:$8 sps:$4 sm:$0xff]   ;;  %v1617_v5 = vld [vmem:[#allocation2 + $0xd4] ss:$8 sps:$4 sm:$0xff]  }
  0x4f   :  { %711 = vmatprep.subr.bf16.mxu0 %v1736_v0  ;;  %1487 = vmatprep.subr.bf16.mxu1 %v1736_v0  ;;  %v1619_v6 = vld [vmem:[#allocation2 + $0x1d4] ss:$8 sps:$4 sm:$0xff]   ;;  %v1621_v7 = vld [vmem:[#allocation2 + $0xd0] ss:$8 sps:$4 sm:$0xff]  }
  0x50   :  { %v1622_v8 = vld [vmem:[#allocation2 + $0x1d0] ss:$8 sps:$4 sm:$0xff]  }
  0x52   :  { %712 = vmatpush1.bf16.msra.mxu0 %v1529_v9  ;;  %1503 = vmatpush1.bf16.msra.mxu1 %v1529_v9  ;;  %v1623_v9 = vld [vmem:[#allocation2 + $0xe4] ss:$8 sps:$4 sm:$0xff]  }
  0x53   :  { %713 = vmatprep.subr.bf16.mxu0 %v1736_v0  ;;  %1488 = vmatprep.subr.bf16.mxu1 %v1736_v0 }
  0x56   :  { %714 = vmatpush1.bf16.msra.mxu0 %v1530_v10  ;;  %1504 = vmatpush1.bf16.msra.mxu1 %v1530_v10  ;;  %v1625_v10 = vld [vmem:[#allocation2 + $0x1e4] ss:$8 sps:$4 sm:$0xff]  }
  0x57   :  { %715 = vmatprep.subr.bf16.mxu0 %v1736_v0  ;;  %1489 = vmatprep.subr.bf16.mxu1 %v1736_v0 }
  0x5a   :  { %716 = vmatpush1.bf16.msra.mxu0 %v1531_v11  ;;  %1505 = vmatpush1.bf16.msra.mxu1 %v1531_v11  ;;  %v1627_v11 = vld [vmem:[#allocation2 + $0xe0] ss:$8 sps:$4 sm:$0xff]  }
  0x5b   :  { %717 = vmatprep.subr.bf16.mxu0 %v1736_v0  ;;  %1490 = vmatprep.subr.bf16.mxu1 %v1736_v0 }
  0x5e   :  { %718 = vmatpush1.bf16.msra.mxu0 %v1532_v12  ;;  %1506 = vmatpush1.bf16.msra.mxu1 %v1532_v12  ;;  %v1628_v12 = vld [vmem:[#allocation2 + $0x1e0] ss:$8 sps:$4 sm:$0xff]  }
  0x5f   :  { %719 = vmatprep.subr.bf16.mxu0 %v1736_v0  ;;  %1491 = vmatprep.subr.bf16.mxu1 %v1736_v0 }
  0x62   :  { %720 = vmatpush1.bf16.msra.mxu0 %v1533_v13  ;;  %1507 = vmatpush1.bf16.msra.mxu1 %v1533_v13  ;;  %v1629_v13 = vld [vmem:[#allocation2 + $0xf4] ss:$8 sps:$4 sm:$0xff]  }
  0x63   :  { %721 = vmatprep.subr.bf16.mxu0 %v1736_v0  ;;  %1492 = vmatprep.subr.bf16.mxu1 %v1736_v0 }
  0x66   :  { %722 = vmatpush1.bf16.msra.mxu0 %v1534_v14  ;;  %1508 = vmatpush1.bf16.msra.mxu1 %v1534_v14  ;;  %v1631_v14 = vld [vmem:[#allocation2 + $0x1f4] ss:$8 sps:$4 sm:$0xff]  }
  0x67   :  { %723 = vmatprep.subr.bf16.mxu0 %v1736_v0  ;;  %1493 = vmatprep.subr.bf16.mxu1 %v1736_v0 }
  0x6a   :  { %724 = vmatpush1.bf16.msra.mxu0 %v1535_v15  ;;  %1509 = vmatpush1.bf16.msra.mxu1 %v1535_v15  ;;  %v1633_v15 = vld [vmem:[#allocation2 + $0xf0] ss:$8 sps:$4 sm:$0xff]  }
  0x6b   :  { %725 = vmatprep.subr.bf16.mxu0 %v1736_v0  ;;  %1494 = vmatprep.subr.bf16.mxu1 %v1736_v0 }
  0x6e   :  { %726 = vmatpush1.bf16.msra.mxu0 %v1536_v16  ;;  %1510 = vmatpush1.bf16.msra.mxu1 %v1536_v16  ;;  %v1634_v16 = vld [vmem:[#allocation2 + $0x1f0] ss:$8 sps:$4 sm:$0xff]  }
  0x6f   :  { %727 = vmatprep.subr.bf16.mxu0 %v1736_v0  ;;  %1495 = vmatprep.subr.bf16.mxu1 %v1736_v0 }
  0x72   :  { %728 = vmatpush1.bf16.msra.mxu0 %v1537_v17  ;;  %1511 = vmatpush1.bf16.msra.mxu1 %v1537_v17 }
  0x73   :  { %729 = vmatprep.subr.bf16.mxu0 %v1736_v0  ;;  %1496 = vmatprep.subr.bf16.mxu1 %v1736_v0  ;;  %v1610_v0 = vld [vmem:[#allocation2 + $0x1b0] ss:$8 sps:$4 sm:$0xff]  }
  0x76   :  { %730 = vmatpush1.bf16.msra.mxu0 %v1538_v18  ;;  %1512 = vmatpush1.bf16.msra.mxu1 %v1538_v18  ;;  %v1829_v18 = vld [vmem:[#allocation7] ss:$0 sm:$0xff] }
  0x79   :  { %732 = vmatmul.mubr.bf16.vlgmr.msra.gmra.mrb[0].mxu0 %v1539_v19  ;;  %860 = vmatmul.mubr.bf16.vlgmr.msra.gmra.mrb[0].mxu1 %v1542_v20 }
  0x7a   :  { %739 = vmatprep.mubr.bf16.mxu0 %v1545_v21  ;;  %867 = vmatprep.mubr.bf16.mxu1 %v1547_v22 }
  0x81   :  { %740 = vmatmul.mubr.bf16.gmra.mrb[4].mxu0 %v1549_v23  ;;  %868 = vmatmul.mubr.bf16.gmra.mrb[4].mxu1 %v1550_v24 }
  0x82   :  { %747 = vmatprep.mubr.bf16.mxu0 %v1551_v25  ;;  %875 = vmatprep.mubr.bf16.mxu1 %v1553_v26 }
  0x89   :  { %748 = vmatmul.mubr.bf16.gmra.mrb[8].mxu0 %v1555_v27  ;;  %876 = vmatmul.mubr.bf16.gmra.mrb[8].mxu1 %v1556_v28 }
  0x8a   :  { %755 = vmatprep.mubr.bf16.mxu0 %v1557_v29  ;;  %883 = vmatprep.mubr.bf16.mxu1 %v1559_v30 }
  0x91   :  { %756 = vmatmul.mubr.bf16.gmra.mrb[12].mxu0 %v1561_v31  ;;  %884 = vmatmul.mubr.bf16.gmra.mrb[12].mxu1 %v1562_v32 }
  0x92   :  { %763 = vmatprep.mubr.bf16.mxu0 %v1563_v33  ;;  %891 = vmatprep.mubr.bf16.mxu1 %v1565_v34 }
  0x99   :  { %764 = vmatmul.mubr.bf16.gmra.mrb[16].mxu0 %v1567_v35  ;;  %892 = vmatmul.mubr.bf16.gmra.mrb[16].mxu1 %v1568_v36 }
  0x9a   :  { %771 = vmatprep.mubr.bf16.mxu0 %v1569_v37  ;;  %899 = vmatprep.mubr.bf16.mxu1 %v1571_v38 }
  0xa1   :  { %772 = vmatmul.mubr.bf16.gmra.mrb[20].mxu0 %v1573_v39  ;;  %900 = vmatmul.mubr.bf16.gmra.mrb[20].mxu1 %v1574_v40 }
  0xa2   :  { %779 = vmatprep.mubr.bf16.mxu0 %v1575_v41  ;;  %907 = vmatprep.mubr.bf16.mxu1 %v1577_v42 }
  0xa9   :  { %780 = vmatmul.mubr.bf16.gmra.mrb[24].mxu0 %v1579_v43  ;;  %908 = vmatmul.mubr.bf16.gmra.mrb[24].mxu1 %v1580_v44 }
  0xaa   :  { %787 = vmatprep.mubr.bf16.mxu0 %v1581_v45  ;;  %915 = vmatprep.mubr.bf16.mxu1 %v1583_v46 }
  0xb1   :  { %788 = vmatmul.mubr.bf16.gmra.mrb[28].mxu0 %v1585_v47  ;;  %916 = vmatmul.mubr.bf16.gmra.mrb[28].mxu1 %v1586_v48 }
  0xb2   :  { %795 = vmatprep.mubr.bf16.mxu0 %v1587_v49  ;;  %923 = vmatprep.mubr.bf16.mxu1 %v1589_v50 }
  0xb9   :  { %796 = vmatmul.mubr.bf16.gmra.mrb[32].mxu0 %v1591_v51  ;;  %924 = vmatmul.mubr.bf16.gmra.mrb[32].mxu1 %v1592_v52 }
  0xba   :  { %803 = vmatprep.mubr.bf16.mxu0 %v1593_v53  ;;  %931 = vmatprep.mubr.bf16.mxu1 %v1595_v54 }
  0xc1   :  { %804 = vmatmul.mubr.bf16.gmra.mrb[36].mxu0 %v1597_v55  ;;  %932 = vmatmul.mubr.bf16.gmra.mrb[36].mxu1 %v1598_v56 }
  0xc2   :  { %811 = vmatprep.mubr.bf16.mxu0 %v1599_v57  ;;  %939 = vmatprep.mubr.bf16.mxu1 %v1601_v58 }
  0xc9   :  { %812 = vmatmul.mubr.bf16.gmra.mrb[40].mxu0 %v1603_v59  ;;  %940 = vmatmul.mubr.bf16.gmra.mrb[40].mxu1 %v1604_v60 }
  0xca   :  { %819 = vmatprep.mubr.bf16.mxu0 %v1605_v61  ;;  %947 = vmatprep.mubr.bf16.mxu1 %v1607_v62 }
  0xd1   :  { %820 = vmatmul.mubr.bf16.gmra.mrb[44].mxu0 %v1609_v63  ;;  %948 = vmatmul.mubr.bf16.gmra.mrb[44].mxu1 %v1610_v0 }
  0xd2   :  { %827 = vmatprep.mubr.bf16.mxu0 %v1611_v1  ;;  %955 = vmatprep.mubr.bf16.mxu1 %v1613_v2 }
  0xd9   :  { %828 = vmatmul.mubr.bf16.gmra.mrb[48].mxu0 %v1615_v3  ;;  %956 = vmatmul.mubr.bf16.gmra.mrb[48].mxu1 %v1616_v4 }
  0xda   :  { %835 = vmatprep.mubr.bf16.mxu0 %v1617_v5  ;;  %963 = vmatprep.mubr.bf16.mxu1 %v1619_v6 }
  0xe1   :  { %836 = vmatmul.mubr.bf16.gmra.mrb[52].mxu0 %v1621_v7  ;;  %964 = vmatmul.mubr.bf16.gmra.mrb[52].mxu1 %v1622_v8 }
  0xe2   :  { %843 = vmatprep.mubr.bf16.mxu0 %v1623_v9  ;;  %971 = vmatprep.mubr.bf16.mxu1 %v1625_v10 }
  0xe9   :  { %844 = vmatmul.mubr.bf16.gmra.mrb[56].mxu0 %v1627_v11  ;;  %972 = vmatmul.mubr.bf16.gmra.mrb[56].mxu1 %v1628_v12 }
  0xea   :  { %851 = vmatprep.mubr.bf16.mxu0 %v1629_v13  ;;  %979 = vmatprep.mubr.bf16.mxu1 %v1631_v14 }
  0xf1   :  { %852 = vmatmul.mubr.bf16.gmra.mrb[60].mxu0 %v1633_v15  ;;  %980 = vmatmul.mubr.bf16.gmra.mrb[60].mxu1 %v1634_v16 }
 0x14c   :  { %v733_v17 = vpop.f32.mrb[0].mxu0  ;;  %v861_v19 = vpop.f32.mrb[0].mxu1 }
 0x14d   :  { %v735_v20 = vpop.f32.mrb[1].mxu0  ;;  %v863_v21 = vpop.f32.mrb[1].mxu1  ;;  %v1190_v24 = vadd.f32 %v1829_v18, %v733_v17  ;;  %v1222_v25 = vadd.f32 %v1829_v18, %v861_v19 }
 0x14e   :  { %v736_v22 = vpop.f32.mrb[2].mxu0  ;;  %v864_v23 = vpop.f32.mrb[2].mxu1 }
 0x14f   :  { %v738_v26 = vpop.f32.mrb[3].mxu0  ;;  %v866_v27 = vpop.f32.mrb[3].mxu1  ;;  %v1254_v28 = vmax.f32 %v1190_v24, 0.0  ;;  %v1286_v29 = vmax.f32 %v1222_v25, 0.0  ;;  %v1191_v30 = vadd.f32 %v1829_v18, %v736_v22  ;;  %v1223_v31 = vadd.f32 %v1829_v18, %v864_v23 }
 0x151   :  { %1318 = vst [vmem:[#allocation8] sm:$0xff] %v1254_v28  ;;  %1350 = vst [vmem:[#allocation8 + $0x100] sm:$0xff] %v1286_v29  ;;  %v1255_v32 = vmax.f32 %v1191_v30, 0.0  ;;  %v1287_v33 = vmax.f32 %v1223_v31, 0.0 }
 0x153   :  { %1319 = vst [vmem:[#allocation8 + $0x8] sm:$0xff] %v1255_v32  ;;  %1351 = vst [vmem:[#allocation8 + $0x108] sm:$0xff] %v1287_v33 }
 0x154   :  { %v741_v34 = vpop.f32.mrb[4].mxu0  ;;  %v869_v35 = vpop.f32.mrb[4].mxu1 }
 0x155   :  { %v743_v36 = vpop.f32.mrb[5].mxu0  ;;  %v871_v37 = vpop.f32.mrb[5].mxu1  ;;  %v1192_v40 = vadd.f32 %v1829_v18, %v741_v34  ;;  %v1224_v41 = vadd.f32 %v1829_v18, %v869_v35 }
 0x156   :  { %v744_v38 = vpop.f32.mrb[6].mxu0  ;;  %v872_v39 = vpop.f32.mrb[6].mxu1 }
 0x157   :  { %v746_v42 = vpop.f32.mrb[7].mxu0  ;;  %v874_v43 = vpop.f32.mrb[7].mxu1  ;;  %v1256_v44 = vmax.f32 %v1192_v40, 0.0  ;;  %v1288_v45 = vmax.f32 %v1224_v41, 0.0  ;;  %v1193_v46 = vadd.f32 %v1829_v18, %v744_v38  ;;  %v1225_v47 = vadd.f32 %v1829_v18, %v872_v39 }
 0x159   :  { %1320 = vst [vmem:[#allocation8 + $0x10] sm:$0xff] %v1256_v44  ;;  %1352 = vst [vmem:[#allocation8 + $0x110] sm:$0xff] %v1288_v45  ;;  %v1257_v48 = vmax.f32 %v1193_v46, 0.0  ;;  %v1289_v49 = vmax.f32 %v1225_v47, 0.0 }
 0x15b   :  { %1321 = vst [vmem:[#allocation8 + $0x18] sm:$0xff] %v1257_v48  ;;  %1353 = vst [vmem:[#allocation8 + $0x118] sm:$0xff] %v1289_v49 }
 0x15c   :  { %v749_v50 = vpop.f32.mrb[8].mxu0  ;;  %v877_v51 = vpop.f32.mrb[8].mxu1 }
 0x15d   :  { %v751_v52 = vpop.f32.mrb[9].mxu0  ;;  %v879_v53 = vpop.f32.mrb[9].mxu1  ;;  %v1194_v56 = vadd.f32 %v1829_v18, %v749_v50  ;;  %v1226_v57 = vadd.f32 %v1829_v18, %v877_v51 }
 0x15e   :  { %v752_v54 = vpop.f32.mrb[10].mxu0  ;;  %v880_v55 = vpop.f32.mrb[10].mxu1 }
 0x15f   :  { %v754_v58 = vpop.f32.mrb[11].mxu0  ;;  %v882_v59 = vpop.f32.mrb[11].mxu1  ;;  %v1258_v60 = vmax.f32 %v1194_v56, 0.0  ;;  %v1290_v61 = vmax.f32 %v1226_v57, 0.0  ;;  %v1195_v62 = vadd.f32 %v1829_v18, %v752_v54  ;;  %v1227_v63 = vadd.f32 %v1829_v18, %v880_v55 }
 0x161   :  { %1322 = vst [vmem:[#allocation8 + $0x20] sm:$0xff] %v1258_v60  ;;  %1354 = vst [vmem:[#allocation8 + $0x120] sm:$0xff] %v1290_v61  ;;  %v1259_v0 = vmax.f32 %v1195_v62, 0.0  ;;  %v1291_v1 = vmax.f32 %v1227_v63, 0.0 }
 0x163   :  { %1323 = vst [vmem:[#allocation8 + $0x28] sm:$0xff] %v1259_v0  ;;  %1355 = vst [vmem:[#allocation8 + $0x128] sm:$0xff] %v1291_v1 }
 0x164   :  { %v757_v2 = vpop.f32.mrb[12].mxu0  ;;  %v885_v3 = vpop.f32.mrb[12].mxu1 }
 0x165   :  { %v759_v4 = vpop.f32.mrb[13].mxu0  ;;  %v887_v5 = vpop.f32.mrb[13].mxu1  ;;  %v1196_v8 = vadd.f32 %v1829_v18, %v757_v2  ;;  %v1228_v9 = vadd.f32 %v1829_v18, %v885_v3 }
 0x166   :  { %v760_v6 = vpop.f32.mrb[14].mxu0  ;;  %v888_v7 = vpop.f32.mrb[14].mxu1 }
 0x167   :  { %v762_v10 = vpop.f32.mrb[15].mxu0  ;;  %v890_v11 = vpop.f32.mrb[15].mxu1  ;;  %v1260_v12 = vmax.f32 %v1196_v8, 0.0  ;;  %v1292_v13 = vmax.f32 %v1228_v9, 0.0  ;;  %v1197_v14 = vadd.f32 %v1829_v18, %v760_v6  ;;  %v1229_v15 = vadd.f32 %v1829_v18, %v888_v7 }
 0x169   :  { %1324 = vst [vmem:[#allocation8 + $0x30] sm:$0xff] %v1260_v12  ;;  %1356 = vst [vmem:[#allocation8 + $0x130] sm:$0xff] %v1292_v13  ;;  %v1261_v16 = vmax.f32 %v1197_v14, 0.0  ;;  %v1293_v17 = vmax.f32 %v1229_v15, 0.0 }
 0x16b   :  { %1325 = vst [vmem:[#allocation8 + $0x38] sm:$0xff] %v1261_v16  ;;  %1357 = vst [vmem:[#allocation8 + $0x138] sm:$0xff] %v1293_v17 }
 0x16c   :  { %v765_v19 = vpop.f32.mrb[16].mxu0  ;;  %v893_v20 = vpop.f32.mrb[16].mxu1 }
 0x16d   :  { %v767_v21 = vpop.f32.mrb[17].mxu0  ;;  %v895_v22 = vpop.f32.mrb[17].mxu1  ;;  %v1198_v25 = vadd.f32 %v1829_v18, %v765_v19  ;;  %v1230_v26 = vadd.f32 %v1829_v18, %v893_v20 }
 0x16e   :  { %v768_v23 = vpop.f32.mrb[18].mxu0  ;;  %v896_v24 = vpop.f32.mrb[18].mxu1 }
 0x16f   :  { %v770_v27 = vpop.f32.mrb[19].mxu0  ;;  %v898_v28 = vpop.f32.mrb[19].mxu1  ;;  %v1262_v29 = vmax.f32 %v1198_v25, 0.0  ;;  %v1294_v30 = vmax.f32 %v1230_v26, 0.0  ;;  %v1199_v31 = vadd.f32 %v1829_v18, %v768_v23  ;;  %v1231_v32 = vadd.f32 %v1829_v18, %v896_v24 }
 0x171   :  { %1326 = vst [vmem:[#allocation8 + $0x40] sm:$0xff] %v1262_v29  ;;  %1358 = vst [vmem:[#allocation8 + $0x140] sm:$0xff] %v1294_v30  ;;  %v1263_v33 = vmax.f32 %v1199_v31, 0.0  ;;  %v1295_v34 = vmax.f32 %v1231_v32, 0.0 }
 0x173   :  { %1327 = vst [vmem:[#allocation8 + $0x48] sm:$0xff] %v1263_v33  ;;  %1359 = vst [vmem:[#allocation8 + $0x148] sm:$0xff] %v1295_v34 }
 0x174   :  { %v773_v35 = vpop.f32.mrb[20].mxu0  ;;  %v901_v36 = vpop.f32.mrb[20].mxu1 }
 0x175   :  { %v775_v37 = vpop.f32.mrb[21].mxu0  ;;  %v903_v38 = vpop.f32.mrb[21].mxu1  ;;  %v1200_v41 = vadd.f32 %v1829_v18, %v773_v35  ;;  %v1232_v42 = vadd.f32 %v1829_v18, %v901_v36 }
 0x176   :  { %v776_v39 = vpop.f32.mrb[22].mxu0  ;;  %v904_v40 = vpop.f32.mrb[22].mxu1 }
 0x177   :  { %v778_v43 = vpop.f32.mrb[23].mxu0  ;;  %v906_v44 = vpop.f32.mrb[23].mxu1  ;;  %v1264_v45 = vmax.f32 %v1200_v41, 0.0  ;;  %v1296_v46 = vmax.f32 %v1232_v42, 0.0  ;;  %v1201_v47 = vadd.f32 %v1829_v18, %v776_v39  ;;  %v1233_v48 = vadd.f32 %v1829_v18, %v904_v40 }
 0x179   :  { %1328 = vst [vmem:[#allocation8 + $0x50] sm:$0xff] %v1264_v45  ;;  %1360 = vst [vmem:[#allocation8 + $0x150] sm:$0xff] %v1296_v46  ;;  %v1265_v49 = vmax.f32 %v1201_v47, 0.0  ;;  %v1297_v50 = vmax.f32 %v1233_v48, 0.0 }
 0x17b   :  { %1329 = vst [vmem:[#allocation8 + $0x58] sm:$0xff] %v1265_v49  ;;  %1361 = vst [vmem:[#allocation8 + $0x158] sm:$0xff] %v1297_v50 }
 0x17c   :  { %v781_v51 = vpop.f32.mrb[24].mxu0  ;;  %v909_v52 = vpop.f32.mrb[24].mxu1 }
 0x17d   :  { %v783_v53 = vpop.f32.mrb[25].mxu0  ;;  %v911_v54 = vpop.f32.mrb[25].mxu1  ;;  %v1202_v57 = vadd.f32 %v1829_v18, %v781_v51  ;;  %v1234_v58 = vadd.f32 %v1829_v18, %v909_v52 }
 0x17e   :  { %v784_v55 = vpop.f32.mrb[26].mxu0  ;;  %v912_v56 = vpop.f32.mrb[26].mxu1 }
 0x17f   :  { %v786_v59 = vpop.f32.mrb[27].mxu0  ;;  %v914_v60 = vpop.f32.mrb[27].mxu1  ;;  %v1266_v61 = vmax.f32 %v1202_v57, 0.0  ;;  %v1298_v62 = vmax.f32 %v1234_v58, 0.0  ;;  %v1203_v63 = vadd.f32 %v1829_v18, %v784_v55  ;;  %v1235_v0 = vadd.f32 %v1829_v18, %v912_v56 }
 0x181   :  { %1330 = vst [vmem:[#allocation8 + $0x60] sm:$0xff] %v1266_v61  ;;  %1362 = vst [vmem:[#allocation8 + $0x160] sm:$0xff] %v1298_v62  ;;  %v1267_v1 = vmax.f32 %v1203_v63, 0.0  ;;  %v1299_v2 = vmax.f32 %v1235_v0, 0.0 }
 0x183   :  { %1331 = vst [vmem:[#allocation8 + $0x68] sm:$0xff] %v1267_v1  ;;  %1363 = vst [vmem:[#allocation8 + $0x168] sm:$0xff] %v1299_v2 }
 0x184   :  { %v789_v3 = vpop.f32.mrb[28].mxu0  ;;  %v917_v4 = vpop.f32.mrb[28].mxu1 }
 0x185   :  { %v791_v5 = vpop.f32.mrb[29].mxu0  ;;  %v919_v6 = vpop.f32.mrb[29].mxu1  ;;  %v1204_v9 = vadd.f32 %v1829_v18, %v789_v3  ;;  %v1236_v10 = vadd.f32 %v1829_v18, %v917_v4 }
 0x186   :  { %v792_v7 = vpop.f32.mrb[30].mxu0  ;;  %v920_v8 = vpop.f32.mrb[30].mxu1 }
 0x187   :  { %v794_v11 = vpop.f32.mrb[31].mxu0  ;;  %v922_v12 = vpop.f32.mrb[31].mxu1  ;;  %v1268_v13 = vmax.f32 %v1204_v9, 0.0  ;;  %v1300_v14 = vmax.f32 %v1236_v10, 0.0  ;;  %v1205_v15 = vadd.f32 %v1829_v18, %v792_v7  ;;  %v1237_v16 = vadd.f32 %v1829_v18, %v920_v8 }
 0x189   :  { %1332 = vst [vmem:[#allocation8 + $0x70] sm:$0xff] %v1268_v13  ;;  %1364 = vst [vmem:[#allocation8 + $0x170] sm:$0xff] %v1300_v14  ;;  %v1269_v17 = vmax.f32 %v1205_v15, 0.0  ;;  %v1301_v19 = vmax.f32 %v1237_v16, 0.0 }
 0x18b   :  { %1333 = vst [vmem:[#allocation8 + $0x78] sm:$0xff] %v1269_v17  ;;  %1365 = vst [vmem:[#allocation8 + $0x178] sm:$0xff] %v1301_v19 }
 0x18c   :  { %v797_v20 = vpop.f32.mrb[32].mxu0  ;;  %v925_v21 = vpop.f32.mrb[32].mxu1 }
 0x18d   :  { %v799_v22 = vpop.f32.mrb[33].mxu0  ;;  %v927_v23 = vpop.f32.mrb[33].mxu1  ;;  %v1206_v26 = vadd.f32 %v1829_v18, %v797_v20  ;;  %v1238_v27 = vadd.f32 %v1829_v18, %v925_v21 }
 0x18e   :  { %v800_v24 = vpop.f32.mrb[34].mxu0  ;;  %v928_v25 = vpop.f32.mrb[34].mxu1 }
 0x18f   :  { %v802_v28 = vpop.f32.mrb[35].mxu0  ;;  %v930_v29 = vpop.f32.mrb[35].mxu1  ;;  %v1270_v30 = vmax.f32 %v1206_v26, 0.0  ;;  %v1302_v31 = vmax.f32 %v1238_v27, 0.0  ;;  %v1207_v32 = vadd.f32 %v1829_v18, %v800_v24  ;;  %v1239_v33 = vadd.f32 %v1829_v18, %v928_v25 }
 0x191   :  { %1334 = vst [vmem:[#allocation8 + $0x80] sm:$0xff] %v1270_v30  ;;  %1366 = vst [vmem:[#allocation8 + $0x180] sm:$0xff] %v1302_v31  ;;  %v1271_v34 = vmax.f32 %v1207_v32, 0.0  ;;  %v1303_v35 = vmax.f32 %v1239_v33, 0.0 }
 0x193   :  { %1335 = vst [vmem:[#allocation8 + $0x88] sm:$0xff] %v1271_v34  ;;  %1367 = vst [vmem:[#allocation8 + $0x188] sm:$0xff] %v1303_v35 }
 0x194   :  { %v805_v36 = vpop.f32.mrb[36].mxu0  ;;  %v933_v37 = vpop.f32.mrb[36].mxu1 }
 0x195   :  { %v807_v38 = vpop.f32.mrb[37].mxu0  ;;  %v935_v39 = vpop.f32.mrb[37].mxu1  ;;  %v1208_v42 = vadd.f32 %v1829_v18, %v805_v36  ;;  %v1240_v43 = vadd.f32 %v1829_v18, %v933_v37 }
 0x196   :  { %v808_v40 = vpop.f32.mrb[38].mxu0  ;;  %v936_v41 = vpop.f32.mrb[38].mxu1 }
 0x197   :  { %v810_v44 = vpop.f32.mrb[39].mxu0  ;;  %v938_v45 = vpop.f32.mrb[39].mxu1  ;;  %v1272_v46 = vmax.f32 %v1208_v42, 0.0  ;;  %v1304_v47 = vmax.f32 %v1240_v43, 0.0  ;;  %v1209_v48 = vadd.f32 %v1829_v18, %v808_v40  ;;  %v1241_v49 = vadd.f32 %v1829_v18, %v936_v41 }
 0x199   :  { %1336 = vst [vmem:[#allocation8 + $0x90] sm:$0xff] %v1272_v46  ;;  %1368 = vst [vmem:[#allocation8 + $0x190] sm:$0xff] %v1304_v47  ;;  %v1273_v50 = vmax.f32 %v1209_v48, 0.0  ;;  %v1305_v51 = vmax.f32 %v1241_v49, 0.0 }
 0x19b   :  { %1337 = vst [vmem:[#allocation8 + $0x98] sm:$0xff] %v1273_v50  ;;  %1369 = vst [vmem:[#allocation8 + $0x198] sm:$0xff] %v1305_v51 }
 0x19c   :  { %v813_v52 = vpop.f32.mrb[40].mxu0  ;;  %v941_v53 = vpop.f32.mrb[40].mxu1 }
 0x19d   :  { %v815_v54 = vpop.f32.mrb[41].mxu0  ;;  %v943_v55 = vpop.f32.mrb[41].mxu1  ;;  %v1210_v58 = vadd.f32 %v1829_v18, %v813_v52  ;;  %v1242_v59 = vadd.f32 %v1829_v18, %v941_v53 }
 0x19e   :  { %v816_v56 = vpop.f32.mrb[42].mxu0  ;;  %v944_v57 = vpop.f32.mrb[42].mxu1 }
 0x19f   :  { %v818_v60 = vpop.f32.mrb[43].mxu0  ;;  %v946_v61 = vpop.f32.mrb[43].mxu1  ;;  %v1274_v62 = vmax.f32 %v1210_v58, 0.0  ;;  %v1306_v63 = vmax.f32 %v1242_v59, 0.0  ;;  %v1211_v0 = vadd.f32 %v1829_v18, %v816_v56  ;;  %v1243_v1 = vadd.f32 %v1829_v18, %v944_v57 }
 0x1a1   :  { %1338 = vst [vmem:[#allocation8 + $0xa0] sm:$0xff] %v1274_v62  ;;  %1370 = vst [vmem:[#allocation8 + $0x1a0] sm:$0xff] %v1306_v63  ;;  %v1275_v2 = vmax.f32 %v1211_v0, 0.0  ;;  %v1307_v3 = vmax.f32 %v1243_v1, 0.0 }
 0x1a3   :  { %1339 = vst [vmem:[#allocation8 + $0xa8] sm:$0xff] %v1275_v2  ;;  %1371 = vst [vmem:[#allocation8 + $0x1a8] sm:$0xff] %v1307_v3 }
 0x1a4   :  { %v821_v4 = vpop.f32.mrb[44].mxu0  ;;  %v949_v5 = vpop.f32.mrb[44].mxu1 }
 0x1a5   :  { %v823_v6 = vpop.f32.mrb[45].mxu0  ;;  %v951_v7 = vpop.f32.mrb[45].mxu1  ;;  %v1212_v10 = vadd.f32 %v1829_v18, %v821_v4  ;;  %v1244_v11 = vadd.f32 %v1829_v18, %v949_v5 }
 0x1a6   :  { %v824_v8 = vpop.f32.mrb[46].mxu0  ;;  %v952_v9 = vpop.f32.mrb[46].mxu1 }
 0x1a7   :  { %v826_v12 = vpop.f32.mrb[47].mxu0  ;;  %v954_v13 = vpop.f32.mrb[47].mxu1  ;;  %v1276_v14 = vmax.f32 %v1212_v10, 0.0  ;;  %v1308_v15 = vmax.f32 %v1244_v11, 0.0  ;;  %v1213_v16 = vadd.f32 %v1829_v18, %v824_v8  ;;  %v1245_v17 = vadd.f32 %v1829_v18, %v952_v9 }
 0x1a9   :  { %1340 = vst [vmem:[#allocation8 + $0xb0] sm:$0xff] %v1276_v14  ;;  %1372 = vst [vmem:[#allocation8 + $0x1b0] sm:$0xff] %v1308_v15  ;;  %v1277_v19 = vmax.f32 %v1213_v16, 0.0  ;;  %v1309_v20 = vmax.f32 %v1245_v17, 0.0 }
 0x1ab   :  { %1341 = vst [vmem:[#allocation8 + $0xb8] sm:$0xff] %v1277_v19  ;;  %1373 = vst [vmem:[#allocation8 + $0x1b8] sm:$0xff] %v1309_v20 }
 0x1ac   :  { %v829_v21 = vpop.f32.mrb[48].mxu0  ;;  %v957_v22 = vpop.f32.mrb[48].mxu1 }
 0x1ad   :  { %v831_v23 = vpop.f32.mrb[49].mxu0  ;;  %v959_v24 = vpop.f32.mrb[49].mxu1  ;;  %v1214_v27 = vadd.f32 %v1829_v18, %v829_v21  ;;  %v1246_v28 = vadd.f32 %v1829_v18, %v957_v22 }
 0x1ae   :  { %v832_v25 = vpop.f32.mrb[50].mxu0  ;;  %v960_v26 = vpop.f32.mrb[50].mxu1 }
 0x1af   :  { %v834_v29 = vpop.f32.mrb[51].mxu0  ;;  %v962_v30 = vpop.f32.mrb[51].mxu1  ;;  %v1278_v31 = vmax.f32 %v1214_v27, 0.0  ;;  %v1310_v32 = vmax.f32 %v1246_v28, 0.0  ;;  %v1215_v33 = vadd.f32 %v1829_v18, %v832_v25  ;;  %v1247_v34 = vadd.f32 %v1829_v18, %v960_v26 }
 0x1b1   :  { %1342 = vst [vmem:[#allocation8 + $0xc0] sm:$0xff] %v1278_v31  ;;  %1374 = vst [vmem:[#allocation8 + $0x1c0] sm:$0xff] %v1310_v32  ;;  %v1279_v35 = vmax.f32 %v1215_v33, 0.0  ;;  %v1311_v36 = vmax.f32 %v1247_v34, 0.0 }
 0x1b3   :  { %1343 = vst [vmem:[#allocation8 + $0xc8] sm:$0xff] %v1279_v35  ;;  %1375 = vst [vmem:[#allocation8 + $0x1c8] sm:$0xff] %v1311_v36 }
 0x1b4   :  { %v837_v37 = vpop.f32.mrb[52].mxu0  ;;  %v965_v38 = vpop.f32.mrb[52].mxu1 }
 0x1b5   :  { %v839_v39 = vpop.f32.mrb[53].mxu0  ;;  %v967_v40 = vpop.f32.mrb[53].mxu1  ;;  %v1216_v43 = vadd.f32 %v1829_v18, %v837_v37  ;;  %v1248_v44 = vadd.f32 %v1829_v18, %v965_v38 }
 0x1b6   :  { %v840_v41 = vpop.f32.mrb[54].mxu0  ;;  %v968_v42 = vpop.f32.mrb[54].mxu1 }
 0x1b7   :  { %v842_v45 = vpop.f32.mrb[55].mxu0  ;;  %v970_v46 = vpop.f32.mrb[55].mxu1  ;;  %v1280_v47 = vmax.f32 %v1216_v43, 0.0  ;;  %v1312_v48 = vmax.f32 %v1248_v44, 0.0  ;;  %v1217_v49 = vadd.f32 %v1829_v18, %v840_v41  ;;  %v1249_v50 = vadd.f32 %v1829_v18, %v968_v42 }
 0x1b9   :  { %1344 = vst [vmem:[#allocation8 + $0xd0] sm:$0xff] %v1280_v47  ;;  %1376 = vst [vmem:[#allocation8 + $0x1d0] sm:$0xff] %v1312_v48  ;;  %v1281_v51 = vmax.f32 %v1217_v49, 0.0  ;;  %v1313_v52 = vmax.f32 %v1249_v50, 0.0 }
 0x1bb   :  { %1345 = vst [vmem:[#allocation8 + $0xd8] sm:$0xff] %v1281_v51  ;;  %1377 = vst [vmem:[#allocation8 + $0x1d8] sm:$0xff] %v1313_v52 }
 0x1bc   :  { %v845_v53 = vpop.f32.mrb[56].mxu0  ;;  %v973_v54 = vpop.f32.mrb[56].mxu1 }
 0x1bd   :  { %v847_v55 = vpop.f32.mrb[57].mxu0  ;;  %v975_v56 = vpop.f32.mrb[57].mxu1  ;;  %v1218_v59 = vadd.f32 %v1829_v18, %v845_v53  ;;  %v1250_v60 = vadd.f32 %v1829_v18, %v973_v54 }
 0x1be   :  { %v848_v57 = vpop.f32.mrb[58].mxu0  ;;  %v976_v58 = vpop.f32.mrb[58].mxu1 }
 0x1bf   :  { %v850_v61 = vpop.f32.mrb[59].mxu0  ;;  %v978_v62 = vpop.f32.mrb[59].mxu1  ;;  %v1282_v63 = vmax.f32 %v1218_v59, 0.0  ;;  %v1314_v0 = vmax.f32 %v1250_v60, 0.0  ;;  %v1219_v1 = vadd.f32 %v1829_v18, %v848_v57  ;;  %v1251_v2 = vadd.f32 %v1829_v18, %v976_v58 }
 0x1c1   :  { %1346 = vst [vmem:[#allocation8 + $0xe0] sm:$0xff] %v1282_v63  ;;  %1378 = vst [vmem:[#allocation8 + $0x1e0] sm:$0xff] %v1314_v0  ;;  %v1283_v3 = vmax.f32 %v1219_v1, 0.0  ;;  %v1315_v4 = vmax.f32 %v1251_v2, 0.0 }
 0x1c3   :  { %1347 = vst [vmem:[#allocation8 + $0xe8] sm:$0xff] %v1283_v3  ;;  %1379 = vst [vmem:[#allocation8 + $0x1e8] sm:$0xff] %v1315_v4 }
 0x1c4   :  { %v853_v5 = vpop.f32.mrb[60].mxu0  ;;  %v981_v6 = vpop.f32.mrb[60].mxu1 }
 0x1c5   :  { %v855_v7 = vpop.f32.mrb[61].mxu0  ;;  %v983_v8 = vpop.f32.mrb[61].mxu1  ;;  %v1220_v11 = vadd.f32 %v1829_v18, %v853_v5  ;;  %v1252_v12 = vadd.f32 %v1829_v18, %v981_v6 }
 0x1c6   :  { %v856_v9 = vpop.f32.mrb[62].mxu0  ;;  %v984_v10 = vpop.f32.mrb[62].mxu1 }
 0x1c7   :  { %v858_v13 = vpop.f32.mrb[63].mxu0  ;;  %v986_v14 = vpop.f32.mrb[63].mxu1  ;;  %v1284_v15 = vmax.f32 %v1220_v11, 0.0  ;;  %v1316_v16 = vmax.f32 %v1252_v12, 0.0  ;;  %v1221_v17 = vadd.f32 %v1829_v18, %v856_v9  ;;  %v1253_v19 = vadd.f32 %v1829_v18, %v984_v10 }
 0x1c9   :  { %1348 = vst [vmem:[#allocation8 + $0xf0] sm:$0xff] %v1284_v15  ;;  %1380 = vst [vmem:[#allocation8 + $0x1f0] sm:$0xff] %v1316_v16  ;;  %v1285_v20 = vmax.f32 %v1221_v17, 0.0  ;;  %v1317_v21 = vmax.f32 %v1253_v19, 0.0 }
 0x1cb   :  { %1349 = vst [vmem:[#allocation8 + $0xf8] sm:$0xff] %v1285_v20  ;;  %1381 = vst [vmem:[#allocation8 + $0x1f8] sm:$0xff] %v1317_v21 }
 0x1cc   :  { %1712 = shalt.err (!%p1709_p0)
}
 0x1cd   :  { %s1713_s28 = scalar_lea.hbm %s1913_s3, 8192 }
 0x1ce   :  { %p1714_p1 = scmp.ne.s32.totalorder %s1913_s3, %s1713_s28  ;;  %p1717_p2 = scmp.lt.u32.totalorder %s1713_s28, %s1913_s3 }
 0x1d0   :  { %p1719_p3 = pnand %p1717_p2, %p1714_p1 }
 0x1d2   :  { %1722 = shalt.err (!%p1719_p3)
}
 0x1d3   :  { %1393 = dma.vmem_to_hbm [thread:$0]  %s1388_s24, 8192, %s1913_s3, [#allocation4], %s1733_s1, %s1733_s1, %s1734_s9  }
 0x1d4   :  { %1727 = dma.done.wait [#allocation4], 8192  }
 0x1d5   :  { %1728 = vsyncadd [#allocation4], 4294959104 }
 0x1d6   :  { %1397 = vsyncpa [#allocation3], 1 }
 0x1d7   :  { %1398 = vsyncpa [#allocation6], 1 }
 0x1d8   :  { %1399 = vsyncpa [#allocation4], 1 }

// kernel: e2e_cnn_forward.24
= control target key start
LH: loop header
LB: loop body
LE: loop exit
PB: predicated region body
PF: predicated region fallthrough
CT: control target
= control target key end

     0   :  { %8 = vsyncpa [#allocation3], 0  ;;  %s1421_s0 = inlined_call_operand.hbm [shape: bf16[128,640], index: 0, kind: input, shape index: {}]   ;;  %s1422_s1 = inlined_call_operand.hbm [shape: bf16[640,128], index: 1, kind: input, shape index: {}]   ;;  %s1423_s2 = inlined_call_operand.hbm [shape: f32[1,128], index: 2, kind: input, shape index: {}]   ;;  %s1424_s3 = inlined_call_operand.hbm [shape: f32[128,128], index: 3, kind: output, shape index: {}]  }
   0x1   :  { %10 = vsyncpa [#allocation3 + $0x1], 0 }
   0x2   :  { %11 = vsyncpa [#allocation6], 0 }
   0x3   :  { %13 = vsyncpa [#allocation6 + $0x1], 0 }
   0x4   :  { %14 = vsyncpa [#allocation4], 0  ;;  %s1167_s12 = smov 0   ;;  %s1169_s13 = smov 0  }
   0x5   :  { %s1171_s14 = smov 0   ;;  %s1173_s15 = smov 0  }
   0x6   :  { %s1175_s16 = smov 0   ;;  %s1177_s17 = smov 0  }
   0x7 LB: > { %s1196_s18 = sadd.s32 4294967295, %s1135_s17   ;;  %s48_s19 = sadd.s32 1, %s1123_s14  ;;  %s1135_s17 = sphi %s1177_s17, %s20_s17   ;;  %s1131_s16 = sphi %s1175_s16, %s1442_s16   ;;  %s1127_s15 = sphi %s1173_s15, %s1441_s15   ;;  %s1123_s14 = sphi %s1171_s14, %s1440_s14   ;;  %s1119_s13 = sphi %s1169_s13, %s1439_s13   ;;  %s1115_s12 = sphi %s1167_s12, %s1438_s12  }
   0x8   : > { %p55_p0 = scmp.ne.s32.totalorder %s1123_s14, %s1119_s13  ;;  %p56_p1 = scmp.eq.s32.totalorder %s1135_s17, 0 }
   0x9   : > { %p61_p2 = scmp.ne.s32.totalorder %s1119_s13, %s1115_s12  ;;  %p1425_p3 = scmp.eq.s32.totalorder %s1196_s18, 0 }
   0xa   : > { %p57_p4 = por %p56_p1, %p55_p0  ;;  %p759_p5 = scmp.ge.s32.totalorder %s1135_s17, 1 }
   0xb   : > { %p1207_p6 = por %p1425_p3, %p61_p2  ;;  %p154_p7 = scmp.lt.s32.totalorder %s1135_s17, 6 }
   0xc   : > { %s1137_s22 = smov [#allocation7]   ;;  %p883_p10 = scmp.lt.s32.totalorder %s1135_s17, 5 }
   0xd   : > { %s1429_s20 = scalar_select %p1207_p6, 1, 0 }
   0xe   : > { %p1212_p8 = pnand %p759_p5, %p154_p7  ;;  %s169_s23 = sshll.u32 %s1137_s22, 4  ;;  %s170_s23 = int_to_ptr.vmem [resolvable:$true] %s169_s23 }
   0xf   : > { %s180_s24 = sand.u32 1, %s1123_s14   ;;  %p1226_p12 = pnand %p883_p10, %p57_p4 }
  0x10   : > { %s1430_s21 = scalar_select %p1212_p8, 1, 0 }
  0x11   : > { %p871_p9 = pneg %p1212_p8  ;;  %s959_s29 = scalar_lea.hbm %s1423_s2, 16 }
  0x12   : > { %s1432_s26 = scalar_select %p1226_p12, 1, 0 }
  0x13   : > { %p1222_p11 = pnand %p871_p9, %p1425_p3  ;;  %p960_p13 = scmp.ne.s32.totalorder %s1423_s2, %s959_s29 }
  0x14   : > { %p966_p5 = scmp.lt.u32.totalorder %s959_s29, %s1423_s2 }
  0x15   : > { %p961_p0 = pneg %p1222_p11 }
  0x17   : > { %p962_p1 = pnand %p961_p0, %p960_p13 }
  0x19   : > { %p963_p2 = pneg %p962_p1 }
  0x1b   : > { %p968_p4 = pnand %p966_p5, %p963_p2 }
  0x1d   : > { %971 = shalt.err (!%p968_p4)
}
  0x1e   : > { %s972_s7 = scalar_lea.vmem %s170_s23, 16  ;;  %s979_s8 = scalar_lea.vmem %s170_s23, 32 }
  0x1f   : > { %p973_p7 = scmp.ne.s32.totalorder %s170_s23, %s972_s7  ;;  %p980_p3 = scmp.lt.s32.totalorder %s170_s23, %s170_s23 }
  0x20   : > { %p981_p6 = scmp.lt.s32.totalorder %s979_s8, %s972_s7 }
  0x21   : > { %p975_p9 = pnand %p973_p7, %p961_p0 }
  0x22   : > { %p982_p8 = por %p981_p6, %p980_p3 }
  0x23   : > { %p976_p10 = pneg %p975_p9 }
  0x25   : > { %p983_p12 = pnand %p982_p8, %p976_p10 }
  0x27   : > { %986 = shalt.err (!%p983_p12)
}
  0x28   : > { %874 = dma.hbm_to_vmem [thread:$0]  (!%p1222_p11), %s1423_s2, 16, %s170_s23, [#allocation6]  }
  0x29   : > { %s32_s11 = sadd.s32 1, %s1131_s16  ;;  %s1249_s12 = sshll.u32 %s180_s24, 6 }
  0x2a   : > { %p33_p3 = scmp.ge.s32.totalorder %s32_s11, 5  ;;  %s763_s22 = sshll.u32 %s1131_s16, 6 }
  0x2b   : > { %s184_s25 = scalar_lea.vmem [#allocation2], %s1249_s12  ;;  %s1258_s30 = scalar_lea.hbm %s1421_s0, %s763_s22 }
  0x2c   : > { %s193_s27 = sshll.u32 %s184_s25, 4  ;;  %s1444_s11 = smov (%p33_p3, %s32_s11), 0  ;;  %s1260_s27 = int_to_ptr.vmem [resolvable:$true] %s193_s27 }
  0x2d   : > { %s44_s23 = ssub.s32 %s1131_s16, %s1444_s11  ;;  %s203_s4 = sand.u32 1, %s1135_s17  }
  0x2e   : > { %p46_p6 = scmp.eq.s32.totalorder %s44_s23, 0  ;;  %s1272_s6 = scalar_lea.sflag [#allocation3], %s180_s24 }
  0x2f   : > { %s987_s7 = scalar_lea.hbm %s1258_s30, 1024  ;;  %p1433_p11 = scmp.ne.s32.totalorder %s1432_s26, 0 }
  0x30   : > { %s1268_s5 = scalar_select %p46_p6, %s1123_s14, %s48_s19  }
  0x31   : > { %p988_p8 = scmp.ne.s32.totalorder %s1258_s30, %s987_s7  ;;  %p989_p12 = pneg %p1433_p11 }
  0x32   : > { %s992_s10 = scalar_lea.hbm %s1421_s0, 5120  ;;  %p993_p1 = scmp.lt.u32.totalorder %s1258_s30, %s1421_s0 }
  0x33   : > { %p990_p13 = pnand %p989_p12, %p988_p8  ;;  %p994_p2 = scmp.lt.u32.totalorder %s992_s10, %s987_s7 }
  0x34   : > { %p996_p4 = scmp.lt.u32.totalorder %s987_s7, %s1258_s30 }
  0x35   : > { %p991_p0 = pneg %p990_p13  ;;  %p995_p5 = por %p994_p2, %p993_p1 }
  0x37   : > { %p997_p7 = por %p996_p4, %p995_p5 }
  0x39   : > { %p998_p9 = pnand %p997_p7, %p991_p0 }
  0x3b   : > { %1001 = shalt.err (!%p998_p9)
}
  0x3c   : > { %s1002_s19 = scalar_lea.vmem %s1260_s27, 1024  ;;  %s1138_s24 = smov [#allocation2]  }
  0x3d   : > { %p1003_p10 = scmp.ne.s32.totalorder %s1260_s27, %s1002_s19  ;;  %s1007_s28 = sshll.u32 %s1138_s24, 4  ;;  %s1008_s28 = int_to_ptr.vmem [resolvable:$false] %s1007_s28 }
  0x3e   : > { %s1009_s29 = scalar_lea.vmem %s1008_s28, 2048  ;;  %p1010_p8 = scmp.lt.s32.totalorder %s1260_s27, %s1008_s28 }
  0x3f   : > { %p1005_p3 = pnand %p1003_p10, %p989_p12  ;;  %p1011_p13 = scmp.lt.s32.totalorder %s1009_s29, %s1002_s19 }
  0x41   : > { %p1006_p6 = pneg %p1005_p3  ;;  %p1012_p1 = por %p1011_p13, %p1010_p8 }
  0x43   : > { %p1013_p2 = pnand %p1012_p1, %p1006_p6 }
  0x45   : > { %1016 = shalt.err (!%p1013_p2)
}
  0x46   : > { %s1139_s23 = smov 320   ;;  %s1140_s7 = smov 64  }
  0x47   : > { %s1141_s8 = smov 4   ;;  %s794_s9 = sshll.u32 %s1131_s16, 10 }
  0x48   : > { %878 = dma.hbm_to_vmem [thread:$0]  (!%p1433_p11), %s1258_s30, 1024, %s1260_s27, %s1272_s6, %s1139_s23, %s1140_s7, %s1141_s8  }
  0x49   : > { %s207_s10 = scalar_lea.vmem [#allocation5], %s1249_s12  ;;  %s1307_s24 = scalar_lea.hbm %s1422_s1, %s794_s9 }
  0x4a   : > { %s215_s22 = sshll.u32 %s207_s10, 4  ;;  %s1313_s28 = scalar_lea.sflag [#allocation6], %s203_s4  ;;  %s1309_s22 = int_to_ptr.vmem [resolvable:$true] %s215_s22 }
  0x4b   : > { %s1017_s29 = scalar_lea.hbm %s1307_s24, 1024  ;;  %s1022_s30 = scalar_lea.hbm %s1422_s1, 5120 }
  0x4c   : > { %p1018_p0 = scmp.ne.s32.totalorder %s1307_s24, %s1017_s29  ;;  %p1023_p7 = scmp.lt.u32.totalorder %s1307_s24, %s1422_s1 }
  0x4d   : > { %p1024_p9 = scmp.lt.u32.totalorder %s1022_s30, %s1017_s29  ;;  %p1026_p3 = scmp.lt.u32.totalorder %s1017_s29, %s1307_s24 }
  0x4e   : > { %p1020_p5 = pnand %p1018_p0, %p989_p12 }
  0x4f   : > { %p1025_p10 = por %p1024_p9, %p1023_p7 }
  0x50   : > { %p1021_p4 = pneg %p1020_p5 }
  0x51   : > { %p1027_p6 = por %p1026_p3, %p1025_p10 }
  0x53   : > { %p1028_p8 = pnand %p1027_p6, %p1021_p4 }
  0x55   : > { %1031 = shalt.err (!%p1028_p8)
}
  0x56   : > { %s1032_s4 = scalar_lea.vmem %s1309_s22, 1024  ;;  %s1142_s9 = smov [#allocation5]  }
  0x57   : > { %p1033_p13 = scmp.ne.s32.totalorder %s1309_s22, %s1032_s4  ;;  %s1037_s10 = sshll.u32 %s1142_s9, 4  ;;  %s1038_s10 = int_to_ptr.vmem [resolvable:$false] %s1037_s10 }
  0x58   : > { %s1039_s25 = scalar_lea.vmem %s1038_s10, 2048  ;;  %p1040_p0 = scmp.lt.s32.totalorder %s1309_s22, %s1038_s10 }
  0x59   : > { %p1035_p1 = pnand %p1033_p13, %p989_p12  ;;  %p1041_p5 = scmp.lt.s32.totalorder %s1039_s25, %s1032_s4 }
  0x5b   : > { %p1036_p2 = pneg %p1035_p1  ;;  %p1042_p7 = por %p1041_p5, %p1040_p0 }
  0x5d   : > { %p1043_p9 = pnand %p1042_p7, %p1036_p2 }
  0x5f   : > { %1046 = shalt.err (!%p1043_p9)
}
  0x60   : > { %881 = dma.hbm_to_vmem [thread:$0]  (!%p1433_p11), %s1307_s24, 1024, %s1309_s22, %s1313_s28, %s1140_s7, %s1140_s7, %s1141_s8  }
  0x61   : > { %p1434_p12 = scmp.ne.s32.totalorder %s1430_s21, 0 }
  0x62   : > { %s229_s19 = sand.u32 (!%p1434_p12), 1, %s1119_s13   ;;  %p1435_p4 = scmp.ne.s32.totalorder (!%p1434_p12), %s1429_s20, 0 }
  0x63   : > { %227 = sbr.rel (%p1434_p12) target bundleno = 421 (0x1a5), region = 32  ;;  %s768_s29 = sshll.u32 (!%p1434_p12), %s229_s19, 6 }
  0x64   : > { %s230_s12 = scalar_lea.sflag (!%p1434_p12), [#allocation3], %s229_s19  ;;  %s1345_s27 = scalar_lea.vmem (!%p1434_p12), [#allocation2], %s768_s29 }
  0x6a   : > { %1098 = dma.done.wait (%p1435_p4), %s230_s12, 1024  }
  0x6b   : > { %1100 = vsyncadd (%p1435_p4), %s230_s12, 4294966272  ;;  %s238_s26 = sand.u32 1, %s1196_s18   ;;  %s1352_s7 = scalar_lea.vmem [#allocation5], %s768_s29 }
  0x6c   : > { %s239_s30 = scalar_lea.sflag [#allocation6], %s238_s26 }
  0x6d   : > { %1102 = dma.done.wait (%p1435_p4), %s239_s30, 1024  }
  0x6e   : > { %1104 = vsyncadd (%p1435_p4), %s239_s30, 4294966272  ;;  %p1436_p11 = scmp.eq.s32.totalorder %s1196_s18, 0 }
  0x70   : > { %1106 = dma.done.wait (%p1436_p11), [#allocation6], 16   ;;  %p1437_p10 = pmov %p1436_p11 }
  0x71   : > { %p771_p3 = scmp.ne.s32.totalorder %s1127_s15, 0 }
  0x72   : > { %1108 = vsyncadd (%p1437_p10), [#allocation6], 4294967280  ;;  %v1143_v0 = vmov (!%p771_p3), 0.0  }
  0x73   : > { %276 = sbr.rel (%p771_p3) target bundleno = 123 (0x7b), region = 48  ;;  %277 = vst [vmem:[#allocation8] sm:$0xff] (!%p771_p3), %v1143_v0  ;;  %278 = vst [vmem:[#allocation8 + $0x8] sm:$0xff] (!%p771_p3), %v1143_v0 }
  0x74   : > { %279 = vst [vmem:[#allocation8 + $0x10] sm:$0xff] (!%p771_p3), %v1143_v0  ;;  %280 = vst [vmem:[#allocation8 + $0x18] sm:$0xff] (!%p771_p3), %v1143_v0 }
  0x75   : > { %281 = vst [vmem:[#allocation8 + $0x20] sm:$0xff] (!%p771_p3), %v1143_v0  ;;  %282 = vst [vmem:[#allocation8 + $0x28] sm:$0xff] (!%p771_p3), %v1143_v0 }
  0x76   : > { %283 = vst [vmem:[#allocation8 + $0x30] sm:$0xff] (!%p771_p3), %v1143_v0  ;;  %284 = vst [vmem:[#allocation8 + $0x38] sm:$0xff] (!%p771_p3), %v1143_v0 }
  0x77   : > { %285 = vst [vmem:[#allocation8 + $0x40] sm:$0xff] (!%p771_p3), %v1143_v0  ;;  %286 = vst [vmem:[#allocation8 + $0x48] sm:$0xff] (!%p771_p3), %v1143_v0 }
  0x78   : > { %287 = vst [vmem:[#allocation8 + $0x50] sm:$0xff] (!%p771_p3), %v1143_v0  ;;  %288 = vst [vmem:[#allocation8 + $0x58] sm:$0xff] (!%p771_p3), %v1143_v0 }
  0x79   : > { %289 = vst [vmem:[#allocation8 + $0x60] sm:$0xff] (!%p771_p3), %v1143_v0  ;;  %290 = vst [vmem:[#allocation8 + $0x68] sm:$0xff] (!%p771_p3), %v1143_v0 }
  0x7a   : > { %291 = vst [vmem:[#allocation8 + $0x70] sm:$0xff] %v1143_v0  ;;  %292 = vst [vmem:[#allocation8 + $0x78] sm:$0xff] %v1143_v0 }
  0x7b PF: > { %v943_v1 = vld [vmem:[%s1352_s7] sm:$0xff]   ;;  %v944_v2 = vld [vmem:[%s1352_s7 + $0x8] sm:$0xff]   ;;  %v945_v3 = vld [vmem:[%s1352_s7 + $0x10] sm:$0xff]   ;;  %p788_p6 = scmp.ne.s32.totalorder %s1127_s15, 4 }
  0x7c   : > { %811 = vmatprep.subr.bf16.mxu0 %v943_v1  ;;  %843 = vmatprep.subr.bf16.mxu1 %v943_v1  ;;  %v946_v4 = vld [vmem:[%s1352_s7 + $0x18] sm:$0xff]   ;;  %v951_v5 = vld [vmem:[%s1345_s27] sm:$0xff]   ;;  %v948_v8 = vld [vmem:[%s1352_s7 + $0x28] sm:$0xff]  }
  0x7d   : > { %812 = vmatpush3.bf16.msra.mxu0 %v943_v1  ;;  %851 = vmatpush3.bf16.msra.mxu1 %v943_v1  ;;  %v952_v6 = vld [vmem:[%s1345_s27 + $0x20] sm:$0xff]   ;;  %v949_v9 = vld [vmem:[%s1352_s7 + $0x30] sm:$0xff]   ;;  %v950_v10 = vld [vmem:[%s1352_s7 + $0x38] sm:$0xff]  }
  0x7e   : > { %813 = vmatprep.subr.bf16.mxu0 %v944_v2  ;;  %844 = vmatprep.subr.bf16.mxu1 %v944_v2  ;;  %v947_v7 = vld [vmem:[%s1352_s7 + $0x20] sm:$0xff]   ;;  %v953_v11 = vld [vmem:[%s1345_s27 + $0x8] sm:$0xff]   ;;  %v955_v13 = vld [vmem:[%s1345_s27 + $0x10] sm:$0xff]  }
  0x7f   : > { %827 = vmatprep.mubr.bf16.mxu0 %v951_v5  ;;  %835 = vmatprep.mubr.bf16.mxu1 %v952_v6  ;;  %v954_v12 = vld [vmem:[%s1345_s27 + $0x28] sm:$0xff]   ;;  %v956_v14 = vld [vmem:[%s1345_s27 + $0x30] sm:$0xff]   ;;  %v957_v15 = vld [vmem:[%s1345_s27 + $0x18] sm:$0xff]  }
  0x80   : > { %v958_v16 = vld [vmem:[%s1345_s27 + $0x38] sm:$0xff]   ;;  %v293_v19 = vld [vmem:[#allocation8] sm:$0xff]  ;;  %v294_v29 = vld [vmem:[#allocation8 + $0x8] sm:$0xff] }
  0x81   : > { %814 = vmatpush3.bf16.msra.mxu0 %v944_v2  ;;  %852 = vmatpush3.bf16.msra.mxu1 %v944_v2  ;;  %v295_v17 = vld [vmem:[#allocation8 + $0x10] sm:$0xff]  ;;  %v301_v20 = vld [vmem:[#allocation8 + $0x40] sm:$0xff]  ;;  %v296_v23 = vld [vmem:[#allocation8 + $0x18] sm:$0xff] }
  0x82   : > { %815 = vmatprep.subr.bf16.mxu0 %v945_v3  ;;  %845 = vmatprep.subr.bf16.mxu1 %v945_v3  ;;  %v303_v18 = vld [vmem:[#allocation8 + $0x50] sm:$0xff]  ;;  %v304_v24 = vld [vmem:[#allocation8 + $0x58] sm:$0xff]  ;;  %v302_v30 = vld [vmem:[#allocation8 + $0x48] sm:$0xff] }
  0x83   : > { %v299_v41 = vld [vmem:[#allocation8 + $0x30] sm:$0xff]  ;;  %v297_v43 = vld [vmem:[#allocation8 + $0x20] sm:$0xff]  ;;  %v300_v47 = vld [vmem:[#allocation8 + $0x38] sm:$0xff] }
  0x84   : > { %v307_v42 = vld [vmem:[#allocation8 + $0x70] sm:$0xff]  ;;  %v305_v44 = vld [vmem:[#allocation8 + $0x60] sm:$0xff]  ;;  %v308_v48 = vld [vmem:[#allocation8 + $0x78] sm:$0xff] }
  0x85   : > { %816 = vmatpush3.bf16.msra.mxu0 %v945_v3  ;;  %853 = vmatpush3.bf16.msra.mxu1 %v945_v3  ;;  %v298_v53 = vld [vmem:[#allocation8 + $0x28] sm:$0xff]  ;;  %v789_v2 = vld [vmem:[#allocation7] ss:$0 sm:$0xff] (!%p788_p6) }
  0x86   : > { %817 = vmatprep.subr.bf16.mxu0 %v946_v4  ;;  %846 = vmatprep.subr.bf16.mxu1 %v946_v4  ;;  %v306_v54 = vld [vmem:[#allocation8 + $0x68] sm:$0xff] }
  0x89   : > { %818 = vmatpush3.bf16.msra.mxu0 %v946_v4  ;;  %854 = vmatpush3.bf16.msra.mxu1 %v946_v4 }
  0x8a   : > { %819 = vmatprep.subr.bf16.mxu0 %v947_v7  ;;  %847 = vmatprep.subr.bf16.mxu1 %v947_v7 }
  0x8d   : > { %820 = vmatpush3.bf16.msra.mxu0 %v947_v7  ;;  %855 = vmatpush3.bf16.msra.mxu1 %v947_v7 }
  0x8e   : > { %821 = vmatprep.subr.bf16.mxu0 %v948_v8  ;;  %848 = vmatprep.subr.bf16.mxu1 %v948_v8 }
  0x91   : > { %822 = vmatpush3.bf16.msra.mxu0 %v948_v8  ;;  %856 = vmatpush3.bf16.msra.mxu1 %v948_v8 }
  0x92   : > { %823 = vmatprep.subr.bf16.mxu0 %v949_v9  ;;  %849 = vmatprep.subr.bf16.mxu1 %v949_v9 }
  0x95   : > { %824 = vmatpush3.bf16.msra.mxu0 %v949_v9  ;;  %857 = vmatpush3.bf16.msra.mxu1 %v949_v9 }
  0x96   : > { %825 = vmatprep.subr.bf16.mxu0 %v950_v10  ;;  %850 = vmatprep.subr.bf16.mxu1 %v950_v10 }
  0x99   : > { %826 = vmatpush3.bf16.msra.mxu0 %v950_v10  ;;  %858 = vmatpush3.bf16.msra.mxu1 %v950_v10 }
  0x9c   : > { %828 = vmatmul.mubr.bf16.vlgmr.msra.gmra.mrb[0].mxu0 %v953_v11  ;;  %836 = vmatmul.mubr.bf16.vlgmr.msra.gmra.mrb[0].mxu1 %v954_v12 }
  0x9d   : > { %831 = vmatprep.mubr.bf16.mxu0 %v955_v13  ;;  %839 = vmatprep.mubr.bf16.mxu1 %v956_v14 }
  0xa4   : > { %832 = vmatmul.mubr.bf16.gmra.mrb[4].mxu0 %v957_v15  ;;  %840 = vmatmul.mubr.bf16.gmra.mrb[4].mxu1 %v958_v16 }
 0x16f   : > { %v829_v21 = vpop.f32.mrb[0].mxu0  ;;  %v837_v22 = vpop.f32.mrb[0].mxu1 }
 0x170   : > { %v536_v25 = vadd.f32 %v829_v21, %v295_v17  ;;  %v544_v26 = vadd.f32 %v837_v22, %v303_v18  ;;  %v471_v27 = vpop.f32.mrb[1].mxu0  ;;  %v503_v28 = vpop.f32.mrb[1].mxu1 }
 0x171   : > { %v534_v31 = vadd.f32 %v471_v27, %v293_v19  ;;  %v542_v32 = vadd.f32 %v503_v28, %v301_v20  ;;  %v830_v33 = vpop.f32.mrb[2].mxu0  ;;  %v838_v34 = vpop.f32.mrb[2].mxu1 }
 0x172   : > { %552 = vst [vmem:[#allocation8 + $0x10] sm:$0xff] %v536_v25  ;;  %560 = vst [vmem:[#allocation8 + $0x50] sm:$0xff] %v544_v26  ;;  %v537_v35 = vadd.f32 %v830_v33, %v296_v23  ;;  %v545_v36 = vadd.f32 %v838_v34, %v304_v24  ;;  %v474_v37 = vpop.f32.mrb[3].mxu0  ;;  %v506_v38 = vpop.f32.mrb[3].mxu1 }
 0x173   : > { %550 = vst [vmem:[#allocation8] sm:$0xff] %v534_v31  ;;  %558 = vst [vmem:[#allocation8 + $0x40] sm:$0xff] %v542_v32  ;;  %v535_v39 = vadd.f32 %v474_v37, %v294_v29  ;;  %v543_v40 = vadd.f32 %v506_v38, %v302_v30 }
 0x174   : > { %553 = vst [vmem:[#allocation8 + $0x18] sm:$0xff] %v537_v35  ;;  %561 = vst [vmem:[#allocation8 + $0x58] sm:$0xff] %v545_v36 }
 0x175   : > { %551 = vst [vmem:[#allocation8 + $0x8] sm:$0xff] %v535_v39  ;;  %559 = vst [vmem:[#allocation8 + $0x48] sm:$0xff] %v543_v40 }
 0x177   : > { %v833_v45 = vpop.f32.mrb[4].mxu0  ;;  %v841_v46 = vpop.f32.mrb[4].mxu1  ;;  %569 = sbr.rel (%p788_p6) target bundleno = 395 (0x18b), region = 52 }
 0x178   : > { %v540_v49 = vadd.f32 %v833_v45, %v299_v41  ;;  %v548_v50 = vadd.f32 %v841_v46, %v307_v42  ;;  %v487_v51 = vpop.f32.mrb[5].mxu0  ;;  %v519_v52 = vpop.f32.mrb[5].mxu1 }
 0x179   : > { %v538_v55 = vadd.f32 %v487_v51, %v297_v43  ;;  %v546_v56 = vadd.f32 %v519_v52, %v305_v44  ;;  %v834_v57 = vpop.f32.mrb[6].mxu0  ;;  %v842_v58 = vpop.f32.mrb[6].mxu1  ;;  %v572_v6 = vld [vmem:[#allocation8 + $0x10] sm:$0xff] (!%p788_p6) }
 0x17a   : > { %556 = vst [vmem:[#allocation8 + $0x30] sm:$0xff] %v540_v49  ;;  %564 = vst [vmem:[#allocation8 + $0x70] sm:$0xff] %v548_v50  ;;  %v541_v59 = vadd.f32 %v834_v57, %v300_v47  ;;  %v549_v60 = vadd.f32 %v842_v58, %v308_v48  ;;  %v490_v61 = vpop.f32.mrb[7].mxu0  ;;  %v522_v62 = vpop.f32.mrb[7].mxu1  ;;  %v570_v1 = vld [vmem:[#allocation8] sm:$0xff] (!%p788_p6)  ;;  %v595_v9 = vadd.f32 (!%p788_p6), %v789_v2, %v572_v6  ;;  %v580_v21 = vld [vmem:[#allocation8 + $0x50] sm:$0xff] (!%p788_p6) }
 0x17b   : > { %554 = vst [vmem:[#allocation8 + $0x20] sm:$0xff] %v538_v55  ;;  %562 = vst [vmem:[#allocation8 + $0x60] sm:$0xff] %v546_v56  ;;  %v539_v63 = vadd.f32 %v490_v61, %v298_v53  ;;  %v547_v0 = vadd.f32 %v522_v62, %v306_v54  ;;  %v593_v4 = vadd.f32 (!%p788_p6), %v789_v2, %v570_v1  ;;  %v573_v7 = vld [vmem:[#allocation8 + $0x18] sm:$0xff] (!%p788_p6)  ;;  %v578_v19 = vld [vmem:[#allocation8 + $0x40] sm:$0xff] (!%p788_p6) }
 0x17c   : > { %557 = vst [vmem:[#allocation8 + $0x38] sm:$0xff] %v541_v59  ;;  %565 = vst [vmem:[#allocation8 + $0x78] sm:$0xff] %v549_v60  ;;  %v571_v3 = vld [vmem:[#allocation8 + $0x8] sm:$0xff] (!%p788_p6)  ;;  %v596_v10 = vadd.f32 (!%p788_p6), %v789_v2, %v573_v7  ;;  %v611_v22 = vmax.f32 (!%p788_p6), %v595_v9, 0.0  ;;  %v581_v26 = vld [vmem:[#allocation8 + $0x58] sm:$0xff] (!%p788_p6)  ;;  %v601_v31 = vadd.f32 (!%p788_p6), %v789_v2, %v578_v19  ;;  %v603_v36 = vadd.f32 (!%p788_p6), %v789_v2, %v580_v21 }
 0x17d   : > { %555 = vst [vmem:[#allocation8 + $0x28] sm:$0xff] %v539_v63  ;;  %563 = vst [vmem:[#allocation8 + $0x68] sm:$0xff] %v547_v0  ;;  %v594_v5 = vadd.f32 (!%p788_p6), %v789_v2, %v571_v3  ;;  %v609_v15 = vmax.f32 (!%p788_p6), %v593_v4, 0.0  ;;  %v579_v20 = vld [vmem:[#allocation8 + $0x48] sm:$0xff] (!%p788_p6)  ;;  %v604_v37 = vadd.f32 (!%p788_p6), %v789_v2, %v581_v26 }
 0x17e   : > { %v612_v23 = vmax.f32 %v596_v10, 0.0  ;;  %v602_v32 = vadd.f32 %v789_v2, %v579_v20  ;;  %627 = vst [vmem:[#allocation8 + $0x10] sm:$0xff] %v611_v22  ;;  %v617_v39 = vmax.f32 %v601_v31, 0.0  ;;  %v619_v43 = vmax.f32 %v603_v36, 0.0 }
 0x17f   : > { %v610_v16 = vmax.f32 %v594_v5, 0.0  ;;  %625 = vst [vmem:[#allocation8] sm:$0xff] %v609_v15  ;;  %v620_v44 = vmax.f32 %v604_v37, 0.0 }
 0x180   : > { %628 = vst [vmem:[#allocation8 + $0x18] sm:$0xff] %v612_v23  ;;  %v618_v40 = vmax.f32 %v602_v32, 0.0  ;;  %633 = vst [vmem:[#allocation8 + $0x40] sm:$0xff] %v617_v39 }
 0x181   : > { %v576_v13 = vld [vmem:[#allocation8 + $0x30] sm:$0xff]  ;;  %626 = vst [vmem:[#allocation8 + $0x8] sm:$0xff] %v610_v16  ;;  %635 = vst [vmem:[#allocation8 + $0x50] sm:$0xff] %v619_v43 }
 0x182   : > { %v574_v8 = vld [vmem:[#allocation8 + $0x20] sm:$0xff]  ;;  %v599_v18 = vadd.f32 %v789_v2, %v576_v13  ;;  %v584_v33 = vld [vmem:[#allocation8 + $0x70] sm:$0xff]  ;;  %634 = vst [vmem:[#allocation8 + $0x48] sm:$0xff] %v618_v40  ;;  %636 = vst [vmem:[#allocation8 + $0x58] sm:$0xff] %v620_v44 }
 0x183   : > { %v597_v11 = vadd.f32 %v789_v2, %v574_v8  ;;  %v577_v14 = vld [vmem:[#allocation8 + $0x38] sm:$0xff]  ;;  %v582_v27 = vld [vmem:[#allocation8 + $0x60] sm:$0xff]  ;;  %v607_v42 = vadd.f32 %v789_v2, %v584_v33 }
 0x184   : > { %v575_v12 = vld [vmem:[#allocation8 + $0x28] sm:$0xff]  ;;  %v600_v25 = vadd.f32 %v789_v2, %v577_v14  ;;  %v615_v30 = vmax.f32 %v599_v18, 0.0  ;;  %v585_v34 = vld [vmem:[#allocation8 + $0x78] sm:$0xff]  ;;  %v605_v38 = vadd.f32 %v789_v2, %v582_v27 }
 0x185   : > { %v598_v17 = vadd.f32 %v789_v2, %v575_v12  ;;  %v613_v24 = vmax.f32 %v597_v11, 0.0  ;;  %v583_v28 = vld [vmem:[#allocation8 + $0x68] sm:$0xff]  ;;  %v608_v46 = vadd.f32 %v789_v2, %v585_v34  ;;  %v623_v48 = vmax.f32 %v607_v42, 0.0 }
 0x186   : > { %v616_v35 = vmax.f32 %v600_v25, 0.0  ;;  %631 = vst [vmem:[#allocation8 + $0x30] sm:$0xff] %v615_v30  ;;  %v606_v41 = vadd.f32 %v789_v2, %v583_v28  ;;  %v621_v45 = vmax.f32 %v605_v38, 0.0 }
 0x187   : > { %v614_v29 = vmax.f32 %v598_v17, 0.0  ;;  %629 = vst [vmem:[#allocation8 + $0x20] sm:$0xff] %v613_v24  ;;  %v624_v49 = vmax.f32 %v608_v46, 0.0  ;;  %639 = vst [vmem:[#allocation8 + $0x70] sm:$0xff] %v623_v48 }
 0x188   : > { %632 = vst [vmem:[#allocation8 + $0x38] sm:$0xff] %v616_v35  ;;  %v622_v47 = vmax.f32 %v606_v41, 0.0  ;;  %637 = vst [vmem:[#allocation8 + $0x60] sm:$0xff] %v621_v45 }
 0x189   : > { %630 = vst [vmem:[#allocation8 + $0x28] sm:$0xff] %v614_v29  ;;  %640 = vst [vmem:[#allocation8 + $0x78] sm:$0xff] %v624_v49 }
 0x18a   : > { %638 = vst [vmem:[#allocation8 + $0x68] sm:$0xff] %v622_v47 }
 0x18b PF: > { %p885_p8 = scmp.eq.s32.totalorder %s1196_s18, 4  ;;  %s1144_s15 = smov [#allocation8]  }
 0x18c   : > { %s651_s20 = sshll.u32 %s1144_s15, 4  ;;  %s652_s20 = int_to_ptr.vmem [resolvable:$true] %s651_s20 }
 0x18d   : > { %s1047_s21 = scalar_lea.vmem %s652_s20, 2048  ;;  %p1054_p0 = scmp.lt.s32.totalorder %s652_s20, %s652_s20 }
 0x18e   : > { %p1048_p13 = scmp.ne.s32.totalorder %s652_s20, %s1047_s21  ;;  %p1055_p5 = scmp.lt.s32.totalorder %s1047_s21, %s1047_s21 }
 0x190   : > { %p1049_p1 = pnand %p1048_p13, %p885_p8  ;;  %p1056_p7 = por %p1055_p5, %p1054_p0 }
 0x192   : > { %p1050_p2 = pneg %p1049_p1 }
 0x194   : > { %p1057_p9 = pnand %p1056_p7, %p1050_p2 }
 0x196   : > { %1060 = shalt.err (!%p1057_p9)
}
 0x197   : > { %s1061_s24 = scalar_lea.hbm %s1424_s3, 2048 }
 0x198   : > { %p1062_p12 = scmp.ne.s32.totalorder %s1424_s3, %s1061_s24  ;;  %p1067_p10 = scmp.lt.u32.totalorder %s1061_s24, %s1424_s3 }
 0x19a   : > { %p1063_p4 = pnand %p1062_p12, %p885_p8 }
 0x19c   : > { %p1064_p11 = pneg %p1063_p4 }
 0x19e   : > { %p1069_p3 = pnand %p1067_p10, %p1064_p11 }
 0x1a0   : > { %1072 = shalt.err (!%p1069_p3)
}
 0x1a1   : > { %s1145_s9 = smov 128   ;;  %s1146_s10 = smov 8  }
 0x1a2   : > { %868 = dma.vmem_to_hbm [thread:$0]  (%p885_p8), %s652_s20, 2048, %s1424_s3, [#allocation4], %s1145_s9, %s1145_s9, %s1146_s10  }
 0x1a3   : > { %1110 = dma.done.wait (%p885_p8), [#allocation4], 2048  }
 0x1a4   : > { %1112 = vsyncadd (%p885_p8), [#allocation4], 4294965248 }
 0x1a5 PF: > { %s20_s17 = sadd.s32 1, %s1135_s17   ;;  %s1438_s12 = smov %s1119_s13 }
 0x1a6   : > { %p17_p6 = scmp.ge.s32.totalorder %s20_s17, 7   ;;  %s1439_s13 = smov %s1123_s14 }
 0x1a7   : > { %s1440_s14 = smov %s1268_s5  ;;  %s1441_s15 = smov %s1131_s16 }
 0x1a8   : > { %s1442_s16 = smov %s1444_s11  ;;  %19 = sbr.rel (!%p17_p6) target bundleno = 7 (0x7), region = 96 }
 0x1af   :  { %667 = vsyncpa [#allocation3], 1 }
 0x1b0   :  { %669 = vsyncpa [#allocation3 + $0x1], 1 }
 0x1b1   :  { %670 = vsyncpa [#allocation6], 1 }
 0x1b2   :  { %672 = vsyncpa [#allocation6 + $0x1], 1 }
 0x1b3   :  { %673 = vsyncpa [#allocation4], 1 }
 0x1b4   :  { %675 = vsyncpa [#allocation4 + $0x1], 1 }

// kernel: e2e_cnn_forward.25
= control target key start
LH: loop header
LB: loop body
LE: loop exit
PB: predicated region body
PF: predicated region fallthrough
CT: control target
= control target key end

     0   :  { %s1617_s0 = inlined_call_operand.hbm [shape: bf16[128,640], index: 0, kind: input, shape index: {}]   ;;  %s1618_s1 = inlined_call_operand.hbm [shape: bf16[640,128], index: 1, kind: input, shape index: {}]   ;;  %s1619_s2 = inlined_call_operand.hbm [shape: f32[1,128], index: 2, kind: input, shape index: {}]   ;;  %s1620_s3 = inlined_call_operand.hbm [shape: f32[128,128], index: 3, kind: input, shape index: {}]   ;;  %s1621_s4 = inlined_call_operand.hbm [shape: f32[128,128], index: 4, kind: output, shape index: {}]  }
   0x1   :  { %1626 = sst [smem:[#allocation16_spill]] %s1617_s0 }
   0x2   :  { %9 = vsyncpa [#allocation3], 0 }
   0x3   :  { %11 = vsyncpa [#allocation3 + $0x1], 0 }
   0x4   :  { %12 = vsyncpa [#allocation6], 0 }
   0x5   :  { %14 = vsyncpa [#allocation6 + $0x1], 0 }
   0x6   :  { %15 = vsyncpa [#allocation9], 0 }
   0x7   :  { %16 = vsyncpa [#allocation4], 0  ;;  %s1321_s15 = smov 0   ;;  %s1323_s16 = smov 0  }
   0x8   :  { %s1325_s17 = smov 0   ;;  %s1327_s18 = smov 0  }
   0x9   :  { %s1329_s19 = smov 0   ;;  %s1331_s20 = smov 0  }
   0xa LB: > { %s1350_s21 = sadd.s32 4294967295, %s1281_s20   ;;  %s50_s22 = sadd.s32 1, %s1269_s17  ;;  %s1281_s20 = sphi %s1331_s20, %s22_s20   ;;  %s1277_s19 = sphi %s1329_s19, %s1644_s19   ;;  %s1273_s18 = sphi %s1327_s18, %s1643_s18   ;;  %s1269_s17 = sphi %s1325_s17, %s1642_s17   ;;  %s1265_s16 = sphi %s1323_s16, %s1641_s16   ;;  %s1261_s15 = sphi %s1321_s15, %s1640_s15  }
   0xb   : > { %p57_p0 = scmp.ne.s32.totalorder %s1269_s17, %s1265_s16  ;;  %p58_p1 = scmp.eq.s32.totalorder %s1281_s20, 0 }
   0xc   : > { %p63_p2 = scmp.ne.s32.totalorder %s1265_s16, %s1261_s15  ;;  %p1622_p3 = scmp.eq.s32.totalorder %s1350_s21, 0 }
   0xd   : > { %p59_p4 = por %p58_p1, %p57_p0  ;;  %p859_p5 = scmp.ge.s32.totalorder %s1281_s20, 1 }
   0xe   : > { %p1361_p6 = por %p1622_p3, %p63_p2  ;;  %p184_p7 = scmp.lt.s32.totalorder %s1281_s20, 6 }
   0xf   : > { %s1283_s25 = smov [#allocation7]   ;;  %p993_p10 = scmp.lt.s32.totalorder %s1281_s20, 5 }
  0x10   : > { %s1627_s23 = scalar_select %p1361_p6, 1, 0 }
  0x11   : > { %p1366_p8 = pnand %p859_p5, %p184_p7  ;;  %s199_s26 = sshll.u32 %s1283_s25, 4  ;;  %s200_s26 = int_to_ptr.vmem [resolvable:$true] %s199_s26 }
  0x12   : > { %p1379_p12 = pnand %p993_p10, %p59_p4  ;;  %s1284_s29 = smov [#allocation8]  }
  0x13   : > { %s1628_s24 = scalar_select %p1366_p8, 1, 0 }
  0x14   : > { %p977_p9 = pneg %p1366_p8  ;;  %s213_s30 = sshll.u32 %s1284_s29, 4  ;;  %s214_s30 = int_to_ptr.vmem [resolvable:$true] %s213_s30 }
  0x15   : > { %s1630_s28 = scalar_select %p1379_p12, 1, 0 }
  0x16   : > { %p1375_p11 = pnand %p977_p9, %p1622_p3  ;;  %s1073_s7 = scalar_lea.hbm %s1619_s2, 16 }
  0x17   : > { %p1074_p13 = scmp.ne.s32.totalorder %s1619_s2, %s1073_s7  ;;  %p1080_p4 = scmp.lt.u32.totalorder %s1073_s7, %s1619_s2 }
  0x18   : > { %p1075_p0 = pneg %p1375_p11 }
  0x1a   : > { %p1076_p1 = pnand %p1075_p0, %p1074_p13 }
  0x1c   : > { %p1077_p2 = pneg %p1076_p1 }
  0x1e   : > { %p1082_p5 = pnand %p1080_p4, %p1077_p2 }
  0x20   : > { %1085 = shalt.err (!%p1082_p5)
}
  0x21   : > { %s1086_s12 = scalar_lea.vmem %s200_s26, 16  ;;  %s1093_s13 = scalar_lea.vmem %s200_s26, 32 }
  0x22   : > { %p1087_p7 = scmp.ne.s32.totalorder %s200_s26, %s1086_s12  ;;  %p1094_p3 = scmp.lt.s32.totalorder %s200_s26, %s200_s26 }
  0x23   : > { %p1095_p6 = scmp.lt.s32.totalorder %s1093_s13, %s1086_s12 }
  0x24   : > { %p1089_p9 = pnand %p1087_p7, %p1075_p0 }
  0x25   : > { %p1096_p8 = por %p1095_p6, %p1094_p3 }
  0x26   : > { %p1090_p10 = pneg %p1089_p9 }
  0x28   : > { %p1097_p12 = pnand %p1096_p8, %p1090_p10 }
  0x2a   : > { %1100 = shalt.err (!%p1097_p12)
}
  0x2b   : > { %980 = dma.hbm_to_vmem [thread:$0]  (!%p1375_p11), %s1619_s2, 16, %s200_s26, [#allocation6]  }
  0x2c   : > { %s1101_s5 = scalar_lea.hbm %s1620_s3, 2048 }
  0x2d   : > { %p1102_p13 = scmp.ne.s32.totalorder %s1620_s3, %s1101_s5  ;;  %p1108_p8 = scmp.lt.u32.totalorder %s1101_s5, %s1620_s3 }
  0x2f   : > { %p1104_p3 = pnand %p1102_p13, %p1075_p0 }
  0x31   : > { %p1105_p6 = pneg %p1104_p3 }
  0x33   : > { %p1110_p12 = pnand %p1108_p8, %p1105_p6 }
  0x35   : > { %1113 = shalt.err (!%p1110_p12)
}
  0x36   : > { %s1114_s26 = scalar_lea.vmem %s214_s30, 2048  ;;  %p1122_p5 = scmp.lt.s32.totalorder %s214_s30, %s214_s30 }
  0x37   : > { %p1115_p1 = scmp.ne.s32.totalorder %s214_s30, %s1114_s26  ;;  %p1123_p7 = scmp.lt.s32.totalorder %s1114_s26, %s1114_s26 }
  0x39   : > { %p1117_p2 = pnand %p1115_p1, %p1075_p0  ;;  %p1124_p9 = por %p1123_p7, %p1122_p5 }
  0x3b   : > { %p1118_p4 = pneg %p1117_p2 }
  0x3d   : > { %p1125_p10 = pnand %p1124_p9, %p1118_p4 }
  0x3f   : > { %1128 = shalt.err (!%p1125_p10)
}
  0x40   : > { %s1285_s10 = smov 128   ;;  %s1286_s11 = smov 8  }
  0x41   : > { %983 = dma.hbm_to_vmem [thread:$0]  (!%p1375_p11), %s1620_s3, 2048, %s214_s30, [#allocation9], %s1285_s10, %s1285_s10, %s1286_s11  }
  0x42   : > { %s227_s14 = sand.u32 1, %s1269_s17   ;;  %s34_s15 = sadd.s32 1, %s1277_s19 }
  0x43   : > { %p35_p0 = scmp.ge.s32.totalorder %s34_s15, 5  ;;  %s1427_s25 = sshll.u32 %s227_s14, 6 }
  0x44   : > { %s864_s29 = sshll.u32 %s1277_s19, 6  ;;  %s1631_s0 = sld [smem:[#allocation16_spill]] }
  0x45   : > { %s1646_s15 = smov (%p35_p0, %s34_s15), 0  ;;  %s231_s30 = scalar_lea.vmem [#allocation2], %s1427_s25 }
  0x46   : > { %s240_s7 = sshll.u32 %s231_s30, 4  ;;  %s46_s8 = ssub.s32 %s1277_s19, %s1646_s15  ;;  %s1440_s7 = int_to_ptr.vmem [resolvable:$true] %s240_s7 }
  0x47   : > { %p48_p11 = scmp.eq.s32.totalorder %s46_s8, 0  ;;  %s1447_s26 = scalar_lea.sflag [#allocation3], %s227_s14 }
  0x48   : > { %p1632_p3 = scmp.ne.s32.totalorder %s1630_s28, 0 }
  0x49   : > { %s1445_s9 = scalar_select %p48_p11, %s1269_s17, %s50_s22  }
  0x4a   : > { %s1435_s27 = scalar_lea.hbm %s1631_s0, %s864_s29  ;;  %p1131_p6 = pneg %p1632_p3 }
  0x4b   : > { %s1129_s10 = scalar_lea.hbm %s1435_s27, 1024  ;;  %s1134_s13 = scalar_lea.hbm %s1631_s0, 5120 }
  0x4c   : > { %p1130_p13 = scmp.ne.s32.totalorder %s1435_s27, %s1129_s10  ;;  %p1135_p1 = scmp.lt.u32.totalorder %s1435_s27, %s1631_s0 }
  0x4d   : > { %p1136_p2 = scmp.lt.u32.totalorder %s1134_s13, %s1129_s10  ;;  %p1138_p5 = scmp.lt.u32.totalorder %s1129_s10, %s1435_s27 }
  0x4e   : > { %p1132_p8 = pnand %p1131_p6, %p1130_p13 }
  0x4f   : > { %p1137_p4 = por %p1136_p2, %p1135_p1 }
  0x50   : > { %p1133_p12 = pneg %p1132_p8 }
  0x51   : > { %p1139_p7 = por %p1138_p5, %p1137_p4 }
  0x53   : > { %p1140_p9 = pnand %p1139_p7, %p1133_p12 }
  0x55   : > { %1143 = shalt.err (!%p1140_p9)
}
  0x56   : > { %s1144_s22 = scalar_lea.vmem %s1440_s7, 1024  ;;  %s1287_s14 = smov [#allocation2]  }
  0x57   : > { %p1145_p10 = scmp.ne.s32.totalorder %s1440_s7, %s1144_s22  ;;  %s1149_s6 = sshll.u32 %s1287_s14, 4  ;;  %s1150_s6 = int_to_ptr.vmem [resolvable:$false] %s1149_s6 }
  0x58   : > { %s1151_s30 = scalar_lea.vmem %s1150_s6, 2048  ;;  %p1152_p13 = scmp.lt.s32.totalorder %s1440_s7, %s1150_s6 }
  0x59   : > { %p1147_p0 = pnand %p1145_p10, %p1131_p6  ;;  %p1153_p8 = scmp.lt.s32.totalorder %s1151_s30, %s1144_s22 }
  0x5b   : > { %p1148_p11 = pneg %p1147_p0  ;;  %p1154_p1 = por %p1153_p8, %p1152_p13 }
  0x5d   : > { %p1155_p2 = pnand %p1154_p1, %p1148_p11 }
  0x5f   : > { %1158 = shalt.err (!%p1155_p2)
}
  0x60   : > { %s1288_s8 = smov 320   ;;  %s1289_s10 = smov 64  }
  0x61   : > { %s1290_s11 = smov 4   ;;  %s250_s12 = sand.u32 1, %s1281_s20  }
  0x62   : > { %987 = dma.hbm_to_vmem [thread:$0]  (!%p1632_p3), %s1435_s27, 1024, %s1440_s7, %s1447_s26, %s1288_s8, %s1289_s10, %s1290_s11  }
  0x63   : > { %s896_s13 = sshll.u32 %s1277_s19, 10  ;;  %s254_s14 = scalar_lea.vmem [#allocation5], %s1427_s25 }
  0x64   : > { %s1482_s22 = scalar_lea.hbm %s1618_s1, %s896_s13  ;;  %s262_s6 = sshll.u32 %s254_s14, 4  ;;  %s1485_s6 = int_to_ptr.vmem [resolvable:$true] %s262_s6 }
  0x65   : > { %s1487_s30 = scalar_lea.sflag [#allocation6], %s250_s12  ;;  %s1159_s0 = scalar_lea.hbm %s1482_s22, 1024 }
  0x66   : > { %p1160_p12 = scmp.ne.s32.totalorder %s1482_s22, %s1159_s0  ;;  %s1164_s26 = scalar_lea.hbm %s1618_s1, 5120 }
  0x67   : > { %p1165_p7 = scmp.lt.u32.totalorder %s1482_s22, %s1618_s1  ;;  %p1166_p9 = scmp.lt.u32.totalorder %s1164_s26, %s1159_s0 }
  0x68   : > { %p1162_p4 = pnand %p1160_p12, %p1131_p6  ;;  %p1168_p0 = scmp.lt.u32.totalorder %s1159_s0, %s1482_s22 }
  0x69   : > { %p1167_p10 = por %p1166_p9, %p1165_p7 }
  0x6a   : > { %p1163_p5 = pneg %p1162_p4 }
  0x6b   : > { %p1169_p11 = por %p1168_p0, %p1167_p10 }
  0x6d   : > { %p1170_p13 = pnand %p1169_p11, %p1163_p5 }
  0x6f   : > { %1173 = shalt.err (!%p1170_p13)
}
  0x70   : > { %s1174_s25 = scalar_lea.vmem %s1485_s6, 1024  ;;  %s1291_s12 = smov [#allocation5]  }
  0x71   : > { %p1175_p8 = scmp.ne.s32.totalorder %s1485_s6, %s1174_s25  ;;  %s1179_s29 = sshll.u32 %s1291_s12, 4  ;;  %s1180_s29 = int_to_ptr.vmem [resolvable:$false] %s1179_s29 }
  0x72   : > { %s1181_s5 = scalar_lea.vmem %s1180_s29, 2048  ;;  %p1182_p12 = scmp.lt.s32.totalorder %s1485_s6, %s1180_s29 }
  0x73   : > { %p1177_p1 = pnand %p1175_p8, %p1131_p6  ;;  %p1183_p4 = scmp.lt.s32.totalorder %s1181_s5, %s1174_s25 }
  0x75   : > { %p1178_p2 = pneg %p1177_p1  ;;  %p1184_p7 = por %p1183_p4, %p1182_p12 }
  0x77   : > { %p1185_p9 = pnand %p1184_p7, %p1178_p2 }
  0x79   : > { %1188 = shalt.err (!%p1185_p9)
}
  0x7a   : > { %990 = dma.hbm_to_vmem [thread:$0]  (!%p1632_p3), %s1482_s22, 1024, %s1485_s6, %s1487_s30, %s1289_s10, %s1289_s10, %s1290_s11  }
  0x7b   : > { %p1633_p6 = scmp.ne.s32.totalorder %s1628_s24, 0 }
  0x7c   : > { %s276_s0 = sand.u32 (!%p1633_p6), 1, %s1265_s16   ;;  %p1634_p5 = scmp.ne.s32.totalorder (!%p1633_p6), %s1627_s23, 0 }
  0x7d   : > { %274 = sbr.rel (%p1633_p6) target bundleno = 452 (0x1c4), region = 36  ;;  %s869_s14 = sshll.u32 (!%p1633_p6), %s276_s0, 6 }
  0x7e   : > { %s277_s27 = scalar_lea.sflag (!%p1633_p6), [#allocation3], %s276_s0  ;;  %s1519_s7 = scalar_lea.vmem (!%p1633_p6), [#allocation2], %s869_s14 }
  0x84   : > { %1240 = dma.done.wait (%p1634_p5), %s277_s27, 1024  }
  0x85   : > { %1242 = vsyncadd (%p1634_p5), %s277_s27, 4294966272  ;;  %s285_s28 = sand.u32 1, %s1350_s21   ;;  %s1526_s10 = scalar_lea.vmem [#allocation5], %s869_s14 }
  0x86   : > { %s286_s26 = scalar_lea.sflag [#allocation6], %s285_s28 }
  0x87   : > { %1244 = dma.done.wait (%p1634_p5), %s286_s26, 1024  }
  0x88   : > { %1246 = vsyncadd (%p1634_p5), %s286_s26, 4294966272  ;;  %p1635_p3 = scmp.eq.s32.totalorder %s1350_s21, 0 }
  0x8a   : > { %1248 = dma.done.wait (%p1635_p3), [#allocation6], 16   ;;  %p1636_p10 = pmov %p1635_p3 }
  0x8b   : > { %p1637_p0 = pmov %p1635_p3 }
  0x8c   : > { %1250 = vsyncadd (%p1636_p10), [#allocation6], 4294967280 }
  0x8d   : > { %1252 = dma.done.wait (%p1637_p0), [#allocation9], 2048   ;;  %p1638_p11 = pmov %p1637_p0 }
  0x8e   : > { %p873_p13 = scmp.ne.s32.totalorder %s1273_s18, 0 }
  0x8f   : > { %1254 = vsyncadd (%p1638_p11), [#allocation9], 4294965248  ;;  %v1292_v0 = vmov (!%p873_p13), 0.0  }
  0x90   : > { %330 = sbr.rel (%p873_p13) target bundleno = 152 (0x98), region = 56  ;;  %331 = vst [vmem:[#allocation10] sm:$0xff] (!%p873_p13), %v1292_v0  ;;  %332 = vst [vmem:[#allocation10 + $0x8] sm:$0xff] (!%p873_p13), %v1292_v0 }
  0x91   : > { %333 = vst [vmem:[#allocation10 + $0x10] sm:$0xff] (!%p873_p13), %v1292_v0  ;;  %334 = vst [vmem:[#allocation10 + $0x18] sm:$0xff] (!%p873_p13), %v1292_v0 }
  0x92   : > { %335 = vst [vmem:[#allocation10 + $0x20] sm:$0xff] (!%p873_p13), %v1292_v0  ;;  %336 = vst [vmem:[#allocation10 + $0x28] sm:$0xff] (!%p873_p13), %v1292_v0 }
  0x93   : > { %337 = vst [vmem:[#allocation10 + $0x30] sm:$0xff] (!%p873_p13), %v1292_v0  ;;  %338 = vst [vmem:[#allocation10 + $0x38] sm:$0xff] (!%p873_p13), %v1292_v0 }
  0x94   : > { %339 = vst [vmem:[#allocation10 + $0x40] sm:$0xff] (!%p873_p13), %v1292_v0  ;;  %340 = vst [vmem:[#allocation10 + $0x48] sm:$0xff] (!%p873_p13), %v1292_v0 }
  0x95   : > { %341 = vst [vmem:[#allocation10 + $0x50] sm:$0xff] (!%p873_p13), %v1292_v0  ;;  %342 = vst [vmem:[#allocation10 + $0x58] sm:$0xff] (!%p873_p13), %v1292_v0 }
  0x96   : > { %343 = vst [vmem:[#allocation10 + $0x60] sm:$0xff] (!%p873_p13), %v1292_v0  ;;  %344 = vst [vmem:[#allocation10 + $0x68] sm:$0xff] (!%p873_p13), %v1292_v0 }
  0x97   : > { %345 = vst [vmem:[#allocation10 + $0x70] sm:$0xff] %v1292_v0  ;;  %346 = vst [vmem:[#allocation10 + $0x78] sm:$0xff] %v1292_v0 }
  0x98 PF: > { %v1057_v1 = vld [vmem:[%s1526_s10] sm:$0xff]   ;;  %v1058_v2 = vld [vmem:[%s1526_s10 + $0x8] sm:$0xff]   ;;  %v1059_v3 = vld [vmem:[%s1526_s10 + $0x10] sm:$0xff]   ;;  %p890_p8 = scmp.ne.s32.totalorder %s1273_s18, 4 }
  0x99   : > { %913 = vmatprep.subr.bf16.mxu0 %v1057_v1  ;;  %945 = vmatprep.subr.bf16.mxu1 %v1057_v1  ;;  %v1060_v4 = vld [vmem:[%s1526_s10 + $0x18] sm:$0xff]   ;;  %v1065_v5 = vld [vmem:[%s1519_s7] sm:$0xff]   ;;  %v1062_v8 = vld [vmem:[%s1526_s10 + $0x28] sm:$0xff]  }
  0x9a   : > { %914 = vmatpush3.bf16.msra.mxu0 %v1057_v1  ;;  %953 = vmatpush3.bf16.msra.mxu1 %v1057_v1  ;;  %v1066_v6 = vld [vmem:[%s1519_s7 + $0x20] sm:$0xff]   ;;  %v1063_v9 = vld [vmem:[%s1526_s10 + $0x30] sm:$0xff]   ;;  %v1064_v10 = vld [vmem:[%s1526_s10 + $0x38] sm:$0xff]  }
  0x9b   : > { %915 = vmatprep.subr.bf16.mxu0 %v1058_v2  ;;  %946 = vmatprep.subr.bf16.mxu1 %v1058_v2  ;;  %v1061_v7 = vld [vmem:[%s1526_s10 + $0x20] sm:$0xff]   ;;  %v1067_v11 = vld [vmem:[%s1519_s7 + $0x8] sm:$0xff]   ;;  %v1069_v13 = vld [vmem:[%s1519_s7 + $0x10] sm:$0xff]  }
  0x9c   : > { %929 = vmatprep.mubr.bf16.mxu0 %v1065_v5  ;;  %937 = vmatprep.mubr.bf16.mxu1 %v1066_v6  ;;  %v1068_v12 = vld [vmem:[%s1519_s7 + $0x28] sm:$0xff]   ;;  %v1070_v14 = vld [vmem:[%s1519_s7 + $0x30] sm:$0xff]   ;;  %v1071_v15 = vld [vmem:[%s1519_s7 + $0x18] sm:$0xff]  }
  0x9d   : > { %v1072_v16 = vld [vmem:[%s1519_s7 + $0x38] sm:$0xff]   ;;  %v347_v19 = vld [vmem:[#allocation10] sm:$0xff]  ;;  %v348_v29 = vld [vmem:[#allocation10 + $0x8] sm:$0xff] }
  0x9e   : > { %916 = vmatpush3.bf16.msra.mxu0 %v1058_v2  ;;  %954 = vmatpush3.bf16.msra.mxu1 %v1058_v2  ;;  %v349_v17 = vld [vmem:[#allocation10 + $0x10] sm:$0xff]  ;;  %v355_v20 = vld [vmem:[#allocation10 + $0x40] sm:$0xff]  ;;  %v350_v23 = vld [vmem:[#allocation10 + $0x18] sm:$0xff] }
  0x9f   : > { %917 = vmatprep.subr.bf16.mxu0 %v1059_v3  ;;  %947 = vmatprep.subr.bf16.mxu1 %v1059_v3  ;;  %v357_v18 = vld [vmem:[#allocation10 + $0x50] sm:$0xff]  ;;  %v358_v24 = vld [vmem:[#allocation10 + $0x58] sm:$0xff]  ;;  %v356_v30 = vld [vmem:[#allocation10 + $0x48] sm:$0xff] }
  0xa0   : > { %v353_v41 = vld [vmem:[#allocation10 + $0x30] sm:$0xff]  ;;  %v351_v43 = vld [vmem:[#allocation10 + $0x20] sm:$0xff]  ;;  %v354_v47 = vld [vmem:[#allocation10 + $0x38] sm:$0xff] }
  0xa1   : > { %v361_v42 = vld [vmem:[#allocation10 + $0x70] sm:$0xff]  ;;  %v359_v44 = vld [vmem:[#allocation10 + $0x60] sm:$0xff]  ;;  %v362_v48 = vld [vmem:[#allocation10 + $0x78] sm:$0xff] }
  0xa2   : > { %918 = vmatpush3.bf16.msra.mxu0 %v1059_v3  ;;  %955 = vmatpush3.bf16.msra.mxu1 %v1059_v3  ;;  %v352_v53 = vld [vmem:[#allocation10 + $0x28] sm:$0xff]  ;;  %v1558_v2 = vld [vmem:[#allocation7] ss:$0 sm:$0xff] (!%p890_p8)  ;;  %v663_v3 = vld [vmem:[#allocation8] sm:$0xff] (!%p890_p8) }
  0xa3   : > { %919 = vmatprep.subr.bf16.mxu0 %v1060_v4  ;;  %948 = vmatprep.subr.bf16.mxu1 %v1060_v4  ;;  %v360_v54 = vld [vmem:[#allocation10 + $0x68] sm:$0xff] }
  0xa4   : > { %v664_v6 = vld [vmem:[#allocation8 + $0x8] sm:$0xff] (!%p890_p8) }
  0xa6   : > { %920 = vmatpush3.bf16.msra.mxu0 %v1060_v4  ;;  %956 = vmatpush3.bf16.msra.mxu1 %v1060_v4 }
  0xa7   : > { %921 = vmatprep.subr.bf16.mxu0 %v1061_v7  ;;  %949 = vmatprep.subr.bf16.mxu1 %v1061_v7 }
  0xaa   : > { %922 = vmatpush3.bf16.msra.mxu0 %v1061_v7  ;;  %957 = vmatpush3.bf16.msra.mxu1 %v1061_v7 }
  0xab   : > { %923 = vmatprep.subr.bf16.mxu0 %v1062_v8  ;;  %950 = vmatprep.subr.bf16.mxu1 %v1062_v8 }
  0xae   : > { %924 = vmatpush3.bf16.msra.mxu0 %v1062_v8  ;;  %958 = vmatpush3.bf16.msra.mxu1 %v1062_v8 }
  0xaf   : > { %925 = vmatprep.subr.bf16.mxu0 %v1063_v9  ;;  %951 = vmatprep.subr.bf16.mxu1 %v1063_v9 }
  0xb2   : > { %926 = vmatpush3.bf16.msra.mxu0 %v1063_v9  ;;  %959 = vmatpush3.bf16.msra.mxu1 %v1063_v9 }
  0xb3   : > { %927 = vmatprep.subr.bf16.mxu0 %v1064_v10  ;;  %952 = vmatprep.subr.bf16.mxu1 %v1064_v10 }
  0xb6   : > { %928 = vmatpush3.bf16.msra.mxu0 %v1064_v10  ;;  %960 = vmatpush3.bf16.msra.mxu1 %v1064_v10  ;;  %v665_v10 = vld [vmem:[#allocation8 + $0x10] sm:$0xff] (!%p890_p8) }
  0xb9   : > { %930 = vmatmul.mubr.bf16.vlgmr.msra.gmra.mrb[0].mxu0 %v1067_v11  ;;  %938 = vmatmul.mubr.bf16.vlgmr.msra.gmra.mrb[0].mxu1 %v1068_v12  ;;  %v666_v12 = vld [vmem:[#allocation8 + $0x18] sm:$0xff] (!%p890_p8) }
  0xba   : > { %933 = vmatprep.mubr.bf16.mxu0 %v1069_v13  ;;  %941 = vmatprep.mubr.bf16.mxu1 %v1070_v14 }
  0xc1   : > { %934 = vmatmul.mubr.bf16.gmra.mrb[4].mxu0 %v1071_v15  ;;  %942 = vmatmul.mubr.bf16.gmra.mrb[4].mxu1 %v1072_v16  ;;  %v667_v16 = vld [vmem:[#allocation8 + $0x20] sm:$0xff] (!%p890_p8) }
 0x18c   : > { %v931_v21 = vpop.f32.mrb[0].mxu0  ;;  %v939_v22 = vpop.f32.mrb[0].mxu1 }
 0x18d   : > { %v590_v25 = vadd.f32 %v931_v21, %v349_v17  ;;  %v598_v26 = vadd.f32 %v939_v22, %v357_v18  ;;  %v525_v27 = vpop.f32.mrb[1].mxu0  ;;  %v557_v28 = vpop.f32.mrb[1].mxu1  ;;  %v668_v22 = vld [vmem:[#allocation8 + $0x28] sm:$0xff] (!%p890_p8) }
 0x18e   : > { %v588_v31 = vadd.f32 %v525_v27, %v347_v19  ;;  %v596_v32 = vadd.f32 %v557_v28, %v355_v20  ;;  %v932_v33 = vpop.f32.mrb[2].mxu0  ;;  %v940_v34 = vpop.f32.mrb[2].mxu1 }
 0x18f   : > { %606 = vst [vmem:[#allocation10 + $0x10] sm:$0xff] %v590_v25  ;;  %614 = vst [vmem:[#allocation10 + $0x50] sm:$0xff] %v598_v26  ;;  %v591_v35 = vadd.f32 %v932_v33, %v350_v23  ;;  %v599_v36 = vadd.f32 %v940_v34, %v358_v24  ;;  %v528_v37 = vpop.f32.mrb[3].mxu0  ;;  %v560_v38 = vpop.f32.mrb[3].mxu1  ;;  %v669_v24 = vld [vmem:[#allocation8 + $0x30] sm:$0xff] (!%p890_p8) }
 0x190   : > { %604 = vst [vmem:[#allocation10] sm:$0xff] %v588_v31  ;;  %612 = vst [vmem:[#allocation10 + $0x40] sm:$0xff] %v596_v32  ;;  %v589_v39 = vadd.f32 %v528_v37, %v348_v29  ;;  %v597_v40 = vadd.f32 %v560_v38, %v356_v30  ;;  %v670_v29 = vld [vmem:[#allocation8 + $0x38] sm:$0xff] (!%p890_p8)  ;;  %v672_v37 = vld [vmem:[#allocation8 + $0x48] sm:$0xff] (!%p890_p8) }
 0x191   : > { %607 = vst [vmem:[#allocation10 + $0x18] sm:$0xff] %v591_v35  ;;  %615 = vst [vmem:[#allocation10 + $0x58] sm:$0xff] %v599_v36  ;;  %v671_v35 = vld [vmem:[#allocation8 + $0x40] sm:$0xff] (!%p890_p8) }
 0x192   : > { %605 = vst [vmem:[#allocation10 + $0x8] sm:$0xff] %v589_v39  ;;  %613 = vst [vmem:[#allocation10 + $0x48] sm:$0xff] %v597_v40 }
 0x194   : > { %v935_v45 = vpop.f32.mrb[4].mxu0  ;;  %v943_v46 = vpop.f32.mrb[4].mxu1  ;;  %623 = sbr.rel (%p890_p8) target bundleno = 426 (0x1aa), region = 60 }
 0x195   : > { %v594_v49 = vadd.f32 %v935_v45, %v353_v41  ;;  %v602_v50 = vadd.f32 %v943_v46, %v361_v42  ;;  %v541_v51 = vpop.f32.mrb[5].mxu0  ;;  %v573_v52 = vpop.f32.mrb[5].mxu1 }
 0x196   : > { %v592_v55 = vadd.f32 %v541_v51, %v351_v43  ;;  %v600_v56 = vadd.f32 %v573_v52, %v359_v44  ;;  %v936_v57 = vpop.f32.mrb[6].mxu0  ;;  %v944_v58 = vpop.f32.mrb[6].mxu1  ;;  %v626_v7 = vld [vmem:[#allocation10 + $0x10] sm:$0xff] (!%p890_p8)  ;;  %v675_v51 = vld [vmem:[#allocation8 + $0x60] sm:$0xff] (!%p890_p8) }
 0x197   : > { %610 = vst [vmem:[#allocation10 + $0x30] sm:$0xff] %v594_v49  ;;  %618 = vst [vmem:[#allocation10 + $0x70] sm:$0xff] %v602_v50  ;;  %v595_v59 = vadd.f32 %v936_v57, %v354_v47  ;;  %v603_v60 = vadd.f32 %v944_v58, %v362_v48  ;;  %v544_v61 = vpop.f32.mrb[7].mxu0  ;;  %v576_v62 = vpop.f32.mrb[7].mxu1  ;;  %v624_v1 = vld [vmem:[#allocation10] sm:$0xff] (!%p890_p8)  ;;  %v649_v9 = vadd.f32 (!%p890_p8), %v1558_v2, %v626_v7  ;;  %v634_v42 = vld [vmem:[#allocation10 + $0x50] sm:$0xff] (!%p890_p8) }
 0x198   : > { %608 = vst [vmem:[#allocation10 + $0x20] sm:$0xff] %v592_v55  ;;  %616 = vst [vmem:[#allocation10 + $0x60] sm:$0xff] %v600_v56  ;;  %v593_v63 = vadd.f32 %v544_v61, %v352_v53  ;;  %v601_v0 = vadd.f32 %v576_v62, %v360_v54  ;;  %v647_v4 = vadd.f32 (!%p890_p8), %v1558_v2, %v624_v1  ;;  %v627_v11 = vld [vmem:[#allocation10 + $0x18] sm:$0xff] (!%p890_p8)  ;;  %v632_v30 = vld [vmem:[#allocation10 + $0x40] sm:$0xff] (!%p890_p8) }
 0x199   : > { %611 = vst [vmem:[#allocation10 + $0x38] sm:$0xff] %v595_v59  ;;  %619 = vst [vmem:[#allocation10 + $0x78] sm:$0xff] %v603_v60  ;;  %v625_v5 = vld [vmem:[#allocation10 + $0x8] sm:$0xff] (!%p890_p8)  ;;  %v650_v14 = vadd.f32 (!%p890_p8), %v1558_v2, %v627_v11  ;;  %v681_v19 = vadd.f32 (!%p890_p8), %v665_v10, %v649_v9  ;;  %v655_v41 = vadd.f32 (!%p890_p8), %v1558_v2, %v632_v30  ;;  %v673_v43 = vld [vmem:[#allocation8 + $0x50] sm:$0xff] (!%p890_p8) }
 0x19a   : > { %609 = vst [vmem:[#allocation10 + $0x28] sm:$0xff] %v593_v63  ;;  %617 = vst [vmem:[#allocation10 + $0x68] sm:$0xff] %v601_v0  ;;  %v648_v8 = vadd.f32 (!%p890_p8), %v1558_v2, %v625_v5  ;;  %v679_v13 = vadd.f32 (!%p890_p8), %v663_v3, %v647_v4  ;;  %v633_v36 = vld [vmem:[#allocation10 + $0x48] sm:$0xff] (!%p890_p8)  ;;  %v635_v44 = vld [vmem:[#allocation10 + $0x58] sm:$0xff] (!%p890_p8)  ;;  %v657_v48 = vadd.f32 (!%p890_p8), %v1558_v2, %v634_v42 }
 0x19b   : > { %v682_v26 = vadd.f32 %v666_v12, %v650_v14  ;;  %v697_v32 = vmax.f32 %v681_v19, 0.0  ;;  %v656_v47 = vadd.f32 %v1558_v2, %v633_v36  ;;  %v674_v49 = vld [vmem:[#allocation8 + $0x58] sm:$0xff]  ;;  %v687_v54 = vadd.f32 %v671_v35, %v655_v41  ;;  %v676_v57 = vld [vmem:[#allocation8 + $0x68] sm:$0xff]  ;;  %v677_v63 = vld [vmem:[#allocation8 + $0x70] sm:$0xff] }
 0x19c   : > { %v680_v18 = vadd.f32 %v664_v6, %v648_v8  ;;  %v695_v25 = vmax.f32 %v679_v13, 0.0  ;;  %v658_v55 = vadd.f32 %v1558_v2, %v635_v44  ;;  %v689_v60 = vadd.f32 %v673_v43, %v657_v48  ;;  %v678_v10 = vld [vmem:[#allocation8 + $0x78] sm:$0xff] }
 0x19d   : > { %v698_v38 = vmax.f32 %v682_v26, 0.0  ;;  %713 = vst [vmem:[#allocation10 + $0x10] sm:$0xff] %v697_v32  ;;  %v688_v59 = vadd.f32 %v672_v37, %v656_v47  ;;  %v703_v3 = vmax.f32 %v687_v54, 0.0 }
 0x19e   : > { %v630_v23 = vld [vmem:[#allocation10 + $0x30] sm:$0xff]  ;;  %v696_v31 = vmax.f32 %v680_v18, 0.0  ;;  %711 = vst [vmem:[#allocation10] sm:$0xff] %v695_v25  ;;  %v690_v4 = vadd.f32 %v674_v49, %v658_v55  ;;  %v705_v7 = vmax.f32 %v689_v60, 0.0 }
 0x19f   : > { %v628_v15 = vld [vmem:[#allocation10 + $0x20] sm:$0xff]  ;;  %v653_v27 = vadd.f32 %v1558_v2, %v630_v23  ;;  %714 = vst [vmem:[#allocation10 + $0x18] sm:$0xff] %v698_v38  ;;  %v638_v58 = vld [vmem:[#allocation10 + $0x70] sm:$0xff]  ;;  %v704_v6 = vmax.f32 %v688_v59, 0.0  ;;  %719 = vst [vmem:[#allocation10 + $0x40] sm:$0xff] %v703_v3 }
 0x1a0   : > { %v651_v20 = vadd.f32 %v1558_v2, %v628_v15  ;;  %v631_v28 = vld [vmem:[#allocation10 + $0x38] sm:$0xff]  ;;  %712 = vst [vmem:[#allocation10 + $0x8] sm:$0xff] %v696_v31  ;;  %v636_v50 = vld [vmem:[#allocation10 + $0x60] sm:$0xff]  ;;  %v661_v5 = vadd.f32 %v1558_v2, %v638_v58  ;;  %v706_v11 = vmax.f32 %v690_v4, 0.0  ;;  %721 = vst [vmem:[#allocation10 + $0x50] sm:$0xff] %v705_v7 }
 0x1a1   : > { %v629_v17 = vld [vmem:[#allocation10 + $0x28] sm:$0xff]  ;;  %v685_v39 = vadd.f32 %v669_v24, %v653_v27  ;;  %v654_v40 = vadd.f32 %v1558_v2, %v631_v28  ;;  %v659_v61 = vadd.f32 %v1558_v2, %v636_v50  ;;  %v639_v0 = vld [vmem:[#allocation10 + $0x78] sm:$0xff]  ;;  %720 = vst [vmem:[#allocation10 + $0x48] sm:$0xff] %v704_v6 }
 0x1a2   : > { %v652_v21 = vadd.f32 %v1558_v2, %v629_v17  ;;  %v683_v33 = vadd.f32 %v667_v16, %v651_v20  ;;  %v637_v56 = vld [vmem:[#allocation10 + $0x68] sm:$0xff]  ;;  %v693_v12 = vadd.f32 %v677_v63, %v661_v5  ;;  %v662_v13 = vadd.f32 %v1558_v2, %v639_v0  ;;  %722 = vst [vmem:[#allocation10 + $0x58] sm:$0xff] %v706_v11 }
 0x1a3   : > { %v701_v52 = vmax.f32 %v685_v39, 0.0  ;;  %v686_v53 = vadd.f32 %v670_v29, %v654_v40  ;;  %v660_v62 = vadd.f32 %v1558_v2, %v637_v56  ;;  %v691_v8 = vadd.f32 %v675_v51, %v659_v61 }
 0x1a4   : > { %v684_v34 = vadd.f32 %v668_v22, %v652_v21  ;;  %v699_v45 = vmax.f32 %v683_v33, 0.0  ;;  %v709_v16 = vmax.f32 %v693_v12, 0.0  ;;  %v694_v17 = vadd.f32 %v678_v10, %v662_v13 }
 0x1a5   : > { %717 = vst [vmem:[#allocation10 + $0x30] sm:$0xff] %v701_v52  ;;  %v702_v1 = vmax.f32 %v686_v53, 0.0  ;;  %v692_v9 = vadd.f32 %v676_v57, %v660_v62  ;;  %v707_v14 = vmax.f32 %v691_v8, 0.0 }
 0x1a6   : > { %v700_v46 = vmax.f32 %v684_v34, 0.0  ;;  %715 = vst [vmem:[#allocation10 + $0x20] sm:$0xff] %v699_v45  ;;  %725 = vst [vmem:[#allocation10 + $0x70] sm:$0xff] %v709_v16  ;;  %v710_v18 = vmax.f32 %v694_v17, 0.0 }
 0x1a7   : > { %718 = vst [vmem:[#allocation10 + $0x38] sm:$0xff] %v702_v1  ;;  %v708_v15 = vmax.f32 %v692_v9, 0.0  ;;  %723 = vst [vmem:[#allocation10 + $0x60] sm:$0xff] %v707_v14 }
 0x1a8   : > { %716 = vst [vmem:[#allocation10 + $0x28] sm:$0xff] %v700_v46  ;;  %726 = vst [vmem:[#allocation10 + $0x78] sm:$0xff] %v710_v18 }
 0x1a9   : > { %724 = vst [vmem:[#allocation10 + $0x68] sm:$0xff] %v708_v15 }
 0x1aa PF: > { %p996_p1 = scmp.eq.s32.totalorder %s1350_s21, 4  ;;  %s1293_s18 = smov [#allocation10]  }
 0x1ab   : > { %s737_s23 = sshll.u32 %s1293_s18, 4  ;;  %s738_s23 = int_to_ptr.vmem [resolvable:$true] %s737_s23 }
 0x1ac   : > { %s1189_s24 = scalar_lea.vmem %s738_s23, 2048  ;;  %p1196_p7 = scmp.lt.s32.totalorder %s738_s23, %s738_s23 }
 0x1ad   : > { %p1190_p2 = scmp.ne.s32.totalorder %s738_s23, %s1189_s24  ;;  %p1197_p9 = scmp.lt.s32.totalorder %s1189_s24, %s1189_s24 }
 0x1af   : > { %p1191_p12 = pnand %p1190_p2, %p996_p1  ;;  %p1198_p6 = por %p1197_p9, %p1196_p7 }
 0x1b1   : > { %p1192_p4 = pneg %p1191_p12 }
 0x1b3   : > { %p1199_p5 = pnand %p1198_p6, %p1192_p4 }
 0x1b5   : > { %1202 = shalt.err (!%p1199_p5)
}
 0x1b6   : > { %s1203_s6 = scalar_lea.hbm %s1621_s4, 2048 }
 0x1b7   : > { %p1204_p3 = scmp.ne.s32.totalorder %s1621_s4, %s1203_s6  ;;  %p1209_p11 = scmp.lt.u32.totalorder %s1203_s6, %s1621_s4 }
 0x1b9   : > { %p1205_p10 = pnand %p1204_p3, %p996_p1 }
 0x1bb   : > { %p1206_p0 = pneg %p1205_p10 }
 0x1bd   : > { %p1211_p13 = pnand %p1209_p11, %p1206_p0 }
 0x1bf   : > { %1214 = shalt.err (!%p1211_p13)
}
 0x1c0   : > { %s1294_s12 = smov 128   ;;  %s1295_s29 = smov 8  }
 0x1c1   : > { %974 = dma.vmem_to_hbm [thread:$0]  (%p996_p1), %s738_s23, 2048, %s1621_s4, [#allocation4], %s1294_s12, %s1294_s12, %s1295_s29  }
 0x1c2   : > { %1256 = dma.done.wait (%p996_p1), [#allocation4], 2048  }
 0x1c3   : > { %1258 = vsyncadd (%p996_p1), [#allocation4], 4294965248 }
 0x1c4 PF: > { %s22_s20 = sadd.s32 1, %s1281_s20   ;;  %s1639_s14 = smov %s1646_s15 }
 0x1c5   : > { %p19_p8 = scmp.ge.s32.totalorder %s22_s20, 7   ;;  %s1640_s15 = smov %s1265_s16 }
 0x1c6   : > { %s1641_s16 = smov %s1269_s17  ;;  %s1642_s17 = smov %s1445_s9 }
 0x1c7   : > { %s1643_s18 = smov %s1277_s19  ;;  %s1644_s19 = smov %s1639_s14 }
 0x1c8   :  { %21 = sbr.rel (!%p19_p8) target bundleno = 10 (0xa), region = 105 }
 0x1cf   :  { %753 = vsyncpa [#allocation3], 1 }
 0x1d0   :  { %755 = vsyncpa [#allocation3 + $0x1], 1 }
 0x1d1   :  { %756 = vsyncpa [#allocation6], 1 }
 0x1d2   :  { %758 = vsyncpa [#allocation6 + $0x1], 1 }
 0x1d3   :  { %759 = vsyncpa [#allocation9], 1 }
 0x1d4   :  { %760 = vsyncpa [#allocation4], 1 }
 0x1d5   :  { %762 = vsyncpa [#allocation4 + $0x1], 1 }

// kernel: e2e_cnn_forward.29
= control target key start
LH: loop header
LB: loop body
LE: loop exit
PB: predicated region body
PF: predicated region fallthrough
CT: control target
= control target key end

     0   :  { %s1173_s0 = inlined_call_operand.hbm [shape: bf16[32,640], index: 0, kind: input, shape index: {}]   ;;  %s1174_s1 = inlined_call_operand.hbm [shape: bf16[640,128], index: 1, kind: input, shape index: {}]   ;;  %s1175_s2 = inlined_call_operand.hbm [shape: f32[1,128], index: 2, kind: input, shape index: {}]   ;;  %s1176_s3 = inlined_call_operand.hbm [shape: f32[32,128], index: 3, kind: output, shape index: {}]  }
   0x1   :  { %1181 = sst [smem:[#allocation13_spill]] %s1173_s0 }
   0x2   :  { %8 = vsyncpa [#allocation3], 0 }
   0x3   :  { %10 = vsyncpa [#allocation3 + $0x1], 0 }
   0x4   :  { %11 = vsyncpa [#allocation6], 0 }
   0x5   :  { %13 = vsyncpa [#allocation6 + $0x1], 0 }
   0x6   :  { %14 = vsyncpa [#allocation4], 0  ;;  %s929_s12 = smov 0   ;;  %s931_s13 = smov 0  }
   0x7   :  { %s933_s14 = smov 0   ;;  %s935_s15 = smov 0  }
   0x8   :  { %s937_s16 = smov 0   ;;  %s939_s17 = smov 0  }
   0x9 LB: > { %s958_s18 = sadd.s32 4294967295, %s897_s17   ;;  %s48_s19 = sadd.s32 1, %s885_s14  ;;  %s897_s17 = sphi %s939_s17, %s20_s17   ;;  %s893_s16 = sphi %s937_s16, %s1196_s16   ;;  %s889_s15 = sphi %s935_s15, %s1195_s15   ;;  %s885_s14 = sphi %s933_s14, %s1194_s14   ;;  %s881_s13 = sphi %s931_s13, %s1193_s13   ;;  %s877_s12 = sphi %s929_s12, %s1192_s12  }
   0xa   : > { %p55_p0 = scmp.ne.s32.totalorder %s885_s14, %s881_s13  ;;  %p56_p1 = scmp.eq.s32.totalorder %s897_s17, 0 }
   0xb   : > { %p61_p2 = scmp.ne.s32.totalorder %s881_s13, %s877_s12  ;;  %p1177_p3 = scmp.eq.s32.totalorder %s958_s18, 0 }
   0xc   : > { %p57_p4 = por %p56_p1, %p55_p0  ;;  %p567_p5 = scmp.ge.s32.totalorder %s897_s17, 1 }
   0xd   : > { %p969_p6 = por %p1177_p3, %p61_p2  ;;  %p154_p7 = scmp.lt.s32.totalorder %s897_s17, 6 }
   0xe   : > { %s899_s22 = smov [#allocation7]   ;;  %p651_p10 = scmp.lt.s32.totalorder %s897_s17, 5 }
   0xf   : > { %s1182_s20 = scalar_select %p969_p6, 1, 0 }
  0x10   : > { %p974_p8 = pnand %p567_p5, %p154_p7  ;;  %s169_s23 = sshll.u32 %s899_s22, 4  ;;  %s170_s23 = int_to_ptr.vmem [resolvable:$true] %s169_s23 }
  0x11   : > { %s982_s24 = sand.u32 1, %s885_s14   ;;  %p990_p12 = pnand %p651_p10, %p57_p4 }
  0x12   : > { %s1183_s21 = scalar_select %p974_p8, 1, 0 }
  0x13   : > { %p639_p9 = pneg %p974_p8  ;;  %s721_s29 = scalar_lea.hbm %s1175_s2, 16 }
  0x14   : > { %s1185_s26 = scalar_select %p990_p12, 1, 0 }
  0x15   : > { %p986_p11 = pnand %p639_p9, %p1177_p3  ;;  %p722_p13 = scmp.ne.s32.totalorder %s1175_s2, %s721_s29 }
  0x16   : > { %p728_p5 = scmp.lt.u32.totalorder %s721_s29, %s1175_s2 }
  0x17   : > { %p723_p0 = pneg %p986_p11 }
  0x19   : > { %p724_p1 = pnand %p723_p0, %p722_p13 }
  0x1b   : > { %p725_p2 = pneg %p724_p1 }
  0x1d   : > { %p730_p4 = pnand %p728_p5, %p725_p2 }
  0x1f   : > { %733 = shalt.err (!%p730_p4)
}
  0x20   : > { %s734_s7 = scalar_lea.vmem %s170_s23, 16  ;;  %s741_s8 = scalar_lea.vmem %s170_s23, 32 }
  0x21   : > { %p735_p7 = scmp.ne.s32.totalorder %s170_s23, %s734_s7  ;;  %p742_p3 = scmp.lt.s32.totalorder %s170_s23, %s170_s23 }
  0x22   : > { %p743_p6 = scmp.lt.s32.totalorder %s741_s8, %s734_s7 }
  0x23   : > { %p737_p9 = pnand %p735_p7, %p723_p0 }
  0x24   : > { %p744_p8 = por %p743_p6, %p742_p3 }
  0x25   : > { %p738_p10 = pneg %p737_p9 }
  0x27   : > { %p745_p12 = pnand %p744_p8, %p738_p10 }
  0x29   : > { %748 = shalt.err (!%p745_p12)
}
  0x2a   : > { %642 = dma.hbm_to_vmem [thread:$0]  (!%p986_p11), %s1175_s2, 16, %s170_s23, [#allocation6]  }
  0x2b   : > { %s32_s11 = sadd.s32 1, %s893_s16  ;;  %s570_s12 = sshll.u32 %s982_s24, 4 }
  0x2c   : > { %p33_p3 = scmp.ge.s32.totalorder %s32_s11, 5  ;;  %s571_s22 = sshll.u32 %s893_s16, 6 }
  0x2d   : > { %s184_s27 = scalar_lea.vmem [#allocation2], %s570_s12  ;;  %s1186_s0 = sld [smem:[#allocation13_spill]] }
  0x2e   : > { %s193_s25 = sshll.u32 %s184_s27, 4  ;;  %s1198_s11 = smov (%p33_p3, %s32_s11), 0  ;;  %s1020_s25 = int_to_ptr.vmem [resolvable:$true] %s193_s25 }
  0x2f   : > { %s44_s23 = ssub.s32 %s893_s16, %s1198_s11  ;;  %s203_s4 = sand.u32 1, %s897_s17  }
  0x30   : > { %p46_p6 = scmp.eq.s32.totalorder %s44_s23, 0  ;;  %s181_s6 = scalar_lea.sflag [#allocation3], %s982_s24 }
  0x31   : > { %p1187_p11 = scmp.ne.s32.totalorder %s1185_s26, 0 }
  0x32   : > { %s1028_s5 = scalar_select %p46_p6, %s885_s14, %s48_s19  }
  0x33   : > { %s1018_s30 = scalar_lea.hbm %s1186_s0, %s571_s22  ;;  %p751_p12 = pneg %p1187_p11 }
  0x34   : > { %s749_s7 = scalar_lea.hbm %s1018_s30, 256  ;;  %s754_s10 = scalar_lea.hbm %s1186_s0, 1280 }
  0x35   : > { %p750_p8 = scmp.ne.s32.totalorder %s1018_s30, %s749_s7  ;;  %p755_p1 = scmp.lt.u32.totalorder %s1018_s30, %s1186_s0 }
  0x36   : > { %p756_p2 = scmp.lt.u32.totalorder %s754_s10, %s749_s7  ;;  %p758_p4 = scmp.lt.u32.totalorder %s749_s7, %s1018_s30 }
  0x37   : > { %p752_p13 = pnand %p751_p12, %p750_p8 }
  0x38   : > { %p757_p5 = por %p756_p2, %p755_p1 }
  0x39   : > { %p753_p0 = pneg %p752_p13 }
  0x3a   : > { %p759_p7 = por %p758_p4, %p757_p5 }
  0x3c   : > { %p760_p9 = pnand %p759_p7, %p753_p0 }
  0x3e   : > { %763 = shalt.err (!%p760_p9)
}
  0x3f   : > { %s764_s19 = scalar_lea.vmem %s1020_s25, 256  ;;  %s900_s27 = smov [#allocation2]  }
  0x40   : > { %p765_p10 = scmp.ne.s32.totalorder %s1020_s25, %s764_s19  ;;  %s769_s28 = sshll.u32 %s900_s27, 4  ;;  %s770_s28 = int_to_ptr.vmem [resolvable:$false] %s769_s28 }
  0x41   : > { %s771_s29 = scalar_lea.vmem %s770_s28, 512  ;;  %p772_p8 = scmp.lt.s32.totalorder %s1020_s25, %s770_s28 }
  0x42   : > { %p767_p3 = pnand %p765_p10, %p751_p12  ;;  %p773_p13 = scmp.lt.s32.totalorder %s771_s29, %s764_s19 }
  0x44   : > { %p768_p6 = pneg %p767_p3  ;;  %p774_p1 = por %p773_p13, %p772_p8 }
  0x46   : > { %p775_p2 = pnand %p774_p1, %p768_p6 }
  0x48   : > { %778 = shalt.err (!%p775_p2)
}
  0x49   : > { %s901_s23 = smov 320   ;;  %s902_s7 = smov 64  }
  0x4a   : > { %s903_s8 = smov 4   ;;  %s572_s9 = sshll.u32 %s982_s24, 6 }
  0x4b   : > { %646 = dma.hbm_to_vmem [thread:$0]  (!%p1187_p11), %s1018_s30, 256, %s1020_s25, %s181_s6, %s901_s23, %s902_s7, %s903_s8  }
  0x4c   : > { %s596_s10 = sshll.u32 %s893_s16, 10  ;;  %s207_s27 = scalar_lea.vmem [#allocation5], %s572_s9 }
  0x4d   : > { %s1065_s19 = scalar_lea.hbm %s1174_s1, %s596_s10  ;;  %s215_s28 = sshll.u32 %s207_s27, 4  ;;  %s1067_s28 = int_to_ptr.vmem [resolvable:$true] %s215_s28 }
  0x4e   : > { %s1071_s29 = scalar_lea.sflag [#allocation6], %s203_s4  ;;  %s779_s0 = scalar_lea.hbm %s1065_s19, 1024 }
  0x4f   : > { %p780_p0 = scmp.ne.s32.totalorder %s1065_s19, %s779_s0  ;;  %s784_s30 = scalar_lea.hbm %s1174_s1, 5120 }
  0x50   : > { %p785_p7 = scmp.lt.u32.totalorder %s1065_s19, %s1174_s1  ;;  %p786_p9 = scmp.lt.u32.totalorder %s784_s30, %s779_s0 }
  0x51   : > { %p782_p5 = pnand %p780_p0, %p751_p12  ;;  %p788_p3 = scmp.lt.u32.totalorder %s779_s0, %s1065_s19 }
  0x52   : > { %p787_p10 = por %p786_p9, %p785_p7 }
  0x53   : > { %p783_p4 = pneg %p782_p5 }
  0x54   : > { %p789_p6 = por %p788_p3, %p787_p10 }
  0x56   : > { %p790_p8 = pnand %p789_p6, %p783_p4 }
  0x58   : > { %793 = shalt.err (!%p790_p8)
}
  0x59   : > { %s794_s4 = scalar_lea.vmem %s1067_s28, 1024  ;;  %s904_s9 = smov [#allocation5]  }
  0x5a   : > { %p795_p13 = scmp.ne.s32.totalorder %s1067_s28, %s794_s4  ;;  %s799_s10 = sshll.u32 %s904_s9, 4  ;;  %s800_s10 = int_to_ptr.vmem [resolvable:$false] %s799_s10 }
  0x5b   : > { %s801_s12 = scalar_lea.vmem %s800_s10, 2048  ;;  %p802_p0 = scmp.lt.s32.totalorder %s1067_s28, %s800_s10 }
  0x5c   : > { %p797_p1 = pnand %p795_p13, %p751_p12  ;;  %p803_p5 = scmp.lt.s32.totalorder %s801_s12, %s794_s4 }
  0x5e   : > { %p798_p2 = pneg %p797_p1  ;;  %p804_p7 = por %p803_p5, %p802_p0 }
  0x60   : > { %p805_p9 = pnand %p804_p7, %p798_p2 }
  0x62   : > { %808 = shalt.err (!%p805_p9)
}
  0x63   : > { %649 = dma.hbm_to_vmem [thread:$0]  (!%p1187_p11), %s1065_s19, 1024, %s1067_s28, %s1071_s29, %s902_s7, %s902_s7, %s903_s8  }
  0x64   : > { %p1188_p12 = scmp.ne.s32.totalorder %s1183_s21, 0 }
  0x65   : > { %s229_s0 = sand.u32 (!%p1188_p12), 1, %s881_s13   ;;  %p1189_p4 = scmp.ne.s32.totalorder (!%p1188_p12), %s1182_s20, 0 }
  0x66   : > { %227 = sbr.rel (%p1188_p12) target bundleno = 414 (0x19e), region = 32  ;;  %s576_s22 = sshll.u32 (!%p1188_p12), %s229_s0, 4 }
  0x67   : > { %s230_s27 = scalar_lea.sflag (!%p1188_p12), [#allocation3], %s229_s0  ;;  %s1103_s24 = scalar_lea.vmem (!%p1188_p12), [#allocation2], %s576_s22 }
  0x6d   : > { %860 = dma.done.wait (%p1189_p4), %s230_s27, 256  }
  0x6e   : > { %862 = vsyncadd (%p1189_p4), %s230_s27, 4294967040  ;;  %s238_s26 = sand.u32 1, %s958_s18   ;;  %s577_s25 = sshll.u32 %s229_s0, 6 }
  0x6f   : > { %s239_s7 = scalar_lea.sflag [#allocation6], %s238_s26  ;;  %s1110_s8 = scalar_lea.vmem [#allocation5], %s577_s25 }
  0x70   : > { %864 = dma.done.wait (%p1189_p4), %s239_s7, 1024  }
  0x71   : > { %866 = vsyncadd (%p1189_p4), %s239_s7, 4294966272  ;;  %p1190_p11 = scmp.eq.s32.totalorder %s958_s18, 0 }
  0x73   : > { %868 = dma.done.wait (%p1190_p11), [#allocation6], 16   ;;  %p1191_p10 = pmov %p1190_p11 }
  0x74   : > { %p579_p3 = scmp.ne.s32.totalorder %s889_s15, 0 }
  0x75   : > { %870 = vsyncadd (%p1191_p10), [#allocation6], 4294967280  ;;  %v905_v0 = vmov (!%p579_p3), 0.0  }
  0x76   : > { %276 = sbr.rel (%p579_p3) target bundleno = 125 (0x7d), region = 48  ;;  %277 = vst [vmem:[#allocation8] sm:$0xff] (!%p579_p3), %v905_v0  ;;  %278 = vst [vmem:[#allocation8 + $0x8] sm:$0xff] (!%p579_p3), %v905_v0 }
  0x77   : > { %279 = vst [vmem:[#allocation8 + $0x10] sm:$0xff] (!%p579_p3), %v905_v0  ;;  %280 = vst [vmem:[#allocation8 + $0x18] sm:$0xff] (!%p579_p3), %v905_v0 }
  0x7d PF: > { %v711_v1 = vld [vmem:[%s1110_s8] sm:$0xff]   ;;  %v712_v2 = vld [vmem:[%s1110_s8 + $0x8] sm:$0xff]   ;;  %v713_v3 = vld [vmem:[%s1110_s8 + $0x10] sm:$0xff]   ;;  %p590_p6 = scmp.ne.s32.totalorder %s889_s15, 4 }
  0x7e   : > { %607 = vmatprep.subr.bf16.mxu0 %v711_v1  ;;  %v714_v4 = vld [vmem:[%s1110_s8 + $0x18] sm:$0xff]   ;;  %v719_v5 = vld [vmem:[%s1103_s24] sm:$0xff]   ;;  %v716_v7 = vld [vmem:[%s1110_s8 + $0x28] sm:$0xff]  }
  0x7f   : > { %608 = vmatpush3.bf16.msra.mxu0 %v711_v1  ;;  %623 = vmatprep.mubr.bf16.mxu0 %v719_v5  ;;  %v715_v6 = vld [vmem:[%s1110_s8 + $0x20] sm:$0xff]   ;;  %v717_v8 = vld [vmem:[%s1110_s8 + $0x30] sm:$0xff]   ;;  %v718_v9 = vld [vmem:[%s1110_s8 + $0x38] sm:$0xff]  }
  0x80   : > { %609 = vmatprep.subr.bf16.mxu0 %v712_v2  ;;  %v720_v10 = vld [vmem:[%s1103_s24 + $0x8] sm:$0xff]   ;;  %v591_v24 = vld [vmem:[#allocation7] ss:$0 sm:$0xff] (!%p590_p6) }
  0x81   : > { %v283_v11 = vld [vmem:[#allocation8 + $0x10] sm:$0xff]  ;;  %v281_v12 = vld [vmem:[#allocation8] sm:$0xff]  ;;  %v284_v14 = vld [vmem:[#allocation8 + $0x18] sm:$0xff] }
  0x82   : > { %v282_v17 = vld [vmem:[#allocation8 + $0x8] sm:$0xff] }
  0x83   : > { %610 = vmatpush3.bf16.msra.mxu0 %v712_v2 }
  0x84   : > { %611 = vmatprep.subr.bf16.mxu0 %v713_v3 }
  0x87   : > { %612 = vmatpush3.bf16.msra.mxu0 %v713_v3 }
  0x88   : > { %613 = vmatprep.subr.bf16.mxu0 %v714_v4 }
  0x8b   : > { %614 = vmatpush3.bf16.msra.mxu0 %v714_v4 }
  0x8c   : > { %615 = vmatprep.subr.bf16.mxu0 %v715_v6 }
  0x8f   : > { %616 = vmatpush3.bf16.msra.mxu0 %v715_v6 }
  0x90   : > { %617 = vmatprep.subr.bf16.mxu0 %v716_v7 }
  0x93   : > { %618 = vmatpush3.bf16.msra.mxu0 %v716_v7 }
  0x94   : > { %619 = vmatprep.subr.bf16.mxu0 %v717_v8 }
  0x97   : > { %620 = vmatpush3.bf16.msra.mxu0 %v717_v8 }
  0x98   : > { %621 = vmatprep.subr.bf16.mxu0 %v718_v9 }
  0x9b   : > { %622 = vmatpush3.bf16.msra.mxu0 %v718_v9 }
  0x9e   : > { %624 = vmatmul.mubr.bf16.vlgmr.msra.gmra.mrb[0].mxu0 %v720_v10 }
 0x171   : > { %v625_v13 = vpop.f32.mrb[0].mxu0  ;;  %425 = sbr.rel (%p590_p6) target bundleno = 388 (0x184), region = 52 }
 0x172   : > { %v416_v15 = vadd.f32 %v625_v13, %v283_v11  ;;  %v399_v16 = vpop.f32.mrb[1].mxu0 }
 0x173   : > { %v414_v18 = vadd.f32 %v399_v16, %v281_v12  ;;  %v626_v19 = vpop.f32.mrb[2].mxu0 }
 0x174   : > { %420 = vst [vmem:[#allocation8 + $0x10] sm:$0xff] %v416_v15  ;;  %v417_v20 = vadd.f32 %v626_v19, %v284_v14  ;;  %v402_v21 = vpop.f32.mrb[3].mxu0 }
 0x175   : > { %418 = vst [vmem:[#allocation8] sm:$0xff] %v414_v18  ;;  %v415_v22 = vadd.f32 %v402_v21, %v282_v17 }
 0x176   : > { %421 = vst [vmem:[#allocation8 + $0x18] sm:$0xff] %v417_v20 }
 0x177   : > { %419 = vst [vmem:[#allocation8 + $0x8] sm:$0xff] %v415_v22 }
 0x17b   : > { %v428_v28 = vld [vmem:[#allocation8 + $0x10] sm:$0xff] }
 0x17c   : > { %v426_v23 = vld [vmem:[#allocation8] sm:$0xff]  ;;  %v439_v30 = vadd.f32 %v591_v24, %v428_v28 }
 0x17d   : > { %v437_v26 = vadd.f32 %v591_v24, %v426_v23  ;;  %v429_v29 = vld [vmem:[#allocation8 + $0x18] sm:$0xff] }
 0x17e   : > { %v427_v25 = vld [vmem:[#allocation8 + $0x8] sm:$0xff]  ;;  %v440_v31 = vadd.f32 %v591_v24, %v429_v29  ;;  %v443_v34 = vmax.f32 %v439_v30, 0.0 }
 0x17f   : > { %v438_v27 = vadd.f32 %v591_v24, %v427_v25  ;;  %v441_v32 = vmax.f32 %v437_v26, 0.0 }
 0x180   : > { %v444_v35 = vmax.f32 %v440_v31, 0.0  ;;  %447 = vst [vmem:[#allocation8 + $0x10] sm:$0xff] %v443_v34 }
 0x181   : > { %v442_v33 = vmax.f32 %v438_v27, 0.0  ;;  %445 = vst [vmem:[#allocation8] sm:$0xff] %v441_v32 }
 0x182   : > { %448 = vst [vmem:[#allocation8 + $0x18] sm:$0xff] %v444_v35 }
 0x183   : > { %446 = vst [vmem:[#allocation8 + $0x8] sm:$0xff] %v442_v33 }
 0x184 PF: > { %p653_p8 = scmp.eq.s32.totalorder %s958_s18, 4  ;;  %s906_s15 = smov [#allocation8]  }
 0x185   : > { %s459_s20 = sshll.u32 %s906_s15, 4  ;;  %s460_s20 = int_to_ptr.vmem [resolvable:$true] %s459_s20 }
 0x186   : > { %s809_s21 = scalar_lea.vmem %s460_s20, 512  ;;  %p816_p0 = scmp.lt.s32.totalorder %s460_s20, %s460_s20 }
 0x187   : > { %p810_p13 = scmp.ne.s32.totalorder %s460_s20, %s809_s21  ;;  %p817_p5 = scmp.lt.s32.totalorder %s809_s21, %s809_s21 }
 0x189   : > { %p811_p1 = pnand %p810_p13, %p653_p8  ;;  %p818_p7 = por %p817_p5, %p816_p0 }
 0x18b   : > { %p812_p2 = pneg %p811_p1 }
 0x18d   : > { %p819_p9 = pnand %p818_p7, %p812_p2 }
 0x18f   : > { %822 = shalt.err (!%p819_p9)
}
 0x190   : > { %s823_s29 = scalar_lea.hbm %s1176_s3, 512 }
 0x191   : > { %p824_p12 = scmp.ne.s32.totalorder %s1176_s3, %s823_s29  ;;  %p829_p10 = scmp.lt.u32.totalorder %s823_s29, %s1176_s3 }
 0x193   : > { %p825_p4 = pnand %p824_p12, %p653_p8 }
 0x195   : > { %p826_p11 = pneg %p825_p4 }
 0x197   : > { %p831_p3 = pnand %p829_p10, %p826_p11 }
 0x199   : > { %834 = shalt.err (!%p831_p3)
}
 0x19a   : > { %s907_s9 = smov 128   ;;  %s908_s10 = smov 8  }
 0x19b   : > { %636 = dma.vmem_to_hbm [thread:$0]  (%p653_p8), %s460_s20, 512, %s1176_s3, [#allocation4], %s907_s9, %s907_s9, %s908_s10  }
 0x19c   : > { %872 = dma.done.wait (%p653_p8), [#allocation4], 512  }
 0x19d   : > { %874 = vsyncadd (%p653_p8), [#allocation4], 4294966784 }
 0x19e PF: > { %s20_s17 = sadd.s32 1, %s897_s17   ;;  %s1192_s12 = smov %s881_s13 }
 0x19f   : > { %p17_p6 = scmp.ge.s32.totalorder %s20_s17, 7   ;;  %s1193_s13 = smov %s885_s14 }
 0x1a0   : > { %s1194_s14 = smov %s1028_s5  ;;  %s1195_s15 = smov %s893_s16 }
 0x1a1   : > { %s1196_s16 = smov %s1198_s11  ;;  %19 = sbr.rel (!%p17_p6) target bundleno = 9 (0x9), region = 96 }
 0x1a8   :  { %475 = vsyncpa [#allocation3], 1 }
 0x1a9   :  { %477 = vsyncpa [#allocation3 + $0x1], 1 }
 0x1aa   :  { %478 = vsyncpa [#allocation6], 1 }
 0x1ab   :  { %480 = vsyncpa [#allocation6 + $0x1], 1 }
 0x1ac   :  { %481 = vsyncpa [#allocation4], 1 }
 0x1ad   :  { %483 = vsyncpa [#allocation4 + $0x1], 1 }

// kernel: e2e_cnn_forward.30
= control target key start
LH: loop header
LB: loop body
LE: loop exit
PB: predicated region body
PF: predicated region fallthrough
CT: control target
= control target key end

     0   :  { %s1331_s0 = inlined_call_operand.hbm [shape: bf16[32,1152], index: 0, kind: input, shape index: {}]   ;;  %s1332_s1 = inlined_call_operand.hbm [shape: bf16[1152,128], index: 1, kind: input, shape index: {}]   ;;  %s1333_s2 = inlined_call_operand.hbm [shape: f32[1,128], index: 2, kind: input, shape index: {}]   ;;  %s1334_s3 = inlined_call_operand.hbm [shape: f32[32,128], index: 3, kind: input, shape index: {}]   ;;  %s1335_s4 = inlined_call_operand.hbm [shape: f32[32,128], index: 4, kind: output, shape index: {}]  }
   0x1   :  { %1340 = sst [smem:[#allocation16_spill]] %s1331_s0 }
   0x2   :  { %1341 = sst [smem:[#allocation17_spill]] %s1333_s2 }
   0x3   :  { %9 = vsyncpa [#allocation3], 0 }
   0x4   :  { %11 = vsyncpa [#allocation3 + $0x1], 0 }
   0x5   :  { %12 = vsyncpa [#allocation6], 0 }
   0x6   :  { %14 = vsyncpa [#allocation6 + $0x1], 0 }
   0x7   :  { %15 = vsyncpa [#allocation9], 0 }
   0x8   :  { %16 = vsyncpa [#allocation4], 0  ;;  %s1059_s15 = smov 0   ;;  %s1061_s16 = smov 0  }
   0x9   :  { %s1063_s17 = smov 0   ;;  %s1065_s18 = smov 0  }
   0xa   :  { %s1067_s19 = smov 0   ;;  %s1069_s20 = smov 0  }
   0xb LB: > { %s1088_s21 = sadd.s32 4294967295, %s1019_s20   ;;  %s50_s22 = sadd.s32 1, %s1007_s17  ;;  %s1019_s20 = sphi %s1069_s20, %s22_s20   ;;  %s1015_s19 = sphi %s1067_s19, %s1360_s19   ;;  %s1011_s18 = sphi %s1065_s18, %s1359_s18   ;;  %s1007_s17 = sphi %s1063_s17, %s1358_s17   ;;  %s1003_s16 = sphi %s1061_s16, %s1357_s16   ;;  %s999_s15 = sphi %s1059_s15, %s1356_s15  }
   0xc   : > { %p57_p0 = scmp.ne.s32.totalorder %s1007_s17, %s1003_s16  ;;  %p58_p1 = scmp.eq.s32.totalorder %s1019_s20, 0 }
   0xd   : > { %p63_p2 = scmp.ne.s32.totalorder %s1003_s16, %s999_s15  ;;  %p1336_p3 = scmp.eq.s32.totalorder %s1088_s21, 0 }
   0xe   : > { %p59_p4 = por %p58_p1, %p57_p0  ;;  %p643_p5 = scmp.ge.s32.totalorder %s1019_s20, 1 }
   0xf   : > { %p1099_p6 = por %p1336_p3, %p63_p2  ;;  %p184_p7 = scmp.lt.s32.totalorder %s1019_s20, 10 }
  0x10   : > { %s1021_s25 = smov [#allocation7]   ;;  %p737_p10 = scmp.lt.s32.totalorder %s1019_s20, 9 }
  0x11   : > { %s1342_s23 = scalar_select %p1099_p6, 1, 0 }
  0x12   : > { %p1104_p8 = pnand %p643_p5, %p184_p7  ;;  %s199_s26 = sshll.u32 %s1021_s25, 4  ;;  %s200_s26 = int_to_ptr.vmem [resolvable:$true] %s199_s26 }
  0x13   : > { %p1117_p12 = pnand %p737_p10, %p59_p4  ;;  %s1022_s29 = smov [#allocation8]  }
  0x14   : > { %s1343_s24 = scalar_select %p1104_p8, 1, 0 }
  0x15   : > { %p721_p9 = pneg %p1104_p8  ;;  %s213_s30 = sshll.u32 %s1022_s29, 4  ;;  %s214_s30 = int_to_ptr.vmem [resolvable:$true] %s213_s30 }
  0x16   : > { %s1345_s28 = scalar_select %p1117_p12, 1, 0 }
  0x17   : > { %p1113_p11 = pnand %p721_p9, %p1336_p3  ;;  %s1346_s2 = sld [smem:[#allocation17_spill]] }
  0x19   : > { %p813_p0 = pneg %p1113_p11 }
  0x1d   : > { %s811_s7 = scalar_lea.hbm %s1346_s2, 16 }
  0x1e   : > { %p812_p13 = scmp.ne.s32.totalorder %s1346_s2, %s811_s7  ;;  %p818_p4 = scmp.lt.u32.totalorder %s811_s7, %s1346_s2 }
  0x20   : > { %p814_p1 = pnand %p813_p0, %p812_p13 }
  0x22   : > { %p815_p2 = pneg %p814_p1 }
  0x24   : > { %p820_p5 = pnand %p818_p4, %p815_p2 }
  0x26   : > { %823 = shalt.err (!%p820_p5)
}
  0x27   : > { %s824_s12 = scalar_lea.vmem %s200_s26, 16  ;;  %s831_s13 = scalar_lea.vmem %s200_s26, 32 }
  0x28   : > { %p825_p7 = scmp.ne.s32.totalorder %s200_s26, %s824_s12  ;;  %p832_p3 = scmp.lt.s32.totalorder %s200_s26, %s200_s26 }
  0x29   : > { %p833_p6 = scmp.lt.s32.totalorder %s831_s13, %s824_s12 }
  0x2a   : > { %p827_p9 = pnand %p825_p7, %p813_p0 }
  0x2b   : > { %p834_p8 = por %p833_p6, %p832_p3 }
  0x2c   : > { %p828_p10 = pneg %p827_p9 }
  0x2e   : > { %p835_p12 = pnand %p834_p8, %p828_p10 }
  0x30   : > { %838 = shalt.err (!%p835_p12)
}
  0x31   : > { %724 = dma.hbm_to_vmem [thread:$0]  (!%p1113_p11), %s1346_s2, 16, %s200_s26, [#allocation6]  }
  0x32   : > { %s839_s5 = scalar_lea.hbm %s1334_s3, 512 }
  0x33   : > { %p840_p13 = scmp.ne.s32.totalorder %s1334_s3, %s839_s5  ;;  %p846_p8 = scmp.lt.u32.totalorder %s839_s5, %s1334_s3 }
  0x35   : > { %p842_p3 = pnand %p840_p13, %p813_p0 }
  0x37   : > { %p843_p6 = pneg %p842_p3 }
  0x39   : > { %p848_p12 = pnand %p846_p8, %p843_p6 }
  0x3b   : > { %851 = shalt.err (!%p848_p12)
}
  0x3c   : > { %s852_s26 = scalar_lea.vmem %s214_s30, 512  ;;  %p860_p5 = scmp.lt.s32.totalorder %s214_s30, %s214_s30 }
  0x3d   : > { %p853_p1 = scmp.ne.s32.totalorder %s214_s30, %s852_s26  ;;  %p861_p7 = scmp.lt.s32.totalorder %s852_s26, %s852_s26 }
  0x3f   : > { %p855_p2 = pnand %p853_p1, %p813_p0  ;;  %p862_p9 = por %p861_p7, %p860_p5 }
  0x41   : > { %p856_p4 = pneg %p855_p2 }
  0x43   : > { %p863_p10 = pnand %p862_p9, %p856_p4 }
  0x45   : > { %866 = shalt.err (!%p863_p10)
}
  0x46   : > { %s1023_s10 = smov 128   ;;  %s1024_s11 = smov 8  }
  0x47   : > { %727 = dma.hbm_to_vmem [thread:$0]  (!%p1113_p11), %s1334_s3, 512, %s214_s30, [#allocation9], %s1023_s10, %s1023_s10, %s1024_s11  }
  0x48   : > { %s1164_s14 = sand.u32 1, %s1007_s17   ;;  %s34_s15 = sadd.s32 1, %s1015_s19 }
  0x49   : > { %p35_p0 = scmp.ge.s32.totalorder %s34_s15, 9  ;;  %s647_s25 = sshll.u32 %s1164_s14, 4 }
  0x4a   : > { %s648_s29 = sshll.u32 %s1015_s19, 6  ;;  %s1347_s0 = sld [smem:[#allocation16_spill]] }
  0x4b   : > { %s1362_s15 = smov (%p35_p0, %s34_s15), 0  ;;  %s231_s30 = scalar_lea.vmem [#allocation2], %s647_s25 }
  0x4c   : > { %s240_s7 = sshll.u32 %s231_s30, 4  ;;  %s46_s8 = ssub.s32 %s1015_s19, %s1362_s15  ;;  %s1178_s7 = int_to_ptr.vmem [resolvable:$true] %s240_s7 }
  0x4d   : > { %p48_p11 = scmp.eq.s32.totalorder %s46_s8, 0  ;;  %s228_s26 = scalar_lea.sflag [#allocation3], %s1164_s14 }
  0x4e   : > { %p1348_p3 = scmp.ne.s32.totalorder %s1345_s28, 0 }
  0x4f   : > { %s1183_s9 = scalar_select %p48_p11, %s1007_s17, %s50_s22  }
  0x50   : > { %s1174_s27 = scalar_lea.hbm %s1347_s0, %s648_s29  ;;  %p869_p6 = pneg %p1348_p3 }
  0x51   : > { %s867_s10 = scalar_lea.hbm %s1174_s27, 256  ;;  %s872_s13 = scalar_lea.hbm %s1347_s0, 2304 }
  0x52   : > { %p868_p13 = scmp.ne.s32.totalorder %s1174_s27, %s867_s10  ;;  %p873_p1 = scmp.lt.u32.totalorder %s1174_s27, %s1347_s0 }
  0x53   : > { %p874_p2 = scmp.lt.u32.totalorder %s872_s13, %s867_s10  ;;  %p876_p5 = scmp.lt.u32.totalorder %s867_s10, %s1174_s27 }
  0x54   : > { %p870_p8 = pnand %p869_p6, %p868_p13 }
  0x55   : > { %p875_p4 = por %p874_p2, %p873_p1 }
  0x56   : > { %p871_p12 = pneg %p870_p8 }
  0x57   : > { %p877_p7 = por %p876_p5, %p875_p4 }
  0x59   : > { %p878_p9 = pnand %p877_p7, %p871_p12 }
  0x5b   : > { %881 = shalt.err (!%p878_p9)
}
  0x5c   : > { %s882_s22 = scalar_lea.vmem %s1178_s7, 256  ;;  %s1025_s5 = smov [#allocation2]  }
  0x5d   : > { %p883_p10 = scmp.ne.s32.totalorder %s1178_s7, %s882_s22  ;;  %s887_s6 = sshll.u32 %s1025_s5, 4  ;;  %s888_s6 = int_to_ptr.vmem [resolvable:$false] %s887_s6 }
  0x5e   : > { %s889_s30 = scalar_lea.vmem %s888_s6, 512  ;;  %p890_p13 = scmp.lt.s32.totalorder %s1178_s7, %s888_s6 }
  0x5f   : > { %p885_p0 = pnand %p883_p10, %p869_p6  ;;  %p891_p8 = scmp.lt.s32.totalorder %s889_s30, %s882_s22 }
  0x61   : > { %p886_p11 = pneg %p885_p0  ;;  %p892_p1 = por %p891_p8, %p890_p13 }
  0x63   : > { %p893_p2 = pnand %p892_p1, %p886_p11 }
  0x65   : > { %896 = shalt.err (!%p893_p2)
}
  0x66   : > { %s1026_s8 = smov 576   ;;  %s1027_s10 = smov 64  }
  0x67   : > { %s1028_s11 = smov 4   ;;  %s250_s12 = sand.u32 1, %s1019_s20  }
  0x68   : > { %731 = dma.hbm_to_vmem [thread:$0]  (!%p1348_p3), %s1174_s27, 256, %s1178_s7, %s228_s26, %s1026_s8, %s1027_s10, %s1028_s11  }
  0x69   : > { %s649_s13 = sshll.u32 %s1164_s14, 6  ;;  %s674_s25 = sshll.u32 %s1015_s19, 10 }
  0x6a   : > { %s254_s29 = scalar_lea.vmem [#allocation5], %s649_s13  ;;  %s1221_s30 = scalar_lea.hbm %s1332_s1, %s674_s25 }
  0x6b   : > { %s262_s22 = sshll.u32 %s254_s29, 4  ;;  %s1225_s0 = scalar_lea.sflag [#allocation6], %s250_s12  ;;  %s1223_s22 = int_to_ptr.vmem [resolvable:$true] %s262_s22 }
  0x6c   : > { %s897_s2 = scalar_lea.hbm %s1221_s30, 1024  ;;  %s902_s7 = scalar_lea.hbm %s1332_s1, 9216 }
  0x6d   : > { %p898_p12 = scmp.ne.s32.totalorder %s1221_s30, %s897_s2  ;;  %p903_p7 = scmp.lt.u32.totalorder %s1221_s30, %s1332_s1 }
  0x6e   : > { %p904_p9 = scmp.lt.u32.totalorder %s902_s7, %s897_s2  ;;  %p906_p0 = scmp.lt.u32.totalorder %s897_s2, %s1221_s30 }
  0x6f   : > { %p900_p4 = pnand %p898_p12, %p869_p6 }
  0x70   : > { %p905_p10 = por %p904_p9, %p903_p7 }
  0x71   : > { %p901_p5 = pneg %p900_p4 }
  0x72   : > { %p907_p11 = por %p906_p0, %p905_p10 }
  0x74   : > { %p908_p13 = pnand %p907_p11, %p901_p5 }
  0x76   : > { %911 = shalt.err (!%p908_p13)
}
  0x77   : > { %s912_s12 = scalar_lea.vmem %s1223_s22, 1024  ;;  %s1029_s13 = smov [#allocation5]  }
  0x78   : > { %p913_p8 = scmp.ne.s32.totalorder %s1223_s22, %s912_s12  ;;  %s917_s25 = sshll.u32 %s1029_s13, 4  ;;  %s918_s25 = int_to_ptr.vmem [resolvable:$false] %s917_s25 }
  0x79   : > { %s919_s29 = scalar_lea.vmem %s918_s25, 2048  ;;  %p920_p12 = scmp.lt.s32.totalorder %s1223_s22, %s918_s25 }
  0x7a   : > { %p915_p1 = pnand %p913_p8, %p869_p6  ;;  %p921_p4 = scmp.lt.s32.totalorder %s919_s29, %s912_s12 }
  0x7c   : > { %p916_p2 = pneg %p915_p1  ;;  %p922_p7 = por %p921_p4, %p920_p12 }
  0x7e   : > { %p923_p9 = pnand %p922_p7, %p916_p2 }
  0x80   : > { %926 = shalt.err (!%p923_p9)
}
  0x81   : > { %734 = dma.hbm_to_vmem [thread:$0]  (!%p1348_p3), %s1221_s30, 1024, %s1223_s22, %s1225_s0, %s1027_s10, %s1027_s10, %s1028_s11  }
  0x82   : > { %p1349_p6 = scmp.ne.s32.totalorder %s1343_s24, 0 }
  0x83   : > { %s276_s2 = sand.u32 (!%p1349_p6), 1, %s1003_s16   ;;  %p1350_p5 = scmp.ne.s32.totalorder (!%p1349_p6), %s1342_s23, 0 }
  0x84   : > { %274 = sbr.rel (%p1349_p6) target bundleno = 449 (0x1c1), region = 36  ;;  %s653_s5 = sshll.u32 (!%p1349_p6), %s276_s2, 4 }
  0x85   : > { %s277_s6 = scalar_lea.sflag (!%p1349_p6), [#allocation3], %s276_s2  ;;  %s1257_s14 = scalar_lea.vmem (!%p1349_p6), [#allocation2], %s653_s5 }
  0x8b   : > { %978 = dma.done.wait (%p1350_p5), %s277_s6, 256  }
  0x8c   : > { %980 = vsyncadd (%p1350_p5), %s277_s6, 4294967040  ;;  %s285_s28 = sand.u32 1, %s1088_s21   ;;  %s654_s27 = sshll.u32 %s276_s2, 6 }
  0x8d   : > { %s286_s0 = scalar_lea.sflag [#allocation6], %s285_s28  ;;  %s1264_s10 = scalar_lea.vmem [#allocation5], %s654_s27 }
  0x8e   : > { %982 = dma.done.wait (%p1350_p5), %s286_s0, 1024  }
  0x8f   : > { %984 = vsyncadd (%p1350_p5), %s286_s0, 4294966272  ;;  %p1351_p3 = scmp.eq.s32.totalorder %s1088_s21, 0 }
  0x91   : > { %986 = dma.done.wait (%p1351_p3), [#allocation6], 16   ;;  %p1352_p10 = pmov %p1351_p3 }
  0x92   : > { %p1353_p0 = pmov %p1351_p3 }
  0x93   : > { %988 = vsyncadd (%p1352_p10), [#allocation6], 4294967280 }
  0x94   : > { %990 = dma.done.wait (%p1353_p0), [#allocation9], 512   ;;  %p1354_p11 = pmov %p1353_p0 }
  0x95   : > { %p657_p13 = scmp.ne.s32.totalorder %s1011_s18, 0 }
  0x96   : > { %992 = vsyncadd (%p1354_p11), [#allocation9], 4294966784  ;;  %v1030_v0 = vmov (!%p657_p13), 0.0  }
  0x97   : > { %330 = sbr.rel (%p657_p13) target bundleno = 158 (0x9e), region = 56  ;;  %331 = vst [vmem:[#allocation10] sm:$0xff] (!%p657_p13), %v1030_v0  ;;  %332 = vst [vmem:[#allocation10 + $0x8] sm:$0xff] (!%p657_p13), %v1030_v0 }
  0x98   : > { %333 = vst [vmem:[#allocation10 + $0x10] sm:$0xff] (!%p657_p13), %v1030_v0  ;;  %334 = vst [vmem:[#allocation10 + $0x18] sm:$0xff] (!%p657_p13), %v1030_v0 }
  0x9e PF: > { %v801_v1 = vld [vmem:[%s1264_s10] sm:$0xff]   ;;  %v802_v2 = vld [vmem:[%s1264_s10 + $0x8] sm:$0xff]   ;;  %v803_v3 = vld [vmem:[%s1264_s10 + $0x10] sm:$0xff]   ;;  %p668_p8 = scmp.ne.s32.totalorder %s1011_s18, 8 }
  0x9f   : > { %685 = vmatprep.subr.bf16.mxu0 %v801_v1  ;;  %v804_v4 = vld [vmem:[%s1264_s10 + $0x18] sm:$0xff]   ;;  %v809_v5 = vld [vmem:[%s1257_s14] sm:$0xff]   ;;  %v806_v7 = vld [vmem:[%s1264_s10 + $0x28] sm:$0xff]  }
  0xa0   : > { %686 = vmatpush3.bf16.msra.mxu0 %v801_v1  ;;  %701 = vmatprep.mubr.bf16.mxu0 %v809_v5  ;;  %v805_v6 = vld [vmem:[%s1264_s10 + $0x20] sm:$0xff]   ;;  %v807_v8 = vld [vmem:[%s1264_s10 + $0x30] sm:$0xff]   ;;  %v808_v9 = vld [vmem:[%s1264_s10 + $0x38] sm:$0xff]  }
  0xa1   : > { %687 = vmatprep.subr.bf16.mxu0 %v802_v2  ;;  %v810_v10 = vld [vmem:[%s1257_s14 + $0x8] sm:$0xff]   ;;  %v669_v24 = vld [vmem:[#allocation7] ss:$0 sm:$0xff] (!%p668_p8) }
  0xa2   : > { %v337_v11 = vld [vmem:[#allocation10 + $0x10] sm:$0xff]  ;;  %v335_v12 = vld [vmem:[#allocation10] sm:$0xff]  ;;  %v338_v14 = vld [vmem:[#allocation10 + $0x18] sm:$0xff] }
  0xa3   : > { %v336_v17 = vld [vmem:[#allocation10 + $0x8] sm:$0xff]  ;;  %v495_v25 = vld [vmem:[#allocation8] sm:$0xff] (!%p668_p8)  ;;  %v497_v32 = vld [vmem:[#allocation8 + $0x10] sm:$0xff] (!%p668_p8) }
  0xa4   : > { %688 = vmatpush3.bf16.msra.mxu0 %v802_v2  ;;  %v496_v28 = vld [vmem:[#allocation8 + $0x8] sm:$0xff] (!%p668_p8)  ;;  %v498_v34 = vld [vmem:[#allocation8 + $0x18] sm:$0xff] (!%p668_p8) }
  0xa5   : > { %689 = vmatprep.subr.bf16.mxu0 %v803_v3 }
  0xa8   : > { %690 = vmatpush3.bf16.msra.mxu0 %v803_v3 }
  0xa9   : > { %691 = vmatprep.subr.bf16.mxu0 %v804_v4 }
  0xac   : > { %692 = vmatpush3.bf16.msra.mxu0 %v804_v4 }
  0xad   : > { %693 = vmatprep.subr.bf16.mxu0 %v805_v6 }
  0xb0   : > { %694 = vmatpush3.bf16.msra.mxu0 %v805_v6 }
  0xb1   : > { %695 = vmatprep.subr.bf16.mxu0 %v806_v7 }
  0xb4   : > { %696 = vmatpush3.bf16.msra.mxu0 %v806_v7 }
  0xb5   : > { %697 = vmatprep.subr.bf16.mxu0 %v807_v8 }
  0xb8   : > { %698 = vmatpush3.bf16.msra.mxu0 %v807_v8 }
  0xb9   : > { %699 = vmatprep.subr.bf16.mxu0 %v808_v9 }
  0xbc   : > { %700 = vmatpush3.bf16.msra.mxu0 %v808_v9 }
  0xbf   : > { %702 = vmatmul.mubr.bf16.vlgmr.msra.gmra.mrb[0].mxu0 %v810_v10 }
 0x192   : > { %v703_v13 = vpop.f32.mrb[0].mxu0  ;;  %479 = sbr.rel (%p668_p8) target bundleno = 423 (0x1a7), region = 60 }
 0x193   : > { %v470_v15 = vadd.f32 %v703_v13, %v337_v11  ;;  %v453_v16 = vpop.f32.mrb[1].mxu0 }
 0x194   : > { %v468_v18 = vadd.f32 %v453_v16, %v335_v12  ;;  %v704_v19 = vpop.f32.mrb[2].mxu0 }
 0x195   : > { %474 = vst [vmem:[#allocation10 + $0x10] sm:$0xff] %v470_v15  ;;  %v471_v20 = vadd.f32 %v704_v19, %v338_v14  ;;  %v456_v21 = vpop.f32.mrb[3].mxu0 }
 0x196   : > { %472 = vst [vmem:[#allocation10] sm:$0xff] %v468_v18  ;;  %v469_v22 = vadd.f32 %v456_v21, %v336_v17 }
 0x197   : > { %475 = vst [vmem:[#allocation10 + $0x18] sm:$0xff] %v471_v20 }
 0x198   : > { %473 = vst [vmem:[#allocation10 + $0x8] sm:$0xff] %v469_v22 }
 0x19c   : > { %v482_v29 = vld [vmem:[#allocation10 + $0x10] sm:$0xff] }
 0x19d   : > { %v480_v23 = vld [vmem:[#allocation10] sm:$0xff]  ;;  %v493_v31 = vadd.f32 %v669_v24, %v482_v29 }
 0x19e   : > { %v491_v26 = vadd.f32 %v669_v24, %v480_v23  ;;  %v483_v33 = vld [vmem:[#allocation10 + $0x18] sm:$0xff] }
 0x19f   : > { %v481_v27 = vld [vmem:[#allocation10 + $0x8] sm:$0xff]  ;;  %v494_v36 = vadd.f32 %v669_v24, %v483_v33  ;;  %v501_v38 = vadd.f32 %v497_v32, %v493_v31 }
 0x1a0   : > { %v492_v30 = vadd.f32 %v669_v24, %v481_v27  ;;  %v499_v35 = vadd.f32 %v495_v25, %v491_v26 }
 0x1a1   : > { %v502_v40 = vadd.f32 %v498_v34, %v494_v36  ;;  %v505_v42 = vmax.f32 %v501_v38, 0.0 }
 0x1a2   : > { %v500_v37 = vadd.f32 %v496_v28, %v492_v30  ;;  %v503_v39 = vmax.f32 %v499_v35, 0.0 }
 0x1a3   : > { %v506_v43 = vmax.f32 %v502_v40, 0.0  ;;  %509 = vst [vmem:[#allocation10 + $0x10] sm:$0xff] %v505_v42 }
 0x1a4   : > { %v504_v41 = vmax.f32 %v500_v37, 0.0  ;;  %507 = vst [vmem:[#allocation10] sm:$0xff] %v503_v39 }
 0x1a5   : > { %510 = vst [vmem:[#allocation10 + $0x18] sm:$0xff] %v506_v43 }
 0x1a6   : > { %508 = vst [vmem:[#allocation10 + $0x8] sm:$0xff] %v504_v41 }
 0x1a7 PF: > { %p740_p1 = scmp.eq.s32.totalorder %s1088_s21, 8  ;;  %s1031_s18 = smov [#allocation10]  }
 0x1a8   : > { %s521_s23 = sshll.u32 %s1031_s18, 4  ;;  %s522_s23 = int_to_ptr.vmem [resolvable:$true] %s521_s23 }
 0x1a9   : > { %s927_s24 = scalar_lea.vmem %s522_s23, 512  ;;  %p934_p7 = scmp.lt.s32.totalorder %s522_s23, %s522_s23 }
 0x1aa   : > { %p928_p2 = scmp.ne.s32.totalorder %s522_s23, %s927_s24  ;;  %p935_p9 = scmp.lt.s32.totalorder %s927_s24, %s927_s24 }
 0x1ac   : > { %p929_p12 = pnand %p928_p2, %p740_p1  ;;  %p936_p6 = por %p935_p9, %p934_p7 }
 0x1ae   : > { %p930_p4 = pneg %p929_p12 }
 0x1b0   : > { %p937_p5 = pnand %p936_p6, %p930_p4 }
 0x1b2   : > { %940 = shalt.err (!%p937_p5)
}
 0x1b3   : > { %s941_s30 = scalar_lea.hbm %s1335_s4, 512 }
 0x1b4   : > { %p942_p3 = scmp.ne.s32.totalorder %s1335_s4, %s941_s30  ;;  %p947_p11 = scmp.lt.u32.totalorder %s941_s30, %s1335_s4 }
 0x1b6   : > { %p943_p10 = pnand %p942_p3, %p740_p1 }
 0x1b8   : > { %p944_p0 = pneg %p943_p10 }
 0x1ba   : > { %p949_p13 = pnand %p947_p11, %p944_p0 }
 0x1bc   : > { %952 = shalt.err (!%p949_p13)
}
 0x1bd   : > { %s1032_s13 = smov 128   ;;  %s1033_s25 = smov 8  }
 0x1be   : > { %718 = dma.vmem_to_hbm [thread:$0]  (%p740_p1), %s522_s23, 512, %s1335_s4, [#allocation4], %s1032_s13, %s1032_s13, %s1033_s25  }
 0x1bf   : > { %994 = dma.done.wait (%p740_p1), [#allocation4], 512  }
 0x1c0   : > { %996 = vsyncadd (%p740_p1), [#allocation4], 4294966784 }
 0x1c1 PF: > { %s22_s20 = sadd.s32 1, %s1019_s20   ;;  %s1355_s5 = smov %s1362_s15 }
 0x1c2   : > { %p19_p8 = scmp.ge.s32.totalorder %s22_s20, 11   ;;  %s1356_s15 = smov %s1003_s16 }
 0x1c3   : > { %s1357_s16 = smov %s1007_s17  ;;  %s1358_s17 = smov %s1183_s9 }
 0x1c4   : > { %s1359_s18 = smov %s1015_s19  ;;  %s1360_s19 = smov %s1355_s5 }
 0x1c5   :  { %21 = sbr.rel (!%p19_p8) target bundleno = 11 (0xb), region = 105 }
 0x1cc   :  { %537 = vsyncpa [#allocation3], 1 }
 0x1cd   :  { %539 = vsyncpa [#allocation3 + $0x1], 1 }
 0x1ce   :  { %540 = vsyncpa [#allocation6], 1 }
 0x1cf   :  { %542 = vsyncpa [#allocation6 + $0x1], 1 }
 0x1d0   :  { %543 = vsyncpa [#allocation9], 1 }
 0x1d1   :  { %544 = vsyncpa [#allocation4], 1 }
 0x1d2   :  { %546 = vsyncpa [#allocation4 + $0x1], 1 }

// kernel: e2e_cnn_forward.31
= control target key start
LH: loop header
LB: loop body
LE: loop exit
PB: predicated region body
PF: predicated region fallthrough
CT: control target
= control target key end

     0   :  { %s1173_s0 = inlined_call_operand.hbm [shape: bf16[32,1152], index: 0, kind: input, shape index: {}]   ;;  %s1174_s1 = inlined_call_operand.hbm [shape: bf16[1152,128], index: 1, kind: input, shape index: {}]   ;;  %s1175_s2 = inlined_call_operand.hbm [shape: f32[1,128], index: 2, kind: input, shape index: {}]   ;;  %s1176_s3 = inlined_call_operand.hbm [shape: f32[32,128], index: 3, kind: output, shape index: {}]  }
   0x1   :  { %1181 = sst [smem:[#allocation13_spill]] %s1173_s0 }
   0x2   :  { %8 = vsyncpa [#allocation3], 0 }
   0x3   :  { %10 = vsyncpa [#allocation3 + $0x1], 0 }
   0x4   :  { %11 = vsyncpa [#allocation6], 0 }
   0x5   :  { %13 = vsyncpa [#allocation6 + $0x1], 0 }
   0x6   :  { %14 = vsyncpa [#allocation4], 0  ;;  %s929_s12 = smov 0   ;;  %s931_s13 = smov 0  }
   0x7   :  { %s933_s14 = smov 0   ;;  %s935_s15 = smov 0  }
   0x8   :  { %s937_s16 = smov 0   ;;  %s939_s17 = smov 0  }
   0x9 LB: > { %s958_s18 = sadd.s32 4294967295, %s897_s17   ;;  %s48_s19 = sadd.s32 1, %s885_s14  ;;  %s897_s17 = sphi %s939_s17, %s20_s17   ;;  %s893_s16 = sphi %s937_s16, %s1196_s16   ;;  %s889_s15 = sphi %s935_s15, %s1195_s15   ;;  %s885_s14 = sphi %s933_s14, %s1194_s14   ;;  %s881_s13 = sphi %s931_s13, %s1193_s13   ;;  %s877_s12 = sphi %s929_s12, %s1192_s12  }
   0xa   : > { %p55_p0 = scmp.ne.s32.totalorder %s885_s14, %s881_s13  ;;  %p56_p1 = scmp.eq.s32.totalorder %s897_s17, 0 }
   0xb   : > { %p61_p2 = scmp.ne.s32.totalorder %s881_s13, %s877_s12  ;;  %p1177_p3 = scmp.eq.s32.totalorder %s958_s18, 0 }
   0xc   : > { %p57_p4 = por %p56_p1, %p55_p0  ;;  %p567_p5 = scmp.ge.s32.totalorder %s897_s17, 1 }
   0xd   : > { %p969_p6 = por %p1177_p3, %p61_p2  ;;  %p154_p7 = scmp.lt.s32.totalorder %s897_s17, 10 }
   0xe   : > { %s899_s22 = smov [#allocation7]   ;;  %p651_p10 = scmp.lt.s32.totalorder %s897_s17, 9 }
   0xf   : > { %s1182_s20 = scalar_select %p969_p6, 1, 0 }
  0x10   : > { %p974_p8 = pnand %p567_p5, %p154_p7  ;;  %s169_s23 = sshll.u32 %s899_s22, 4  ;;  %s170_s23 = int_to_ptr.vmem [resolvable:$true] %s169_s23 }
  0x11   : > { %s982_s24 = sand.u32 1, %s885_s14   ;;  %p990_p12 = pnand %p651_p10, %p57_p4 }
  0x12   : > { %s1183_s21 = scalar_select %p974_p8, 1, 0 }
  0x13   : > { %p639_p9 = pneg %p974_p8  ;;  %s721_s29 = scalar_lea.hbm %s1175_s2, 16 }
  0x14   : > { %s1185_s26 = scalar_select %p990_p12, 1, 0 }
  0x15   : > { %p986_p11 = pnand %p639_p9, %p1177_p3  ;;  %p722_p13 = scmp.ne.s32.totalorder %s1175_s2, %s721_s29 }
  0x16   : > { %p728_p5 = scmp.lt.u32.totalorder %s721_s29, %s1175_s2 }
  0x17   : > { %p723_p0 = pneg %p986_p11 }
  0x19   : > { %p724_p1 = pnand %p723_p0, %p722_p13 }
  0x1b   : > { %p725_p2 = pneg %p724_p1 }
  0x1d   : > { %p730_p4 = pnand %p728_p5, %p725_p2 }
  0x1f   : > { %733 = shalt.err (!%p730_p4)
}
  0x20   : > { %s734_s7 = scalar_lea.vmem %s170_s23, 16  ;;  %s741_s8 = scalar_lea.vmem %s170_s23, 32 }
  0x21   : > { %p735_p7 = scmp.ne.s32.totalorder %s170_s23, %s734_s7  ;;  %p742_p3 = scmp.lt.s32.totalorder %s170_s23, %s170_s23 }
  0x22   : > { %p743_p6 = scmp.lt.s32.totalorder %s741_s8, %s734_s7 }
  0x23   : > { %p737_p9 = pnand %p735_p7, %p723_p0 }
  0x24   : > { %p744_p8 = por %p743_p6, %p742_p3 }
  0x25   : > { %p738_p10 = pneg %p737_p9 }
  0x27   : > { %p745_p12 = pnand %p744_p8, %p738_p10 }
  0x29   : > { %748 = shalt.err (!%p745_p12)
}
  0x2a   : > { %642 = dma.hbm_to_vmem [thread:$0]  (!%p986_p11), %s1175_s2, 16, %s170_s23, [#allocation6]  }
  0x2b   : > { %s32_s11 = sadd.s32 1, %s893_s16  ;;  %s570_s12 = sshll.u32 %s982_s24, 4 }
  0x2c   : > { %p33_p3 = scmp.ge.s32.totalorder %s32_s11, 9  ;;  %s571_s22 = sshll.u32 %s893_s16, 6 }
  0x2d   : > { %s184_s27 = scalar_lea.vmem [#allocation2], %s570_s12  ;;  %s1186_s0 = sld [smem:[#allocation13_spill]] }
  0x2e   : > { %s193_s25 = sshll.u32 %s184_s27, 4  ;;  %s1198_s11 = smov (%p33_p3, %s32_s11), 0  ;;  %s1020_s25 = int_to_ptr.vmem [resolvable:$true] %s193_s25 }
  0x2f   : > { %s44_s23 = ssub.s32 %s893_s16, %s1198_s11  ;;  %s203_s4 = sand.u32 1, %s897_s17  }
  0x30   : > { %p46_p6 = scmp.eq.s32.totalorder %s44_s23, 0  ;;  %s181_s6 = scalar_lea.sflag [#allocation3], %s982_s24 }
  0x31   : > { %p1187_p11 = scmp.ne.s32.totalorder %s1185_s26, 0 }
  0x32   : > { %s1028_s5 = scalar_select %p46_p6, %s885_s14, %s48_s19  }
  0x33   : > { %s1018_s30 = scalar_lea.hbm %s1186_s0, %s571_s22  ;;  %p751_p12 = pneg %p1187_p11 }
  0x34   : > { %s749_s7 = scalar_lea.hbm %s1018_s30, 256  ;;  %s754_s10 = scalar_lea.hbm %s1186_s0, 2304 }
  0x35   : > { %p750_p8 = scmp.ne.s32.totalorder %s1018_s30, %s749_s7  ;;  %p755_p1 = scmp.lt.u32.totalorder %s1018_s30, %s1186_s0 }
  0x36   : > { %p756_p2 = scmp.lt.u32.totalorder %s754_s10, %s749_s7  ;;  %p758_p4 = scmp.lt.u32.totalorder %s749_s7, %s1018_s30 }
  0x37   : > { %p752_p13 = pnand %p751_p12, %p750_p8 }
  0x38   : > { %p757_p5 = por %p756_p2, %p755_p1 }
  0x39   : > { %p753_p0 = pneg %p752_p13 }
  0x3a   : > { %p759_p7 = por %p758_p4, %p757_p5 }
  0x3c   : > { %p760_p9 = pnand %p759_p7, %p753_p0 }
  0x3e   : > { %763 = shalt.err (!%p760_p9)
}
  0x3f   : > { %s764_s19 = scalar_lea.vmem %s1020_s25, 256  ;;  %s900_s27 = smov [#allocation2]  }
  0x40   : > { %p765_p10 = scmp.ne.s32.totalorder %s1020_s25, %s764_s19  ;;  %s769_s28 = sshll.u32 %s900_s27, 4  ;;  %s770_s28 = int_to_ptr.vmem [resolvable:$false] %s769_s28 }
  0x41   : > { %s771_s29 = scalar_lea.vmem %s770_s28, 512  ;;  %p772_p8 = scmp.lt.s32.totalorder %s1020_s25, %s770_s28 }
  0x42   : > { %p767_p3 = pnand %p765_p10, %p751_p12  ;;  %p773_p13 = scmp.lt.s32.totalorder %s771_s29, %s764_s19 }
  0x44   : > { %p768_p6 = pneg %p767_p3  ;;  %p774_p1 = por %p773_p13, %p772_p8 }
  0x46   : > { %p775_p2 = pnand %p774_p1, %p768_p6 }
  0x48   : > { %778 = shalt.err (!%p775_p2)
}
  0x49   : > { %s901_s23 = smov 576   ;;  %s902_s7 = smov 64  }
  0x4a   : > { %s903_s8 = smov 4   ;;  %s572_s9 = sshll.u32 %s982_s24, 6 }
  0x4b   : > { %646 = dma.hbm_to_vmem [thread:$0]  (!%p1187_p11), %s1018_s30, 256, %s1020_s25, %s181_s6, %s901_s23, %s902_s7, %s903_s8  }
  0x4c   : > { %s596_s10 = sshll.u32 %s893_s16, 10  ;;  %s207_s27 = scalar_lea.vmem [#allocation5], %s572_s9 }
  0x4d   : > { %s1065_s19 = scalar_lea.hbm %s1174_s1, %s596_s10  ;;  %s215_s28 = sshll.u32 %s207_s27, 4  ;;  %s1067_s28 = int_to_ptr.vmem [resolvable:$true] %s215_s28 }
  0x4e   : > { %s1071_s29 = scalar_lea.sflag [#allocation6], %s203_s4  ;;  %s779_s0 = scalar_lea.hbm %s1065_s19, 1024 }
  0x4f   : > { %p780_p0 = scmp.ne.s32.totalorder %s1065_s19, %s779_s0  ;;  %s784_s30 = scalar_lea.hbm %s1174_s1, 9216 }
  0x50   : > { %p785_p7 = scmp.lt.u32.totalorder %s1065_s19, %s1174_s1  ;;  %p786_p9 = scmp.lt.u32.totalorder %s784_s30, %s779_s0 }
  0x51   : > { %p782_p5 = pnand %p780_p0, %p751_p12  ;;  %p788_p3 = scmp.lt.u32.totalorder %s779_s0, %s1065_s19 }
  0x52   : > { %p787_p10 = por %p786_p9, %p785_p7 }
  0x53   : > { %p783_p4 = pneg %p782_p5 }
  0x54   : > { %p789_p6 = por %p788_p3, %p787_p10 }
  0x56   : > { %p790_p8 = pnand %p789_p6, %p783_p4 }
  0x58   : > { %793 = shalt.err (!%p790_p8)
}
  0x59   : > { %s794_s4 = scalar_lea.vmem %s1067_s28, 1024  ;;  %s904_s9 = smov [#allocation5]  }
  0x5a   : > { %p795_p13 = scmp.ne.s32.totalorder %s1067_s28, %s794_s4  ;;  %s799_s10 = sshll.u32 %s904_s9, 4  ;;  %s800_s10 = int_to_ptr.vmem [resolvable:$false] %s799_s10 }
  0x5b   : > { %s801_s12 = scalar_lea.vmem %s800_s10, 2048  ;;  %p802_p0 = scmp.lt.s32.totalorder %s1067_s28, %s800_s10 }
  0x5c   : > { %p797_p1 = pnand %p795_p13, %p751_p12  ;;  %p803_p5 = scmp.lt.s32.totalorder %s801_s12, %s794_s4 }
  0x5e   : > { %p798_p2 = pneg %p797_p1  ;;  %p804_p7 = por %p803_p5, %p802_p0 }
  0x60   : > { %p805_p9 = pnand %p804_p7, %p798_p2 }
  0x62   : > { %808 = shalt.err (!%p805_p9)
}
  0x63   : > { %649 = dma.hbm_to_vmem [thread:$0]  (!%p1187_p11), %s1065_s19, 1024, %s1067_s28, %s1071_s29, %s902_s7, %s902_s7, %s903_s8  }
  0x64   : > { %p1188_p12 = scmp.ne.s32.totalorder %s1183_s21, 0 }
  0x65   : > { %s229_s0 = sand.u32 (!%p1188_p12), 1, %s881_s13   ;;  %p1189_p4 = scmp.ne.s32.totalorder (!%p1188_p12), %s1182_s20, 0 }
  0x66   : > { %227 = sbr.rel (%p1188_p12) target bundleno = 414 (0x19e), region = 32  ;;  %s576_s22 = sshll.u32 (!%p1188_p12), %s229_s0, 4 }
  0x67   : > { %s230_s27 = scalar_lea.sflag (!%p1188_p12), [#allocation3], %s229_s0  ;;  %s1103_s24 = scalar_lea.vmem (!%p1188_p12), [#allocation2], %s576_s22 }
  0x6d   : > { %860 = dma.done.wait (%p1189_p4), %s230_s27, 256  }
  0x6e   : > { %862 = vsyncadd (%p1189_p4), %s230_s27, 4294967040  ;;  %s238_s26 = sand.u32 1, %s958_s18   ;;  %s577_s25 = sshll.u32 %s229_s0, 6 }
  0x6f   : > { %s239_s7 = scalar_lea.sflag [#allocation6], %s238_s26  ;;  %s1110_s8 = scalar_lea.vmem [#allocation5], %s577_s25 }
  0x70   : > { %864 = dma.done.wait (%p1189_p4), %s239_s7, 1024  }
  0x71   : > { %866 = vsyncadd (%p1189_p4), %s239_s7, 4294966272  ;;  %p1190_p11 = scmp.eq.s32.totalorder %s958_s18, 0 }
  0x73   : > { %868 = dma.done.wait (%p1190_p11), [#allocation6], 16   ;;  %p1191_p10 = pmov %p1190_p11 }
  0x74   : > { %p579_p3 = scmp.ne.s32.totalorder %s889_s15, 0 }
  0x75   : > { %870 = vsyncadd (%p1191_p10), [#allocation6], 4294967280  ;;  %v905_v0 = vmov (!%p579_p3), 0.0  }
  0x76   : > { %276 = sbr.rel (%p579_p3) target bundleno = 125 (0x7d), region = 48  ;;  %277 = vst [vmem:[#allocation8] sm:$0xff] (!%p579_p3), %v905_v0  ;;  %278 = vst [vmem:[#allocation8 + $0x8] sm:$0xff] (!%p579_p3), %v905_v0 }
  0x77   : > { %279 = vst [vmem:[#allocation8 + $0x10] sm:$0xff] (!%p579_p3), %v905_v0  ;;  %280 = vst [vmem:[#allocation8 + $0x18] sm:$0xff] (!%p579_p3), %v905_v0 }
  0x7d PF: > { %v711_v1 = vld [vmem:[%s1110_s8] sm:$0xff]   ;;  %v712_v2 = vld [vmem:[%s1110_s8 + $0x8] sm:$0xff]   ;;  %v713_v3 = vld [vmem:[%s1110_s8 + $0x10] sm:$0xff]   ;;  %p590_p6 = scmp.ne.s32.totalorder %s889_s15, 8 }
  0x7e   : > { %607 = vmatprep.subr.bf16.mxu0 %v711_v1  ;;  %v714_v4 = vld [vmem:[%s1110_s8 + $0x18] sm:$0xff]   ;;  %v719_v5 = vld [vmem:[%s1103_s24] sm:$0xff]   ;;  %v716_v7 = vld [vmem:[%s1110_s8 + $0x28] sm:$0xff]  }
  0x7f   : > { %608 = vmatpush3.bf16.msra.mxu0 %v711_v1  ;;  %623 = vmatprep.mubr.bf16.mxu0 %v719_v5  ;;  %v715_v6 = vld [vmem:[%s1110_s8 + $0x20] sm:$0xff]   ;;  %v717_v8 = vld [vmem:[%s1110_s8 + $0x30] sm:$0xff]   ;;  %v718_v9 = vld [vmem:[%s1110_s8 + $0x38] sm:$0xff]  }
  0x80   : > { %609 = vmatprep.subr.bf16.mxu0 %v712_v2  ;;  %v720_v10 = vld [vmem:[%s1103_s24 + $0x8] sm:$0xff]   ;;  %v591_v24 = vld [vmem:[#allocation7] ss:$0 sm:$0xff] (!%p590_p6) }
  0x81   : > { %v283_v11 = vld [vmem:[#allocation8 + $0x10] sm:$0xff]  ;;  %v281_v12 = vld [vmem:[#allocation8] sm:$0xff]  ;;  %v284_v14 = vld [vmem:[#allocation8 + $0x18] sm:$0xff] }
  0x82   : > { %v282_v17 = vld [vmem:[#allocation8 + $0x8] sm:$0xff] }
  0x83   : > { %610 = vmatpush3.bf16.msra.mxu0 %v712_v2 }
  0x84   : > { %611 = vmatprep.subr.bf16.mxu0 %v713_v3 }
  0x87   : > { %612 = vmatpush3.bf16.msra.mxu0 %v713_v3 }
  0x88   : > { %613 = vmatprep.subr.bf16.mxu0 %v714_v4 }
  0x8b   : > { %614 = vmatpush3.bf16.msra.mxu0 %v714_v4 }
  0x8c   : > { %615 = vmatprep.subr.bf16.mxu0 %v715_v6 }
  0x8f   : > { %616 = vmatpush3.bf16.msra.mxu0 %v715_v6 }
  0x90   : > { %617 = vmatprep.subr.bf16.mxu0 %v716_v7 }
  0x93   : > { %618 = vmatpush3.bf16.msra.mxu0 %v716_v7 }
  0x94   : > { %619 = vmatprep.subr.bf16.mxu0 %v717_v8 }
  0x97   : > { %620 = vmatpush3.bf16.msra.mxu0 %v717_v8 }
  0x98   : > { %621 = vmatprep.subr.bf16.mxu0 %v718_v9 }
  0x9b   : > { %622 = vmatpush3.bf16.msra.mxu0 %v718_v9 }
  0x9e   : > { %624 = vmatmul.mubr.bf16.vlgmr.msra.gmra.mrb[0].mxu0 %v720_v10 }
 0x171   : > { %v625_v13 = vpop.f32.mrb[0].mxu0  ;;  %425 = sbr.rel (%p590_p6) target bundleno = 388 (0x184), region = 52 }
 0x172   : > { %v416_v15 = vadd.f32 %v625_v13, %v283_v11  ;;  %v399_v16 = vpop.f32.mrb[1].mxu0 }
 0x173   : > { %v414_v18 = vadd.f32 %v399_v16, %v281_v12  ;;  %v626_v19 = vpop.f32.mrb[2].mxu0 }
 0x174   : > { %420 = vst [vmem:[#allocation8 + $0x10] sm:$0xff] %v416_v15  ;;  %v417_v20 = vadd.f32 %v626_v19, %v284_v14  ;;  %v402_v21 = vpop.f32.mrb[3].mxu0 }
 0x175   : > { %418 = vst [vmem:[#allocation8] sm:$0xff] %v414_v18  ;;  %v415_v22 = vadd.f32 %v402_v21, %v282_v17 }
 0x176   : > { %421 = vst [vmem:[#allocation8 + $0x18] sm:$0xff] %v417_v20 }
 0x177   : > { %419 = vst [vmem:[#allocation8 + $0x8] sm:$0xff] %v415_v22 }
 0x17b   : > { %v428_v28 = vld [vmem:[#allocation8 + $0x10] sm:$0xff] }
 0x17c   : > { %v426_v23 = vld [vmem:[#allocation8] sm:$0xff]  ;;  %v439_v30 = vadd.f32 %v591_v24, %v428_v28 }
 0x17d   : > { %v437_v26 = vadd.f32 %v591_v24, %v426_v23  ;;  %v429_v29 = vld [vmem:[#allocation8 + $0x18] sm:$0xff] }
 0x17e   : > { %v427_v25 = vld [vmem:[#allocation8 + $0x8] sm:$0xff]  ;;  %v440_v31 = vadd.f32 %v591_v24, %v429_v29  ;;  %v443_v34 = vmax.f32 %v439_v30, 0.0 }
 0x17f   : > { %v438_v27 = vadd.f32 %v591_v24, %v427_v25  ;;  %v441_v32 = vmax.f32 %v437_v26, 0.0 }
 0x180   : > { %v444_v35 = vmax.f32 %v440_v31, 0.0  ;;  %447 = vst [vmem:[#allocation8 + $0x10] sm:$0xff] %v443_v34 }
 0x181   : > { %v442_v33 = vmax.f32 %v438_v27, 0.0  ;;  %445 = vst [vmem:[#allocation8] sm:$0xff] %v441_v32 }
 0x182   : > { %448 = vst [vmem:[#allocation8 + $0x18] sm:$0xff] %v444_v35 }
 0x183   : > { %446 = vst [vmem:[#allocation8 + $0x8] sm:$0xff] %v442_v33 }
 0x184 PF: > { %p653_p8 = scmp.eq.s32.totalorder %s958_s18, 8  ;;  %s906_s15 = smov [#allocation8]  }
 0x185   : > { %s459_s20 = sshll.u32 %s906_s15, 4  ;;  %s460_s20 = int_to_ptr.vmem [resolvable:$true] %s459_s20 }
 0x186   : > { %s809_s21 = scalar_lea.vmem %s460_s20, 512  ;;  %p816_p0 = scmp.lt.s32.totalorder %s460_s20, %s460_s20 }
 0x187   : > { %p810_p13 = scmp.ne.s32.totalorder %s460_s20, %s809_s21  ;;  %p817_p5 = scmp.lt.s32.totalorder %s809_s21, %s809_s21 }
 0x189   : > { %p811_p1 = pnand %p810_p13, %p653_p8  ;;  %p818_p7 = por %p817_p5, %p816_p0 }
 0x18b   : > { %p812_p2 = pneg %p811_p1 }
 0x18d   : > { %p819_p9 = pnand %p818_p7, %p812_p2 }
 0x18f   : > { %822 = shalt.err (!%p819_p9)
}
 0x190   : > { %s823_s29 = scalar_lea.hbm %s1176_s3, 512 }
 0x191   : > { %p824_p12 = scmp.ne.s32.totalorder %s1176_s3, %s823_s29  ;;  %p829_p10 = scmp.lt.u32.totalorder %s823_s29, %s1176_s3 }
 0x193   : > { %p825_p4 = pnand %p824_p12, %p653_p8 }
 0x195   : > { %p826_p11 = pneg %p825_p4 }
 0x197   : > { %p831_p3 = pnand %p829_p10, %p826_p11 }
 0x199   : > { %834 = shalt.err (!%p831_p3)
}
 0x19a   : > { %s907_s9 = smov 128   ;;  %s908_s10 = smov 8  }
 0x19b   : > { %636 = dma.vmem_to_hbm [thread:$0]  (%p653_p8), %s460_s20, 512, %s1176_s3, [#allocation4], %s907_s9, %s907_s9, %s908_s10  }
 0x19c   : > { %872 = dma.done.wait (%p653_p8), [#allocation4], 512  }
 0x19d   : > { %874 = vsyncadd (%p653_p8), [#allocation4], 4294966784 }
 0x19e PF: > { %s20_s17 = sadd.s32 1, %s897_s17   ;;  %s1192_s12 = smov %s881_s13 }
 0x19f   : > { %p17_p6 = scmp.ge.s32.totalorder %s20_s17, 11   ;;  %s1193_s13 = smov %s885_s14 }
 0x1a0   : > { %s1194_s14 = smov %s1028_s5  ;;  %s1195_s15 = smov %s893_s16 }
 0x1a1   : > { %s1196_s16 = smov %s1198_s11  ;;  %19 = sbr.rel (!%p17_p6) target bundleno = 9 (0x9), region = 96 }
 0x1a8   :  { %475 = vsyncpa [#allocation3], 1 }
 0x1a9   :  { %477 = vsyncpa [#allocation3 + $0x1], 1 }
 0x1aa   :  { %478 = vsyncpa [#allocation6], 1 }
 0x1ab   :  { %480 = vsyncpa [#allocation6 + $0x1], 1 }
 0x1ac   :  { %481 = vsyncpa [#allocation4], 1 }
 0x1ad   :  { %483 = vsyncpa [#allocation4 + $0x1], 1 }

// kernel: e2e_cnn_forward.28
= control target key start
LH: loop header
LB: loop body
LE: loop exit
PB: predicated region body
PF: predicated region fallthrough
CT: control target
= control target key end

     0   :  { %8 = vsyncpa [#allocation3], 0  ;;  %s481_s0 = inlined_call_operand.hbm [shape: bf16[32,128], index: 0, kind: input, shape index: {}]   ;;  %s482_s1 = inlined_call_operand.hbm [shape: bf16[128,128], index: 1, kind: input, shape index: {}]   ;;  %s483_s2 = inlined_call_operand.hbm [shape: f32[1,128], index: 2, kind: input, shape index: {}]   ;;  %s484_s3 = inlined_call_operand.hbm [shape: f32[32,128], index: 3, kind: output, shape index: {}]  }
   0x1   :  { %9 = vsyncpa [#allocation6], 0 }
   0x2   :  { %10 = vsyncpa [#allocation4], 0  ;;  %s398_s12 = smov [#allocation5]   ;;  %s399_s14 = smov [#allocation2]  }
   0x3   :  { %s28_s13 = sshll.u32 %s398_s12, 4  ;;  %s16_s15 = sshll.u32 %s399_s14, 4  ;;  %s29_s13 = int_to_ptr.vmem [resolvable:$true] %s28_s13  ;;  %s426_s15 = int_to_ptr.vmem [resolvable:$true] %s16_s15 }
   0x4   :  { %s304_s18 = scalar_lea.hbm %s482_s1, 1024 }
   0x5   :  { %p305_p0 = scmp.ne.s32.totalorder %s482_s1, %s304_s18  ;;  %p308_p1 = scmp.lt.u32.totalorder %s304_s18, %s482_s1 }
   0x7   :  { %p310_p2 = pnand %p308_p1, %p305_p0 }
   0x9   :  { %313 = shalt.err (!%p310_p2)
}
   0xa   :  { %s314_s23 = scalar_lea.vmem %s29_s13, 1024  ;;  %p319_p4 = scmp.lt.s32.totalorder %s29_s13, %s29_s13 }
   0xb   :  { %p315_p3 = scmp.ne.s32.totalorder %s29_s13, %s314_s23  ;;  %p320_p5 = scmp.lt.s32.totalorder %s314_s23, %s314_s23 }
   0xd   :  { %p321_p6 = por %p320_p5, %p319_p4 }
   0xf   :  { %p322_p7 = pnand %p321_p6, %p315_p3 }
  0x11   :  { %325 = shalt.err (!%p322_p7)
}
  0x12   :  { %s400_s24 = smov 64   ;;  %s401_s25 = smov 4  }
  0x13   :  { %34 = dma.hbm_to_vmem [thread:$0]  %s482_s1, 1024, %s29_s13, [#allocation6], %s400_s24, %s400_s24, %s401_s25  }
  0x14   :  { %s326_s30 = scalar_lea.hbm %s481_s0, 256 }
  0x15   :  { %p327_p8 = scmp.ne.s32.totalorder %s481_s0, %s326_s30  ;;  %p330_p9 = scmp.lt.u32.totalorder %s326_s30, %s481_s0 }
  0x17   :  { %p332_p10 = pnand %p330_p9, %p327_p8 }
  0x19   :  { %335 = shalt.err (!%p332_p10)
}
  0x1a   :  { %s336_s8 = scalar_lea.vmem %s426_s15, 256  ;;  %p341_p12 = scmp.lt.s32.totalorder %s426_s15, %s426_s15 }
  0x1b   :  { %p337_p11 = scmp.ne.s32.totalorder %s426_s15, %s336_s8  ;;  %p342_p13 = scmp.lt.s32.totalorder %s336_s8, %s336_s8 }
  0x1d   :  { %p343_p0 = por %p342_p13, %p341_p12 }
  0x1f   :  { %p344_p1 = pnand %p343_p0, %p337_p11 }
  0x21   :  { %347 = shalt.err (!%p344_p1)
}
  0x22   :  { %22 = dma.hbm_to_vmem [thread:$0]  %s481_s0, 256, %s426_s15, [#allocation3], %s400_s24, %s400_s24, %s401_s25  }
  0x23   :  { %s402_s10 = smov [#allocation7]   ;;  %s348_s14 = scalar_lea.hbm %s483_s2, 16 }
  0x24   :  { %s41_s11 = sshll.u32 %s402_s10, 4  ;;  %p349_p2 = scmp.ne.s32.totalorder %s483_s2, %s348_s14  ;;  %s42_s11 = int_to_ptr.vmem [resolvable:$true] %s41_s11 }
  0x25   :  { %p352_p3 = scmp.lt.u32.totalorder %s348_s14, %s483_s2 }
  0x27   :  { %p354_p4 = pnand %p352_p3, %p349_p2 }
  0x29   :  { %357 = shalt.err (!%p354_p4)
}
  0x2a   :  { %s358_s20 = scalar_lea.vmem %s42_s11, 16  ;;  %s362_s0 = scalar_lea.vmem %s42_s11, 32 }
  0x2b   :  { %p359_p5 = scmp.ne.s32.totalorder %s42_s11, %s358_s20  ;;  %p363_p6 = scmp.lt.s32.totalorder %s42_s11, %s42_s11 }
  0x2c   :  { %p364_p7 = scmp.lt.s32.totalorder %s362_s0, %s358_s20 }
  0x2e   :  { %p365_p8 = por %p364_p7, %p363_p6 }
  0x30   :  { %p366_p9 = pnand %p365_p8, %p359_p5 }
  0x32   :  { %369 = shalt.err (!%p366_p9)
}
  0x33   :  { %44 = dma.hbm_to_vmem [thread:$0]  %s483_s2, 16, %s42_s11, [#allocation6]  }
  0x34   :  { %392 = dma.done.wait [#allocation3], 256  }
  0x35   :  { %393 = vsyncadd [#allocation3], 4294967040 }
  0x36   :  { %394 = dma.done.wait [#allocation6], 1040  }
  0x37   :  { %395 = vsyncadd [#allocation6], 4294966256  ;;  %v294_v0 = vld [vmem:[#allocation5] sm:$0xff]   ;;  %v295_v1 = vld [vmem:[#allocation5 + $0x8] sm:$0xff]   ;;  %s403_s2 = smov [#allocation8]  }
  0x38   :  { %265 = vmatprep.subr.bf16.mxu0 %v294_v0  ;;  %v296_v2 = vld [vmem:[#allocation5 + $0x10] sm:$0xff]   ;;  %v297_v3 = vld [vmem:[#allocation5 + $0x18] sm:$0xff]   ;;  %v298_v5 = vld [vmem:[#allocation5 + $0x20] sm:$0xff]   ;;  %s231_s22 = sshll.u32 %s403_s2, 4  ;;  %s232_s22 = int_to_ptr.vmem [resolvable:$true] %s231_s22 }
  0x39   :  { %266 = vmatpush3.bf16.msra.mxu0 %v294_v0  ;;  %v302_v4 = vld [vmem:[#allocation2] sm:$0xff]   ;;  %v299_v6 = vld [vmem:[#allocation5 + $0x28] sm:$0xff]   ;;  %v301_v8 = vld [vmem:[#allocation5 + $0x38] sm:$0xff]   ;;  %s370_s23 = scalar_lea.vmem %s232_s22, 512  ;;  %p375_p11 = scmp.lt.s32.totalorder %s232_s22, %s232_s22 }
  0x3a   :  { %267 = vmatprep.subr.bf16.mxu0 %v295_v1  ;;  %281 = vmatprep.mubr.bf16.mxu0 %v302_v4  ;;  %v300_v7 = vld [vmem:[#allocation5 + $0x30] sm:$0xff]   ;;  %v303_v9 = vld [vmem:[#allocation2 + $0x8] sm:$0xff]   ;;  %v254_v11 = vld [vmem:[#allocation7] ss:$0 sm:$0xff]  ;;  %p371_p10 = scmp.ne.s32.totalorder %s232_s22, %s370_s23  ;;  %p376_p12 = scmp.lt.s32.totalorder %s370_s23, %s370_s23 }
  0x3c   :  { %p377_p13 = por %p376_p12, %p375_p11 }
  0x3d   :  { %268 = vmatpush3.bf16.msra.mxu0 %v295_v1 }
  0x3e   :  { %269 = vmatprep.subr.bf16.mxu0 %v296_v2  ;;  %p378_p0 = pnand %p377_p13, %p371_p10 }
  0x41   :  { %270 = vmatpush3.bf16.msra.mxu0 %v296_v2 }
  0x42   :  { %271 = vmatprep.subr.bf16.mxu0 %v297_v3 }
  0x45   :  { %272 = vmatpush3.bf16.msra.mxu0 %v297_v3 }
  0x46   :  { %273 = vmatprep.subr.bf16.mxu0 %v298_v5 }
  0x49   :  { %274 = vmatpush3.bf16.msra.mxu0 %v298_v5 }
  0x4a   :  { %275 = vmatprep.subr.bf16.mxu0 %v299_v6 }
  0x4d   :  { %276 = vmatpush3.bf16.msra.mxu0 %v299_v6 }
  0x4e   :  { %277 = vmatprep.subr.bf16.mxu0 %v300_v7 }
  0x51   :  { %278 = vmatpush3.bf16.msra.mxu0 %v300_v7 }
  0x52   :  { %279 = vmatprep.subr.bf16.mxu0 %v301_v8 }
  0x55   :  { %280 = vmatpush3.bf16.msra.mxu0 %v301_v8 }
  0x58   :  { %282 = vmatmul.mubr.bf16.vlgmr.msra.gmra.mrb[0].mxu0 %v303_v9 }
 0x12b   :  { %v283_v10 = vpop.f32.mrb[0].mxu0 }
 0x12c   :  { %v181_v12 = vpop.f32.mrb[1].mxu0  ;;  %v220_v14 = vadd.f32 %v283_v10, %v254_v11 }
 0x12d   :  { %v284_v13 = vpop.f32.mrb[2].mxu0  ;;  %v218_v16 = vadd.f32 %v254_v11, %v181_v12 }
 0x12e   :  { %v184_v15 = vpop.f32.mrb[3].mxu0  ;;  %224 = vst [vmem:[#allocation8 + $0x10] sm:$0xff] %v220_v14  ;;  %v221_v17 = vadd.f32 %v284_v13, %v254_v11 }
 0x12f   :  { %222 = vst [vmem:[#allocation8] sm:$0xff] %v218_v16  ;;  %v219_v18 = vadd.f32 %v254_v11, %v184_v15 }
 0x130   :  { %225 = vst [vmem:[#allocation8 + $0x18] sm:$0xff] %v221_v17 }
 0x131   :  { %223 = vst [vmem:[#allocation8 + $0x8] sm:$0xff] %v219_v18 }
 0x132   :  { %381 = shalt.err (!%p378_p0)
}
 0x133   :  { %s382_s26 = scalar_lea.hbm %s484_s3, 512 }
 0x134   :  { %p383_p1 = scmp.ne.s32.totalorder %s484_s3, %s382_s26  ;;  %p386_p2 = scmp.lt.u32.totalorder %s382_s26, %s484_s3 }
 0x136   :  { %p388_p3 = pnand %p386_p2, %p383_p1 }
 0x138   :  { %391 = shalt.err (!%p388_p3)
}
 0x139   :  { %s404_s4 = smov 128   ;;  %s405_s5 = smov 8  }
 0x13a   :  { %237 = dma.vmem_to_hbm [thread:$0]  %s232_s22, 512, %s484_s3, [#allocation4], %s404_s4, %s404_s4, %s405_s5  }
 0x13b   :  { %396 = dma.done.wait [#allocation4], 512  }
 0x13c   :  { %397 = vsyncadd [#allocation4], 4294966784 }
 0x13d   :  { %241 = vsyncpa [#allocation3], 1 }
 0x13e   :  { %242 = vsyncpa [#allocation6], 1 }
 0x13f   :  { %243 = vsyncpa [#allocation4], 1 }

// kernel: e2e_cnn_forward.34
= control target key start
LH: loop header
LB: loop body
LE: loop exit
PB: predicated region body
PF: predicated region fallthrough
CT: control target
= control target key end

     0   :  { %8 = vsyncpa [#allocation3], 0  ;;  %s1177_s0 = inlined_call_operand.hbm [shape: bf16[8,1152], index: 0, kind: input, shape index: {}]   ;;  %s1178_s1 = inlined_call_operand.hbm [shape: bf16[1152,256], index: 1, kind: input, shape index: {}]   ;;  %s1179_s2 = inlined_call_operand.hbm [shape: f32[1,256], index: 2, kind: input, shape index: {}]   ;;  %s1180_s3 = inlined_call_operand.hbm [shape: f32[8,256], index: 3, kind: output, shape index: {}]  }
   0x1   :  { %10 = vsyncpa [#allocation3 + $0x1], 0 }
   0x2   :  { %11 = vsyncpa [#allocation6], 0 }
   0x3   :  { %13 = vsyncpa [#allocation6 + $0x1], 0 }
   0x4   :  { %14 = vsyncpa [#allocation4], 0  ;;  %s916_s12 = smov 0   ;;  %s918_s13 = smov 0  }
   0x5   :  { %s920_s14 = smov 0   ;;  %s922_s15 = smov 0  }
   0x6   :  { %s924_s16 = smov 0   ;;  %s926_s17 = smov 0  }
   0x7 LB: > { %s945_s18 = sadd.s32 4294967295, %s886_s17   ;;  %s48_s19 = sadd.s32 1, %s874_s14  ;;  %s886_s17 = sphi %s926_s17, %s20_s17   ;;  %s882_s16 = sphi %s924_s16, %s1201_s16   ;;  %s878_s15 = sphi %s922_s15, %s1200_s15   ;;  %s874_s14 = sphi %s920_s14, %s1199_s14   ;;  %s870_s13 = sphi %s918_s13, %s1198_s13   ;;  %s866_s12 = sphi %s916_s12, %s1197_s12  }
   0x8   : > { %p55_p0 = scmp.ne.s32.totalorder %s874_s14, %s870_s13  ;;  %p61_p1 = scmp.ne.s32.totalorder %s870_s13, %s866_s12 }
   0x9   : > { %p1181_p2 = scmp.eq.s32.totalorder %s945_s18, 0  ;;  %p567_p3 = scmp.ge.s32.totalorder %s886_s17, 1 }
   0xa   : > { %p154_p4 = scmp.lt.s32.totalorder %s886_s17, 10  ;;  %s888_s22 = smov [#allocation7]  }
   0xb   : > { %p956_p5 = por %p1181_p2, %p61_p1  ;;  %s170_s23 = sshll.u32 %s888_s22, 4  ;;  %s171_s23 = int_to_ptr.vmem [resolvable:$true] %s170_s23 }
   0xc   : > { %p960_p6 = pnand %p567_p3, %p154_p4  ;;  %p56_p8 = scmp.eq.s32.totalorder %s886_s17, 0 }
   0xd   : > { %s1184_s20 = scalar_select %p956_p5, 1, 0 }
   0xe   : > { %s1185_s21 = scalar_select %p960_p6, 1, 0 }
   0xf   : > { %p616_p7 = pneg %p960_p6  ;;  %s32_s25 = sadd.s32 1, %s882_s16 }
  0x10   : > { %p974_p10 = scmp.ge.s32.totalorder %s32_s25, 9  ;;  %p981_p11 = por %p56_p8, %p55_p0 }
  0x11   : > { %p969_p9 = pnand %p616_p7, %p1181_p2  ;;  %s710_s30 = scalar_lea.hbm %s1179_s2, 32 }
  0x12   : > { %s1187_s26 = scalar_select %p974_p10, 1, 0 }
  0x13   : > { %s1188_s27 = scalar_select %p981_p11, 1, 0 }
  0x14   : > { %p711_p13 = scmp.ne.s32.totalorder %s1179_s2, %s710_s30  ;;  %p712_p1 = pneg %p969_p9 }
  0x15   : > { %p717_p0 = scmp.lt.u32.totalorder %s710_s30, %s1179_s2 }
  0x16   : > { %p713_p3 = pnand %p712_p1, %p711_p13 }
  0x18   : > { %p714_p4 = pneg %p713_p3 }
  0x1a   : > { %p719_p7 = pnand %p717_p0, %p714_p4 }
  0x1c   : > { %722 = shalt.err (!%p719_p7)
}
  0x1d   : > { %s723_s8 = scalar_lea.vmem %s171_s23, 32  ;;  %p731_p5 = scmp.lt.s32.totalorder %s171_s23, %s171_s23 }
  0x1e   : > { %p724_p8 = scmp.ne.s32.totalorder %s171_s23, %s723_s8  ;;  %p732_p6 = scmp.lt.s32.totalorder %s723_s8, %s723_s8 }
  0x20   : > { %p726_p2 = pnand %p724_p8, %p712_p1  ;;  %p733_p11 = por %p732_p6, %p731_p5 }
  0x22   : > { %p727_p12 = pneg %p726_p2 }
  0x24   : > { %p734_p10 = pnand %p733_p11, %p727_p12 }
  0x26   : > { %737 = shalt.err (!%p734_p10)
}
  0x27   : > { %619 = dma.hbm_to_vmem [thread:$0]  (!%p969_p9), %s1179_s2, 32, %s171_s23, [#allocation6]  }
  0x28   : > { %p1189_p2 = scmp.ne.s32.totalorder %s1187_s26, 0  ;;  %s1007_s11 = sand.u32 1, %s874_s14  }
  0x29   : > { %s571_s12 = sshll.u32 %s882_s16, 6  ;;  %s570_s24 = sshll.u32 %s1007_s11, 2 }
  0x2a   : > { %s1203_s25 = smov (%p1189_p2, %s32_s25), 0  ;;  %s1016_s30 = scalar_lea.hbm %s1177_s0, %s571_s12 }
  0x2b   : > { %s44_s22 = ssub.s32 %s882_s16, %s1203_s25  ;;  %s185_s26 = scalar_lea.vmem [#allocation2], %s570_s24 }
  0x2c   : > { %p46_p5 = scmp.eq.s32.totalorder %s44_s22, 0  ;;  %s194_s4 = sshll.u32 %s185_s26, 4  ;;  %s1031_s4 = int_to_ptr.vmem [resolvable:$true] %s194_s4 }
  0x2d   : > { %p1190_p6 = scmp.ne.s32.totalorder %s1188_s27, 0  ;;  %p1191_p9 = scmp.lt.s32.totalorder %s886_s17, 9 }
  0x2e   : > { %s1021_s23 = scalar_select %p46_p5, %s874_s14, %s48_s19  }
  0x2f   : > { %p1027_p10 = pnand %p1191_p9, %p1190_p6  ;;  %s572_s6 = sshll.u32 %s1007_s11, 7 }
  0x30   : > { %s182_s7 = scalar_lea.sflag [#allocation3], %s1007_s11  ;;  %s738_s8 = scalar_lea.hbm %s1016_s30, 64 }
  0x31   : > { %p739_p11 = scmp.ne.s32.totalorder %s1016_s30, %s738_s8  ;;  %p740_p12 = pneg %p1027_p10 }
  0x32   : > { %s743_s9 = scalar_lea.hbm %s1177_s0, 576  ;;  %p744_p3 = scmp.lt.u32.totalorder %s1016_s30, %s1177_s0 }
  0x33   : > { %p741_p13 = pnand %p740_p12, %p739_p11  ;;  %p745_p4 = scmp.lt.u32.totalorder %s743_s9, %s738_s8 }
  0x34   : > { %p747_p7 = scmp.lt.u32.totalorder %s738_s8, %s1016_s30 }
  0x35   : > { %p742_p1 = pneg %p741_p13  ;;  %p746_p0 = por %p745_p4, %p744_p3 }
  0x37   : > { %p748_p8 = por %p747_p7, %p746_p0 }
  0x39   : > { %p749_p2 = pnand %p748_p8, %p742_p1 }
  0x3b   : > { %752 = shalt.err (!%p749_p2)
}
  0x3c   : > { %s753_s22 = scalar_lea.vmem %s1031_s4, 64  ;;  %s889_s24 = smov [#allocation2]  }
  0x3d   : > { %p754_p5 = scmp.ne.s32.totalorder %s1031_s4, %s753_s22  ;;  %s758_s28 = sshll.u32 %s889_s24, 4  ;;  %s759_s28 = int_to_ptr.vmem [resolvable:$false] %s758_s28 }
  0x3e   : > { %s760_s29 = scalar_lea.vmem %s759_s28, 128  ;;  %p761_p11 = scmp.lt.s32.totalorder %s1031_s4, %s759_s28 }
  0x3f   : > { %p756_p6 = pnand %p754_p5, %p740_p12  ;;  %p762_p13 = scmp.lt.s32.totalorder %s760_s29, %s753_s22 }
  0x41   : > { %p757_p9 = pneg %p756_p6  ;;  %p763_p3 = por %p762_p13, %p761_p11 }
  0x43   : > { %p764_p4 = pnand %p763_p3, %p757_p9 }
  0x45   : > { %767 = shalt.err (!%p764_p4)
}
  0x46   : > { %623 = dma.hbm_to_vmem [thread:$0]  (!%p1027_p10), %s1016_s30, 64, %s1031_s4, %s182_s7  }
  0x47   : > { %s603_s26 = sshll.u32 %s882_s16, 11  ;;  %s205_s8 = scalar_lea.vmem [#allocation5], %s572_s6 }
  0x48   : > { %s215_s19 = sshll.u32 %s205_s8, 4  ;;  %s201_s27 = sand.u32 1, %s886_s17   ;;  %s1063_s19 = int_to_ptr.vmem [resolvable:$true] %s215_s19 }
  0x49   : > { %s1069_s12 = scalar_lea.hbm %s1178_s1, %s603_s26  ;;  %s1071_s22 = scalar_lea.sflag [#allocation6], %s201_s27 }
  0x4a   : > { %s768_s24 = scalar_lea.hbm %s1069_s12, 2048  ;;  %s773_s4 = scalar_lea.hbm %s1178_s1, 18432 }
  0x4b   : > { %p769_p1 = scmp.ne.s32.totalorder %s1069_s12, %s768_s24  ;;  %p774_p8 = scmp.lt.u32.totalorder %s1069_s12, %s1178_s1 }
  0x4c   : > { %p775_p2 = scmp.lt.u32.totalorder %s773_s4, %s768_s24  ;;  %p777_p6 = scmp.lt.u32.totalorder %s768_s24, %s1069_s12 }
  0x4d   : > { %p771_p0 = pnand %p769_p1, %p740_p12 }
  0x4e   : > { %p776_p5 = por %p775_p2, %p774_p8 }
  0x4f   : > { %p772_p7 = pneg %p771_p0 }
  0x50   : > { %p778_p9 = por %p777_p6, %p776_p5 }
  0x52   : > { %p779_p11 = pnand %p778_p9, %p772_p7 }
  0x54   : > { %782 = shalt.err (!%p779_p11)
}
  0x55   : > { %s783_s28 = scalar_lea.vmem %s1063_s19, 2048  ;;  %s890_s29 = smov [#allocation5]  }
  0x56   : > { %p784_p13 = scmp.ne.s32.totalorder %s1063_s19, %s783_s28  ;;  %s788_s26 = sshll.u32 %s890_s29, 4  ;;  %s789_s26 = int_to_ptr.vmem [resolvable:$false] %s788_s26 }
  0x57   : > { %s790_s8 = scalar_lea.vmem %s789_s26, 4096  ;;  %p791_p1 = scmp.lt.s32.totalorder %s1063_s19, %s789_s26 }
  0x58   : > { %p786_p3 = pnand %p784_p13, %p740_p12  ;;  %p792_p0 = scmp.lt.s32.totalorder %s790_s8, %s783_s28 }
  0x5a   : > { %p787_p4 = pneg %p786_p3  ;;  %p793_p8 = por %p792_p0, %p791_p1 }
  0x5c   : > { %p794_p2 = pnand %p793_p8, %p787_p4 }
  0x5e   : > { %797 = shalt.err (!%p794_p2)
}
  0x5f   : > { %s891_s27 = smov 128   ;;  %s892_s9 = smov 8  }
  0x60   : > { %626 = dma.hbm_to_vmem [thread:$0]  (!%p1027_p10), %s1069_s12, 2048, %s1063_s19, %s1071_s22, %s891_s27, %s891_s27, %s892_s9  }
  0x61   : > { %p1193_p12 = scmp.ne.s32.totalorder %s1185_s21, 0 }
  0x62   : > { %s229_s10 = sand.u32 (!%p1193_p12), 1, %s870_s13   ;;  %p1194_p7 = scmp.ne.s32.totalorder (!%p1193_p12), %s1184_s20, 0 }
  0x63   : > { %227 = sbr.rel (%p1193_p12) target bundleno = 408 (0x198), region = 32  ;;  %s577_s24 = sshll.u32 (!%p1193_p12), %s229_s10, 2 }
  0x64   : > { %s230_s11 = scalar_lea.sflag (!%p1193_p12), [#allocation3], %s229_s10  ;;  %s1100_s30 = scalar_lea.vmem (!%p1193_p12), [#allocation2], %s577_s24 }
  0x6a   : > { %849 = dma.done.wait (%p1194_p7), %s230_s11, 64  }
  0x6b   : > { %851 = vsyncadd (%p1194_p7), %s230_s11, 4294967232  ;;  %s238_s4 = sand.u32 1, %s945_s18   ;;  %s578_s5 = sshll.u32 %s229_s10, 7 }
  0x6c   : > { %s239_s19 = scalar_lea.sflag [#allocation6], %s238_s4  ;;  %s1107_s12 = scalar_lea.vmem [#allocation5], %s578_s5 }
  0x6d   : > { %853 = dma.done.wait (%p1194_p7), %s239_s19, 2048  }
  0x6e   : > { %855 = vsyncadd (%p1194_p7), %s239_s19, 4294965248  ;;  %p1195_p10 = scmp.eq.s32.totalorder %s945_s18, 0 }
  0x70   : > { %857 = dma.done.wait (%p1195_p10), [#allocation6], 32   ;;  %p1196_p5 = pmov %p1195_p10 }
  0x71   : > { %p580_p6 = scmp.ne.s32.totalorder %s878_s15, 0 }
  0x72   : > { %859 = vsyncadd (%p1196_p5), [#allocation6], 4294967264  ;;  %v893_v0 = vmov (!%p580_p6), 0.0  }
  0x73   : > { %277 = sbr.rel (%p580_p6) target bundleno = 122 (0x7a), region = 48  ;;  %278 = vst [vmem:[#allocation8] sm:$0xff] (!%p580_p6), %v893_v0  ;;  %279 = vst [vmem:[#allocation8 + $0x8] sm:$0xff] (!%p580_p6), %v893_v0 }
  0x7a PF: > { %v686_v1 = vld [vmem:[%s1107_s12 + $0x4] ss:$8 sps:$4 sm:$0xff]   ;;  %v688_v2 = vld [vmem:[%s1107_s12] ss:$8 sps:$4 sm:$0xff]   ;;  %v894_v3 = vmov 0   ;;  %p597_p9 = scmp.ne.s32.totalorder %s878_s15, 8 }
  0x7b   : > { %411 = vmatprep.mubr.bf16.mxu0 %v894_v3  ;;  %379 = vmatprep.subr.bf16.mxu0 %v686_v1  ;;  %v689_v4 = vld [vmem:[%s1107_s12 + $0x14] ss:$8 sps:$4 sm:$0xff]   ;;  %v691_v5 = vld [vmem:[%s1107_s12 + $0x10] ss:$8 sps:$4 sm:$0xff]   ;;  %v692_v6 = vld [vmem:[%s1107_s12 + $0x24] ss:$8 sps:$4 sm:$0xff]   ;;  %v432_v27 = vlaneseq (!%p597_p9) }
  0x7c   : > { %380 = vmatpush1.bf16.msra.mxu0 %v688_v2  ;;  %v694_v7 = vld [vmem:[%s1107_s12 + $0x20] ss:$8 sps:$4 sm:$0xff]   ;;  %v695_v8 = vld [vmem:[%s1107_s12 + $0x34] ss:$8 sps:$4 sm:$0xff]   ;;  %v697_v9 = vld [vmem:[%s1107_s12 + $0x30] ss:$8 sps:$4 sm:$0xff]  }
  0x7d   : > { %381 = vmatprep.subr.bf16.mxu0 %v689_v4  ;;  %v698_v10 = vld [vmem:[%s1107_s12 + $0x44] ss:$8 sps:$4 sm:$0xff]   ;;  %v700_v11 = vld [vmem:[%s1107_s12 + $0x40] ss:$8 sps:$4 sm:$0xff]   ;;  %v701_v12 = vld [vmem:[%s1107_s12 + $0x54] ss:$8 sps:$4 sm:$0xff]  }
  0x7e   : > { %v703_v13 = vld [vmem:[%s1107_s12 + $0x50] ss:$8 sps:$4 sm:$0xff]   ;;  %v704_v14 = vld [vmem:[%s1107_s12 + $0x64] ss:$8 sps:$4 sm:$0xff]   ;;  %v706_v15 = vld [vmem:[%s1107_s12 + $0x60] ss:$8 sps:$4 sm:$0xff]  }
  0x7f   : > { %v707_v16 = vld [vmem:[%s1107_s12 + $0x74] ss:$8 sps:$4 sm:$0xff]   ;;  %v709_v17 = vld [vmem:[%s1107_s12 + $0x70] ss:$8 sps:$4 sm:$0xff]   ;;  %v280_v19 = vld [vmem:[#allocation8] sm:$0xff]  ;;  %v433_v28 = vshrl.u32 (!%p597_p9), %v432_v27, 7 }
  0x80   : > { %382 = vmatpush1.bf16.msra.mxu0 %v691_v5  ;;  %v282_v18 = vld [vmem:[%s1100_s30] sm:$0xf]  ;;  %v281_v20 = vld [vmem:[#allocation8 + $0x8] sm:$0xff]  ;;  %v430_v29 = vld [vmem:[#allocation7] sm:$0x3] (!%p597_p9) }
  0x81   : > { %383 = vmatprep.subr.bf16.mxu0 %v692_v6  ;;  %v434_v30 = vsub.s32 (!%p597_p9), 0, %v433_v28  ;;  %v438_v31 = vsub.s32 (!%p597_p9), 1, %v433_v28 }
  0x83   : > { %v435_v34 = vrot.slane (!%p597_p9), %v430_v29, %v434_v30  ;;  %v439_v35 = vrot.slane (!%p597_p9), %v430_v29, %v438_v31 }
  0x84   : > { %384 = vmatpush1.bf16.msra.mxu0 %v694_v7 }
  0x85   : > { %385 = vmatprep.subr.bf16.mxu0 %v695_v8 }
  0x88   : > { %386 = vmatpush1.bf16.msra.mxu0 %v697_v9 }
  0x89   : > { %387 = vmatprep.subr.bf16.mxu0 %v698_v10 }
  0x8c   : > { %388 = vmatpush1.bf16.msra.mxu0 %v700_v11 }
  0x8d   : > { %389 = vmatprep.subr.bf16.mxu0 %v701_v12 }
  0x90   : > { %390 = vmatpush1.bf16.msra.mxu0 %v703_v13 }
  0x91   : > { %391 = vmatprep.subr.bf16.mxu0 %v704_v14 }
  0x94   : > { %392 = vmatpush1.bf16.msra.mxu0 %v706_v15 }
  0x95   : > { %393 = vmatprep.subr.bf16.mxu0 %v707_v16 }
  0x98   : > { %394 = vmatpush1.bf16.msra.mxu0 %v709_v17 }
  0x9b   : > { %412 = vmatmul.mubr.bf16.vlgmr.msra.gmra.mrb[0].mxu0 %v282_v18 }
 0x16c   : > { %427 = sbr.rel (%p597_p9) target bundleno = 383 (0x17f), region = 52 }
 0x16e   : > { %v413_v21 = vpop.f32.mrb[0].mxu0 }
 0x16f   : > { %v420_v22 = vadd.f32 %v413_v21, %v280_v19  ;;  %v415_v23 = vpop.f32.mrb[1].mxu0 }
 0x170   : > { %v421_v24 = vadd.f32 %v415_v23, %v281_v20  ;;  %v417_v25 = vpop.f32.mrb[2].mxu0 }
 0x171   : > { %422 = vst [vmem:[#allocation8] sm:$0xff] %v420_v22  ;;  %v418_v26 = vpop.f32.mrb[3].mxu0 }
 0x172   : > { %423 = vst [vmem:[#allocation8 + $0x8] sm:$0xff] %v421_v24 }
 0x178   : > { %v428_v32 = vld [vmem:[#allocation8] sm:$0xff] }
 0x179   : > { %v429_v33 = vld [vmem:[#allocation8 + $0x8] sm:$0xff]  ;;  %v442_v36 = vadd.f32 %v435_v34, %v428_v32 }
 0x17a   : > { %v443_v37 = vadd.f32 %v439_v35, %v429_v33 }
 0x17b   : > { %v444_v38 = vmax.f32 %v442_v36, 0.0 }
 0x17c   : > { %v445_v39 = vmax.f32 %v443_v37, 0.0 }
 0x17d   : > { %446 = vst [vmem:[#allocation8] sm:$0xff] %v444_v38 }
 0x17e   : > { %447 = vst [vmem:[#allocation8 + $0x8] sm:$0xff] %v445_v39 }
 0x17f PF: > { %p630_p11 = scmp.eq.s32.totalorder %s945_s18, 8  ;;  %s895_s15 = smov [#allocation8]  }
 0x180   : > { %s460_s20 = sshll.u32 %s895_s15, 4  ;;  %s461_s20 = int_to_ptr.vmem [resolvable:$true] %s460_s20 }
 0x181   : > { %s798_s21 = scalar_lea.vmem %s461_s20, 256  ;;  %p805_p1 = scmp.lt.s32.totalorder %s461_s20, %s461_s20 }
 0x182   : > { %p799_p13 = scmp.ne.s32.totalorder %s461_s20, %s798_s21  ;;  %p806_p0 = scmp.lt.s32.totalorder %s798_s21, %s798_s21 }
 0x184   : > { %p800_p3 = pnand %p799_p13, %p630_p11  ;;  %p807_p8 = por %p806_p0, %p805_p1 }
 0x186   : > { %p801_p4 = pneg %p800_p3 }
 0x188   : > { %p808_p2 = pnand %p807_p8, %p801_p4 }
 0x18a   : > { %811 = shalt.err (!%p808_p2)
}
 0x18b   : > { %s812_s7 = scalar_lea.hbm %s1180_s3, 256 }
 0x18c   : > { %p813_p12 = scmp.ne.s32.totalorder %s1180_s3, %s812_s7  ;;  %p818_p5 = scmp.lt.u32.totalorder %s812_s7, %s1180_s3 }
 0x18e   : > { %p814_p7 = pnand %p813_p12, %p630_p11 }
 0x190   : > { %p815_p10 = pneg %p814_p7 }
 0x192   : > { %p820_p6 = pnand %p818_p5, %p815_p10 }
 0x194   : > { %823 = shalt.err (!%p820_p6)
}
 0x195   : > { %613 = dma.vmem_to_hbm [thread:$0]  (%p630_p11), %s461_s20, 256, %s1180_s3, [#allocation4]  }
 0x196   : > { %861 = dma.done.wait (%p630_p11), [#allocation4], 256  }
 0x197   : > { %863 = vsyncadd (%p630_p11), [#allocation4], 4294967040 }
 0x198 PF: > { %s20_s17 = sadd.s32 1, %s886_s17   ;;  %s1197_s12 = smov %s870_s13 }
 0x199   : > { %p17_p9 = scmp.ge.s32.totalorder %s20_s17, 11   ;;  %s1198_s13 = smov %s874_s14 }
 0x19a   : > { %s1199_s14 = smov %s1021_s23  ;;  %s1200_s15 = smov %s882_s16 }
 0x19b   : > { %s1201_s16 = smov %s1203_s25  ;;  %19 = sbr.rel (!%p17_p9) target bundleno = 7 (0x7), region = 96 }
 0x1a2   :  { %473 = vsyncpa [#allocation3], 1 }
 0x1a3   :  { %475 = vsyncpa [#allocation3 + $0x1], 1 }
 0x1a4   :  { %476 = vsyncpa [#allocation6], 1 }
 0x1a5   :  { %478 = vsyncpa [#allocation6 + $0x1], 1 }
 0x1a6   :  { %479 = vsyncpa [#allocation4], 1 }
 0x1a7   :  { %481 = vsyncpa [#allocation4 + $0x1], 1 }

// kernel: e2e_cnn_forward.35
= control target key start
LH: loop header
LB: loop body
LE: loop exit
PB: predicated region body
PF: predicated region fallthrough
CT: control target
= control target key end

     0   :  { %9 = vsyncpa [#allocation3], 0  ;;  %s1486_s0 = inlined_call_operand.hbm [shape: bf16[8,2304], index: 0, kind: input, shape index: {}]   ;;  %s1487_s1 = inlined_call_operand.hbm [shape: bf16[2304,256], index: 1, kind: input, shape index: {}]   ;;  %s1488_s2 = inlined_call_operand.hbm [shape: f32[1,256], index: 2, kind: input, shape index: {}]   ;;  %s1489_s3 = inlined_call_operand.hbm [shape: f32[8,256], index: 3, kind: input, shape index: {}]   ;;  %s1490_s4 = inlined_call_operand.hbm [shape: f32[8,256], index: 4, kind: output, shape index: {}]  }
   0x1   :  { %11 = vsyncpa [#allocation3 + $0x1], 0 }
   0x2   :  { %12 = vsyncpa [#allocation6], 0 }
   0x3   :  { %14 = vsyncpa [#allocation6 + $0x1], 0 }
   0x4   :  { %15 = vsyncpa [#allocation9], 0 }
   0x5   :  { %16 = vsyncpa [#allocation4], 0  ;;  %s1187_s15 = smov 0   ;;  %s1189_s16 = smov 0  }
   0x6   :  { %s1191_s17 = smov 0   ;;  %s1193_s18 = smov 0  }
   0x7   :  { %s1195_s19 = smov 0   ;;  %s1197_s20 = smov 0  }
   0x8 LB: > { %s1216_s21 = sadd.s32 4294967295, %s1152_s20   ;;  %p63_p0 = scmp.ne.s32.totalorder %s1136_s16, %s1132_s15  ;;  %s1152_s20 = sphi %s1197_s20, %s22_s20   ;;  %s1148_s19 = sphi %s1195_s19, %s1508_s19   ;;  %s1144_s18 = sphi %s1193_s18, %s1507_s18   ;;  %s1140_s17 = sphi %s1191_s17, %s1506_s17   ;;  %s1136_s16 = sphi %s1189_s16, %s1505_s16   ;;  %s1132_s15 = sphi %s1187_s15, %s1504_s15  }
   0x9   : > { %p1491_p1 = scmp.eq.s32.totalorder %s1216_s21, 0  ;;  %p744_p2 = scmp.ge.s32.totalorder %s1152_s20, 1 }
   0xa   : > { %p184_p3 = scmp.lt.s32.totalorder %s1152_s20, 10  ;;  %s1154_s24 = smov [#allocation7]  }
   0xb   : > { %p1224_p4 = por %p1491_p1, %p63_p0  ;;  %s200_s25 = sshll.u32 %s1154_s24, 4  ;;  %s201_s25 = int_to_ptr.vmem [resolvable:$true] %s200_s25 }
   0xc   : > { %p1228_p5 = pnand %p744_p2, %p184_p3  ;;  %s1155_s26 = smov [#allocation8]  }
   0xd   : > { %s1494_s22 = scalar_select %p1224_p4, 1, 0 }
   0xe   : > { %s1495_s23 = scalar_select %p1228_p5, 1, 0 }
   0xf   : > { %p819_p6 = pneg %p1228_p5  ;;  %s216_s27 = sshll.u32 %s1155_s26, 4  ;;  %s1240_s27 = int_to_ptr.vmem [resolvable:$true] %s216_s27 }
  0x10   : > { %s944_s5 = scalar_lea.hbm %s1488_s2, 32 }
  0x11   : > { %p1236_p7 = pnand %p819_p6, %p1491_p1  ;;  %p945_p8 = scmp.ne.s32.totalorder %s1488_s2, %s944_s5 }
  0x12   : > { %p951_p12 = scmp.lt.u32.totalorder %s944_s5, %s1488_s2 }
  0x13   : > { %p946_p9 = pneg %p1236_p7 }
  0x15   : > { %p947_p10 = pnand %p946_p9, %p945_p8 }
  0x17   : > { %p948_p11 = pneg %p947_p10 }
  0x19   : > { %p953_p13 = pnand %p951_p12, %p948_p11 }
  0x1b   : > { %956 = shalt.err (!%p953_p13)
}
  0x1c   : > { %s957_s10 = scalar_lea.vmem %s201_s25, 32  ;;  %p965_p6 = scmp.lt.s32.totalorder %s201_s25, %s201_s25 }
  0x1d   : > { %p958_p0 = scmp.ne.s32.totalorder %s201_s25, %s957_s10  ;;  %p966_p1 = scmp.lt.s32.totalorder %s957_s10, %s957_s10 }
  0x1f   : > { %p960_p2 = pnand %p958_p0, %p946_p9  ;;  %p967_p4 = por %p966_p1, %p965_p6 }
  0x21   : > { %p961_p3 = pneg %p960_p2 }
  0x23   : > { %p968_p5 = pnand %p967_p4, %p961_p3 }
  0x25   : > { %971 = shalt.err (!%p968_p5)
}
  0x26   : > { %822 = dma.hbm_to_vmem [thread:$0]  (!%p1236_p7), %s1488_s2, 32, %s201_s25, [#allocation6]  }
  0x27   : > { %s972_s15 = scalar_lea.hbm %s1489_s3, 256 }
  0x28   : > { %p973_p8 = scmp.ne.s32.totalorder %s1489_s3, %s972_s15  ;;  %p979_p5 = scmp.lt.u32.totalorder %s972_s15, %s1489_s3 }
  0x2a   : > { %p975_p1 = pnand %p973_p8, %p946_p9 }
  0x2c   : > { %p976_p4 = pneg %p975_p1 }
  0x2e   : > { %p981_p10 = pnand %p979_p5, %p976_p4 }
  0x30   : > { %984 = shalt.err (!%p981_p10)
}
  0x31   : > { %s985_s25 = scalar_lea.vmem %s1240_s27, 256  ;;  %p993_p0 = scmp.lt.s32.totalorder %s1240_s27, %s1240_s27 }
  0x32   : > { %p986_p11 = scmp.ne.s32.totalorder %s1240_s27, %s985_s25  ;;  %p994_p2 = scmp.lt.s32.totalorder %s985_s25, %s985_s25 }
  0x34   : > { %p988_p12 = pnand %p986_p11, %p946_p9  ;;  %p995_p3 = por %p994_p2, %p993_p0 }
  0x36   : > { %p989_p13 = pneg %p988_p12 }
  0x38   : > { %p996_p6 = pnand %p995_p3, %p989_p13 }
  0x3a   : > { %999 = shalt.err (!%p996_p6)
}
  0x3b   : > { %825 = dma.hbm_to_vmem [thread:$0]  (!%p1236_p7), %s1489_s3, 256, %s1240_s27, [#allocation9]  }
  0x3c   : > { %s34_s7 = sadd.s32 1, %s1148_s19  ;;  %s50_s8 = sadd.s32 1, %s1140_s17 }
  0x3d   : > { %p35_p9 = scmp.ge.s32.totalorder %s34_s7, 9  ;;  %p57_p8 = scmp.ne.s32.totalorder %s1140_s17, %s1136_s16 }
  0x3e   : > { %p58_p1 = scmp.eq.s32.totalorder %s1152_s20, 0  ;;  %p835_p4 = scmp.lt.s32.totalorder %s1152_s20, 9 }
  0x3f   : > { %s1510_s7 = smov (%p35_p9, %s34_s7), 0  ;;  %s1298_s28 = sand.u32 1, %s1140_s17  }
  0x40   : > { %p59_p5 = por %p58_p1, %p57_p8  ;;  %s46_s9 = ssub.s32 %s1148_s19, %s1510_s7 }
  0x41   : > { %p48_p10 = scmp.eq.s32.totalorder %s46_s9, 0  ;;  %s748_s27 = sshll.u32 %s1298_s28, 3 }
  0x42   : > { %s800_s10 = sshll.u32 %s1148_s19, 7  ;;  %s231_s15 = scalar_lea.vmem [#allocation2], %s748_s27 }
  0x43   : > { %s1305_s11 = scalar_select %p48_p10, %s1140_s17, %s50_s8  }
  0x44   : > { %s1310_s14 = scalar_lea.hbm %s1486_s0, %s800_s10  ;;  %s241_s24 = sshll.u32 %s231_s15, 4  ;;  %s1312_s24 = int_to_ptr.vmem [resolvable:$true] %s241_s24 }
  0x45   : > { %p1316_p7 = pnand %p835_p4, %p59_p5  ;;  %s751_s29 = sshll.u32 %s1298_s28, 8 }
  0x46   : > { %s802_s30 = sshll.u32 %s1148_s19, 12  ;;  %s228_s25 = scalar_lea.sflag [#allocation3], %s1298_s28 }
  0x47   : > { %s1000_s5 = scalar_lea.hbm %s1310_s14, 128  ;;  %p1002_p12 = pneg %p1316_p7 }
  0x48   : > { %p1001_p11 = scmp.ne.s32.totalorder %s1310_s14, %s1000_s5  ;;  %s1005_s9 = scalar_lea.hbm %s1486_s0, 1152 }
  0x49   : > { %p1006_p2 = scmp.lt.u32.totalorder %s1310_s14, %s1486_s0  ;;  %p1007_p3 = scmp.lt.u32.totalorder %s1005_s9, %s1000_s5 }
  0x4a   : > { %p1003_p13 = pnand %p1002_p12, %p1001_p11  ;;  %p1009_p9 = scmp.lt.u32.totalorder %s1000_s5, %s1310_s14 }
  0x4b   : > { %p1008_p6 = por %p1007_p3, %p1006_p2 }
  0x4c   : > { %p1004_p0 = pneg %p1003_p13 }
  0x4d   : > { %p1010_p8 = por %p1009_p9, %p1008_p6 }
  0x4f   : > { %p1011_p1 = pnand %p1010_p8, %p1004_p0 }
  0x51   : > { %1014 = shalt.err (!%p1011_p1)
}
  0x52   : > { %s1015_s12 = scalar_lea.vmem %s1312_s24, 128  ;;  %s1156_s13 = smov [#allocation2]  }
  0x53   : > { %p1016_p4 = scmp.ne.s32.totalorder %s1312_s24, %s1015_s12  ;;  %s1020_s15 = sshll.u32 %s1156_s13, 4  ;;  %s1021_s15 = int_to_ptr.vmem [resolvable:$false] %s1020_s15 }
  0x54   : > { %s1022_s6 = scalar_lea.vmem %s1021_s15, 256  ;;  %p1023_p11 = scmp.lt.s32.totalorder %s1312_s24, %s1021_s15 }
  0x55   : > { %p1018_p5 = pnand %p1016_p4, %p1002_p12  ;;  %p1024_p13 = scmp.lt.s32.totalorder %s1022_s6, %s1015_s12 }
  0x57   : > { %p1019_p10 = pneg %p1018_p5  ;;  %p1025_p2 = por %p1024_p13, %p1023_p11 }
  0x59   : > { %p1026_p3 = pnand %p1025_p2, %p1019_p10 }
  0x5b   : > { %1029 = shalt.err (!%p1026_p3)
}
  0x5c   : > { %829 = dma.hbm_to_vmem [thread:$0]  (!%p1316_p7), %s1310_s14, 128, %s1312_s24, %s228_s25  }
  0x5d   : > { %s252_s5 = scalar_lea.vmem [#allocation5], %s751_s29  ;;  %s248_s9 = sand.u32 1, %s1152_s20  }
  0x5e   : > { %s262_s8 = sshll.u32 %s252_s5, 4  ;;  %s1358_s12 = scalar_lea.hbm %s1487_s1, %s802_s30  ;;  %s1351_s8 = int_to_ptr.vmem [resolvable:$true] %s262_s8 }
  0x5f   : > { %s1360_s13 = scalar_lea.sflag [#allocation6], %s248_s9  ;;  %s1030_s15 = scalar_lea.hbm %s1358_s12, 4096 }
  0x60   : > { %p1031_p0 = scmp.ne.s32.totalorder %s1358_s12, %s1030_s15  ;;  %s1035_s24 = scalar_lea.hbm %s1487_s1, 36864 }
  0x61   : > { %p1036_p8 = scmp.lt.u32.totalorder %s1358_s12, %s1487_s1  ;;  %p1037_p1 = scmp.lt.u32.totalorder %s1035_s24, %s1030_s15 }
  0x62   : > { %p1033_p6 = pnand %p1031_p0, %p1002_p12  ;;  %p1039_p5 = scmp.lt.u32.totalorder %s1030_s15, %s1358_s12 }
  0x63   : > { %p1038_p4 = por %p1037_p1, %p1036_p8 }
  0x64   : > { %p1034_p9 = pneg %p1033_p6 }
  0x65   : > { %p1040_p10 = por %p1039_p5, %p1038_p4 }
  0x67   : > { %p1041_p11 = pnand %p1040_p10, %p1034_p9 }
  0x69   : > { %1044 = shalt.err (!%p1041_p11)
}
  0x6a   : > { %s1045_s30 = scalar_lea.vmem %s1351_s8, 4096  ;;  %s1157_s6 = smov [#allocation5]  }
  0x6b   : > { %p1046_p13 = scmp.ne.s32.totalorder %s1351_s8, %s1045_s30  ;;  %s1050_s5 = sshll.u32 %s1157_s6, 4  ;;  %s1051_s5 = int_to_ptr.vmem [resolvable:$false] %s1050_s5 }
  0x6c   : > { %s1052_s9 = scalar_lea.vmem %s1051_s5, 8192  ;;  %p1053_p0 = scmp.lt.s32.totalorder %s1351_s8, %s1051_s5 }
  0x6d   : > { %p1048_p2 = pnand %p1046_p13, %p1002_p12  ;;  %p1054_p6 = scmp.lt.s32.totalorder %s1052_s9, %s1045_s30 }
  0x6f   : > { %p1049_p3 = pneg %p1048_p2  ;;  %p1055_p8 = por %p1054_p6, %p1053_p0 }
  0x71   : > { %p1056_p1 = pnand %p1055_p8, %p1049_p3 }
  0x73   : > { %1059 = shalt.err (!%p1056_p1)
}
  0x74   : > { %s1158_s27 = smov 128   ;;  %s1159_s10 = smov 8  }
  0x75   : > { %832 = dma.hbm_to_vmem [thread:$0]  (!%p1316_p7), %s1358_s12, 4096, %s1351_s8, %s1360_s13, %s1158_s27, %s1158_s27, %s1159_s10  }
  0x76   : > { %p1498_p12 = scmp.ne.s32.totalorder %s1495_s23, 0 }
  0x77   : > { %s276_s15 = sand.u32 (!%p1498_p12), 1, %s1136_s16   ;;  %p1499_p9 = scmp.ne.s32.totalorder (!%p1498_p12), %s1494_s22, 0 }
  0x78   : > { %274 = sbr.rel (%p1498_p12) target bundleno = 467 (0x1d3), region = 36  ;;  %s756_s28 = sshll.u32 (!%p1498_p12), %s276_s15, 3 }
  0x79   : > { %s277_s14 = scalar_lea.sflag (!%p1498_p12), [#allocation3], %s276_s15  ;;  %s1389_s24 = scalar_lea.vmem (!%p1498_p12), [#allocation2], %s756_s28 }
  0x7f   : > { %1111 = dma.done.wait (%p1499_p9), %s277_s14, 128  }
  0x80   : > { %1113 = vsyncadd (%p1499_p9), %s277_s14, 4294967168  ;;  %s285_s29 = sand.u32 1, %s1216_s21   ;;  %s757_s26 = sshll.u32 %s276_s15, 8 }
  0x81   : > { %s286_s8 = scalar_lea.sflag [#allocation6], %s285_s29  ;;  %s1396_s12 = scalar_lea.vmem [#allocation5], %s757_s26 }
  0x82   : > { %1115 = dma.done.wait (%p1499_p9), %s286_s8, 4096  }
  0x83   : > { %1117 = vsyncadd (%p1499_p9), %s286_s8, 4294963200  ;;  %p1500_p7 = scmp.eq.s32.totalorder %s1216_s21, 0 }
  0x85   : > { %1119 = dma.done.wait (%p1500_p7), [#allocation6], 32   ;;  %p1501_p4 = pmov %p1500_p7 }
  0x87   : > { %1121 = vsyncadd (%p1501_p4), [#allocation6], 4294967264  ;;  %p1502_p5 = pmov %p1501_p4 }
  0x88   : > { %p1503_p10 = pmov %p1501_p4 }
  0x89   : > { %1123 = dma.done.wait (%p1502_p5), [#allocation9], 256  }
  0x8a   : > { %1125 = vsyncadd (%p1503_p10), [#allocation9], 4294967040  ;;  %p760_p11 = scmp.ne.s32.totalorder %s1144_s18, 0 }
  0x8b   : > { %v1160_v0 = vmov (!%p760_p11), 0.0  }
  0x8c   : > { %331 = sbr.rel (%p760_p11) target bundleno = 147 (0x93), region = 56  ;;  %332 = vst [vmem:[#allocation10] sm:$0xff] (!%p760_p11), %v1160_v0  ;;  %333 = vst [vmem:[#allocation10 + $0x8] sm:$0xff] (!%p760_p11), %v1160_v0 }
  0x93 PF: > { %v894_v1 = vld [vmem:[%s1396_s12 + $0x4] ss:$8 sps:$4 sm:$0xff]   ;;  %v896_v2 = vld [vmem:[%s1396_s12] ss:$8 sps:$4 sm:$0xff]   ;;  %v897_v3 = vld [vmem:[%s1396_s12 + $0x14] ss:$8 sps:$4 sm:$0xff]  }
  0x94   : > { %536 = vmatprep.subr.bf16.mxu0 %v894_v1  ;;  %v899_v4 = vld [vmem:[%s1396_s12 + $0x10] ss:$8 sps:$4 sm:$0xff]   ;;  %v900_v5 = vld [vmem:[%s1396_s12 + $0x24] ss:$8 sps:$4 sm:$0xff]   ;;  %v902_v6 = vld [vmem:[%s1396_s12 + $0x20] ss:$8 sps:$4 sm:$0xff]  }
  0x95   : > { %537 = vmatpush1.bf16.msra.mxu0 %v896_v2  ;;  %v903_v7 = vld [vmem:[%s1396_s12 + $0x34] ss:$8 sps:$4 sm:$0xff]   ;;  %v905_v8 = vld [vmem:[%s1396_s12 + $0x30] ss:$8 sps:$4 sm:$0xff]   ;;  %v906_v9 = vld [vmem:[%s1396_s12 + $0x44] ss:$8 sps:$4 sm:$0xff]  }
  0x96   : > { %538 = vmatprep.subr.bf16.mxu0 %v897_v3  ;;  %v908_v10 = vld [vmem:[%s1396_s12 + $0x40] ss:$8 sps:$4 sm:$0xff]   ;;  %v909_v11 = vld [vmem:[%s1396_s12 + $0x54] ss:$8 sps:$4 sm:$0xff]   ;;  %v911_v12 = vld [vmem:[%s1396_s12 + $0x50] ss:$8 sps:$4 sm:$0xff]  }
  0x97   : > { %v912_v13 = vld [vmem:[%s1396_s12 + $0x64] ss:$8 sps:$4 sm:$0xff]   ;;  %v336_v14 = vld [vmem:[%s1389_s24] sm:$0xff]  ;;  %v914_v16 = vld [vmem:[%s1396_s12 + $0x60] ss:$8 sps:$4 sm:$0xff]   ;;  %p795_p13 = scmp.ne.s32.totalorder %s1144_s18, 8 }
  0x98   : > { %v762_v15 = vcombine.high %v336_v14, %v336_v14  ;;  %v915_v17 = vld [vmem:[%s1396_s12 + $0x74] ss:$8 sps:$4 sm:$0xff]   ;;  %v917_v18 = vld [vmem:[%s1396_s12 + $0x70] ss:$8 sps:$4 sm:$0xff]   ;;  %v918_v19 = vld [vmem:[%s1396_s12 + $0x84] ss:$8 sps:$4 sm:$0xff]   ;;  %v761_v35 = vcombine.low %v336_v14, %v336_v14  ;;  %v589_v44 = vlaneseq (!%p795_p13) }
  0x99   : > { %539 = vmatpush1.bf16.msra.mxu0 %v899_v4  ;;  %v920_v20 = vld [vmem:[%s1396_s12 + $0x80] ss:$8 sps:$4 sm:$0xff]   ;;  %v921_v21 = vld [vmem:[%s1396_s12 + $0x94] ss:$8 sps:$4 sm:$0xff]   ;;  %v923_v22 = vld [vmem:[%s1396_s12 + $0x90] ss:$8 sps:$4 sm:$0xff]  }
  0x9a   : > { %540 = vmatprep.subr.bf16.mxu0 %v900_v5  ;;  %568 = vmatprep.mubr.bf16.mxu0 %v762_v15  ;;  %v924_v23 = vld [vmem:[%s1396_s12 + $0xa4] ss:$8 sps:$4 sm:$0xff]   ;;  %v926_v24 = vld [vmem:[%s1396_s12 + $0xa0] ss:$8 sps:$4 sm:$0xff]   ;;  %v927_v25 = vld [vmem:[%s1396_s12 + $0xb4] ss:$8 sps:$4 sm:$0xff]  }
  0x9b   : > { %v929_v26 = vld [vmem:[%s1396_s12 + $0xb0] ss:$8 sps:$4 sm:$0xff]   ;;  %v930_v27 = vld [vmem:[%s1396_s12 + $0xc4] ss:$8 sps:$4 sm:$0xff]   ;;  %v932_v28 = vld [vmem:[%s1396_s12 + $0xc0] ss:$8 sps:$4 sm:$0xff]  }
  0x9c   : > { %v933_v29 = vld [vmem:[%s1396_s12 + $0xd4] ss:$8 sps:$4 sm:$0xff]   ;;  %v935_v30 = vld [vmem:[%s1396_s12 + $0xd0] ss:$8 sps:$4 sm:$0xff]   ;;  %v936_v31 = vld [vmem:[%s1396_s12 + $0xe4] ss:$8 sps:$4 sm:$0xff]  }
  0x9d   : > { %541 = vmatpush1.bf16.msra.mxu0 %v902_v6  ;;  %v938_v32 = vld [vmem:[%s1396_s12 + $0xe0] ss:$8 sps:$4 sm:$0xff]   ;;  %v939_v33 = vld [vmem:[%s1396_s12 + $0xf4] ss:$8 sps:$4 sm:$0xff]   ;;  %v941_v34 = vld [vmem:[%s1396_s12 + $0xf0] ss:$8 sps:$4 sm:$0xff]  }
  0x9e   : > { %542 = vmatprep.subr.bf16.mxu0 %v903_v7  ;;  %v334_v36 = vld [vmem:[#allocation10] sm:$0xff]  ;;  %v335_v37 = vld [vmem:[#allocation10 + $0x8] sm:$0xff]  ;;  %v590_v45 = vshrl.u32 (!%p795_p13), %v589_v44, 7  ;;  %v601_v53 = vld [vmem:[#allocation8] sm:$0xff] (!%p795_p13) }
  0x9f   : > { %v587_v46 = vld [vmem:[#allocation7] sm:$0x3] (!%p795_p13)  ;;  %v602_v54 = vld [vmem:[#allocation8 + $0x8] sm:$0xff] (!%p795_p13) }
  0xa0   : > { %v591_v47 = vsub.s32 (!%p795_p13), 0, %v590_v45  ;;  %v595_v48 = vsub.s32 (!%p795_p13), 1, %v590_v45 }
  0xa1   : > { %543 = vmatpush1.bf16.msra.mxu0 %v905_v8 }
  0xa2   : > { %544 = vmatprep.subr.bf16.mxu0 %v906_v9  ;;  %v592_v51 = vrot.slane (!%p795_p13), %v587_v46, %v591_v47  ;;  %v596_v52 = vrot.slane (!%p795_p13), %v587_v46, %v595_v48 }
  0xa5   : > { %545 = vmatpush1.bf16.msra.mxu0 %v908_v10 }
  0xa6   : > { %546 = vmatprep.subr.bf16.mxu0 %v909_v11 }
  0xa9   : > { %547 = vmatpush1.bf16.msra.mxu0 %v911_v12 }
  0xaa   : > { %548 = vmatprep.subr.bf16.mxu0 %v912_v13 }
  0xad   : > { %549 = vmatpush1.bf16.msra.mxu0 %v914_v16 }
  0xae   : > { %550 = vmatprep.subr.bf16.mxu0 %v915_v17 }
  0xb1   : > { %551 = vmatpush1.bf16.msra.mxu0 %v917_v18 }
  0xb2   : > { %552 = vmatprep.subr.bf16.mxu0 %v918_v19 }
  0xb5   : > { %553 = vmatpush1.bf16.msra.mxu0 %v920_v20 }
  0xb6   : > { %554 = vmatprep.subr.bf16.mxu0 %v921_v21 }
  0xb9   : > { %555 = vmatpush1.bf16.msra.mxu0 %v923_v22 }
  0xba   : > { %556 = vmatprep.subr.bf16.mxu0 %v924_v23 }
  0xbd   : > { %557 = vmatpush1.bf16.msra.mxu0 %v926_v24 }
  0xbe   : > { %558 = vmatprep.subr.bf16.mxu0 %v927_v25 }
  0xc1   : > { %559 = vmatpush1.bf16.msra.mxu0 %v929_v26 }
  0xc2   : > { %560 = vmatprep.subr.bf16.mxu0 %v930_v27 }
  0xc5   : > { %561 = vmatpush1.bf16.msra.mxu0 %v932_v28 }
  0xc6   : > { %562 = vmatprep.subr.bf16.mxu0 %v933_v29 }
  0xc9   : > { %563 = vmatpush1.bf16.msra.mxu0 %v935_v30 }
  0xca   : > { %564 = vmatprep.subr.bf16.mxu0 %v936_v31 }
  0xcd   : > { %565 = vmatpush1.bf16.msra.mxu0 %v938_v32 }
  0xce   : > { %566 = vmatprep.subr.bf16.mxu0 %v939_v33 }
  0xd1   : > { %567 = vmatpush1.bf16.msra.mxu0 %v941_v34 }
  0xd4   : > { %569 = vmatmul.mubr.bf16.vlgmr.msra.gmra.mrb[0].mxu0 %v761_v35 }
 0x1a5   : > { %584 = sbr.rel (%p795_p13) target bundleno = 442 (0x1ba), region = 60 }
 0x1a7   : > { %v570_v38 = vpop.f32.mrb[0].mxu0 }
 0x1a8   : > { %v577_v39 = vadd.f32 %v570_v38, %v334_v36  ;;  %v572_v40 = vpop.f32.mrb[1].mxu0 }
 0x1a9   : > { %v578_v41 = vadd.f32 %v572_v40, %v335_v37  ;;  %v574_v42 = vpop.f32.mrb[2].mxu0 }
 0x1aa   : > { %579 = vst [vmem:[#allocation10] sm:$0xff] %v577_v39  ;;  %v575_v43 = vpop.f32.mrb[3].mxu0 }
 0x1ab   : > { %580 = vst [vmem:[#allocation10 + $0x8] sm:$0xff] %v578_v41 }
 0x1b1   : > { %v585_v49 = vld [vmem:[#allocation10] sm:$0xff] }
 0x1b2   : > { %v586_v50 = vld [vmem:[#allocation10 + $0x8] sm:$0xff]  ;;  %v599_v55 = vadd.f32 %v592_v51, %v585_v49 }
 0x1b3   : > { %v600_v56 = vadd.f32 %v596_v52, %v586_v50 }
 0x1b4   : > { %v603_v57 = vadd.f32 %v601_v53, %v599_v55 }
 0x1b5   : > { %v604_v58 = vadd.f32 %v602_v54, %v600_v56 }
 0x1b6   : > { %v605_v59 = vmax.f32 %v603_v57, 0.0 }
 0x1b7   : > { %v606_v60 = vmax.f32 %v604_v58, 0.0 }
 0x1b8   : > { %607 = vst [vmem:[#allocation10] sm:$0xff] %v605_v59 }
 0x1b9   : > { %608 = vst [vmem:[#allocation10 + $0x8] sm:$0xff] %v606_v60 }
 0x1ba PF: > { %p838_p2 = scmp.eq.s32.totalorder %s1216_s21, 8  ;;  %s1161_s18 = smov [#allocation10]  }
 0x1bb   : > { %s621_s22 = sshll.u32 %s1161_s18, 4  ;;  %s622_s22 = int_to_ptr.vmem [resolvable:$true] %s621_s22 }
 0x1bc   : > { %s1060_s23 = scalar_lea.vmem %s622_s22, 256  ;;  %p1067_p8 = scmp.lt.s32.totalorder %s622_s22, %s622_s22 }
 0x1bd   : > { %p1061_p3 = scmp.ne.s32.totalorder %s622_s22, %s1060_s23  ;;  %p1068_p1 = scmp.lt.s32.totalorder %s1060_s23, %s1060_s23 }
 0x1bf   : > { %p1062_p0 = pnand %p1061_p3, %p838_p2  ;;  %p1069_p12 = por %p1068_p1, %p1067_p8 }
 0x1c1   : > { %p1063_p6 = pneg %p1062_p0 }
 0x1c3   : > { %p1070_p9 = pnand %p1069_p12, %p1063_p6 }
 0x1c5   : > { %1073 = shalt.err (!%p1070_p9)
}
 0x1c6   : > { %s1074_s30 = scalar_lea.hbm %s1490_s4, 256 }
 0x1c7   : > { %p1075_p7 = scmp.ne.s32.totalorder %s1490_s4, %s1074_s30  ;;  %p1080_p10 = scmp.lt.u32.totalorder %s1074_s30, %s1490_s4 }
 0x1c9   : > { %p1076_p4 = pnand %p1075_p7, %p838_p2 }
 0x1cb   : > { %p1077_p5 = pneg %p1076_p4 }
 0x1cd   : > { %p1082_p11 = pnand %p1080_p10, %p1077_p5 }
 0x1cf   : > { %1085 = shalt.err (!%p1082_p11)
}
 0x1d0   : > { %816 = dma.vmem_to_hbm [thread:$0]  (%p838_p2), %s622_s22, 256, %s1490_s4, [#allocation4]  }
 0x1d1   : > { %1127 = dma.done.wait (%p838_p2), [#allocation4], 256  }
 0x1d2   : > { %1129 = vsyncadd (%p838_p2), [#allocation4], 4294967040 }
 0x1d3 PF: > { %s22_s20 = sadd.s32 1, %s1152_s20   ;;  %s1504_s15 = smov %s1136_s16 }
 0x1d4   : > { %p19_p13 = scmp.ge.s32.totalorder %s22_s20, 11   ;;  %s1505_s16 = smov %s1140_s17 }
 0x1d5   : > { %s1506_s17 = smov %s1305_s11  ;;  %s1507_s18 = smov %s1148_s19 }
 0x1d6   : > { %s1508_s19 = smov %s1510_s7  ;;  %21 = sbr.rel (!%p19_p13) target bundleno = 8 (0x8), region = 105 }
 0x1dd   :  { %634 = vsyncpa [#allocation3], 1 }
 0x1de   :  { %636 = vsyncpa [#allocation3 + $0x1], 1 }
 0x1df   :  { %637 = vsyncpa [#allocation6], 1 }
 0x1e0   :  { %639 = vsyncpa [#allocation6 + $0x1], 1 }
 0x1e1   :  { %640 = vsyncpa [#allocation9], 1 }
 0x1e2   :  { %641 = vsyncpa [#allocation4], 1 }
 0x1e3   :  { %643 = vsyncpa [#allocation4 + $0x1], 1 }

// kernel: e2e_cnn_forward.36
= control target key start
LH: loop header
LB: loop body
LE: loop exit
PB: predicated region body
PF: predicated region fallthrough
CT: control target
= control target key end

     0   :  { %8 = vsyncpa [#allocation3], 0  ;;  %s1342_s0 = inlined_call_operand.hbm [shape: bf16[8,2304], index: 0, kind: input, shape index: {}]   ;;  %s1343_s1 = inlined_call_operand.hbm [shape: bf16[2304,256], index: 1, kind: input, shape index: {}]   ;;  %s1344_s2 = inlined_call_operand.hbm [shape: f32[1,256], index: 2, kind: input, shape index: {}]   ;;  %s1345_s3 = inlined_call_operand.hbm [shape: f32[8,256], index: 3, kind: output, shape index: {}]  }
   0x1   :  { %10 = vsyncpa [#allocation3 + $0x1], 0 }
   0x2   :  { %11 = vsyncpa [#allocation6], 0 }
   0x3   :  { %13 = vsyncpa [#allocation6 + $0x1], 0 }
   0x4   :  { %14 = vsyncpa [#allocation4], 0  ;;  %s1065_s12 = smov 0   ;;  %s1067_s13 = smov 0  }
   0x5   :  { %s1069_s14 = smov 0   ;;  %s1071_s15 = smov 0  }
   0x6   :  { %s1073_s16 = smov 0   ;;  %s1075_s17 = smov 0  }
   0x7 LB: > { %s1094_s18 = sadd.s32 4294967295, %s1036_s17   ;;  %s48_s19 = sadd.s32 1, %s1024_s14  ;;  %s1036_s17 = sphi %s1075_s17, %s20_s17   ;;  %s1032_s16 = sphi %s1073_s16, %s1366_s16   ;;  %s1028_s15 = sphi %s1071_s15, %s1365_s15   ;;  %s1024_s14 = sphi %s1069_s14, %s1364_s14   ;;  %s1020_s13 = sphi %s1067_s13, %s1363_s13   ;;  %s1016_s12 = sphi %s1065_s12, %s1362_s12  }
   0x8   : > { %p55_p0 = scmp.ne.s32.totalorder %s1024_s14, %s1020_s13  ;;  %p61_p1 = scmp.ne.s32.totalorder %s1020_s13, %s1016_s12 }
   0x9   : > { %p1346_p2 = scmp.eq.s32.totalorder %s1094_s18, 0  ;;  %p672_p3 = scmp.ge.s32.totalorder %s1036_s17, 1 }
   0xa   : > { %p154_p4 = scmp.lt.s32.totalorder %s1036_s17, 10  ;;  %s1038_s22 = smov [#allocation7]  }
   0xb   : > { %p1105_p5 = por %p1346_p2, %p61_p1  ;;  %s170_s23 = sshll.u32 %s1038_s22, 4  ;;  %s171_s23 = int_to_ptr.vmem [resolvable:$true] %s170_s23 }
   0xc   : > { %p1109_p6 = pnand %p672_p3, %p154_p4  ;;  %p56_p8 = scmp.eq.s32.totalorder %s1036_s17, 0 }
   0xd   : > { %s1349_s20 = scalar_select %p1105_p5, 1, 0 }
   0xe   : > { %s1350_s21 = scalar_select %p1109_p6, 1, 0 }
   0xf   : > { %p741_p7 = pneg %p1109_p6  ;;  %s32_s25 = sadd.s32 1, %s1032_s16 }
  0x10   : > { %p1123_p10 = scmp.ge.s32.totalorder %s32_s25, 9  ;;  %p1130_p11 = por %p56_p8, %p55_p0 }
  0x11   : > { %p1118_p9 = pnand %p741_p7, %p1346_p2  ;;  %s860_s30 = scalar_lea.hbm %s1344_s2, 32 }
  0x12   : > { %s1352_s26 = scalar_select %p1123_p10, 1, 0 }
  0x13   : > { %s1353_s27 = scalar_select %p1130_p11, 1, 0 }
  0x14   : > { %p861_p13 = scmp.ne.s32.totalorder %s1344_s2, %s860_s30  ;;  %p862_p1 = pneg %p1118_p9 }
  0x15   : > { %p867_p0 = scmp.lt.u32.totalorder %s860_s30, %s1344_s2 }
  0x16   : > { %p863_p3 = pnand %p862_p1, %p861_p13 }
  0x18   : > { %p864_p4 = pneg %p863_p3 }
  0x1a   : > { %p869_p7 = pnand %p867_p0, %p864_p4 }
  0x1c   : > { %872 = shalt.err (!%p869_p7)
}
  0x1d   : > { %s873_s8 = scalar_lea.vmem %s171_s23, 32  ;;  %p881_p5 = scmp.lt.s32.totalorder %s171_s23, %s171_s23 }
  0x1e   : > { %p874_p8 = scmp.ne.s32.totalorder %s171_s23, %s873_s8  ;;  %p882_p6 = scmp.lt.s32.totalorder %s873_s8, %s873_s8 }
  0x20   : > { %p876_p2 = pnand %p874_p8, %p862_p1  ;;  %p883_p11 = por %p882_p6, %p881_p5 }
  0x22   : > { %p877_p12 = pneg %p876_p2 }
  0x24   : > { %p884_p10 = pnand %p883_p11, %p877_p12 }
  0x26   : > { %887 = shalt.err (!%p884_p10)
}
  0x27   : > { %744 = dma.hbm_to_vmem [thread:$0]  (!%p1118_p9), %s1344_s2, 32, %s171_s23, [#allocation6]  }
  0x28   : > { %p1354_p2 = scmp.ne.s32.totalorder %s1352_s26, 0  ;;  %s1156_s11 = sand.u32 1, %s1024_s14  }
  0x29   : > { %s726_s12 = sshll.u32 %s1032_s16, 7  ;;  %s675_s24 = sshll.u32 %s1156_s11, 3 }
  0x2a   : > { %s1368_s25 = smov (%p1354_p2, %s32_s25), 0  ;;  %s1165_s30 = scalar_lea.hbm %s1342_s0, %s726_s12 }
  0x2b   : > { %s44_s22 = ssub.s32 %s1032_s16, %s1368_s25  ;;  %s185_s26 = scalar_lea.vmem [#allocation2], %s675_s24 }
  0x2c   : > { %p46_p5 = scmp.eq.s32.totalorder %s44_s22, 0  ;;  %s195_s4 = sshll.u32 %s185_s26, 4  ;;  %s1180_s4 = int_to_ptr.vmem [resolvable:$true] %s195_s4 }
  0x2d   : > { %p1355_p6 = scmp.ne.s32.totalorder %s1353_s27, 0  ;;  %p1356_p9 = scmp.lt.s32.totalorder %s1036_s17, 9 }
  0x2e   : > { %s1170_s23 = scalar_select %p46_p5, %s1024_s14, %s48_s19  }
  0x2f   : > { %p1176_p10 = pnand %p1356_p9, %p1355_p6  ;;  %s678_s6 = sshll.u32 %s1156_s11, 8 }
  0x30   : > { %s182_s7 = scalar_lea.sflag [#allocation3], %s1156_s11  ;;  %s888_s8 = scalar_lea.hbm %s1165_s30, 128 }
  0x31   : > { %p889_p11 = scmp.ne.s32.totalorder %s1165_s30, %s888_s8  ;;  %p890_p12 = pneg %p1176_p10 }
  0x32   : > { %s893_s9 = scalar_lea.hbm %s1342_s0, 1152  ;;  %p894_p3 = scmp.lt.u32.totalorder %s1165_s30, %s1342_s0 }
  0x33   : > { %p891_p13 = pnand %p890_p12, %p889_p11  ;;  %p895_p4 = scmp.lt.u32.totalorder %s893_s9, %s888_s8 }
  0x34   : > { %p897_p7 = scmp.lt.u32.totalorder %s888_s8, %s1165_s30 }
  0x35   : > { %p892_p1 = pneg %p891_p13  ;;  %p896_p0 = por %p895_p4, %p894_p3 }
  0x37   : > { %p898_p8 = por %p897_p7, %p896_p0 }
  0x39   : > { %p899_p2 = pnand %p898_p8, %p892_p1 }
  0x3b   : > { %902 = shalt.err (!%p899_p2)
}
  0x3c   : > { %s903_s22 = scalar_lea.vmem %s1180_s4, 128  ;;  %s1039_s24 = smov [#allocation2]  }
  0x3d   : > { %p904_p5 = scmp.ne.s32.totalorder %s1180_s4, %s903_s22  ;;  %s908_s28 = sshll.u32 %s1039_s24, 4  ;;  %s909_s28 = int_to_ptr.vmem [resolvable:$false] %s908_s28 }
  0x3e   : > { %s910_s29 = scalar_lea.vmem %s909_s28, 256  ;;  %p911_p11 = scmp.lt.s32.totalorder %s1180_s4, %s909_s28 }
  0x3f   : > { %p906_p6 = pnand %p904_p5, %p890_p12  ;;  %p912_p13 = scmp.lt.s32.totalorder %s910_s29, %s903_s22 }
  0x41   : > { %p907_p9 = pneg %p906_p6  ;;  %p913_p3 = por %p912_p13, %p911_p11 }
  0x43   : > { %p914_p4 = pnand %p913_p3, %p907_p9 }
  0x45   : > { %917 = shalt.err (!%p914_p4)
}
  0x46   : > { %748 = dma.hbm_to_vmem [thread:$0]  (!%p1176_p10), %s1165_s30, 128, %s1180_s4, %s182_s7  }
  0x47   : > { %s728_s26 = sshll.u32 %s1032_s16, 12  ;;  %s206_s8 = scalar_lea.vmem [#allocation5], %s678_s6 }
  0x48   : > { %s216_s19 = sshll.u32 %s206_s8, 4  ;;  %s202_s27 = sand.u32 1, %s1036_s17   ;;  %s1212_s19 = int_to_ptr.vmem [resolvable:$true] %s216_s19 }
  0x49   : > { %s1218_s12 = scalar_lea.hbm %s1343_s1, %s728_s26  ;;  %s1220_s22 = scalar_lea.sflag [#allocation6], %s202_s27 }
  0x4a   : > { %s918_s24 = scalar_lea.hbm %s1218_s12, 4096  ;;  %s923_s4 = scalar_lea.hbm %s1343_s1, 36864 }
  0x4b   : > { %p919_p1 = scmp.ne.s32.totalorder %s1218_s12, %s918_s24  ;;  %p924_p8 = scmp.lt.u32.totalorder %s1218_s12, %s1343_s1 }
  0x4c   : > { %p925_p2 = scmp.lt.u32.totalorder %s923_s4, %s918_s24  ;;  %p927_p6 = scmp.lt.u32.totalorder %s918_s24, %s1218_s12 }
  0x4d   : > { %p921_p0 = pnand %p919_p1, %p890_p12 }
  0x4e   : > { %p926_p5 = por %p925_p2, %p924_p8 }
  0x4f   : > { %p922_p7 = pneg %p921_p0 }
  0x50   : > { %p928_p9 = por %p927_p6, %p926_p5 }
  0x52   : > { %p929_p11 = pnand %p928_p9, %p922_p7 }
  0x54   : > { %932 = shalt.err (!%p929_p11)
}
  0x55   : > { %s933_s28 = scalar_lea.vmem %s1212_s19, 4096  ;;  %s1040_s29 = smov [#allocation5]  }
  0x56   : > { %p934_p13 = scmp.ne.s32.totalorder %s1212_s19, %s933_s28  ;;  %s938_s26 = sshll.u32 %s1040_s29, 4  ;;  %s939_s26 = int_to_ptr.vmem [resolvable:$false] %s938_s26 }
  0x57   : > { %s940_s8 = scalar_lea.vmem %s939_s26, 8192  ;;  %p941_p1 = scmp.lt.s32.totalorder %s1212_s19, %s939_s26 }
  0x58   : > { %p936_p3 = pnand %p934_p13, %p890_p12  ;;  %p942_p0 = scmp.lt.s32.totalorder %s940_s8, %s933_s28 }
  0x5a   : > { %p937_p4 = pneg %p936_p3  ;;  %p943_p8 = por %p942_p0, %p941_p1 }
  0x5c   : > { %p944_p2 = pnand %p943_p8, %p937_p4 }
  0x5e   : > { %947 = shalt.err (!%p944_p2)
}
  0x5f   : > { %s1041_s27 = smov 128   ;;  %s1042_s9 = smov 8  }
  0x60   : > { %751 = dma.hbm_to_vmem [thread:$0]  (!%p1176_p10), %s1218_s12, 4096, %s1212_s19, %s1220_s22, %s1041_s27, %s1041_s27, %s1042_s9  }
  0x61   : > { %p1358_p12 = scmp.ne.s32.totalorder %s1350_s21, 0 }
  0x62   : > { %s230_s10 = sand.u32 (!%p1358_p12), 1, %s1020_s13   ;;  %p1359_p7 = scmp.ne.s32.totalorder (!%p1358_p12), %s1349_s20, 0 }
  0x63   : > { %228 = sbr.rel (%p1358_p12) target bundleno = 440 (0x1b8), region = 32  ;;  %s683_s24 = sshll.u32 (!%p1358_p12), %s230_s10, 3 }
  0x64   : > { %s231_s11 = scalar_lea.sflag (!%p1358_p12), [#allocation3], %s230_s10  ;;  %s1249_s30 = scalar_lea.vmem (!%p1358_p12), [#allocation2], %s683_s24 }
  0x6a   : > { %999 = dma.done.wait (%p1359_p7), %s231_s11, 128  }
  0x6b   : > { %1001 = vsyncadd (%p1359_p7), %s231_s11, 4294967168  ;;  %s239_s4 = sand.u32 1, %s1094_s18   ;;  %s684_s5 = sshll.u32 %s230_s10, 8 }
  0x6c   : > { %s240_s19 = scalar_lea.sflag [#allocation6], %s239_s4  ;;  %s1256_s12 = scalar_lea.vmem [#allocation5], %s684_s5 }
  0x6d   : > { %1003 = dma.done.wait (%p1359_p7), %s240_s19, 4096  }
  0x6e   : > { %1005 = vsyncadd (%p1359_p7), %s240_s19, 4294963200  ;;  %p1360_p10 = scmp.eq.s32.totalorder %s1094_s18, 0 }
  0x70   : > { %1007 = dma.done.wait (%p1360_p10), [#allocation6], 32   ;;  %p1361_p5 = pmov %p1360_p10 }
  0x71   : > { %p686_p6 = scmp.ne.s32.totalorder %s1028_s15, 0 }
  0x72   : > { %1009 = vsyncadd (%p1361_p5), [#allocation6], 4294967264  ;;  %v1043_v0 = vmov (!%p686_p6), 0.0  }
  0x73   : > { %278 = sbr.rel (%p686_p6) target bundleno = 122 (0x7a), region = 48  ;;  %279 = vst [vmem:[#allocation8] sm:$0xff] (!%p686_p6), %v1043_v0  ;;  %280 = vst [vmem:[#allocation8 + $0x8] sm:$0xff] (!%p686_p6), %v1043_v0 }
  0x7a PF: > { %v810_v1 = vld [vmem:[%s1256_s12 + $0x4] ss:$8 sps:$4 sm:$0xff]   ;;  %v812_v2 = vld [vmem:[%s1256_s12] ss:$8 sps:$4 sm:$0xff]   ;;  %v813_v3 = vld [vmem:[%s1256_s12 + $0x14] ss:$8 sps:$4 sm:$0xff]  }
  0x7b   : > { %483 = vmatprep.subr.bf16.mxu0 %v810_v1  ;;  %v815_v4 = vld [vmem:[%s1256_s12 + $0x10] ss:$8 sps:$4 sm:$0xff]   ;;  %v816_v5 = vld [vmem:[%s1256_s12 + $0x24] ss:$8 sps:$4 sm:$0xff]   ;;  %v818_v6 = vld [vmem:[%s1256_s12 + $0x20] ss:$8 sps:$4 sm:$0xff]  }
  0x7c   : > { %484 = vmatpush1.bf16.msra.mxu0 %v812_v2  ;;  %v819_v7 = vld [vmem:[%s1256_s12 + $0x34] ss:$8 sps:$4 sm:$0xff]   ;;  %v821_v8 = vld [vmem:[%s1256_s12 + $0x30] ss:$8 sps:$4 sm:$0xff]   ;;  %v822_v9 = vld [vmem:[%s1256_s12 + $0x44] ss:$8 sps:$4 sm:$0xff]  }
  0x7d   : > { %485 = vmatprep.subr.bf16.mxu0 %v813_v3  ;;  %v824_v10 = vld [vmem:[%s1256_s12 + $0x40] ss:$8 sps:$4 sm:$0xff]   ;;  %v825_v11 = vld [vmem:[%s1256_s12 + $0x54] ss:$8 sps:$4 sm:$0xff]   ;;  %v827_v12 = vld [vmem:[%s1256_s12 + $0x50] ss:$8 sps:$4 sm:$0xff]  }
  0x7e   : > { %v828_v13 = vld [vmem:[%s1256_s12 + $0x64] ss:$8 sps:$4 sm:$0xff]   ;;  %v283_v14 = vld [vmem:[%s1249_s30] sm:$0xff]  ;;  %v830_v16 = vld [vmem:[%s1256_s12 + $0x60] ss:$8 sps:$4 sm:$0xff]   ;;  %p721_p9 = scmp.ne.s32.totalorder %s1028_s15, 8 }
  0x7f   : > { %v688_v15 = vcombine.high %v283_v14, %v283_v14  ;;  %v831_v17 = vld [vmem:[%s1256_s12 + $0x74] ss:$8 sps:$4 sm:$0xff]   ;;  %v833_v18 = vld [vmem:[%s1256_s12 + $0x70] ss:$8 sps:$4 sm:$0xff]   ;;  %v834_v19 = vld [vmem:[%s1256_s12 + $0x84] ss:$8 sps:$4 sm:$0xff]   ;;  %v687_v35 = vcombine.low %v283_v14, %v283_v14  ;;  %v536_v44 = vlaneseq (!%p721_p9) }
  0x80   : > { %486 = vmatpush1.bf16.msra.mxu0 %v815_v4  ;;  %v836_v20 = vld [vmem:[%s1256_s12 + $0x80] ss:$8 sps:$4 sm:$0xff]   ;;  %v837_v21 = vld [vmem:[%s1256_s12 + $0x94] ss:$8 sps:$4 sm:$0xff]   ;;  %v839_v22 = vld [vmem:[%s1256_s12 + $0x90] ss:$8 sps:$4 sm:$0xff]  }
  0x81   : > { %487 = vmatprep.subr.bf16.mxu0 %v816_v5  ;;  %515 = vmatprep.mubr.bf16.mxu0 %v688_v15  ;;  %v840_v23 = vld [vmem:[%s1256_s12 + $0xa4] ss:$8 sps:$4 sm:$0xff]   ;;  %v842_v24 = vld [vmem:[%s1256_s12 + $0xa0] ss:$8 sps:$4 sm:$0xff]   ;;  %v843_v25 = vld [vmem:[%s1256_s12 + $0xb4] ss:$8 sps:$4 sm:$0xff]  }
  0x82   : > { %v845_v26 = vld [vmem:[%s1256_s12 + $0xb0] ss:$8 sps:$4 sm:$0xff]   ;;  %v846_v27 = vld [vmem:[%s1256_s12 + $0xc4] ss:$8 sps:$4 sm:$0xff]   ;;  %v848_v28 = vld [vmem:[%s1256_s12 + $0xc0] ss:$8 sps:$4 sm:$0xff]  }
  0x83   : > { %v849_v29 = vld [vmem:[%s1256_s12 + $0xd4] ss:$8 sps:$4 sm:$0xff]   ;;  %v851_v30 = vld [vmem:[%s1256_s12 + $0xd0] ss:$8 sps:$4 sm:$0xff]   ;;  %v852_v31 = vld [vmem:[%s1256_s12 + $0xe4] ss:$8 sps:$4 sm:$0xff]  }
  0x84   : > { %488 = vmatpush1.bf16.msra.mxu0 %v818_v6  ;;  %v854_v32 = vld [vmem:[%s1256_s12 + $0xe0] ss:$8 sps:$4 sm:$0xff]   ;;  %v855_v33 = vld [vmem:[%s1256_s12 + $0xf4] ss:$8 sps:$4 sm:$0xff]   ;;  %v857_v34 = vld [vmem:[%s1256_s12 + $0xf0] ss:$8 sps:$4 sm:$0xff]  }
  0x85   : > { %489 = vmatprep.subr.bf16.mxu0 %v819_v7  ;;  %v281_v36 = vld [vmem:[#allocation8] sm:$0xff]  ;;  %v282_v37 = vld [vmem:[#allocation8 + $0x8] sm:$0xff]  ;;  %v537_v45 = vshrl.u32 (!%p721_p9), %v536_v44, 7  ;;  %v534_v46 = vld [vmem:[#allocation7] sm:$0x3] (!%p721_p9) }
  0x87   : > { %v538_v47 = vsub.s32 (!%p721_p9), 0, %v537_v45  ;;  %v542_v48 = vsub.s32 (!%p721_p9), 1, %v537_v45 }
  0x88   : > { %490 = vmatpush1.bf16.msra.mxu0 %v821_v8 }
  0x89   : > { %491 = vmatprep.subr.bf16.mxu0 %v822_v9  ;;  %v539_v51 = vrot.slane (!%p721_p9), %v534_v46, %v538_v47  ;;  %v543_v52 = vrot.slane (!%p721_p9), %v534_v46, %v542_v48 }
  0x8c   : > { %492 = vmatpush1.bf16.msra.mxu0 %v824_v10 }
  0x8d   : > { %493 = vmatprep.subr.bf16.mxu0 %v825_v11 }
  0x90   : > { %494 = vmatpush1.bf16.msra.mxu0 %v827_v12 }
  0x91   : > { %495 = vmatprep.subr.bf16.mxu0 %v828_v13 }
  0x94   : > { %496 = vmatpush1.bf16.msra.mxu0 %v830_v16 }
  0x95   : > { %497 = vmatprep.subr.bf16.mxu0 %v831_v17 }
  0x98   : > { %498 = vmatpush1.bf16.msra.mxu0 %v833_v18 }
  0x99   : > { %499 = vmatprep.subr.bf16.mxu0 %v834_v19 }
  0x9c   : > { %500 = vmatpush1.bf16.msra.mxu0 %v836_v20 }
  0x9d   : > { %501 = vmatprep.subr.bf16.mxu0 %v837_v21 }
  0xa0   : > { %502 = vmatpush1.bf16.msra.mxu0 %v839_v22 }
  0xa1   : > { %503 = vmatprep.subr.bf16.mxu0 %v840_v23 }
  0xa4   : > { %504 = vmatpush1.bf16.msra.mxu0 %v842_v24 }
  0xa5   : > { %505 = vmatprep.subr.bf16.mxu0 %v843_v25 }
  0xa8   : > { %506 = vmatpush1.bf16.msra.mxu0 %v845_v26 }
  0xa9   : > { %507 = vmatprep.subr.bf16.mxu0 %v846_v27 }
  0xac   : > { %508 = vmatpush1.bf16.msra.mxu0 %v848_v28 }
  0xad   : > { %509 = vmatprep.subr.bf16.mxu0 %v849_v29 }
  0xb0   : > { %510 = vmatpush1.bf16.msra.mxu0 %v851_v30 }
  0xb1   : > { %511 = vmatprep.subr.bf16.mxu0 %v852_v31 }
  0xb4   : > { %512 = vmatpush1.bf16.msra.mxu0 %v854_v32 }
  0xb5   : > { %513 = vmatprep.subr.bf16.mxu0 %v855_v33 }
  0xb8   : > { %514 = vmatpush1.bf16.msra.mxu0 %v857_v34 }
  0xbb   : > { %516 = vmatmul.mubr.bf16.vlgmr.msra.gmra.mrb[0].mxu0 %v687_v35 }
 0x18c   : > { %531 = sbr.rel (%p721_p9) target bundleno = 415 (0x19f), region = 52 }
 0x18e   : > { %v517_v38 = vpop.f32.mrb[0].mxu0 }
 0x18f   : > { %v524_v39 = vadd.f32 %v517_v38, %v281_v36  ;;  %v519_v40 = vpop.f32.mrb[1].mxu0 }
 0x190   : > { %v525_v41 = vadd.f32 %v519_v40, %v282_v37  ;;  %v521_v42 = vpop.f32.mrb[2].mxu0 }
 0x191   : > { %526 = vst [vmem:[#allocation8] sm:$0xff] %v524_v39  ;;  %v522_v43 = vpop.f32.mrb[3].mxu0 }
 0x192   : > { %527 = vst [vmem:[#allocation8 + $0x8] sm:$0xff] %v525_v41 }
 0x198   : > { %v532_v49 = vld [vmem:[#allocation8] sm:$0xff] }
 0x199   : > { %v533_v50 = vld [vmem:[#allocation8 + $0x8] sm:$0xff]  ;;  %v546_v53 = vadd.f32 %v539_v51, %v532_v49 }
 0x19a   : > { %v547_v54 = vadd.f32 %v543_v52, %v533_v50 }
 0x19b   : > { %v548_v55 = vmax.f32 %v546_v53, 0.0 }
 0x19c   : > { %v549_v56 = vmax.f32 %v547_v54, 0.0 }
 0x19d   : > { %550 = vst [vmem:[#allocation8] sm:$0xff] %v548_v55 }
 0x19e   : > { %551 = vst [vmem:[#allocation8 + $0x8] sm:$0xff] %v549_v56 }
 0x19f PF: > { %p755_p11 = scmp.eq.s32.totalorder %s1094_s18, 8  ;;  %s1044_s15 = smov [#allocation8]  }
 0x1a0   : > { %s564_s20 = sshll.u32 %s1044_s15, 4  ;;  %s565_s20 = int_to_ptr.vmem [resolvable:$true] %s564_s20 }
 0x1a1   : > { %s948_s21 = scalar_lea.vmem %s565_s20, 256  ;;  %p955_p1 = scmp.lt.s32.totalorder %s565_s20, %s565_s20 }
 0x1a2   : > { %p949_p13 = scmp.ne.s32.totalorder %s565_s20, %s948_s21  ;;  %p956_p0 = scmp.lt.s32.totalorder %s948_s21, %s948_s21 }
 0x1a4   : > { %p950_p3 = pnand %p949_p13, %p755_p11  ;;  %p957_p8 = por %p956_p0, %p955_p1 }
 0x1a6   : > { %p951_p4 = pneg %p950_p3 }
 0x1a8   : > { %p958_p2 = pnand %p957_p8, %p951_p4 }
 0x1aa   : > { %961 = shalt.err (!%p958_p2)
}
 0x1ab   : > { %s962_s7 = scalar_lea.hbm %s1345_s3, 256 }
 0x1ac   : > { %p963_p12 = scmp.ne.s32.totalorder %s1345_s3, %s962_s7  ;;  %p968_p5 = scmp.lt.u32.totalorder %s962_s7, %s1345_s3 }
 0x1ae   : > { %p964_p7 = pnand %p963_p12, %p755_p11 }
 0x1b0   : > { %p965_p10 = pneg %p964_p7 }
 0x1b2   : > { %p970_p6 = pnand %p968_p5, %p965_p10 }
 0x1b4   : > { %973 = shalt.err (!%p970_p6)
}
 0x1b5   : > { %738 = dma.vmem_to_hbm [thread:$0]  (%p755_p11), %s565_s20, 256, %s1345_s3, [#allocation4]  }
 0x1b6   : > { %1011 = dma.done.wait (%p755_p11), [#allocation4], 256  }
 0x1b7   : > { %1013 = vsyncadd (%p755_p11), [#allocation4], 4294967040 }
 0x1b8 PF: > { %s20_s17 = sadd.s32 1, %s1036_s17   ;;  %s1362_s12 = smov %s1020_s13 }
 0x1b9   : > { %p17_p9 = scmp.ge.s32.totalorder %s20_s17, 11   ;;  %s1363_s13 = smov %s1024_s14 }
 0x1ba   : > { %s1364_s14 = smov %s1170_s23  ;;  %s1365_s15 = smov %s1032_s16 }
 0x1bb   : > { %s1366_s16 = smov %s1368_s25  ;;  %19 = sbr.rel (!%p17_p9) target bundleno = 7 (0x7), region = 96 }
 0x1c2   :  { %577 = vsyncpa [#allocation3], 1 }
 0x1c3   :  { %579 = vsyncpa [#allocation3 + $0x1], 1 }
 0x1c4   :  { %580 = vsyncpa [#allocation6], 1 }
 0x1c5   :  { %582 = vsyncpa [#allocation6 + $0x1], 1 }
 0x1c6   :  { %583 = vsyncpa [#allocation4], 1 }
 0x1c7   :  { %585 = vsyncpa [#allocation4 + $0x1], 1 }

// kernel: e2e_cnn_forward.33
= control target key start
LH: loop header
LB: loop body
LE: loop exit
PB: predicated region body
PF: predicated region fallthrough
CT: control target
= control target key end

     0   :  { %8 = vsyncpa [#allocation3], 0  ;;  %s457_s0 = inlined_call_operand.hbm [shape: bf16[8,128], index: 0, kind: input, shape index: {}]   ;;  %s458_s1 = inlined_call_operand.hbm [shape: bf16[128,256], index: 1, kind: input, shape index: {}]   ;;  %s459_s2 = inlined_call_operand.hbm [shape: f32[1,256], index: 2, kind: input, shape index: {}]   ;;  %s460_s3 = inlined_call_operand.hbm [shape: f32[8,256], index: 3, kind: output, shape index: {}]  }
   0x1   :  { %9 = vsyncpa [#allocation6], 0 }
   0x2   :  { %10 = vsyncpa [#allocation4], 0  ;;  %s382_s12 = smov [#allocation5]   ;;  %s288_s16 = scalar_lea.hbm %s458_s1, 2048 }
   0x3   :  { %s26_s13 = sshll.u32 %s382_s12, 4  ;;  %p289_p0 = scmp.ne.s32.totalorder %s458_s1, %s288_s16  ;;  %s27_s13 = int_to_ptr.vmem [resolvable:$true] %s26_s13 }
   0x4   :  { %p292_p1 = scmp.lt.u32.totalorder %s288_s16, %s458_s1 }
   0x6   :  { %p294_p2 = pnand %p292_p1, %p289_p0 }
   0x8   :  { %297 = shalt.err (!%p294_p2)
}
   0x9   :  { %s298_s21 = scalar_lea.vmem %s27_s13, 2048  ;;  %p303_p4 = scmp.lt.s32.totalorder %s27_s13, %s27_s13 }
   0xa   :  { %p299_p3 = scmp.ne.s32.totalorder %s27_s13, %s298_s21  ;;  %p304_p5 = scmp.lt.s32.totalorder %s298_s21, %s298_s21 }
   0xc   :  { %p305_p6 = por %p304_p5, %p303_p4 }
   0xe   :  { %p306_p7 = pnand %p305_p6, %p299_p3 }
  0x10   :  { %309 = shalt.err (!%p306_p7)
}
  0x11   :  { %s383_s22 = smov 128   ;;  %s384_s23 = smov 8  }
  0x12   :  { %32 = dma.hbm_to_vmem [thread:$0]  %s458_s1, 2048, %s27_s13, [#allocation6], %s383_s22, %s383_s22, %s384_s23  }
  0x13   :  { %s385_s26 = smov [#allocation2]   ;;  %s386_s28 = smov [#allocation7]  }
  0x14   :  { %s17_s27 = sshll.u32 %s385_s26, 4  ;;  %s39_s29 = sshll.u32 %s386_s28, 4  ;;  %s18_s27 = int_to_ptr.vmem [resolvable:$true] %s17_s27  ;;  %s40_s29 = int_to_ptr.vmem [resolvable:$true] %s39_s29 }
  0x15   :  { %s310_s5 = scalar_lea.hbm %s457_s0, 64 }
  0x16   :  { %p311_p8 = scmp.ne.s32.totalorder %s457_s0, %s310_s5  ;;  %p314_p9 = scmp.lt.u32.totalorder %s310_s5, %s457_s0 }
  0x18   :  { %p316_p10 = pnand %p314_p9, %p311_p8 }
  0x1a   :  { %319 = shalt.err (!%p316_p10)
}
  0x1b   :  { %s320_s1 = scalar_lea.vmem %s18_s27, 64  ;;  %p325_p12 = scmp.lt.s32.totalorder %s18_s27, %s18_s27 }
  0x1c   :  { %p321_p11 = scmp.ne.s32.totalorder %s18_s27, %s320_s1  ;;  %p326_p13 = scmp.lt.s32.totalorder %s320_s1, %s320_s1 }
  0x1e   :  { %p327_p0 = por %p326_p13, %p325_p12 }
  0x20   :  { %p328_p1 = pnand %p327_p0, %p321_p11 }
  0x22   :  { %331 = shalt.err (!%p328_p1)
}
  0x23   :  { %20 = dma.hbm_to_vmem [thread:$0]  %s457_s0, 64, %s18_s27, [#allocation3]  }
  0x24   :  { %s332_s14 = scalar_lea.hbm %s459_s2, 32 }
  0x25   :  { %p333_p2 = scmp.ne.s32.totalorder %s459_s2, %s332_s14  ;;  %p336_p3 = scmp.lt.u32.totalorder %s332_s14, %s459_s2 }
  0x27   :  { %p338_p4 = pnand %p336_p3, %p333_p2 }
  0x29   :  { %341 = shalt.err (!%p338_p4)
}
  0x2a   :  { %s342_s19 = scalar_lea.vmem %s40_s29, 32  ;;  %p347_p6 = scmp.lt.s32.totalorder %s40_s29, %s40_s29 }
  0x2b   :  { %p343_p5 = scmp.ne.s32.totalorder %s40_s29, %s342_s19  ;;  %p348_p7 = scmp.lt.s32.totalorder %s342_s19, %s342_s19 }
  0x2d   :  { %p349_p8 = por %p348_p7, %p347_p6 }
  0x2f   :  { %p350_p9 = pnand %p349_p8, %p343_p5 }
  0x31   :  { %353 = shalt.err (!%p350_p9)
}
  0x32   :  { %42 = dma.hbm_to_vmem [thread:$0]  %s459_s2, 32, %s40_s29, [#allocation6]  }
  0x33   :  { %376 = dma.done.wait [#allocation3], 64  }
  0x34   :  { %377 = vsyncadd [#allocation3], 4294967232 }
  0x35   :  { %378 = dma.done.wait [#allocation6], 2080  }
  0x36   :  { %379 = vsyncadd [#allocation6], 4294965216  ;;  %v387_v0 = vmov 0   ;;  %v264_v1 = vld [vmem:[#allocation5 + $0x4] ss:$8 sps:$4 sm:$0xff]   ;;  %v210_v18 = vlaneseq  ;;  %s388_s2 = smov [#allocation8]  }
  0x37   :  { %190 = vmatprep.mubr.bf16.mxu0 %v387_v0  ;;  %v266_v2 = vld [vmem:[#allocation5] ss:$8 sps:$4 sm:$0xff]   ;;  %158 = vmatprep.subr.bf16.mxu0 %v264_v1  ;;  %v267_v3 = vld [vmem:[#allocation5 + $0x14] ss:$8 sps:$4 sm:$0xff]   ;;  %v269_v4 = vld [vmem:[#allocation5 + $0x10] ss:$8 sps:$4 sm:$0xff]  }
  0x38   :  { %159 = vmatpush1.bf16.msra.mxu0 %v266_v2  ;;  %v270_v5 = vld [vmem:[#allocation5 + $0x24] ss:$8 sps:$4 sm:$0xff]   ;;  %v272_v6 = vld [vmem:[#allocation5 + $0x20] ss:$8 sps:$4 sm:$0xff]   ;;  %v273_v7 = vld [vmem:[#allocation5 + $0x34] ss:$8 sps:$4 sm:$0xff]  }
  0x39   :  { %160 = vmatprep.subr.bf16.mxu0 %v267_v3  ;;  %v275_v8 = vld [vmem:[#allocation5 + $0x30] ss:$8 sps:$4 sm:$0xff]   ;;  %v276_v9 = vld [vmem:[#allocation5 + $0x44] ss:$8 sps:$4 sm:$0xff]   ;;  %v278_v10 = vld [vmem:[#allocation5 + $0x40] ss:$8 sps:$4 sm:$0xff]  }
  0x3a   :  { %v279_v11 = vld [vmem:[#allocation5 + $0x54] ss:$8 sps:$4 sm:$0xff]   ;;  %v281_v12 = vld [vmem:[#allocation5 + $0x50] ss:$8 sps:$4 sm:$0xff]   ;;  %v282_v13 = vld [vmem:[#allocation5 + $0x64] ss:$8 sps:$4 sm:$0xff]  }
  0x3b   :  { %v284_v14 = vld [vmem:[#allocation5 + $0x60] ss:$8 sps:$4 sm:$0xff]   ;;  %v285_v15 = vld [vmem:[#allocation5 + $0x74] ss:$8 sps:$4 sm:$0xff]   ;;  %v287_v16 = vld [vmem:[#allocation5 + $0x70] ss:$8 sps:$4 sm:$0xff]  }
  0x3c   :  { %161 = vmatpush1.bf16.msra.mxu0 %v269_v4  ;;  %v61_v17 = vld [vmem:[#allocation2] sm:$0xf]  ;;  %v211_v19 = vshrl.u32 %v210_v18, 7  ;;  %v208_v21 = vld [vmem:[#allocation7] sm:$0x3]  ;;  %s230_s21 = sshll.u32 %s388_s2, 4  ;;  %s231_s21 = int_to_ptr.vmem [resolvable:$true] %s230_s21 }
  0x3d   :  { %162 = vmatprep.subr.bf16.mxu0 %v270_v5  ;;  %s354_s22 = scalar_lea.vmem %s231_s21, 256  ;;  %p359_p11 = scmp.lt.s32.totalorder %s231_s21, %s231_s21 }
  0x3e   :  { %v212_v20 = vsub.s32 0, %v211_v19  ;;  %v216_v22 = vsub.s32 1, %v211_v19  ;;  %p355_p10 = scmp.ne.s32.totalorder %s231_s21, %s354_s22  ;;  %p360_p12 = scmp.lt.s32.totalorder %s354_s22, %s354_s22 }
  0x40   :  { %163 = vmatpush1.bf16.msra.mxu0 %v272_v6  ;;  %v213_v23 = vrot.slane %v208_v21, %v212_v20  ;;  %v217_v25 = vrot.slane %v208_v21, %v216_v22  ;;  %p361_p13 = por %p360_p12, %p359_p11 }
  0x41   :  { %164 = vmatprep.subr.bf16.mxu0 %v273_v7 }
  0x42   :  { %p362_p0 = pnand %p361_p13, %p355_p10 }
  0x44   :  { %165 = vmatpush1.bf16.msra.mxu0 %v275_v8 }
  0x45   :  { %166 = vmatprep.subr.bf16.mxu0 %v276_v9 }
  0x48   :  { %167 = vmatpush1.bf16.msra.mxu0 %v278_v10 }
  0x49   :  { %168 = vmatprep.subr.bf16.mxu0 %v279_v11 }
  0x4c   :  { %169 = vmatpush1.bf16.msra.mxu0 %v281_v12 }
  0x4d   :  { %170 = vmatprep.subr.bf16.mxu0 %v282_v13 }
  0x50   :  { %171 = vmatpush1.bf16.msra.mxu0 %v284_v14 }
  0x51   :  { %172 = vmatprep.subr.bf16.mxu0 %v285_v15 }
  0x54   :  { %173 = vmatpush1.bf16.msra.mxu0 %v287_v16 }
  0x57   :  { %191 = vmatmul.mubr.bf16.vlgmr.msra.gmra.mrb[0].mxu0 %v61_v17 }
 0x12a   :  { %v192_v24 = vpop.f32.mrb[0].mxu0 }
 0x12b   :  { %v194_v26 = vpop.f32.mrb[1].mxu0  ;;  %v220_v29 = vadd.f32 %v213_v23, %v192_v24 }
 0x12c   :  { %v196_v27 = vpop.f32.mrb[2].mxu0  ;;  %v221_v30 = vadd.f32 %v217_v25, %v194_v26 }
 0x12d   :  { %v197_v28 = vpop.f32.mrb[3].mxu0  ;;  %222 = vst [vmem:[#allocation8] sm:$0xff] %v220_v29 }
 0x12e   :  { %223 = vst [vmem:[#allocation8 + $0x8] sm:$0xff] %v221_v30 }
 0x12f   :  { %365 = shalt.err (!%p362_p0)
}
 0x130   :  { %s366_s25 = scalar_lea.hbm %s460_s3, 256 }
 0x131   :  { %p367_p1 = scmp.ne.s32.totalorder %s460_s3, %s366_s25  ;;  %p370_p2 = scmp.lt.u32.totalorder %s366_s25, %s460_s3 }
 0x133   :  { %p372_p3 = pnand %p370_p2, %p367_p1 }
 0x135   :  { %375 = shalt.err (!%p372_p3)
}
 0x136   :  { %233 = dma.vmem_to_hbm [thread:$0]  %s231_s21, 256, %s460_s3, [#allocation4]  }
 0x137   :  { %380 = dma.done.wait [#allocation4], 256  }
 0x138   :  { %381 = vsyncadd [#allocation4], 4294967040 }
 0x139   :  { %237 = vsyncpa [#allocation3], 1 }
 0x13a   :  { %238 = vsyncpa [#allocation6], 1 }
 0x13b   :  { %239 = vsyncpa [#allocation4], 1 }

// kernel: e2e_cnn_forward.38
= control target key start
LH: loop header
LB: loop body
LE: loop exit
PB: predicated region body
PF: predicated region fallthrough
CT: control target
= control target key end

     0   :  { %8 = vsyncpa [#allocation3], 0  ;;  %s938_s0 = inlined_call_operand.hbm [shape: bf16[8,256], index: 0, kind: input, shape index: {}]   ;;  %s939_s1 = inlined_call_operand.hbm [shape: bf16[256,512], index: 1, kind: input, shape index: {}]   ;;  %s940_s2 = inlined_call_operand.hbm [shape: f32[1,512], index: 2, kind: input, shape index: {}]   ;;  %s941_s3 = inlined_call_operand.hbm [shape: f32[8,512], index: 3, kind: output, shape index: {}]  }
   0x1   :  { %9 = vsyncpa [#allocation6], 0 }
   0x2   :  { %10 = vsyncpa [#allocation4], 0  ;;  %s864_s12 = smov [#allocation5]   ;;  %s770_s16 = scalar_lea.hbm %s939_s1, 8192 }
   0x3   :  { %s26_s13 = sshll.u32 %s864_s12, 4  ;;  %p771_p0 = scmp.ne.s32.totalorder %s939_s1, %s770_s16  ;;  %s27_s13 = int_to_ptr.vmem [resolvable:$true] %s26_s13 }
   0x4   :  { %p774_p1 = scmp.lt.u32.totalorder %s770_s16, %s939_s1 }
   0x6   :  { %p776_p2 = pnand %p774_p1, %p771_p0 }
   0x8   :  { %779 = shalt.err (!%p776_p2)
}
   0x9   :  { %s780_s21 = scalar_lea.vmem %s27_s13, 8192  ;;  %p785_p4 = scmp.lt.s32.totalorder %s27_s13, %s27_s13 }
   0xa   :  { %p781_p3 = scmp.ne.s32.totalorder %s27_s13, %s780_s21  ;;  %p786_p5 = scmp.lt.s32.totalorder %s780_s21, %s780_s21 }
   0xc   :  { %p787_p6 = por %p786_p5, %p785_p4 }
   0xe   :  { %p788_p7 = pnand %p787_p6, %p781_p3 }
  0x10   :  { %791 = shalt.err (!%p788_p7)
}
  0x11   :  { %s865_s22 = smov 256   ;;  %s866_s23 = smov 16  }
  0x12   :  { %32 = dma.hbm_to_vmem [thread:$0]  %s939_s1, 8192, %s27_s13, [#allocation6], %s865_s22, %s865_s22, %s866_s23  }
  0x13   :  { %s867_s26 = smov [#allocation2]   ;;  %s868_s28 = smov [#allocation7]  }
  0x14   :  { %s17_s27 = sshll.u32 %s867_s26, 4  ;;  %s39_s29 = sshll.u32 %s868_s28, 4  ;;  %s18_s27 = int_to_ptr.vmem [resolvable:$true] %s17_s27  ;;  %s40_s29 = int_to_ptr.vmem [resolvable:$true] %s39_s29 }
  0x15   :  { %s792_s5 = scalar_lea.hbm %s938_s0, 128 }
  0x16   :  { %p793_p8 = scmp.ne.s32.totalorder %s938_s0, %s792_s5  ;;  %p796_p9 = scmp.lt.u32.totalorder %s792_s5, %s938_s0 }
  0x18   :  { %p798_p10 = pnand %p796_p9, %p793_p8 }
  0x1a   :  { %801 = shalt.err (!%p798_p10)
}
  0x1b   :  { %s802_s1 = scalar_lea.vmem %s18_s27, 128  ;;  %p807_p12 = scmp.lt.s32.totalorder %s18_s27, %s18_s27 }
  0x1c   :  { %p803_p11 = scmp.ne.s32.totalorder %s18_s27, %s802_s1  ;;  %p808_p13 = scmp.lt.s32.totalorder %s802_s1, %s802_s1 }
  0x1e   :  { %p809_p0 = por %p808_p13, %p807_p12 }
  0x20   :  { %p810_p1 = pnand %p809_p0, %p803_p11 }
  0x22   :  { %813 = shalt.err (!%p810_p1)
}
  0x23   :  { %20 = dma.hbm_to_vmem [thread:$0]  %s938_s0, 128, %s18_s27, [#allocation3]  }
  0x24   :  { %s814_s14 = scalar_lea.hbm %s940_s2, 64 }
  0x25   :  { %p815_p2 = scmp.ne.s32.totalorder %s940_s2, %s814_s14  ;;  %p818_p3 = scmp.lt.u32.totalorder %s814_s14, %s940_s2 }
  0x27   :  { %p820_p4 = pnand %p818_p3, %p815_p2 }
  0x29   :  { %823 = shalt.err (!%p820_p4)
}
  0x2a   :  { %s824_s19 = scalar_lea.vmem %s40_s29, 64  ;;  %p829_p6 = scmp.lt.s32.totalorder %s40_s29, %s40_s29 }
  0x2b   :  { %p825_p5 = scmp.ne.s32.totalorder %s40_s29, %s824_s19  ;;  %p830_p7 = scmp.lt.s32.totalorder %s824_s19, %s824_s19 }
  0x2d   :  { %p831_p8 = por %p830_p7, %p829_p6 }
  0x2f   :  { %p832_p9 = pnand %p831_p8, %p825_p5 }
  0x31   :  { %835 = shalt.err (!%p832_p9)
}
  0x32   :  { %42 = dma.hbm_to_vmem [thread:$0]  %s940_s2, 64, %s40_s29, [#allocation6]  }
  0x33   :  { %858 = dma.done.wait [#allocation3], 128  }
  0x34   :  { %859 = vsyncadd [#allocation3], 4294967168 }
  0x35   :  { %860 = dma.done.wait [#allocation6], 8256  }
  0x36   :  { %861 = vsyncadd [#allocation6], 4294959040  ;;  %v672_v0 = vld [vmem:[#allocation5 + $0x4] ss:$16 sps:$4 sm:$0xff]   ;;  %v674_v1 = vld [vmem:[#allocation5 + $0xc] ss:$16 sps:$4 sm:$0xff]  }
  0x37   :  { %456 = vmatprep.subr.bf16.mxu0 %v672_v0  ;;  %v676_v2 = vld [vmem:[#allocation5] ss:$16 sps:$4 sm:$0xff]   ;;  %v677_v3 = vld [vmem:[#allocation5 + $0x8] ss:$16 sps:$4 sm:$0xff]   ;;  %497 = vmatprep.subr.bf16.mxu1 %v674_v1  ;;  %v678_v4 = vld [vmem:[#allocation5 + $0x24] ss:$16 sps:$4 sm:$0xff]  }
  0x38   :  { %457 = vmatpush1.bf16.msra.mxu0 %v676_v2  ;;  %498 = vmatpush1.bf16.msra.mxu1 %v677_v3  ;;  %v680_v5 = vld [vmem:[#allocation5 + $0x2c] ss:$16 sps:$4 sm:$0xff]   ;;  %v682_v6 = vld [vmem:[#allocation5 + $0x20] ss:$16 sps:$4 sm:$0xff]   ;;  %v683_v7 = vld [vmem:[#allocation5 + $0x28] ss:$16 sps:$4 sm:$0xff]   ;;  %v555_v3 = vlaneseq }
  0x39   :  { %458 = vmatprep.subr.bf16.mxu0 %v678_v4  ;;  %499 = vmatprep.subr.bf16.mxu1 %v680_v5  ;;  %v684_v8 = vld [vmem:[#allocation5 + $0x44] ss:$16 sps:$4 sm:$0xff]   ;;  %v686_v9 = vld [vmem:[#allocation5 + $0x4c] ss:$16 sps:$4 sm:$0xff]   ;;  %v688_v10 = vld [vmem:[#allocation5 + $0x40] ss:$16 sps:$4 sm:$0xff]  }
  0x3a   :  { %v689_v11 = vld [vmem:[#allocation5 + $0x48] ss:$16 sps:$4 sm:$0xff]   ;;  %v690_v12 = vld [vmem:[#allocation5 + $0x64] ss:$16 sps:$4 sm:$0xff]   ;;  %v692_v13 = vld [vmem:[#allocation5 + $0x6c] ss:$16 sps:$4 sm:$0xff]  }
  0x3b   :  { %v694_v14 = vld [vmem:[#allocation5 + $0x60] ss:$16 sps:$4 sm:$0xff]   ;;  %v695_v15 = vld [vmem:[#allocation5 + $0x68] ss:$16 sps:$4 sm:$0xff]   ;;  %v696_v16 = vld [vmem:[#allocation5 + $0x84] ss:$16 sps:$4 sm:$0xff]  }
  0x3c   :  { %459 = vmatpush1.bf16.msra.mxu0 %v682_v6  ;;  %500 = vmatpush1.bf16.msra.mxu1 %v683_v7  ;;  %v698_v17 = vld [vmem:[#allocation5 + $0x8c] ss:$16 sps:$4 sm:$0xff]   ;;  %v700_v18 = vld [vmem:[#allocation5 + $0x80] ss:$16 sps:$4 sm:$0xff]   ;;  %v701_v19 = vld [vmem:[#allocation5 + $0x88] ss:$16 sps:$4 sm:$0xff]  }
  0x3d   :  { %460 = vmatprep.subr.bf16.mxu0 %v684_v8  ;;  %501 = vmatprep.subr.bf16.mxu1 %v686_v9  ;;  %v702_v20 = vld [vmem:[#allocation5 + $0xa4] ss:$16 sps:$4 sm:$0xff]   ;;  %v704_v21 = vld [vmem:[#allocation5 + $0xac] ss:$16 sps:$4 sm:$0xff]   ;;  %v706_v22 = vld [vmem:[#allocation5 + $0xa0] ss:$16 sps:$4 sm:$0xff]  }
  0x3e   :  { %v707_v23 = vld [vmem:[#allocation5 + $0xa8] ss:$16 sps:$4 sm:$0xff]   ;;  %v708_v24 = vld [vmem:[#allocation5 + $0xc4] ss:$16 sps:$4 sm:$0xff]   ;;  %v710_v25 = vld [vmem:[#allocation5 + $0xcc] ss:$16 sps:$4 sm:$0xff]  }
  0x3f   :  { %v712_v26 = vld [vmem:[#allocation5 + $0xc0] ss:$16 sps:$4 sm:$0xff]   ;;  %v713_v27 = vld [vmem:[#allocation5 + $0xc8] ss:$16 sps:$4 sm:$0xff]   ;;  %v714_v28 = vld [vmem:[#allocation5 + $0xe4] ss:$16 sps:$4 sm:$0xff]  }
  0x40   :  { %461 = vmatpush1.bf16.msra.mxu0 %v688_v10  ;;  %502 = vmatpush1.bf16.msra.mxu1 %v689_v11  ;;  %v716_v29 = vld [vmem:[#allocation5 + $0xec] ss:$16 sps:$4 sm:$0xff]   ;;  %v718_v30 = vld [vmem:[#allocation5 + $0xe0] ss:$16 sps:$4 sm:$0xff]   ;;  %v719_v31 = vld [vmem:[#allocation5 + $0xe8] ss:$16 sps:$4 sm:$0xff]  }
  0x41   :  { %462 = vmatprep.subr.bf16.mxu0 %v690_v12  ;;  %503 = vmatprep.subr.bf16.mxu1 %v692_v13  ;;  %v720_v32 = vld [vmem:[#allocation5 + $0x104] ss:$16 sps:$4 sm:$0xff]   ;;  %v722_v33 = vld [vmem:[#allocation5 + $0x10c] ss:$16 sps:$4 sm:$0xff]   ;;  %v724_v34 = vld [vmem:[#allocation5 + $0x100] ss:$16 sps:$4 sm:$0xff]  }
  0x42   :  { %v725_v35 = vld [vmem:[#allocation5 + $0x108] ss:$16 sps:$4 sm:$0xff]   ;;  %v726_v36 = vld [vmem:[#allocation5 + $0x124] ss:$16 sps:$4 sm:$0xff]   ;;  %v728_v37 = vld [vmem:[#allocation5 + $0x12c] ss:$16 sps:$4 sm:$0xff]  }
  0x43   :  { %v730_v38 = vld [vmem:[#allocation5 + $0x120] ss:$16 sps:$4 sm:$0xff]   ;;  %v731_v39 = vld [vmem:[#allocation5 + $0x128] ss:$16 sps:$4 sm:$0xff]   ;;  %v732_v40 = vld [vmem:[#allocation5 + $0x144] ss:$16 sps:$4 sm:$0xff]  }
  0x44   :  { %463 = vmatpush1.bf16.msra.mxu0 %v694_v14  ;;  %504 = vmatpush1.bf16.msra.mxu1 %v695_v15  ;;  %v734_v41 = vld [vmem:[#allocation5 + $0x14c] ss:$16 sps:$4 sm:$0xff]   ;;  %v736_v42 = vld [vmem:[#allocation5 + $0x140] ss:$16 sps:$4 sm:$0xff]   ;;  %v737_v43 = vld [vmem:[#allocation5 + $0x148] ss:$16 sps:$4 sm:$0xff]  }
  0x45   :  { %464 = vmatprep.subr.bf16.mxu0 %v696_v16  ;;  %505 = vmatprep.subr.bf16.mxu1 %v698_v17  ;;  %v738_v44 = vld [vmem:[#allocation5 + $0x164] ss:$16 sps:$4 sm:$0xff]   ;;  %v740_v45 = vld [vmem:[#allocation5 + $0x16c] ss:$16 sps:$4 sm:$0xff]   ;;  %v742_v48 = vld [vmem:[#allocation5 + $0x160] ss:$16 sps:$4 sm:$0xff]  }
  0x46   :  { %v64_v46 = vld [vmem:[#allocation2] sm:$0xff]  ;;  %v744_v50 = vld [vmem:[#allocation5 + $0x184] ss:$16 sps:$4 sm:$0xff]   ;;  %v748_v52 = vld [vmem:[#allocation5 + $0x180] ss:$16 sps:$4 sm:$0xff]   ;;  %v556_v4 = vshrl.u32 %v555_v3, 7 }
  0x47   :  { %v600_v47 = vcombine.high %v64_v46, %v64_v46  ;;  %v743_v49 = vld [vmem:[#allocation5 + $0x168] ss:$16 sps:$4 sm:$0xff]   ;;  %v746_v51 = vld [vmem:[#allocation5 + $0x18c] ss:$16 sps:$4 sm:$0xff]   ;;  %v750_v54 = vld [vmem:[#allocation5 + $0x1a4] ss:$16 sps:$4 sm:$0xff]   ;;  %v599_v2 = vcombine.low %v64_v46, %v64_v46 }
  0x48   :  { %465 = vmatpush1.bf16.msra.mxu0 %v700_v18  ;;  %506 = vmatpush1.bf16.msra.mxu1 %v701_v19  ;;  %v749_v53 = vld [vmem:[#allocation5 + $0x188] ss:$16 sps:$4 sm:$0xff]   ;;  %v752_v55 = vld [vmem:[#allocation5 + $0x1ac] ss:$16 sps:$4 sm:$0xff]   ;;  %v754_v56 = vld [vmem:[#allocation5 + $0x1a0] ss:$16 sps:$4 sm:$0xff]  }
  0x49   :  { %466 = vmatprep.subr.bf16.mxu0 %v702_v20  ;;  %507 = vmatprep.subr.bf16.mxu1 %v704_v21  ;;  %v755_v57 = vld [vmem:[#allocation5 + $0x1a8] ss:$16 sps:$4 sm:$0xff]   ;;  %v756_v58 = vld [vmem:[#allocation5 + $0x1c4] ss:$16 sps:$4 sm:$0xff]   ;;  %v758_v59 = vld [vmem:[#allocation5 + $0x1cc] ss:$16 sps:$4 sm:$0xff]  }
  0x4a   :  { %488 = vmatprep.mubr.bf16.mxu0 %v600_v47  ;;  %529 = vmatprep.mubr.bf16.mxu1 %v600_v47  ;;  %v760_v60 = vld [vmem:[#allocation5 + $0x1c0] ss:$16 sps:$4 sm:$0xff]   ;;  %v761_v61 = vld [vmem:[#allocation5 + $0x1c8] ss:$16 sps:$4 sm:$0xff]   ;;  %v762_v62 = vld [vmem:[#allocation5 + $0x1e4] ss:$16 sps:$4 sm:$0xff]  }
  0x4b   :  { %v764_v63 = vld [vmem:[#allocation5 + $0x1ec] ss:$16 sps:$4 sm:$0xff]   ;;  %v766_v0 = vld [vmem:[#allocation5 + $0x1e0] ss:$16 sps:$4 sm:$0xff]   ;;  %v767_v1 = vld [vmem:[#allocation5 + $0x1e8] ss:$16 sps:$4 sm:$0xff]  }
  0x4c   :  { %467 = vmatpush1.bf16.msra.mxu0 %v706_v22  ;;  %508 = vmatpush1.bf16.msra.mxu1 %v707_v23  ;;  %v557_v5 = vsub.s32 0, %v556_v4  ;;  %v565_v6 = vsub.s32 2, %v556_v4  ;;  %v553_v7 = vld [vmem:[#allocation7] sm:$0xf]  ;;  %v561_v8 = vsub.s32 1, %v556_v4  ;;  %v569_v9 = vsub.s32 3, %v556_v4 }
  0x4d   :  { %468 = vmatprep.subr.bf16.mxu0 %v708_v24  ;;  %509 = vmatprep.subr.bf16.mxu1 %v710_v25  ;;  %s869_s2 = smov [#allocation8]  }
  0x4e   :  { %v558_v10 = vrot.slane %v553_v7, %v557_v5  ;;  %v566_v11 = vrot.slane %v553_v7, %v565_v6  ;;  %v562_v14 = vrot.slane %v553_v7, %v561_v8  ;;  %v570_v15 = vrot.slane %v553_v7, %v569_v9  ;;  %s589_s21 = sshll.u32 %s869_s2, 4  ;;  %s590_s21 = int_to_ptr.vmem [resolvable:$true] %s589_s21 }
  0x4f   :  { %s836_s22 = scalar_lea.vmem %s590_s21, 512  ;;  %p841_p11 = scmp.lt.s32.totalorder %s590_s21, %s590_s21 }
  0x50   :  { %469 = vmatpush1.bf16.msra.mxu0 %v712_v26  ;;  %510 = vmatpush1.bf16.msra.mxu1 %v713_v27  ;;  %p837_p10 = scmp.ne.s32.totalorder %s590_s21, %s836_s22  ;;  %p842_p12 = scmp.lt.s32.totalorder %s836_s22, %s836_s22 }
  0x51   :  { %470 = vmatprep.subr.bf16.mxu0 %v714_v28  ;;  %511 = vmatprep.subr.bf16.mxu1 %v716_v29 }
  0x52   :  { %p843_p13 = por %p842_p12, %p841_p11 }
  0x54   :  { %471 = vmatpush1.bf16.msra.mxu0 %v718_v30  ;;  %512 = vmatpush1.bf16.msra.mxu1 %v719_v31  ;;  %p844_p0 = pnand %p843_p13, %p837_p10 }
  0x55   :  { %472 = vmatprep.subr.bf16.mxu0 %v720_v32  ;;  %513 = vmatprep.subr.bf16.mxu1 %v722_v33 }
  0x58   :  { %473 = vmatpush1.bf16.msra.mxu0 %v724_v34  ;;  %514 = vmatpush1.bf16.msra.mxu1 %v725_v35 }
  0x59   :  { %474 = vmatprep.subr.bf16.mxu0 %v726_v36  ;;  %515 = vmatprep.subr.bf16.mxu1 %v728_v37 }
  0x5c   :  { %475 = vmatpush1.bf16.msra.mxu0 %v730_v38  ;;  %516 = vmatpush1.bf16.msra.mxu1 %v731_v39 }
  0x5d   :  { %476 = vmatprep.subr.bf16.mxu0 %v732_v40  ;;  %517 = vmatprep.subr.bf16.mxu1 %v734_v41 }
  0x60   :  { %477 = vmatpush1.bf16.msra.mxu0 %v736_v42  ;;  %518 = vmatpush1.bf16.msra.mxu1 %v737_v43 }
  0x61   :  { %478 = vmatprep.subr.bf16.mxu0 %v738_v44  ;;  %519 = vmatprep.subr.bf16.mxu1 %v740_v45 }
  0x64   :  { %479 = vmatpush1.bf16.msra.mxu0 %v742_v48  ;;  %520 = vmatpush1.bf16.msra.mxu1 %v743_v49 }
  0x65   :  { %480 = vmatprep.subr.bf16.mxu0 %v744_v50  ;;  %521 = vmatprep.subr.bf16.mxu1 %v746_v51 }
  0x68   :  { %481 = vmatpush1.bf16.msra.mxu0 %v748_v52  ;;  %522 = vmatpush1.bf16.msra.mxu1 %v749_v53 }
  0x69   :  { %482 = vmatprep.subr.bf16.mxu0 %v750_v54  ;;  %523 = vmatprep.subr.bf16.mxu1 %v752_v55 }
  0x6c   :  { %483 = vmatpush1.bf16.msra.mxu0 %v754_v56  ;;  %524 = vmatpush1.bf16.msra.mxu1 %v755_v57 }
  0x6d   :  { %484 = vmatprep.subr.bf16.mxu0 %v756_v58  ;;  %525 = vmatprep.subr.bf16.mxu1 %v758_v59 }
  0x70   :  { %485 = vmatpush1.bf16.msra.mxu0 %v760_v60  ;;  %526 = vmatpush1.bf16.msra.mxu1 %v761_v61 }
  0x71   :  { %486 = vmatprep.subr.bf16.mxu0 %v762_v62  ;;  %527 = vmatprep.subr.bf16.mxu1 %v764_v63 }
  0x74   :  { %487 = vmatpush1.bf16.msra.mxu0 %v766_v0  ;;  %528 = vmatpush1.bf16.msra.mxu1 %v767_v1 }
  0x77   :  { %489 = vmatmul.mubr.bf16.vlgmr.msra.gmra.mrb[0].mxu0 %v599_v2  ;;  %530 = vmatmul.mubr.bf16.vlgmr.msra.gmra.mrb[0].mxu1 %v599_v2 }
 0x14a   :  { %v490_v12 = vpop.f32.mrb[0].mxu0  ;;  %v531_v13 = vpop.f32.mrb[0].mxu1 }
 0x14b   :  { %v492_v16 = vpop.f32.mrb[1].mxu0  ;;  %v533_v17 = vpop.f32.mrb[1].mxu1  ;;  %v575_v22 = vadd.f32 %v558_v10, %v490_v12  ;;  %v577_v23 = vadd.f32 %v566_v11, %v531_v13 }
 0x14c   :  { %v494_v18 = vpop.f32.mrb[2].mxu0  ;;  %v535_v19 = vpop.f32.mrb[2].mxu1  ;;  %v576_v24 = vadd.f32 %v562_v14, %v492_v16  ;;  %v578_v25 = vadd.f32 %v570_v15, %v533_v17 }
 0x14d   :  { %v495_v20 = vpop.f32.mrb[3].mxu0  ;;  %v536_v21 = vpop.f32.mrb[3].mxu1  ;;  %579 = vst [vmem:[#allocation8] sm:$0xff] %v575_v22  ;;  %581 = vst [vmem:[#allocation8 + $0x10] sm:$0xff] %v577_v23 }
 0x14e   :  { %580 = vst [vmem:[#allocation8 + $0x8] sm:$0xff] %v576_v24  ;;  %582 = vst [vmem:[#allocation8 + $0x18] sm:$0xff] %v578_v25 }
 0x14f   :  { %847 = shalt.err (!%p844_p0)
}
 0x150   :  { %s848_s25 = scalar_lea.hbm %s941_s3, 512 }
 0x151   :  { %p849_p1 = scmp.ne.s32.totalorder %s941_s3, %s848_s25  ;;  %p852_p2 = scmp.lt.u32.totalorder %s848_s25, %s941_s3 }
 0x153   :  { %p854_p3 = pnand %p852_p2, %p849_p1 }
 0x155   :  { %857 = shalt.err (!%p854_p3)
}
 0x156   :  { %592 = dma.vmem_to_hbm [thread:$0]  %s590_s21, 512, %s941_s3, [#allocation4]  }
 0x157   :  { %862 = dma.done.wait [#allocation4], 512  }
 0x158   :  { %863 = vsyncadd [#allocation4], 4294966784 }
 0x159   :  { %596 = vsyncpa [#allocation3], 1 }
 0x15a   :  { %597 = vsyncpa [#allocation6], 1 }
 0x15b   :  { %598 = vsyncpa [#allocation4], 1 }

// kernel: e2e_cnn_forward.39
= control target key start
LH: loop header
LB: loop body
LE: loop exit
PB: predicated region body
PF: predicated region fallthrough
CT: control target
= control target key end

     0   :  { %8 = vsyncpa [#allocation3], 0  ;;  %s1713_s0 = inlined_call_operand.hbm [shape: bf16[8,2304], index: 0, kind: input, shape index: {}]   ;;  %s1714_s1 = inlined_call_operand.hbm [shape: bf16[2304,512], index: 1, kind: input, shape index: {}]   ;;  %s1715_s2 = inlined_call_operand.hbm [shape: f32[1,512], index: 2, kind: input, shape index: {}]   ;;  %s1716_s3 = inlined_call_operand.hbm [shape: f32[8,512], index: 3, kind: output, shape index: {}]  }
   0x1   :  { %10 = vsyncpa [#allocation3 + $0x1], 0 }
   0x2   :  { %11 = vsyncpa [#allocation6], 0 }
   0x3   :  { %13 = vsyncpa [#allocation6 + $0x1], 0 }
   0x4   :  { %14 = vsyncpa [#allocation4], 0  ;;  %s1404_s12 = smov 0   ;;  %s1406_s13 = smov 0  }
   0x5   :  { %s1408_s14 = smov 0   ;;  %s1410_s15 = smov 0  }
   0x6   :  { %s1412_s16 = smov 0   ;;  %s1414_s17 = smov 0  }
   0x7 LB: > { %s1433_s18 = sadd.s32 4294967295, %s1375_s17   ;;  %s48_s19 = sadd.s32 1, %s1363_s14  ;;  %s1375_s17 = sphi %s1414_s17, %s20_s17   ;;  %s1371_s16 = sphi %s1412_s16, %s1737_s16   ;;  %s1367_s15 = sphi %s1410_s15, %s1736_s15   ;;  %s1363_s14 = sphi %s1408_s14, %s1735_s14   ;;  %s1359_s13 = sphi %s1406_s13, %s1734_s13   ;;  %s1355_s12 = sphi %s1404_s12, %s1733_s12  }
   0x8   : > { %p55_p0 = scmp.ne.s32.totalorder %s1363_s14, %s1359_s13  ;;  %p61_p1 = scmp.ne.s32.totalorder %s1359_s13, %s1355_s12 }
   0x9   : > { %p1717_p2 = scmp.eq.s32.totalorder %s1433_s18, 0  ;;  %p931_p3 = scmp.ge.s32.totalorder %s1375_s17, 1 }
   0xa   : > { %p154_p4 = scmp.lt.s32.totalorder %s1375_s17, 10  ;;  %s1377_s22 = smov [#allocation7]  }
   0xb   : > { %p1444_p5 = por %p1717_p2, %p61_p1  ;;  %s170_s23 = sshll.u32 %s1377_s22, 4  ;;  %s171_s23 = int_to_ptr.vmem [resolvable:$true] %s170_s23 }
   0xc   : > { %p1448_p6 = pnand %p931_p3, %p154_p4  ;;  %p56_p8 = scmp.eq.s32.totalorder %s1375_s17, 0 }
   0xd   : > { %s1720_s20 = scalar_select %p1444_p5, 1, 0 }
   0xe   : > { %s1721_s21 = scalar_select %p1448_p6, 1, 0 }
   0xf   : > { %p1032_p7 = pneg %p1448_p6  ;;  %s32_s25 = sadd.s32 1, %s1371_s16 }
  0x10   : > { %p1462_p10 = scmp.ge.s32.totalorder %s32_s25, 9  ;;  %p1469_p11 = por %p56_p8, %p55_p0 }
  0x11   : > { %p1457_p9 = pnand %p1032_p7, %p1717_p2  ;;  %s1199_s30 = scalar_lea.hbm %s1715_s2, 64 }
  0x12   : > { %s1723_s26 = scalar_select %p1462_p10, 1, 0 }
  0x13   : > { %s1724_s27 = scalar_select %p1469_p11, 1, 0 }
  0x14   : > { %p1200_p13 = scmp.ne.s32.totalorder %s1715_s2, %s1199_s30  ;;  %p1201_p1 = pneg %p1457_p9 }
  0x15   : > { %p1206_p0 = scmp.lt.u32.totalorder %s1199_s30, %s1715_s2 }
  0x16   : > { %p1202_p3 = pnand %p1201_p1, %p1200_p13 }
  0x18   : > { %p1203_p4 = pneg %p1202_p3 }
  0x1a   : > { %p1208_p7 = pnand %p1206_p0, %p1203_p4 }
  0x1c   : > { %1211 = shalt.err (!%p1208_p7)
}
  0x1d   : > { %s1212_s8 = scalar_lea.vmem %s171_s23, 64  ;;  %p1220_p5 = scmp.lt.s32.totalorder %s171_s23, %s171_s23 }
  0x1e   : > { %p1213_p8 = scmp.ne.s32.totalorder %s171_s23, %s1212_s8  ;;  %p1221_p6 = scmp.lt.s32.totalorder %s1212_s8, %s1212_s8 }
  0x20   : > { %p1215_p2 = pnand %p1213_p8, %p1201_p1  ;;  %p1222_p11 = por %p1221_p6, %p1220_p5 }
  0x22   : > { %p1216_p12 = pneg %p1215_p2 }
  0x24   : > { %p1223_p10 = pnand %p1222_p11, %p1216_p12 }
  0x26   : > { %1226 = shalt.err (!%p1223_p10)
}
  0x27   : > { %1035 = dma.hbm_to_vmem [thread:$0]  (!%p1457_p9), %s1715_s2, 64, %s171_s23, [#allocation6]  }
  0x28   : > { %p1725_p2 = scmp.ne.s32.totalorder %s1723_s26, 0  ;;  %s1495_s11 = sand.u32 1, %s1363_s14  }
  0x29   : > { %s1017_s12 = sshll.u32 %s1371_s16, 7  ;;  %s934_s24 = sshll.u32 %s1495_s11, 3 }
  0x2a   : > { %s1739_s25 = smov (%p1725_p2, %s32_s25), 0  ;;  %s1504_s30 = scalar_lea.hbm %s1713_s0, %s1017_s12 }
  0x2b   : > { %s44_s22 = ssub.s32 %s1371_s16, %s1739_s25  ;;  %s185_s26 = scalar_lea.vmem [#allocation2], %s934_s24 }
  0x2c   : > { %p46_p5 = scmp.eq.s32.totalorder %s44_s22, 0  ;;  %s195_s4 = sshll.u32 %s185_s26, 4  ;;  %s1519_s4 = int_to_ptr.vmem [resolvable:$true] %s195_s4 }
  0x2d   : > { %p1726_p6 = scmp.ne.s32.totalorder %s1724_s27, 0  ;;  %p1727_p9 = scmp.lt.s32.totalorder %s1375_s17, 9 }
  0x2e   : > { %s1509_s23 = scalar_select %p46_p5, %s1363_s14, %s48_s19  }
  0x2f   : > { %p1515_p10 = pnand %p1727_p9, %p1726_p6  ;;  %s937_s6 = sshll.u32 %s1495_s11, 9 }
  0x30   : > { %s182_s7 = scalar_lea.sflag [#allocation3], %s1495_s11  ;;  %s1227_s8 = scalar_lea.hbm %s1504_s30, 128 }
  0x31   : > { %p1228_p11 = scmp.ne.s32.totalorder %s1504_s30, %s1227_s8  ;;  %p1229_p12 = pneg %p1515_p10 }
  0x32   : > { %s1232_s9 = scalar_lea.hbm %s1713_s0, 1152  ;;  %p1233_p3 = scmp.lt.u32.totalorder %s1504_s30, %s1713_s0 }
  0x33   : > { %p1230_p13 = pnand %p1229_p12, %p1228_p11  ;;  %p1234_p4 = scmp.lt.u32.totalorder %s1232_s9, %s1227_s8 }
  0x34   : > { %p1236_p7 = scmp.lt.u32.totalorder %s1227_s8, %s1504_s30 }
  0x35   : > { %p1231_p1 = pneg %p1230_p13  ;;  %p1235_p0 = por %p1234_p4, %p1233_p3 }
  0x37   : > { %p1237_p8 = por %p1236_p7, %p1235_p0 }
  0x39   : > { %p1238_p2 = pnand %p1237_p8, %p1231_p1 }
  0x3b   : > { %1241 = shalt.err (!%p1238_p2)
}
  0x3c   : > { %s1242_s22 = scalar_lea.vmem %s1519_s4, 128  ;;  %s1378_s24 = smov [#allocation2]  }
  0x3d   : > { %p1243_p5 = scmp.ne.s32.totalorder %s1519_s4, %s1242_s22  ;;  %s1247_s28 = sshll.u32 %s1378_s24, 4  ;;  %s1248_s28 = int_to_ptr.vmem [resolvable:$false] %s1247_s28 }
  0x3e   : > { %s1249_s29 = scalar_lea.vmem %s1248_s28, 256  ;;  %p1250_p11 = scmp.lt.s32.totalorder %s1519_s4, %s1248_s28 }
  0x3f   : > { %p1245_p6 = pnand %p1243_p5, %p1229_p12  ;;  %p1251_p13 = scmp.lt.s32.totalorder %s1249_s29, %s1242_s22 }
  0x41   : > { %p1246_p9 = pneg %p1245_p6  ;;  %p1252_p3 = por %p1251_p13, %p1250_p11 }
  0x43   : > { %p1253_p4 = pnand %p1252_p3, %p1246_p9 }
  0x45   : > { %1256 = shalt.err (!%p1253_p4)
}
  0x46   : > { %1039 = dma.hbm_to_vmem [thread:$0]  (!%p1515_p10), %s1504_s30, 128, %s1519_s4, %s182_s7  }
  0x47   : > { %s1019_s26 = sshll.u32 %s1371_s16, 13  ;;  %s206_s8 = scalar_lea.vmem [#allocation5], %s937_s6 }
  0x48   : > { %s216_s19 = sshll.u32 %s206_s8, 4  ;;  %s202_s27 = sand.u32 1, %s1375_s17   ;;  %s1551_s19 = int_to_ptr.vmem [resolvable:$true] %s216_s19 }
  0x49   : > { %s1557_s12 = scalar_lea.hbm %s1714_s1, %s1019_s26  ;;  %s1559_s22 = scalar_lea.sflag [#allocation6], %s202_s27 }
  0x4a   : > { %s1257_s24 = scalar_lea.hbm %s1557_s12, 8192  ;;  %s1262_s4 = scalar_lea.hbm %s1714_s1, 73728 }
  0x4b   : > { %p1258_p1 = scmp.ne.s32.totalorder %s1557_s12, %s1257_s24  ;;  %p1263_p8 = scmp.lt.u32.totalorder %s1557_s12, %s1714_s1 }
  0x4c   : > { %p1264_p2 = scmp.lt.u32.totalorder %s1262_s4, %s1257_s24  ;;  %p1266_p6 = scmp.lt.u32.totalorder %s1257_s24, %s1557_s12 }
  0x4d   : > { %p1260_p0 = pnand %p1258_p1, %p1229_p12 }
  0x4e   : > { %p1265_p5 = por %p1264_p2, %p1263_p8 }
  0x4f   : > { %p1261_p7 = pneg %p1260_p0 }
  0x50   : > { %p1267_p9 = por %p1266_p6, %p1265_p5 }
  0x52   : > { %p1268_p11 = pnand %p1267_p9, %p1261_p7 }
  0x54   : > { %1271 = shalt.err (!%p1268_p11)
}
  0x55   : > { %s1272_s28 = scalar_lea.vmem %s1551_s19, 8192  ;;  %s1379_s29 = smov [#allocation5]  }
  0x56   : > { %p1273_p13 = scmp.ne.s32.totalorder %s1551_s19, %s1272_s28  ;;  %s1277_s26 = sshll.u32 %s1379_s29, 4  ;;  %s1278_s26 = int_to_ptr.vmem [resolvable:$false] %s1277_s26 }
  0x57   : > { %s1279_s8 = scalar_lea.vmem %s1278_s26, 16384  ;;  %p1280_p1 = scmp.lt.s32.totalorder %s1551_s19, %s1278_s26 }
  0x58   : > { %p1275_p3 = pnand %p1273_p13, %p1229_p12  ;;  %p1281_p0 = scmp.lt.s32.totalorder %s1279_s8, %s1272_s28 }
  0x5a   : > { %p1276_p4 = pneg %p1275_p3  ;;  %p1282_p8 = por %p1281_p0, %p1280_p1 }
  0x5c   : > { %p1283_p2 = pnand %p1282_p8, %p1276_p4 }
  0x5e   : > { %1286 = shalt.err (!%p1283_p2)
}
  0x5f   : > { %s1380_s27 = smov 256   ;;  %s1381_s9 = smov 16  }
  0x60   : > { %1042 = dma.hbm_to_vmem [thread:$0]  (!%p1515_p10), %s1557_s12, 8192, %s1551_s19, %s1559_s22, %s1380_s27, %s1380_s27, %s1381_s9  }
  0x61   : > { %p1729_p12 = scmp.ne.s32.totalorder %s1721_s21, 0 }
  0x62   : > { %s230_s10 = sand.u32 (!%p1729_p12), 1, %s1359_s13   ;;  %p1730_p7 = scmp.ne.s32.totalorder (!%p1729_p12), %s1720_s20, 0 }
  0x63   : > { %228 = sbr.rel (%p1729_p12) target bundleno = 440 (0x1b8), region = 32  ;;  %s942_s24 = sshll.u32 (!%p1729_p12), %s230_s10, 3 }
  0x64   : > { %s231_s11 = scalar_lea.sflag (!%p1729_p12), [#allocation3], %s230_s10  ;;  %s1588_s30 = scalar_lea.vmem (!%p1729_p12), [#allocation2], %s942_s24 }
  0x6a   : > { %1338 = dma.done.wait (%p1730_p7), %s231_s11, 128  }
  0x6b   : > { %1340 = vsyncadd (%p1730_p7), %s231_s11, 4294967168  ;;  %s239_s4 = sand.u32 1, %s1433_s18   ;;  %s943_s5 = sshll.u32 %s230_s10, 9 }
  0x6c   : > { %s240_s19 = scalar_lea.sflag [#allocation6], %s239_s4  ;;  %s1595_s12 = scalar_lea.vmem [#allocation5], %s943_s5 }
  0x6d   : > { %1342 = dma.done.wait (%p1730_p7), %s240_s19, 8192  }
  0x6e   : > { %1344 = vsyncadd (%p1730_p7), %s240_s19, 4294959104  ;;  %p1731_p10 = scmp.eq.s32.totalorder %s1433_s18, 0 }
  0x70   : > { %1346 = dma.done.wait (%p1731_p10), [#allocation6], 64   ;;  %p1732_p5 = pmov %p1731_p10 }
  0x71   : > { %p945_p6 = scmp.ne.s32.totalorder %s1367_s15, 0 }
  0x72   : > { %1348 = vsyncadd (%p1732_p5), [#allocation6], 4294967232  ;;  %v1382_v0 = vmov (!%p945_p6), 0.0  }
  0x73   : > { %278 = sbr.rel (%p945_p6) target bundleno = 122 (0x7a), region = 48  ;;  %279 = vst [vmem:[#allocation8] sm:$0xff] (!%p945_p6), %v1382_v0  ;;  %280 = vst [vmem:[#allocation8 + $0x8] sm:$0xff] (!%p945_p6), %v1382_v0 }
  0x74   : > { %281 = vst [vmem:[#allocation8 + $0x10] sm:$0xff] (!%p945_p6), %v1382_v0  ;;  %282 = vst [vmem:[#allocation8 + $0x18] sm:$0xff] (!%p945_p6), %v1382_v0 }
  0x7a PF: > { %v1101_v1 = vld [vmem:[%s1595_s12 + $0x4] ss:$16 sps:$4 sm:$0xff]   ;;  %v1103_v2 = vld [vmem:[%s1595_s12 + $0xc] ss:$16 sps:$4 sm:$0xff]   ;;  %v1105_v3 = vld [vmem:[%s1595_s12] ss:$16 sps:$4 sm:$0xff]  }
  0x7b   : > { %679 = vmatprep.subr.bf16.mxu0 %v1101_v1  ;;  %v1106_v4 = vld [vmem:[%s1595_s12 + $0x8] ss:$16 sps:$4 sm:$0xff]   ;;  %720 = vmatprep.subr.bf16.mxu1 %v1103_v2  ;;  %v1107_v5 = vld [vmem:[%s1595_s12 + $0x24] ss:$16 sps:$4 sm:$0xff]   ;;  %v1109_v6 = vld [vmem:[%s1595_s12 + $0x2c] ss:$16 sps:$4 sm:$0xff]  }
  0x7c   : > { %680 = vmatpush1.bf16.msra.mxu0 %v1105_v3  ;;  %721 = vmatpush1.bf16.msra.mxu1 %v1106_v4  ;;  %v1111_v7 = vld [vmem:[%s1595_s12 + $0x20] ss:$16 sps:$4 sm:$0xff]   ;;  %v1112_v8 = vld [vmem:[%s1595_s12 + $0x28] ss:$16 sps:$4 sm:$0xff]   ;;  %v1113_v9 = vld [vmem:[%s1595_s12 + $0x44] ss:$16 sps:$4 sm:$0xff]  }
  0x7d   : > { %681 = vmatprep.subr.bf16.mxu0 %v1107_v5  ;;  %722 = vmatprep.subr.bf16.mxu1 %v1109_v6  ;;  %v1115_v10 = vld [vmem:[%s1595_s12 + $0x4c] ss:$16 sps:$4 sm:$0xff]   ;;  %v1117_v11 = vld [vmem:[%s1595_s12 + $0x40] ss:$16 sps:$4 sm:$0xff]   ;;  %v1118_v12 = vld [vmem:[%s1595_s12 + $0x48] ss:$16 sps:$4 sm:$0xff]  }
  0x7e   : > { %v1119_v13 = vld [vmem:[%s1595_s12 + $0x64] ss:$16 sps:$4 sm:$0xff]   ;;  %v1121_v14 = vld [vmem:[%s1595_s12 + $0x6c] ss:$16 sps:$4 sm:$0xff]   ;;  %v1123_v15 = vld [vmem:[%s1595_s12 + $0x60] ss:$16 sps:$4 sm:$0xff]  }
  0x7f   : > { %v1124_v16 = vld [vmem:[%s1595_s12 + $0x68] ss:$16 sps:$4 sm:$0xff]   ;;  %v1125_v17 = vld [vmem:[%s1595_s12 + $0x84] ss:$16 sps:$4 sm:$0xff]   ;;  %v1127_v18 = vld [vmem:[%s1595_s12 + $0x8c] ss:$16 sps:$4 sm:$0xff]  }
  0x80   : > { %682 = vmatpush1.bf16.msra.mxu0 %v1111_v7  ;;  %723 = vmatpush1.bf16.msra.mxu1 %v1112_v8  ;;  %v1129_v19 = vld [vmem:[%s1595_s12 + $0x80] ss:$16 sps:$4 sm:$0xff]   ;;  %v1130_v20 = vld [vmem:[%s1595_s12 + $0x88] ss:$16 sps:$4 sm:$0xff]   ;;  %v1131_v21 = vld [vmem:[%s1595_s12 + $0xa4] ss:$16 sps:$4 sm:$0xff]  }
  0x81   : > { %683 = vmatprep.subr.bf16.mxu0 %v1113_v9  ;;  %724 = vmatprep.subr.bf16.mxu1 %v1115_v10  ;;  %v1133_v22 = vld [vmem:[%s1595_s12 + $0xac] ss:$16 sps:$4 sm:$0xff]   ;;  %v1135_v23 = vld [vmem:[%s1595_s12 + $0xa0] ss:$16 sps:$4 sm:$0xff]   ;;  %v1136_v24 = vld [vmem:[%s1595_s12 + $0xa8] ss:$16 sps:$4 sm:$0xff]  }
  0x82   : > { %v1137_v25 = vld [vmem:[%s1595_s12 + $0xc4] ss:$16 sps:$4 sm:$0xff]   ;;  %v1139_v26 = vld [vmem:[%s1595_s12 + $0xcc] ss:$16 sps:$4 sm:$0xff]   ;;  %v1141_v27 = vld [vmem:[%s1595_s12 + $0xc0] ss:$16 sps:$4 sm:$0xff]  }
  0x83   : > { %v1142_v28 = vld [vmem:[%s1595_s12 + $0xc8] ss:$16 sps:$4 sm:$0xff]   ;;  %v1143_v29 = vld [vmem:[%s1595_s12 + $0xe4] ss:$16 sps:$4 sm:$0xff]   ;;  %v1145_v30 = vld [vmem:[%s1595_s12 + $0xec] ss:$16 sps:$4 sm:$0xff]  }
  0x84   : > { %684 = vmatpush1.bf16.msra.mxu0 %v1117_v11  ;;  %725 = vmatpush1.bf16.msra.mxu1 %v1118_v12  ;;  %v1147_v31 = vld [vmem:[%s1595_s12 + $0xe0] ss:$16 sps:$4 sm:$0xff]   ;;  %v1148_v32 = vld [vmem:[%s1595_s12 + $0xe8] ss:$16 sps:$4 sm:$0xff]   ;;  %v1149_v33 = vld [vmem:[%s1595_s12 + $0x104] ss:$16 sps:$4 sm:$0xff]  }
  0x85   : > { %685 = vmatprep.subr.bf16.mxu0 %v1119_v13  ;;  %726 = vmatprep.subr.bf16.mxu1 %v1121_v14  ;;  %v1151_v34 = vld [vmem:[%s1595_s12 + $0x10c] ss:$16 sps:$4 sm:$0xff]   ;;  %v1153_v35 = vld [vmem:[%s1595_s12 + $0x100] ss:$16 sps:$4 sm:$0xff]   ;;  %v1154_v36 = vld [vmem:[%s1595_s12 + $0x108] ss:$16 sps:$4 sm:$0xff]  }
  0x86   : > { %v1155_v37 = vld [vmem:[%s1595_s12 + $0x124] ss:$16 sps:$4 sm:$0xff]   ;;  %v1157_v38 = vld [vmem:[%s1595_s12 + $0x12c] ss:$16 sps:$4 sm:$0xff]   ;;  %v1159_v39 = vld [vmem:[%s1595_s12 + $0x120] ss:$16 sps:$4 sm:$0xff]  }
  0x87   : > { %v1160_v40 = vld [vmem:[%s1595_s12 + $0x128] ss:$16 sps:$4 sm:$0xff]   ;;  %v1161_v41 = vld [vmem:[%s1595_s12 + $0x144] ss:$16 sps:$4 sm:$0xff]   ;;  %v1163_v42 = vld [vmem:[%s1595_s12 + $0x14c] ss:$16 sps:$4 sm:$0xff]  }
  0x88   : > { %686 = vmatpush1.bf16.msra.mxu0 %v1123_v15  ;;  %727 = vmatpush1.bf16.msra.mxu1 %v1124_v16  ;;  %v1165_v43 = vld [vmem:[%s1595_s12 + $0x140] ss:$16 sps:$4 sm:$0xff]   ;;  %v1166_v44 = vld [vmem:[%s1595_s12 + $0x148] ss:$16 sps:$4 sm:$0xff]   ;;  %v1167_v45 = vld [vmem:[%s1595_s12 + $0x164] ss:$16 sps:$4 sm:$0xff]  }
  0x89   : > { %687 = vmatprep.subr.bf16.mxu0 %v1125_v17  ;;  %728 = vmatprep.subr.bf16.mxu1 %v1127_v18  ;;  %v1169_v46 = vld [vmem:[%s1595_s12 + $0x16c] ss:$16 sps:$4 sm:$0xff]   ;;  %v1171_v49 = vld [vmem:[%s1595_s12 + $0x160] ss:$16 sps:$4 sm:$0xff]   ;;  %v1172_v50 = vld [vmem:[%s1595_s12 + $0x168] ss:$16 sps:$4 sm:$0xff]  }
  0x8a   : > { %v287_v47 = vld [vmem:[%s1588_s30] sm:$0xff]  ;;  %v283_v4 = vld [vmem:[#allocation8] sm:$0xff]  ;;  %p1012_p9 = scmp.ne.s32.totalorder %s1367_s15, 8 }
  0x8b   : > { %v947_v48 = vcombine.high %v287_v47, %v287_v47  ;;  %v1173_v51 = vld [vmem:[%s1595_s12 + $0x184] ss:$16 sps:$4 sm:$0xff]   ;;  %v1175_v52 = vld [vmem:[%s1595_s12 + $0x18c] ss:$16 sps:$4 sm:$0xff]   ;;  %v1177_v53 = vld [vmem:[%s1595_s12 + $0x180] ss:$16 sps:$4 sm:$0xff]   ;;  %v946_v3 = vcombine.low %v287_v47, %v287_v47 }
  0x8c   : > { %688 = vmatpush1.bf16.msra.mxu0 %v1129_v19  ;;  %729 = vmatpush1.bf16.msra.mxu1 %v1130_v20  ;;  %v1178_v54 = vld [vmem:[%s1595_s12 + $0x188] ss:$16 sps:$4 sm:$0xff]   ;;  %v1179_v55 = vld [vmem:[%s1595_s12 + $0x1a4] ss:$16 sps:$4 sm:$0xff]   ;;  %v1181_v56 = vld [vmem:[%s1595_s12 + $0x1ac] ss:$16 sps:$4 sm:$0xff]   ;;  %v779_v20 = vlaneseq (!%p1012_p9) }
  0x8d   : > { %689 = vmatprep.subr.bf16.mxu0 %v1131_v21  ;;  %730 = vmatprep.subr.bf16.mxu1 %v1133_v22  ;;  %v1183_v57 = vld [vmem:[%s1595_s12 + $0x1a0] ss:$16 sps:$4 sm:$0xff]   ;;  %v1184_v58 = vld [vmem:[%s1595_s12 + $0x1a8] ss:$16 sps:$4 sm:$0xff]   ;;  %v1185_v59 = vld [vmem:[%s1595_s12 + $0x1c4] ss:$16 sps:$4 sm:$0xff]  }
  0x8e   : > { %711 = vmatprep.mubr.bf16.mxu0 %v947_v48  ;;  %752 = vmatprep.mubr.bf16.mxu1 %v947_v48  ;;  %v1187_v60 = vld [vmem:[%s1595_s12 + $0x1cc] ss:$16 sps:$4 sm:$0xff]   ;;  %v1189_v61 = vld [vmem:[%s1595_s12 + $0x1c0] ss:$16 sps:$4 sm:$0xff]   ;;  %v1190_v62 = vld [vmem:[%s1595_s12 + $0x1c8] ss:$16 sps:$4 sm:$0xff]  }
  0x8f   : > { %v1191_v63 = vld [vmem:[%s1595_s12 + $0x1e4] ss:$16 sps:$4 sm:$0xff]   ;;  %v1193_v0 = vld [vmem:[%s1595_s12 + $0x1ec] ss:$16 sps:$4 sm:$0xff]   ;;  %v1195_v1 = vld [vmem:[%s1595_s12 + $0x1e0] ss:$16 sps:$4 sm:$0xff]  }
  0x90   : > { %690 = vmatpush1.bf16.msra.mxu0 %v1135_v23  ;;  %731 = vmatpush1.bf16.msra.mxu1 %v1136_v24  ;;  %v1196_v2 = vld [vmem:[%s1595_s12 + $0x1e8] ss:$16 sps:$4 sm:$0xff]   ;;  %v284_v6 = vld [vmem:[#allocation8 + $0x8] sm:$0xff]  ;;  %v286_v7 = vld [vmem:[#allocation8 + $0x18] sm:$0xff]  ;;  %v780_v21 = vshrl.u32 (!%p1012_p9), %v779_v20, 7 }
  0x91   : > { %691 = vmatprep.subr.bf16.mxu0 %v1137_v25  ;;  %732 = vmatprep.subr.bf16.mxu1 %v1139_v26  ;;  %v285_v5 = vld [vmem:[#allocation8 + $0x10] sm:$0xff]  ;;  %v777_v22 = vld [vmem:[#allocation7] sm:$0xf] (!%p1012_p9) }
  0x92   : > { %v781_v24 = vsub.s32 (!%p1012_p9), 0, %v780_v21  ;;  %v785_v25 = vsub.s32 (!%p1012_p9), 1, %v780_v21  ;;  %v789_v26 = vsub.s32 (!%p1012_p9), 2, %v780_v21 }
  0x94   : > { %692 = vmatpush1.bf16.msra.mxu0 %v1141_v27  ;;  %733 = vmatpush1.bf16.msra.mxu1 %v1142_v28  ;;  %v793_v27 = vsub.s32 (!%p1012_p9), 3, %v780_v21 }
  0x95   : > { %693 = vmatprep.subr.bf16.mxu0 %v1143_v29  ;;  %734 = vmatprep.subr.bf16.mxu1 %v1145_v30 }
  0x98   : > { %694 = vmatpush1.bf16.msra.mxu0 %v1147_v31  ;;  %735 = vmatpush1.bf16.msra.mxu1 %v1148_v32  ;;  %v782_v31 = vrot.slane (!%p1012_p9), %v777_v22, %v781_v24  ;;  %v786_v32 = vrot.slane (!%p1012_p9), %v777_v22, %v785_v25 }
  0x99   : > { %695 = vmatprep.subr.bf16.mxu0 %v1149_v33  ;;  %736 = vmatprep.subr.bf16.mxu1 %v1151_v34  ;;  %v790_v33 = vrot.slane (!%p1012_p9), %v777_v22, %v789_v26  ;;  %v794_v34 = vrot.slane (!%p1012_p9), %v777_v22, %v793_v27 }
  0x9c   : > { %696 = vmatpush1.bf16.msra.mxu0 %v1153_v35  ;;  %737 = vmatpush1.bf16.msra.mxu1 %v1154_v36 }
  0x9d   : > { %697 = vmatprep.subr.bf16.mxu0 %v1155_v37  ;;  %738 = vmatprep.subr.bf16.mxu1 %v1157_v38 }
  0xa0   : > { %698 = vmatpush1.bf16.msra.mxu0 %v1159_v39  ;;  %739 = vmatpush1.bf16.msra.mxu1 %v1160_v40 }
  0xa1   : > { %699 = vmatprep.subr.bf16.mxu0 %v1161_v41  ;;  %740 = vmatprep.subr.bf16.mxu1 %v1163_v42 }
  0xa4   : > { %700 = vmatpush1.bf16.msra.mxu0 %v1165_v43  ;;  %741 = vmatpush1.bf16.msra.mxu1 %v1166_v44 }
  0xa5   : > { %701 = vmatprep.subr.bf16.mxu0 %v1167_v45  ;;  %742 = vmatprep.subr.bf16.mxu1 %v1169_v46 }
  0xa8   : > { %702 = vmatpush1.bf16.msra.mxu0 %v1171_v49  ;;  %743 = vmatpush1.bf16.msra.mxu1 %v1172_v50 }
  0xa9   : > { %703 = vmatprep.subr.bf16.mxu0 %v1173_v51  ;;  %744 = vmatprep.subr.bf16.mxu1 %v1175_v52 }
  0xac   : > { %704 = vmatpush1.bf16.msra.mxu0 %v1177_v53  ;;  %745 = vmatpush1.bf16.msra.mxu1 %v1178_v54 }
  0xad   : > { %705 = vmatprep.subr.bf16.mxu0 %v1179_v55  ;;  %746 = vmatprep.subr.bf16.mxu1 %v1181_v56 }
  0xb0   : > { %706 = vmatpush1.bf16.msra.mxu0 %v1183_v57  ;;  %747 = vmatpush1.bf16.msra.mxu1 %v1184_v58 }
  0xb1   : > { %707 = vmatprep.subr.bf16.mxu0 %v1185_v59  ;;  %748 = vmatprep.subr.bf16.mxu1 %v1187_v60 }
  0xb4   : > { %708 = vmatpush1.bf16.msra.mxu0 %v1189_v61  ;;  %749 = vmatpush1.bf16.msra.mxu1 %v1190_v62 }
  0xb5   : > { %709 = vmatprep.subr.bf16.mxu0 %v1191_v63  ;;  %750 = vmatprep.subr.bf16.mxu1 %v1193_v0 }
  0xb8   : > { %710 = vmatpush1.bf16.msra.mxu0 %v1195_v1  ;;  %751 = vmatpush1.bf16.msra.mxu1 %v1196_v2 }
  0xbb   : > { %712 = vmatmul.mubr.bf16.vlgmr.msra.gmra.mrb[0].mxu0 %v946_v3  ;;  %753 = vmatmul.mubr.bf16.vlgmr.msra.gmra.mrb[0].mxu1 %v946_v3 }
 0x18c   : > { %772 = sbr.rel (%p1012_p9) target bundleno = 415 (0x19f), region = 52 }
 0x18e   : > { %v713_v8 = vpop.f32.mrb[0].mxu0  ;;  %v754_v9 = vpop.f32.mrb[0].mxu1 }
 0x18f   : > { %v761_v10 = vadd.f32 %v713_v8, %v283_v4  ;;  %v763_v11 = vadd.f32 %v754_v9, %v285_v5  ;;  %v715_v12 = vpop.f32.mrb[1].mxu0  ;;  %v756_v13 = vpop.f32.mrb[1].mxu1 }
 0x190   : > { %v762_v14 = vadd.f32 %v715_v12, %v284_v6  ;;  %v764_v15 = vadd.f32 %v756_v13, %v286_v7  ;;  %v717_v16 = vpop.f32.mrb[2].mxu0  ;;  %v758_v17 = vpop.f32.mrb[2].mxu1 }
 0x191   : > { %765 = vst [vmem:[#allocation8] sm:$0xff] %v761_v10  ;;  %767 = vst [vmem:[#allocation8 + $0x10] sm:$0xff] %v763_v11  ;;  %v718_v18 = vpop.f32.mrb[3].mxu0  ;;  %v759_v19 = vpop.f32.mrb[3].mxu1 }
 0x192   : > { %766 = vst [vmem:[#allocation8 + $0x8] sm:$0xff] %v762_v14  ;;  %768 = vst [vmem:[#allocation8 + $0x18] sm:$0xff] %v764_v15 }
 0x198   : > { %v773_v23 = vld [vmem:[#allocation8] sm:$0xff]  ;;  %v775_v29 = vld [vmem:[#allocation8 + $0x10] sm:$0xff] }
 0x199   : > { %v774_v28 = vld [vmem:[#allocation8 + $0x8] sm:$0xff]  ;;  %v776_v30 = vld [vmem:[#allocation8 + $0x18] sm:$0xff]  ;;  %v799_v35 = vadd.f32 %v782_v31, %v773_v23  ;;  %v801_v37 = vadd.f32 %v790_v33, %v775_v29 }
 0x19a   : > { %v800_v36 = vadd.f32 %v786_v32, %v774_v28  ;;  %v802_v38 = vadd.f32 %v794_v34, %v776_v30 }
 0x19b   : > { %v803_v39 = vmax.f32 %v799_v35, 0.0  ;;  %v805_v41 = vmax.f32 %v801_v37, 0.0 }
 0x19c   : > { %v804_v40 = vmax.f32 %v800_v36, 0.0  ;;  %v806_v42 = vmax.f32 %v802_v38, 0.0 }
 0x19d   : > { %807 = vst [vmem:[#allocation8] sm:$0xff] %v803_v39  ;;  %809 = vst [vmem:[#allocation8 + $0x10] sm:$0xff] %v805_v41 }
 0x19e   : > { %808 = vst [vmem:[#allocation8 + $0x8] sm:$0xff] %v804_v40  ;;  %810 = vst [vmem:[#allocation8 + $0x18] sm:$0xff] %v806_v42 }
 0x19f PF: > { %p1046_p11 = scmp.eq.s32.totalorder %s1433_s18, 8  ;;  %s1383_s15 = smov [#allocation8]  }
 0x1a0   : > { %s823_s20 = sshll.u32 %s1383_s15, 4  ;;  %s824_s20 = int_to_ptr.vmem [resolvable:$true] %s823_s20 }
 0x1a1   : > { %s1287_s21 = scalar_lea.vmem %s824_s20, 512  ;;  %p1294_p1 = scmp.lt.s32.totalorder %s824_s20, %s824_s20 }
 0x1a2   : > { %p1288_p13 = scmp.ne.s32.totalorder %s824_s20, %s1287_s21  ;;  %p1295_p0 = scmp.lt.s32.totalorder %s1287_s21, %s1287_s21 }
 0x1a4   : > { %p1289_p3 = pnand %p1288_p13, %p1046_p11  ;;  %p1296_p8 = por %p1295_p0, %p1294_p1 }
 0x1a6   : > { %p1290_p4 = pneg %p1289_p3 }
 0x1a8   : > { %p1297_p2 = pnand %p1296_p8, %p1290_p4 }
 0x1aa   : > { %1300 = shalt.err (!%p1297_p2)
}
 0x1ab   : > { %s1301_s7 = scalar_lea.hbm %s1716_s3, 512 }
 0x1ac   : > { %p1302_p12 = scmp.ne.s32.totalorder %s1716_s3, %s1301_s7  ;;  %p1307_p5 = scmp.lt.u32.totalorder %s1301_s7, %s1716_s3 }
 0x1ae   : > { %p1303_p7 = pnand %p1302_p12, %p1046_p11 }
 0x1b0   : > { %p1304_p10 = pneg %p1303_p7 }
 0x1b2   : > { %p1309_p6 = pnand %p1307_p5, %p1304_p10 }
 0x1b4   : > { %1312 = shalt.err (!%p1309_p6)
}
 0x1b5   : > { %1029 = dma.vmem_to_hbm [thread:$0]  (%p1046_p11), %s824_s20, 512, %s1716_s3, [#allocation4]  }
 0x1b6   : > { %1350 = dma.done.wait (%p1046_p11), [#allocation4], 512  }
 0x1b7   : > { %1352 = vsyncadd (%p1046_p11), [#allocation4], 4294966784 }
 0x1b8 PF: > { %s20_s17 = sadd.s32 1, %s1375_s17   ;;  %s1733_s12 = smov %s1359_s13 }
 0x1b9   : > { %p17_p9 = scmp.ge.s32.totalorder %s20_s17, 11   ;;  %s1734_s13 = smov %s1363_s14 }
 0x1ba   : > { %s1735_s14 = smov %s1509_s23  ;;  %s1736_s15 = smov %s1371_s16 }
 0x1bb   : > { %s1737_s16 = smov %s1739_s25  ;;  %19 = sbr.rel (!%p17_p9) target bundleno = 7 (0x7), region = 96 }
 0x1c2   :  { %836 = vsyncpa [#allocation3], 1 }
 0x1c3   :  { %838 = vsyncpa [#allocation3 + $0x1], 1 }
 0x1c4   :  { %839 = vsyncpa [#allocation6], 1 }
 0x1c5   :  { %841 = vsyncpa [#allocation6 + $0x1], 1 }
 0x1c6   :  { %842 = vsyncpa [#allocation4], 1 }
 0x1c7   :  { %844 = vsyncpa [#allocation4 + $0x1], 1 }

// kernel: e2e_cnn_forward.40
= control target key start
LH: loop header
LB: loop body
LE: loop exit
PB: predicated region body
PF: predicated region fallthrough
CT: control target
= control target key end

     0   :  { %9 = vsyncpa [#allocation3], 0  ;;  %s2576_s0 = inlined_call_operand.hbm [shape: bf16[8,4608], index: 0, kind: input, shape index: {}]   ;;  %s2577_s1 = inlined_call_operand.hbm [shape: bf16[4608,512], index: 1, kind: input, shape index: {}]   ;;  %s2578_s2 = inlined_call_operand.hbm [shape: f32[1,512], index: 2, kind: input, shape index: {}]   ;;  %s2579_s3 = inlined_call_operand.hbm [shape: f32[8,512], index: 3, kind: input, shape index: {}]   ;;  %s2580_s4 = inlined_call_operand.hbm [shape: f32[8,512], index: 4, kind: output, shape index: {}]  }
   0x1   :  { %11 = vsyncpa [#allocation3 + $0x1], 0 }
   0x2   :  { %12 = vsyncpa [#allocation6], 0 }
   0x3   :  { %14 = vsyncpa [#allocation6 + $0x1], 0 }
   0x4   :  { %15 = vsyncpa [#allocation9], 0 }
   0x5   :  { %16 = vsyncpa [#allocation4], 0  ;;  %s2168_s15 = smov 0   ;;  %s2170_s16 = smov 0  }
   0x6   :  { %s2172_s17 = smov 0   ;;  %s2174_s18 = smov 0  }
   0x7   :  { %s2176_s19 = smov 0   ;;  %s2178_s20 = smov 0  }
   0x8 LB: > { %s2197_s21 = sadd.s32 4294967295, %s2133_s20   ;;  %p63_p0 = scmp.ne.s32.totalorder %s2117_s16, %s2113_s15  ;;  %s2133_s20 = sphi %s2178_s20, %s22_s20   ;;  %s2129_s19 = sphi %s2176_s19, %s2598_s19   ;;  %s2125_s18 = sphi %s2174_s18, %s2597_s18   ;;  %s2121_s17 = sphi %s2172_s17, %s2596_s17   ;;  %s2117_s16 = sphi %s2170_s16, %s2595_s16   ;;  %s2113_s15 = sphi %s2168_s15, %s2594_s15  }
   0x9   : > { %p2581_p1 = scmp.eq.s32.totalorder %s2197_s21, 0  ;;  %p1481_p2 = scmp.ge.s32.totalorder %s2133_s20, 1 }
   0xa   : > { %p184_p3 = scmp.lt.s32.totalorder %s2133_s20, 10  ;;  %s2135_s24 = smov [#allocation7]  }
   0xb   : > { %p2205_p4 = por %p2581_p1, %p63_p0  ;;  %s200_s25 = sshll.u32 %s2135_s24, 4  ;;  %s201_s25 = int_to_ptr.vmem [resolvable:$true] %s200_s25 }
   0xc   : > { %p2209_p5 = pnand %p1481_p2, %p184_p3  ;;  %s2136_s26 = smov [#allocation8]  }
   0xd   : > { %s2584_s22 = scalar_select %p2205_p4, 1, 0 }
   0xe   : > { %s2585_s23 = scalar_select %p2209_p5, 1, 0 }
   0xf   : > { %p1654_p6 = pneg %p2209_p5  ;;  %s216_s27 = sshll.u32 %s2136_s26, 4  ;;  %s2221_s27 = int_to_ptr.vmem [resolvable:$true] %s216_s27 }
  0x10   : > { %s1925_s5 = scalar_lea.hbm %s2578_s2, 64 }
  0x11   : > { %p2217_p7 = pnand %p1654_p6, %p2581_p1  ;;  %p1926_p8 = scmp.ne.s32.totalorder %s2578_s2, %s1925_s5 }
  0x12   : > { %p1932_p12 = scmp.lt.u32.totalorder %s1925_s5, %s2578_s2 }
  0x13   : > { %p1927_p9 = pneg %p2217_p7 }
  0x15   : > { %p1928_p10 = pnand %p1927_p9, %p1926_p8 }
  0x17   : > { %p1929_p11 = pneg %p1928_p10 }
  0x19   : > { %p1934_p13 = pnand %p1932_p12, %p1929_p11 }
  0x1b   : > { %1937 = shalt.err (!%p1934_p13)
}
  0x1c   : > { %s1938_s10 = scalar_lea.vmem %s201_s25, 64  ;;  %p1946_p6 = scmp.lt.s32.totalorder %s201_s25, %s201_s25 }
  0x1d   : > { %p1939_p0 = scmp.ne.s32.totalorder %s201_s25, %s1938_s10  ;;  %p1947_p1 = scmp.lt.s32.totalorder %s1938_s10, %s1938_s10 }
  0x1f   : > { %p1941_p2 = pnand %p1939_p0, %p1927_p9  ;;  %p1948_p4 = por %p1947_p1, %p1946_p6 }
  0x21   : > { %p1942_p3 = pneg %p1941_p2 }
  0x23   : > { %p1949_p5 = pnand %p1948_p4, %p1942_p3 }
  0x25   : > { %1952 = shalt.err (!%p1949_p5)
}
  0x26   : > { %1657 = dma.hbm_to_vmem [thread:$0]  (!%p2217_p7), %s2578_s2, 64, %s201_s25, [#allocation6]  }
  0x27   : > { %s1953_s15 = scalar_lea.hbm %s2579_s3, 512 }
  0x28   : > { %p1954_p8 = scmp.ne.s32.totalorder %s2579_s3, %s1953_s15  ;;  %p1960_p5 = scmp.lt.u32.totalorder %s1953_s15, %s2579_s3 }
  0x2a   : > { %p1956_p1 = pnand %p1954_p8, %p1927_p9 }
  0x2c   : > { %p1957_p4 = pneg %p1956_p1 }
  0x2e   : > { %p1962_p10 = pnand %p1960_p5, %p1957_p4 }
  0x30   : > { %1965 = shalt.err (!%p1962_p10)
}
  0x31   : > { %s1966_s25 = scalar_lea.vmem %s2221_s27, 512  ;;  %p1974_p0 = scmp.lt.s32.totalorder %s2221_s27, %s2221_s27 }
  0x32   : > { %p1967_p11 = scmp.ne.s32.totalorder %s2221_s27, %s1966_s25  ;;  %p1975_p2 = scmp.lt.s32.totalorder %s1966_s25, %s1966_s25 }
  0x34   : > { %p1969_p12 = pnand %p1967_p11, %p1927_p9  ;;  %p1976_p3 = por %p1975_p2, %p1974_p0 }
  0x36   : > { %p1970_p13 = pneg %p1969_p12 }
  0x38   : > { %p1977_p6 = pnand %p1976_p3, %p1970_p13 }
  0x3a   : > { %1980 = shalt.err (!%p1977_p6)
}
  0x3b   : > { %1660 = dma.hbm_to_vmem [thread:$0]  (!%p2217_p7), %s2579_s3, 512, %s2221_s27, [#allocation9]  }
  0x3c   : > { %s34_s7 = sadd.s32 1, %s2129_s19  ;;  %s50_s8 = sadd.s32 1, %s2121_s17 }
  0x3d   : > { %p35_p9 = scmp.ge.s32.totalorder %s34_s7, 9  ;;  %p57_p8 = scmp.ne.s32.totalorder %s2121_s17, %s2117_s16 }
  0x3e   : > { %p58_p1 = scmp.eq.s32.totalorder %s2133_s20, 0  ;;  %p1670_p4 = scmp.lt.s32.totalorder %s2133_s20, 9 }
  0x3f   : > { %s2600_s7 = smov (%p35_p9, %s34_s7), 0  ;;  %s2279_s28 = sand.u32 1, %s2121_s17  }
  0x40   : > { %p59_p5 = por %p58_p1, %p57_p8  ;;  %s46_s9 = ssub.s32 %s2129_s19, %s2600_s7 }
  0x41   : > { %p48_p10 = scmp.eq.s32.totalorder %s46_s9, 0  ;;  %s1485_s27 = sshll.u32 %s2279_s28, 4 }
  0x42   : > { %s1635_s10 = sshll.u32 %s2129_s19, 8  ;;  %s231_s15 = scalar_lea.vmem [#allocation2], %s1485_s27 }
  0x43   : > { %s2286_s11 = scalar_select %p48_p10, %s2121_s17, %s50_s8  }
  0x44   : > { %s2291_s14 = scalar_lea.hbm %s2576_s0, %s1635_s10  ;;  %s241_s24 = sshll.u32 %s231_s15, 4  ;;  %s2293_s24 = int_to_ptr.vmem [resolvable:$true] %s241_s24 }
  0x45   : > { %p2297_p7 = pnand %p1670_p4, %p59_p5  ;;  %s1488_s29 = sshll.u32 %s2279_s28, 10 }
  0x46   : > { %s1637_s30 = sshll.u32 %s2129_s19, 14  ;;  %s228_s25 = scalar_lea.sflag [#allocation3], %s2279_s28 }
  0x47   : > { %s1981_s5 = scalar_lea.hbm %s2291_s14, 256  ;;  %p1983_p12 = pneg %p2297_p7 }
  0x48   : > { %p1982_p11 = scmp.ne.s32.totalorder %s2291_s14, %s1981_s5  ;;  %s1986_s9 = scalar_lea.hbm %s2576_s0, 2304 }
  0x49   : > { %p1987_p2 = scmp.lt.u32.totalorder %s2291_s14, %s2576_s0  ;;  %p1988_p3 = scmp.lt.u32.totalorder %s1986_s9, %s1981_s5 }
  0x4a   : > { %p1984_p13 = pnand %p1983_p12, %p1982_p11  ;;  %p1990_p9 = scmp.lt.u32.totalorder %s1981_s5, %s2291_s14 }
  0x4b   : > { %p1989_p6 = por %p1988_p3, %p1987_p2 }
  0x4c   : > { %p1985_p0 = pneg %p1984_p13 }
  0x4d   : > { %p1991_p8 = por %p1990_p9, %p1989_p6 }
  0x4f   : > { %p1992_p1 = pnand %p1991_p8, %p1985_p0 }
  0x51   : > { %1995 = shalt.err (!%p1992_p1)
}
  0x52   : > { %s1996_s12 = scalar_lea.vmem %s2293_s24, 256  ;;  %s2137_s13 = smov [#allocation2]  }
  0x53   : > { %p1997_p4 = scmp.ne.s32.totalorder %s2293_s24, %s1996_s12  ;;  %s2001_s15 = sshll.u32 %s2137_s13, 4  ;;  %s2002_s15 = int_to_ptr.vmem [resolvable:$false] %s2001_s15 }
  0x54   : > { %s2003_s6 = scalar_lea.vmem %s2002_s15, 512  ;;  %p2004_p11 = scmp.lt.s32.totalorder %s2293_s24, %s2002_s15 }
  0x55   : > { %p1999_p5 = pnand %p1997_p4, %p1983_p12  ;;  %p2005_p13 = scmp.lt.s32.totalorder %s2003_s6, %s1996_s12 }
  0x57   : > { %p2000_p10 = pneg %p1999_p5  ;;  %p2006_p2 = por %p2005_p13, %p2004_p11 }
  0x59   : > { %p2007_p3 = pnand %p2006_p2, %p2000_p10 }
  0x5b   : > { %2010 = shalt.err (!%p2007_p3)
}
  0x5c   : > { %1664 = dma.hbm_to_vmem [thread:$0]  (!%p2297_p7), %s2291_s14, 256, %s2293_s24, %s228_s25  }
  0x5d   : > { %s252_s5 = scalar_lea.vmem [#allocation5], %s1488_s29  ;;  %s248_s9 = sand.u32 1, %s2133_s20  }
  0x5e   : > { %s262_s8 = sshll.u32 %s252_s5, 4  ;;  %s2339_s12 = scalar_lea.hbm %s2577_s1, %s1637_s30  ;;  %s2332_s8 = int_to_ptr.vmem [resolvable:$true] %s262_s8 }
  0x5f   : > { %s2341_s13 = scalar_lea.sflag [#allocation6], %s248_s9  ;;  %s2011_s15 = scalar_lea.hbm %s2339_s12, 16384 }
  0x60   : > { %p2012_p0 = scmp.ne.s32.totalorder %s2339_s12, %s2011_s15  ;;  %s2016_s24 = scalar_lea.hbm %s2577_s1, 147456 }
  0x61   : > { %p2017_p8 = scmp.lt.u32.totalorder %s2339_s12, %s2577_s1  ;;  %p2018_p1 = scmp.lt.u32.totalorder %s2016_s24, %s2011_s15 }
  0x62   : > { %p2014_p6 = pnand %p2012_p0, %p1983_p12  ;;  %p2020_p5 = scmp.lt.u32.totalorder %s2011_s15, %s2339_s12 }
  0x63   : > { %p2019_p4 = por %p2018_p1, %p2017_p8 }
  0x64   : > { %p2015_p9 = pneg %p2014_p6 }
  0x65   : > { %p2021_p10 = por %p2020_p5, %p2019_p4 }
  0x67   : > { %p2022_p11 = pnand %p2021_p10, %p2015_p9 }
  0x69   : > { %2025 = shalt.err (!%p2022_p11)
}
  0x6a   : > { %s2026_s30 = scalar_lea.vmem %s2332_s8, 16384  ;;  %s2138_s6 = smov [#allocation5]  }
  0x6b   : > { %p2027_p13 = scmp.ne.s32.totalorder %s2332_s8, %s2026_s30  ;;  %s2031_s5 = sshll.u32 %s2138_s6, 4  ;;  %s2032_s5 = int_to_ptr.vmem [resolvable:$false] %s2031_s5 }
  0x6c   : > { %s2033_s9 = scalar_lea.vmem %s2032_s5, 32768  ;;  %p2034_p0 = scmp.lt.s32.totalorder %s2332_s8, %s2032_s5 }
  0x6d   : > { %p2029_p2 = pnand %p2027_p13, %p1983_p12  ;;  %p2035_p6 = scmp.lt.s32.totalorder %s2033_s9, %s2026_s30 }
  0x6f   : > { %p2030_p3 = pneg %p2029_p2  ;;  %p2036_p8 = por %p2035_p6, %p2034_p0 }
  0x71   : > { %p2037_p1 = pnand %p2036_p8, %p2030_p3 }
  0x73   : > { %2040 = shalt.err (!%p2037_p1)
}
  0x74   : > { %s2139_s27 = smov 256   ;;  %s2140_s10 = smov 16  }
  0x75   : > { %1667 = dma.hbm_to_vmem [thread:$0]  (!%p2297_p7), %s2339_s12, 16384, %s2332_s8, %s2341_s13, %s2139_s27, %s2139_s27, %s2140_s10  }
  0x76   : > { %p2588_p12 = scmp.ne.s32.totalorder %s2585_s23, 0 }
  0x77   : > { %s276_s15 = sand.u32 (!%p2588_p12), 1, %s2117_s16   ;;  %p2589_p9 = scmp.ne.s32.totalorder (!%p2588_p12), %s2584_s22, 0 }
  0x78   : > { %274 = sbr.rel (%p2588_p12) target bundleno = 534 (0x216), region = 36  ;;  %s1493_s28 = sshll.u32 (!%p2588_p12), %s276_s15, 4 }
  0x79   : > { %s277_s14 = scalar_lea.sflag (!%p2588_p12), [#allocation3], %s276_s15  ;;  %s2370_s24 = scalar_lea.vmem (!%p2588_p12), [#allocation2], %s1493_s28 }
  0x7f   : > { %2092 = dma.done.wait (%p2589_p9), %s277_s14, 256  }
  0x80   : > { %2094 = vsyncadd (%p2589_p9), %s277_s14, 4294967040  ;;  %s285_s29 = sand.u32 1, %s2197_s21   ;;  %s1494_s26 = sshll.u32 %s276_s15, 10 }
  0x81   : > { %s286_s8 = scalar_lea.sflag [#allocation6], %s285_s29  ;;  %s2377_s12 = scalar_lea.vmem [#allocation5], %s1494_s26 }
  0x82   : > { %2096 = dma.done.wait (%p2589_p9), %s286_s8, 16384  }
  0x83   : > { %2098 = vsyncadd (%p2589_p9), %s286_s8, 4294950912  ;;  %p2590_p7 = scmp.eq.s32.totalorder %s2197_s21, 0 }
  0x85   : > { %2100 = dma.done.wait (%p2590_p7), [#allocation6], 64   ;;  %p2591_p4 = pmov %p2590_p7 }
  0x87   : > { %2102 = vsyncadd (%p2591_p4), [#allocation6], 4294967232  ;;  %p2592_p5 = pmov %p2591_p4 }
  0x88   : > { %p2593_p10 = pmov %p2591_p4 }
  0x89   : > { %2104 = dma.done.wait (%p2592_p5), [#allocation9], 512  }
  0x8a   : > { %2106 = vsyncadd (%p2593_p10), [#allocation9], 4294966784  ;;  %p1497_p11 = scmp.ne.s32.totalorder %s2125_s18, 0 }
  0x8b   : > { %v2141_v0 = vmov (!%p1497_p11), 0.0  }
  0x8c   : > { %331 = sbr.rel (%p1497_p11) target bundleno = 147 (0x93), region = 56  ;;  %332 = vst [vmem:[#allocation10] sm:$0xff] (!%p1497_p11), %v2141_v0  ;;  %333 = vst [vmem:[#allocation10 + $0x8] sm:$0xff] (!%p1497_p11), %v2141_v0 }
  0x8d   : > { %334 = vst [vmem:[#allocation10 + $0x10] sm:$0xff] (!%p1497_p11), %v2141_v0  ;;  %335 = vst [vmem:[#allocation10 + $0x18] sm:$0xff] (!%p1497_p11), %v2141_v0 }
  0x93 PF: > { %v1729_v1 = vld [vmem:[%s2377_s12 + $0x4] ss:$16 sps:$4 sm:$0xff]   ;;  %v1733_v3 = vld [vmem:[%s2377_s12] ss:$16 sps:$4 sm:$0xff]   ;;  %v341_v49 = vld [vmem:[%s2370_s24 + $0x8] sm:$0xff]  ;;  %p1630_p13 = scmp.ne.s32.totalorder %s2125_s18, 8 }
  0x94   : > { %v1731_v2 = vld [vmem:[%s2377_s12 + $0x204] ss:$16 sps:$4 sm:$0xff]   ;;  %1124 = vmatprep.subr.bf16.mxu0 %v1729_v1  ;;  %v1734_v4 = vld [vmem:[%s2377_s12 + $0x200] ss:$16 sps:$4 sm:$0xff]   ;;  %v1501_v52 = vcombine.high %v341_v49, %v341_v49 }
  0x95   : > { %1165 = vmatprep.subr.bf16.mxu1 %v1731_v2  ;;  %v1735_v5 = vld [vmem:[%s2377_s12 + $0x24] ss:$16 sps:$4 sm:$0xff]   ;;  %1125 = vmatpush1.bf16.msra.mxu0 %v1733_v3  ;;  %v1739_v7 = vld [vmem:[%s2377_s12 + $0x20] ss:$16 sps:$4 sm:$0xff]  }
  0x96   : > { %1166 = vmatpush1.bf16.msra.mxu1 %v1734_v4  ;;  %v1737_v6 = vld [vmem:[%s2377_s12 + $0x224] ss:$16 sps:$4 sm:$0xff]   ;;  %1126 = vmatprep.subr.bf16.mxu0 %v1735_v5  ;;  %v1740_v8 = vld [vmem:[%s2377_s12 + $0x220] ss:$16 sps:$4 sm:$0xff]   ;;  %v1831_v5 = vld [vmem:[%s2377_s12 + $0xc] ss:$16 sps:$4 sm:$0xff]  }
  0x97   : > { %1167 = vmatprep.subr.bf16.mxu1 %v1737_v6  ;;  %v1741_v9 = vld [vmem:[%s2377_s12 + $0x44] ss:$16 sps:$4 sm:$0xff]   ;;  %v1745_v11 = vld [vmem:[%s2377_s12 + $0x40] ss:$16 sps:$4 sm:$0xff]   ;;  %1197 = vmatprep.mubr.bf16.mxu1 %v1501_v52  ;;  %v1834_v6 = vld [vmem:[%s2377_s12 + $0x20c] ss:$16 sps:$4 sm:$0xff]  }
  0x98   : > { %v1743_v10 = vld [vmem:[%s2377_s12 + $0x244] ss:$16 sps:$4 sm:$0xff]   ;;  %v1746_v12 = vld [vmem:[%s2377_s12 + $0x240] ss:$16 sps:$4 sm:$0xff]  }
  0x99   : > { %1127 = vmatpush1.bf16.msra.mxu0 %v1739_v7  ;;  %v1747_v13 = vld [vmem:[%s2377_s12 + $0x64] ss:$16 sps:$4 sm:$0xff]   ;;  %v1751_v15 = vld [vmem:[%s2377_s12 + $0x60] ss:$16 sps:$4 sm:$0xff]  }
  0x9a   : > { %1168 = vmatpush1.bf16.msra.mxu1 %v1740_v8  ;;  %1128 = vmatprep.subr.bf16.mxu0 %v1741_v9  ;;  %v1749_v14 = vld [vmem:[%s2377_s12 + $0x264] ss:$16 sps:$4 sm:$0xff]   ;;  %v1752_v16 = vld [vmem:[%s2377_s12 + $0x260] ss:$16 sps:$4 sm:$0xff]   ;;  %v2465_v8 = vcombine.low %v341_v49, %v341_v49  ;;  %v1829_v9 = vld [vmem:[%s2377_s12 + $0x8] ss:$16 sps:$4 sm:$0xff]  }
  0x9b   : > { %1169 = vmatprep.subr.bf16.mxu1 %v1743_v10  ;;  %v1753_v17 = vld [vmem:[%s2377_s12 + $0x84] ss:$16 sps:$4 sm:$0xff]   ;;  %v1757_v19 = vld [vmem:[%s2377_s12 + $0x80] ss:$16 sps:$4 sm:$0xff]   ;;  %v1832_v10 = vld [vmem:[%s2377_s12 + $0x208] ss:$16 sps:$4 sm:$0xff]  }
  0x9c   : > { %v1755_v18 = vld [vmem:[%s2377_s12 + $0x284] ss:$16 sps:$4 sm:$0xff]   ;;  %v1758_v20 = vld [vmem:[%s2377_s12 + $0x280] ss:$16 sps:$4 sm:$0xff]   ;;  %v1889_v49 = vld [vmem:[%s2377_s12 + $0x148] ss:$16 sps:$4 sm:$0xff]  }
  0x9d   : > { %1129 = vmatpush1.bf16.msra.mxu0 %v1745_v11  ;;  %v1759_v21 = vld [vmem:[%s2377_s12 + $0xa4] ss:$16 sps:$4 sm:$0xff]   ;;  %v1763_v23 = vld [vmem:[%s2377_s12 + $0xa0] ss:$16 sps:$4 sm:$0xff]   ;;  %v1837_v11 = vld [vmem:[%s2377_s12 + $0x2c] ss:$16 sps:$4 sm:$0xff]  }
  0x9e   : > { %1170 = vmatpush1.bf16.msra.mxu1 %v1746_v12  ;;  %1130 = vmatprep.subr.bf16.mxu0 %v1747_v13  ;;  %v1761_v22 = vld [vmem:[%s2377_s12 + $0x2a4] ss:$16 sps:$4 sm:$0xff]   ;;  %v1764_v24 = vld [vmem:[%s2377_s12 + $0x2a0] ss:$16 sps:$4 sm:$0xff]   ;;  %v1840_v12 = vld [vmem:[%s2377_s12 + $0x22c] ss:$16 sps:$4 sm:$0xff]  }
  0x9f   : > { %1171 = vmatprep.subr.bf16.mxu1 %v1749_v14  ;;  %v1765_v25 = vld [vmem:[%s2377_s12 + $0xc4] ss:$16 sps:$4 sm:$0xff]   ;;  %v1769_v27 = vld [vmem:[%s2377_s12 + $0xc0] ss:$16 sps:$4 sm:$0xff]   ;;  %v1835_v13 = vld [vmem:[%s2377_s12 + $0x28] ss:$16 sps:$4 sm:$0xff]  }
  0xa0   : > { %v1767_v26 = vld [vmem:[%s2377_s12 + $0x2c4] ss:$16 sps:$4 sm:$0xff]   ;;  %v1770_v28 = vld [vmem:[%s2377_s12 + $0x2c0] ss:$16 sps:$4 sm:$0xff]   ;;  %v1838_v14 = vld [vmem:[%s2377_s12 + $0x228] ss:$16 sps:$4 sm:$0xff]  }
  0xa1   : > { %1131 = vmatpush1.bf16.msra.mxu0 %v1751_v15  ;;  %v1771_v29 = vld [vmem:[%s2377_s12 + $0xe4] ss:$16 sps:$4 sm:$0xff]   ;;  %v1775_v31 = vld [vmem:[%s2377_s12 + $0xe0] ss:$16 sps:$4 sm:$0xff]   ;;  %v1843_v15 = vld [vmem:[%s2377_s12 + $0x4c] ss:$16 sps:$4 sm:$0xff]  }
  0xa2   : > { %1172 = vmatpush1.bf16.msra.mxu1 %v1752_v16  ;;  %1132 = vmatprep.subr.bf16.mxu0 %v1753_v17  ;;  %v1773_v30 = vld [vmem:[%s2377_s12 + $0x2e4] ss:$16 sps:$4 sm:$0xff]   ;;  %v1776_v32 = vld [vmem:[%s2377_s12 + $0x2e0] ss:$16 sps:$4 sm:$0xff]   ;;  %v1846_v16 = vld [vmem:[%s2377_s12 + $0x24c] ss:$16 sps:$4 sm:$0xff]  }
  0xa3   : > { %1173 = vmatprep.subr.bf16.mxu1 %v1755_v18  ;;  %v1777_v33 = vld [vmem:[%s2377_s12 + $0x104] ss:$16 sps:$4 sm:$0xff]   ;;  %v1781_v35 = vld [vmem:[%s2377_s12 + $0x100] ss:$16 sps:$4 sm:$0xff]   ;;  %v1841_v17 = vld [vmem:[%s2377_s12 + $0x48] ss:$16 sps:$4 sm:$0xff]  }
  0xa4   : > { %v1779_v34 = vld [vmem:[%s2377_s12 + $0x304] ss:$16 sps:$4 sm:$0xff]   ;;  %v1782_v36 = vld [vmem:[%s2377_s12 + $0x300] ss:$16 sps:$4 sm:$0xff]   ;;  %v1844_v18 = vld [vmem:[%s2377_s12 + $0x248] ss:$16 sps:$4 sm:$0xff]  }
  0xa5   : > { %1133 = vmatpush1.bf16.msra.mxu0 %v1757_v19  ;;  %v1783_v37 = vld [vmem:[%s2377_s12 + $0x124] ss:$16 sps:$4 sm:$0xff]   ;;  %v1787_v39 = vld [vmem:[%s2377_s12 + $0x120] ss:$16 sps:$4 sm:$0xff]   ;;  %v1849_v19 = vld [vmem:[%s2377_s12 + $0x6c] ss:$16 sps:$4 sm:$0xff]  }
  0xa6   : > { %1174 = vmatpush1.bf16.msra.mxu1 %v1758_v20  ;;  %1134 = vmatprep.subr.bf16.mxu0 %v1759_v21  ;;  %v1785_v38 = vld [vmem:[%s2377_s12 + $0x324] ss:$16 sps:$4 sm:$0xff]   ;;  %v1788_v40 = vld [vmem:[%s2377_s12 + $0x320] ss:$16 sps:$4 sm:$0xff]   ;;  %v1852_v20 = vld [vmem:[%s2377_s12 + $0x26c] ss:$16 sps:$4 sm:$0xff]  }
  0xa7   : > { %1175 = vmatprep.subr.bf16.mxu1 %v1761_v22  ;;  %v1789_v41 = vld [vmem:[%s2377_s12 + $0x144] ss:$16 sps:$4 sm:$0xff]   ;;  %v1793_v43 = vld [vmem:[%s2377_s12 + $0x140] ss:$16 sps:$4 sm:$0xff]   ;;  %v1847_v21 = vld [vmem:[%s2377_s12 + $0x68] ss:$16 sps:$4 sm:$0xff]  }
  0xa8   : > { %v1791_v42 = vld [vmem:[%s2377_s12 + $0x344] ss:$16 sps:$4 sm:$0xff]   ;;  %v1794_v44 = vld [vmem:[%s2377_s12 + $0x340] ss:$16 sps:$4 sm:$0xff]   ;;  %v1850_v22 = vld [vmem:[%s2377_s12 + $0x268] ss:$16 sps:$4 sm:$0xff]  }
  0xa9   : > { %1135 = vmatpush1.bf16.msra.mxu0 %v1763_v23  ;;  %v1795_v45 = vld [vmem:[%s2377_s12 + $0x164] ss:$16 sps:$4 sm:$0xff]   ;;  %v1799_v50 = vld [vmem:[%s2377_s12 + $0x160] ss:$16 sps:$4 sm:$0xff]   ;;  %v1855_v23 = vld [vmem:[%s2377_s12 + $0x8c] ss:$16 sps:$4 sm:$0xff]  }
  0xaa   : > { %1176 = vmatpush1.bf16.msra.mxu1 %v1764_v24  ;;  %1136 = vmatprep.subr.bf16.mxu0 %v1765_v25  ;;  %v1797_v46 = vld [vmem:[%s2377_s12 + $0x364] ss:$16 sps:$4 sm:$0xff]   ;;  %v1800_v51 = vld [vmem:[%s2377_s12 + $0x360] ss:$16 sps:$4 sm:$0xff]   ;;  %v1858_v24 = vld [vmem:[%s2377_s12 + $0x28c] ss:$16 sps:$4 sm:$0xff]  }
  0xab   : > { %1177 = vmatprep.subr.bf16.mxu1 %v1767_v26  ;;  %v340_v47 = vld [vmem:[%s2370_s24] sm:$0xff]  ;;  %v1853_v25 = vld [vmem:[%s2377_s12 + $0x88] ss:$16 sps:$4 sm:$0xff]  }
  0xac   : > { %v2439_v48 = vcombine.high %v340_v47, %v340_v47  ;;  %v1801_v53 = vld [vmem:[%s2377_s12 + $0x184] ss:$16 sps:$4 sm:$0xff]   ;;  %v1805_v55 = vld [vmem:[%s2377_s12 + $0x180] ss:$16 sps:$4 sm:$0xff]   ;;  %v2463_v7 = vcombine.low %v340_v47, %v340_v47  ;;  %v1856_v26 = vld [vmem:[%s2377_s12 + $0x288] ss:$16 sps:$4 sm:$0xff]  }
  0xad   : > { %1137 = vmatpush1.bf16.msra.mxu0 %v1769_v27  ;;  %v1803_v54 = vld [vmem:[%s2377_s12 + $0x384] ss:$16 sps:$4 sm:$0xff]   ;;  %v1806_v56 = vld [vmem:[%s2377_s12 + $0x380] ss:$16 sps:$4 sm:$0xff]   ;;  %v1861_v27 = vld [vmem:[%s2377_s12 + $0xac] ss:$16 sps:$4 sm:$0xff]  }
  0xae   : > { %1178 = vmatpush1.bf16.msra.mxu1 %v1770_v28  ;;  %1138 = vmatprep.subr.bf16.mxu0 %v1771_v29  ;;  %v1807_v57 = vld [vmem:[%s2377_s12 + $0x1a4] ss:$16 sps:$4 sm:$0xff]   ;;  %v1811_v59 = vld [vmem:[%s2377_s12 + $0x1a0] ss:$16 sps:$4 sm:$0xff]   ;;  %v1864_v28 = vld [vmem:[%s2377_s12 + $0x2ac] ss:$16 sps:$4 sm:$0xff]  }
  0xaf   : > { %1179 = vmatprep.subr.bf16.mxu1 %v1773_v30  ;;  %1156 = vmatprep.mubr.bf16.mxu0 %v2439_v48  ;;  %v1809_v58 = vld [vmem:[%s2377_s12 + $0x3a4] ss:$16 sps:$4 sm:$0xff]   ;;  %v1812_v60 = vld [vmem:[%s2377_s12 + $0x3a0] ss:$16 sps:$4 sm:$0xff]   ;;  %v1859_v29 = vld [vmem:[%s2377_s12 + $0xa8] ss:$16 sps:$4 sm:$0xff]  }
  0xb0   : > { %v1813_v61 = vld [vmem:[%s2377_s12 + $0x1c4] ss:$16 sps:$4 sm:$0xff]   ;;  %v1817_v63 = vld [vmem:[%s2377_s12 + $0x1c0] ss:$16 sps:$4 sm:$0xff]   ;;  %v1862_v30 = vld [vmem:[%s2377_s12 + $0x2a8] ss:$16 sps:$4 sm:$0xff]  }
  0xb1   : > { %1139 = vmatpush1.bf16.msra.mxu0 %v1775_v31  ;;  %v1815_v62 = vld [vmem:[%s2377_s12 + $0x3c4] ss:$16 sps:$4 sm:$0xff]   ;;  %v1818_v0 = vld [vmem:[%s2377_s12 + $0x3c0] ss:$16 sps:$4 sm:$0xff]   ;;  %v1867_v31 = vld [vmem:[%s2377_s12 + $0xcc] ss:$16 sps:$4 sm:$0xff]  }
  0xb2   : > { %1180 = vmatpush1.bf16.msra.mxu1 %v1776_v32  ;;  %1140 = vmatprep.subr.bf16.mxu0 %v1777_v33  ;;  %v1819_v1 = vld [vmem:[%s2377_s12 + $0x1e4] ss:$16 sps:$4 sm:$0xff]   ;;  %v1823_v3 = vld [vmem:[%s2377_s12 + $0x1e0] ss:$16 sps:$4 sm:$0xff]   ;;  %v1870_v32 = vld [vmem:[%s2377_s12 + $0x2cc] ss:$16 sps:$4 sm:$0xff]  }
  0xb3   : > { %1181 = vmatprep.subr.bf16.mxu1 %v1779_v34  ;;  %v1821_v2 = vld [vmem:[%s2377_s12 + $0x3e4] ss:$16 sps:$4 sm:$0xff]   ;;  %v1824_v4 = vld [vmem:[%s2377_s12 + $0x3e0] ss:$16 sps:$4 sm:$0xff]   ;;  %v1865_v33 = vld [vmem:[%s2377_s12 + $0xc8] ss:$16 sps:$4 sm:$0xff]  }
  0xb4   : > { %v1868_v34 = vld [vmem:[%s2377_s12 + $0x2c8] ss:$16 sps:$4 sm:$0xff]   ;;  %v1891_v47 = vld [vmem:[%s2377_s12 + $0x14c] ss:$16 sps:$4 sm:$0xff]  }
  0xb5   : > { %1141 = vmatpush1.bf16.msra.mxu0 %v1781_v35  ;;  %v1873_v35 = vld [vmem:[%s2377_s12 + $0xec] ss:$16 sps:$4 sm:$0xff]  }
  0xb6   : > { %1182 = vmatpush1.bf16.msra.mxu1 %v1782_v36  ;;  %1142 = vmatprep.subr.bf16.mxu0 %v1783_v37  ;;  %v1876_v36 = vld [vmem:[%s2377_s12 + $0x2ec] ss:$16 sps:$4 sm:$0xff]   ;;  %v1871_v37 = vld [vmem:[%s2377_s12 + $0xe8] ss:$16 sps:$4 sm:$0xff]  }
  0xb7   : > { %1183 = vmatprep.subr.bf16.mxu1 %v1785_v38  ;;  %v1874_v38 = vld [vmem:[%s2377_s12 + $0x2e8] ss:$16 sps:$4 sm:$0xff]  }
  0xb9   : > { %1143 = vmatpush1.bf16.msra.mxu0 %v1787_v39  ;;  %v1879_v39 = vld [vmem:[%s2377_s12 + $0x10c] ss:$16 sps:$4 sm:$0xff]  }
  0xba   : > { %1184 = vmatpush1.bf16.msra.mxu1 %v1788_v40  ;;  %1144 = vmatprep.subr.bf16.mxu0 %v1789_v41  ;;  %v1882_v40 = vld [vmem:[%s2377_s12 + $0x30c] ss:$16 sps:$4 sm:$0xff]   ;;  %v1877_v41 = vld [vmem:[%s2377_s12 + $0x108] ss:$16 sps:$4 sm:$0xff]  }
  0xbb   : > { %1185 = vmatprep.subr.bf16.mxu1 %v1791_v42  ;;  %v1880_v42 = vld [vmem:[%s2377_s12 + $0x308] ss:$16 sps:$4 sm:$0xff]  }
  0xbd   : > { %1145 = vmatpush1.bf16.msra.mxu0 %v1793_v43  ;;  %v1885_v43 = vld [vmem:[%s2377_s12 + $0x12c] ss:$16 sps:$4 sm:$0xff]  }
  0xbe   : > { %1186 = vmatpush1.bf16.msra.mxu1 %v1794_v44  ;;  %1146 = vmatprep.subr.bf16.mxu0 %v1795_v45  ;;  %v1888_v44 = vld [vmem:[%s2377_s12 + $0x32c] ss:$16 sps:$4 sm:$0xff]   ;;  %v1883_v45 = vld [vmem:[%s2377_s12 + $0x128] ss:$16 sps:$4 sm:$0xff]  }
  0xbf   : > { %1187 = vmatprep.subr.bf16.mxu1 %v1797_v46  ;;  %v1886_v46 = vld [vmem:[%s2377_s12 + $0x328] ss:$16 sps:$4 sm:$0xff]  }
  0xc1   : > { %1147 = vmatpush1.bf16.msra.mxu0 %v1799_v50  ;;  %v1892_v50 = vld [vmem:[%s2377_s12 + $0x348] ss:$16 sps:$4 sm:$0xff]  }
  0xc2   : > { %1188 = vmatpush1.bf16.msra.mxu1 %v1800_v51  ;;  %1148 = vmatprep.subr.bf16.mxu0 %v1801_v53  ;;  %v1897_v51 = vld [vmem:[%s2377_s12 + $0x16c] ss:$16 sps:$4 sm:$0xff]   ;;  %v1895_v53 = vld [vmem:[%s2377_s12 + $0x168] ss:$16 sps:$4 sm:$0xff]  }
  0xc3   : > { %1189 = vmatprep.subr.bf16.mxu1 %v1803_v54  ;;  %v1898_v54 = vld [vmem:[%s2377_s12 + $0x368] ss:$16 sps:$4 sm:$0xff]  }
  0xc5   : > { %1149 = vmatpush1.bf16.msra.mxu0 %v1805_v55  ;;  %v1903_v55 = vld [vmem:[%s2377_s12 + $0x18c] ss:$16 sps:$4 sm:$0xff]  }
  0xc6   : > { %1190 = vmatpush1.bf16.msra.mxu1 %v1806_v56  ;;  %1150 = vmatprep.subr.bf16.mxu0 %v1807_v57  ;;  %v1906_v56 = vld [vmem:[%s2377_s12 + $0x38c] ss:$16 sps:$4 sm:$0xff]   ;;  %v1901_v57 = vld [vmem:[%s2377_s12 + $0x188] ss:$16 sps:$4 sm:$0xff]  }
  0xc7   : > { %1191 = vmatprep.subr.bf16.mxu1 %v1809_v58  ;;  %v1904_v58 = vld [vmem:[%s2377_s12 + $0x388] ss:$16 sps:$4 sm:$0xff]  }
  0xc9   : > { %1151 = vmatpush1.bf16.msra.mxu0 %v1811_v59  ;;  %v1909_v59 = vld [vmem:[%s2377_s12 + $0x1ac] ss:$16 sps:$4 sm:$0xff]  }
  0xca   : > { %1192 = vmatpush1.bf16.msra.mxu1 %v1812_v60  ;;  %1152 = vmatprep.subr.bf16.mxu0 %v1813_v61  ;;  %v1912_v60 = vld [vmem:[%s2377_s12 + $0x3ac] ss:$16 sps:$4 sm:$0xff]   ;;  %v1907_v61 = vld [vmem:[%s2377_s12 + $0x1a8] ss:$16 sps:$4 sm:$0xff]  }
  0xcb   : > { %1193 = vmatprep.subr.bf16.mxu1 %v1815_v62  ;;  %v1910_v62 = vld [vmem:[%s2377_s12 + $0x3a8] ss:$16 sps:$4 sm:$0xff]  }
  0xcd   : > { %1153 = vmatpush1.bf16.msra.mxu0 %v1817_v63  ;;  %v1915_v63 = vld [vmem:[%s2377_s12 + $0x1cc] ss:$16 sps:$4 sm:$0xff]  }
  0xce   : > { %1194 = vmatpush1.bf16.msra.mxu1 %v1818_v0  ;;  %1154 = vmatprep.subr.bf16.mxu0 %v1819_v1  ;;  %v1918_v0 = vld [vmem:[%s2377_s12 + $0x3cc] ss:$16 sps:$4 sm:$0xff]   ;;  %v1913_v1 = vld [vmem:[%s2377_s12 + $0x1c8] ss:$16 sps:$4 sm:$0xff]  }
  0xcf   : > { %1195 = vmatprep.subr.bf16.mxu1 %v1821_v2  ;;  %v1916_v2 = vld [vmem:[%s2377_s12 + $0x3c8] ss:$16 sps:$4 sm:$0xff]  }
  0xd1   : > { %1155 = vmatpush1.bf16.msra.mxu0 %v1823_v3  ;;  %v1921_v3 = vld [vmem:[%s2377_s12 + $0x1ec] ss:$16 sps:$4 sm:$0xff]  }
  0xd2   : > { %1196 = vmatpush1.bf16.msra.mxu1 %v1824_v4  ;;  %1206 = vmatprep.subr.bf16.mxu0 %v1831_v5  ;;  %v1924_v4 = vld [vmem:[%s2377_s12 + $0x3ec] ss:$16 sps:$4 sm:$0xff]   ;;  %v1919_v5 = vld [vmem:[%s2377_s12 + $0x1e8] ss:$16 sps:$4 sm:$0xff]  }
  0xd3   : > { %1247 = vmatprep.subr.bf16.mxu1 %v1834_v6  ;;  %v1922_v6 = vld [vmem:[%s2377_s12 + $0x3e8] ss:$16 sps:$4 sm:$0xff]  }
  0xd4   : > { %1157 = vmatmul.mubr.bf16.vlgmr.msra.gmra.mrb[0].mxu0 %v2463_v7 }
  0xd5   : > { %1198 = vmatmul.mubr.bf16.vlgmr.msra.gmra.mrb[0].mxu1 %v2465_v8  ;;  %1207 = vmatpush1.bf16.msra.mxu0 %v1829_v9 }
  0xd6   : > { %1248 = vmatpush1.bf16.msra.mxu1 %v1832_v10  ;;  %1208 = vmatprep.subr.bf16.mxu0 %v1837_v11  ;;  %v336_v10 = vld [vmem:[#allocation10] sm:$0xff] }
  0xd7   : > { %1249 = vmatprep.subr.bf16.mxu1 %v1840_v12  ;;  %1238 = vmatprep.mubr.bf16.mxu0 %v2439_v48  ;;  %v1894_v48 = vld [vmem:[%s2377_s12 + $0x34c] ss:$16 sps:$4 sm:$0xff]  }
  0xd8   : > { %1279 = vmatprep.mubr.bf16.mxu1 %v1501_v52  ;;  %v1900_v52 = vld [vmem:[%s2377_s12 + $0x36c] ss:$16 sps:$4 sm:$0xff]  }
  0xd9   : > { %1209 = vmatpush1.bf16.msra.mxu0 %v1835_v13 }
  0xda   : > { %1250 = vmatpush1.bf16.msra.mxu1 %v1838_v14  ;;  %1210 = vmatprep.subr.bf16.mxu0 %v1843_v15  ;;  %v337_v14 = vld [vmem:[#allocation10 + $0x8] sm:$0xff] }
  0xdb   : > { %1251 = vmatprep.subr.bf16.mxu1 %v1846_v16 }
  0xdd   : > { %1211 = vmatpush1.bf16.msra.mxu0 %v1841_v17 }
  0xde   : > { %1252 = vmatpush1.bf16.msra.mxu1 %v1844_v18  ;;  %1212 = vmatprep.subr.bf16.mxu0 %v1849_v19 }
  0xdf   : > { %1253 = vmatprep.subr.bf16.mxu1 %v1852_v20 }
  0xe1   : > { %1213 = vmatpush1.bf16.msra.mxu0 %v1847_v21 }
  0xe2   : > { %1254 = vmatpush1.bf16.msra.mxu1 %v1850_v22  ;;  %1214 = vmatprep.subr.bf16.mxu0 %v1855_v23 }
  0xe3   : > { %1255 = vmatprep.subr.bf16.mxu1 %v1858_v24 }
  0xe5   : > { %1215 = vmatpush1.bf16.msra.mxu0 %v1853_v25 }
  0xe6   : > { %1256 = vmatpush1.bf16.msra.mxu1 %v1856_v26  ;;  %1216 = vmatprep.subr.bf16.mxu0 %v1861_v27  ;;  %v339_v26 = vld [vmem:[#allocation10 + $0x18] sm:$0xff] }
  0xe7   : > { %1257 = vmatprep.subr.bf16.mxu1 %v1864_v28 }
  0xe9   : > { %1217 = vmatpush1.bf16.msra.mxu0 %v1859_v29 }
  0xea   : > { %1258 = vmatpush1.bf16.msra.mxu1 %v1862_v30  ;;  %1218 = vmatprep.subr.bf16.mxu0 %v1867_v31 }
  0xeb   : > { %1259 = vmatprep.subr.bf16.mxu1 %v1870_v32 }
  0xed   : > { %1219 = vmatpush1.bf16.msra.mxu0 %v1865_v33 }
  0xee   : > { %1260 = vmatpush1.bf16.msra.mxu1 %v1868_v34  ;;  %1220 = vmatprep.subr.bf16.mxu0 %v1873_v35  ;;  %v1306_v35 = vlaneseq (!%p1630_p13) }
  0xef   : > { %1261 = vmatprep.subr.bf16.mxu1 %v1876_v36 }
  0xf0   : > { %v1307_v36 = vshrl.u32 (!%p1630_p13), %v1306_v35, 7 }
  0xf1   : > { %1221 = vmatpush1.bf16.msra.mxu0 %v1871_v37  ;;  %v1304_v37 = vld [vmem:[#allocation7] sm:$0xf] (!%p1630_p13) }
  0xf2   : > { %1262 = vmatpush1.bf16.msra.mxu1 %v1874_v38  ;;  %1222 = vmatprep.subr.bf16.mxu0 %v1879_v39  ;;  %v1308_v39 = vsub.s32 (!%p1630_p13), 0, %v1307_v36 }
  0xf3   : > { %1263 = vmatprep.subr.bf16.mxu1 %v1882_v40  ;;  %v1312_v40 = vsub.s32 (!%p1630_p13), 1, %v1307_v36 }
  0xf5   : > { %1223 = vmatpush1.bf16.msra.mxu0 %v1877_v41  ;;  %v1316_v41 = vsub.s32 (!%p1630_p13), 2, %v1307_v36 }
  0xf6   : > { %1264 = vmatpush1.bf16.msra.mxu1 %v1880_v42  ;;  %1224 = vmatprep.subr.bf16.mxu0 %v1885_v43  ;;  %v1320_v42 = vsub.s32 (!%p1630_p13), 3, %v1307_v36 }
  0xf7   : > { %1265 = vmatprep.subr.bf16.mxu1 %v1888_v44 }
  0xf9   : > { %1225 = vmatpush1.bf16.msra.mxu0 %v1883_v45 }
  0xfa   : > { %1266 = vmatpush1.bf16.msra.mxu1 %v1886_v46  ;;  %1226 = vmatprep.subr.bf16.mxu0 %v1891_v47  ;;  %v1309_v46 = vrot.slane (!%p1630_p13), %v1304_v37, %v1308_v39  ;;  %v1330_v47 = vld [vmem:[#allocation8] sm:$0xff] (!%p1630_p13) }
  0xfb   : > { %1267 = vmatprep.subr.bf16.mxu1 %v1894_v48  ;;  %v1313_v48 = vrot.slane (!%p1630_p13), %v1304_v37, %v1312_v40 }
  0xfd   : > { %1227 = vmatpush1.bf16.msra.mxu0 %v1889_v49  ;;  %v1317_v49 = vrot.slane (!%p1630_p13), %v1304_v37, %v1316_v41 }
  0xfe   : > { %1268 = vmatpush1.bf16.msra.mxu1 %v1892_v50  ;;  %1228 = vmatprep.subr.bf16.mxu0 %v1897_v51  ;;  %v1321_v50 = vrot.slane (!%p1630_p13), %v1304_v37, %v1320_v42  ;;  %v1331_v51 = vld [vmem:[#allocation8 + $0x8] sm:$0xff] (!%p1630_p13) }
  0xff   : > { %1269 = vmatprep.subr.bf16.mxu1 %v1900_v52  ;;  %v1332_v52 = vld [vmem:[#allocation8 + $0x10] sm:$0xff] (!%p1630_p13) }
 0x101   : > { %1229 = vmatpush1.bf16.msra.mxu0 %v1895_v53  ;;  %v1333_v53 = vld [vmem:[#allocation8 + $0x18] sm:$0xff] (!%p1630_p13) }
 0x102   : > { %1270 = vmatpush1.bf16.msra.mxu1 %v1898_v54  ;;  %1230 = vmatprep.subr.bf16.mxu0 %v1903_v55 }
 0x103   : > { %1271 = vmatprep.subr.bf16.mxu1 %v1906_v56 }
 0x105   : > { %1231 = vmatpush1.bf16.msra.mxu0 %v1901_v57 }
 0x106   : > { %1272 = vmatpush1.bf16.msra.mxu1 %v1904_v58  ;;  %1232 = vmatprep.subr.bf16.mxu0 %v1909_v59 }
 0x107   : > { %1273 = vmatprep.subr.bf16.mxu1 %v1912_v60 }
 0x109   : > { %1233 = vmatpush1.bf16.msra.mxu0 %v1907_v61 }
 0x10a   : > { %1274 = vmatpush1.bf16.msra.mxu1 %v1910_v62  ;;  %1234 = vmatprep.subr.bf16.mxu0 %v1915_v63 }
 0x10b   : > { %1275 = vmatprep.subr.bf16.mxu1 %v1918_v0 }
 0x10d   : > { %1235 = vmatpush1.bf16.msra.mxu0 %v1913_v1 }
 0x10e   : > { %1276 = vmatpush1.bf16.msra.mxu1 %v1916_v2  ;;  %1236 = vmatprep.subr.bf16.mxu0 %v1921_v3 }
 0x10f   : > { %1277 = vmatprep.subr.bf16.mxu1 %v1924_v4 }
 0x111   : > { %1237 = vmatpush1.bf16.msra.mxu0 %v1919_v5 }
 0x112   : > { %1278 = vmatpush1.bf16.msra.mxu1 %v1922_v6 }
 0x114   : > { %1239 = vmatmul.mubr.bf16.vlgmr.msra.gmra.mrb[4].mxu0 %v2463_v7  ;;  %v338_v7 = vld [vmem:[#allocation10 + $0x10] sm:$0xff] }
 0x115   : > { %1280 = vmatmul.mubr.bf16.vlgmr.msra.gmra.mrb[4].mxu1 %v2465_v8 }
 0x1a7   : > { %v1158_v9 = vpop.f32.mrb[0].mxu0 }
 0x1a8   : > { %v1199_v11 = vpop.f32.mrb[0].mxu1  ;;  %v1160_v13 = vpop.f32.mrb[1].mxu0 }
 0x1a9   : > { %v1200_v12 = vadd.f32 %v1199_v11, %v1158_v9  ;;  %v1201_v15 = vpop.f32.mrb[1].mxu1  ;;  %v1162_v17 = vpop.f32.mrb[2].mxu0 }
 0x1aa   : > { %v1202_v16 = vadd.f32 %v1201_v15, %v1160_v13  ;;  %v1203_v18 = vpop.f32.mrb[2].mxu1  ;;  %v1163_v20 = vpop.f32.mrb[3].mxu0 }
 0x1ab   : > { %v1288_v19 = vadd.f32 %v1200_v12, %v336_v10  ;;  %v1204_v21 = vpop.f32.mrb[3].mxu1 }
 0x1ac   : > { %v1289_v22 = vadd.f32 %v1202_v16, %v337_v14 }
 0x1ad   : > { %1292 = vst [vmem:[#allocation10] sm:$0xff] %v1288_v19 }
 0x1ae   : > { %1293 = vst [vmem:[#allocation10 + $0x8] sm:$0xff] %v1289_v22 }
 0x1b4   : > { %v1300_v38 = vld [vmem:[#allocation10] sm:$0xff] (!%p1630_p13) }
 0x1b5   : > { %v1301_v43 = vld [vmem:[#allocation10 + $0x8] sm:$0xff] (!%p1630_p13)  ;;  %v1326_v54 = vadd.f32 (!%p1630_p13), %v1309_v46, %v1300_v38 }
 0x1b6   : > { %v1327_v55 = vadd.f32 (!%p1630_p13), %v1313_v48, %v1301_v43 }
 0x1b7   : > { %v1334_v58 = vadd.f32 (!%p1630_p13), %v1330_v47, %v1326_v54 }
 0x1b8   : > { %v1335_v59 = vadd.f32 (!%p1630_p13), %v1331_v51, %v1327_v55 }
 0x1b9   : > { %v1338_v62 = vmax.f32 (!%p1630_p13), %v1334_v58, 0.0 }
 0x1ba   : > { %v1339_v63 = vmax.f32 (!%p1630_p13), %v1335_v59, 0.0 }
 0x1bb   : > { %1342 = vst [vmem:[#allocation10] sm:$0xff] (!%p1630_p13), %v1338_v62 }
 0x1bc   : > { %1343 = vst [vmem:[#allocation10 + $0x8] sm:$0xff] (!%p1630_p13), %v1339_v63 }
 0x1e7   : > { %v1240_v23 = vpop.f32.mrb[4].mxu0 }
 0x1e8   : > { %v1281_v24 = vpop.f32.mrb[4].mxu1  ;;  %v1242_v25 = vpop.f32.mrb[5].mxu0  ;;  %1299 = sbr.rel (%p1630_p13) target bundleno = 509 (0x1fd), region = 60 }
 0x1e9   : > { %v1282_v8 = vadd.f32 %v1281_v24, %v1240_v23  ;;  %v1283_v27 = vpop.f32.mrb[5].mxu1  ;;  %v1244_v29 = vpop.f32.mrb[6].mxu0 }
 0x1ea   : > { %v1284_v28 = vadd.f32 %v1283_v27, %v1242_v25  ;;  %v1285_v30 = vpop.f32.mrb[6].mxu1  ;;  %v1245_v32 = vpop.f32.mrb[7].mxu0 }
 0x1eb   : > { %v1290_v31 = vadd.f32 %v1282_v8, %v338_v7  ;;  %v1286_v33 = vpop.f32.mrb[7].mxu1 }
 0x1ec   : > { %v1291_v34 = vadd.f32 %v1284_v28, %v339_v26 }
 0x1ed   : > { %1294 = vst [vmem:[#allocation10 + $0x10] sm:$0xff] %v1290_v31 }
 0x1ee   : > { %1295 = vst [vmem:[#allocation10 + $0x18] sm:$0xff] %v1291_v34 }
 0x1f4   : > { %v1302_v44 = vld [vmem:[#allocation10 + $0x10] sm:$0xff] }
 0x1f5   : > { %v1303_v45 = vld [vmem:[#allocation10 + $0x18] sm:$0xff]  ;;  %v1328_v56 = vadd.f32 %v1317_v49, %v1302_v44 }
 0x1f6   : > { %v1329_v57 = vadd.f32 %v1321_v50, %v1303_v45 }
 0x1f7   : > { %v1336_v60 = vadd.f32 %v1332_v52, %v1328_v56 }
 0x1f8   : > { %v1337_v61 = vadd.f32 %v1333_v53, %v1329_v57 }
 0x1f9   : > { %v1340_v0 = vmax.f32 %v1336_v60, 0.0 }
 0x1fa   : > { %v1341_v1 = vmax.f32 %v1337_v61, 0.0 }
 0x1fb   : > { %1344 = vst [vmem:[#allocation10 + $0x10] sm:$0xff] %v1340_v0 }
 0x1fc   : > { %1345 = vst [vmem:[#allocation10 + $0x18] sm:$0xff] %v1341_v1 }
 0x1fd PF: > { %p1673_p2 = scmp.eq.s32.totalorder %s2197_s21, 8  ;;  %s2142_s18 = smov [#allocation10]  }
 0x1fe   : > { %s1358_s22 = sshll.u32 %s2142_s18, 4  ;;  %s1359_s22 = int_to_ptr.vmem [resolvable:$true] %s1358_s22 }
 0x1ff   : > { %s2041_s23 = scalar_lea.vmem %s1359_s22, 512  ;;  %p2048_p8 = scmp.lt.s32.totalorder %s1359_s22, %s1359_s22 }
 0x200   : > { %p2042_p3 = scmp.ne.s32.totalorder %s1359_s22, %s2041_s23  ;;  %p2049_p1 = scmp.lt.s32.totalorder %s2041_s23, %s2041_s23 }
 0x202   : > { %p2043_p0 = pnand %p2042_p3, %p1673_p2  ;;  %p2050_p12 = por %p2049_p1, %p2048_p8 }
 0x204   : > { %p2044_p6 = pneg %p2043_p0 }
 0x206   : > { %p2051_p9 = pnand %p2050_p12, %p2044_p6 }
 0x208   : > { %2054 = shalt.err (!%p2051_p9)
}
 0x209   : > { %s2055_s30 = scalar_lea.hbm %s2580_s4, 512 }
 0x20a   : > { %p2056_p7 = scmp.ne.s32.totalorder %s2580_s4, %s2055_s30  ;;  %p2061_p10 = scmp.lt.u32.totalorder %s2055_s30, %s2580_s4 }
 0x20c   : > { %p2057_p4 = pnand %p2056_p7, %p1673_p2 }
 0x20e   : > { %p2058_p5 = pneg %p2057_p4 }
 0x210   : > { %p2063_p11 = pnand %p2061_p10, %p2058_p5 }
 0x212   : > { %2066 = shalt.err (!%p2063_p11)
}
 0x213   : > { %1651 = dma.vmem_to_hbm [thread:$0]  (%p1673_p2), %s1359_s22, 512, %s2580_s4, [#allocation4]  }
 0x214   : > { %2108 = dma.done.wait (%p1673_p2), [#allocation4], 512  }
 0x215   : > { %2110 = vsyncadd (%p1673_p2), [#allocation4], 4294966784 }
 0x216 PF: > { %s22_s20 = sadd.s32 1, %s2133_s20   ;;  %s2594_s15 = smov %s2117_s16 }
 0x217   : > { %p19_p13 = scmp.ge.s32.totalorder %s22_s20, 11   ;;  %s2595_s16 = smov %s2121_s17 }
 0x218   : > { %s2596_s17 = smov %s2286_s11  ;;  %s2597_s18 = smov %s2129_s19 }
 0x219   : > { %s2598_s19 = smov %s2600_s7  ;;  %21 = sbr.rel (!%p19_p13) target bundleno = 8 (0x8), region = 105 }
 0x220   :  { %1371 = vsyncpa [#allocation3], 1 }
 0x221   :  { %1373 = vsyncpa [#allocation3 + $0x1], 1 }
 0x222   :  { %1374 = vsyncpa [#allocation6], 1 }
 0x223   :  { %1376 = vsyncpa [#allocation6 + $0x1], 1 }
 0x224   :  { %1377 = vsyncpa [#allocation9], 1 }
 0x225   :  { %1378 = vsyncpa [#allocation4], 1 }
 0x226   :  { %1380 = vsyncpa [#allocation4 + $0x1], 1 }

// kernel: e2e_cnn_forward.41
= control target key start
LH: loop header
LB: loop body
LE: loop exit
PB: predicated region body
PF: predicated region fallthrough
CT: control target
= control target key end

     0   :  { %8 = vsyncpa [#allocation3], 0  ;;  %s2428_s0 = inlined_call_operand.hbm [shape: bf16[8,4608], index: 0, kind: input, shape index: {}]   ;;  %s2429_s1 = inlined_call_operand.hbm [shape: bf16[4608,512], index: 1, kind: input, shape index: {}]   ;;  %s2430_s2 = inlined_call_operand.hbm [shape: f32[1,512], index: 2, kind: input, shape index: {}]   ;;  %s2431_s3 = inlined_call_operand.hbm [shape: f32[8,512], index: 3, kind: output, shape index: {}]  }
   0x1   :  { %10 = vsyncpa [#allocation3 + $0x1], 0 }
   0x2   :  { %11 = vsyncpa [#allocation6], 0 }
   0x3   :  { %13 = vsyncpa [#allocation6 + $0x1], 0 }
   0x4   :  { %14 = vsyncpa [#allocation4], 0  ;;  %s2042_s12 = smov 0   ;;  %s2044_s13 = smov 0  }
   0x5   :  { %s2046_s14 = smov 0   ;;  %s2048_s15 = smov 0  }
   0x6   :  { %s2050_s16 = smov 0   ;;  %s2052_s17 = smov 0  }
   0x7 LB: > { %s2071_s18 = sadd.s32 4294967295, %s2013_s17   ;;  %s48_s19 = sadd.s32 1, %s2001_s14  ;;  %s2013_s17 = sphi %s2052_s17, %s20_s17   ;;  %s2009_s16 = sphi %s2050_s16, %s2452_s16   ;;  %s2005_s15 = sphi %s2048_s15, %s2451_s15   ;;  %s2001_s14 = sphi %s2046_s14, %s2450_s14   ;;  %s1997_s13 = sphi %s2044_s13, %s2449_s13   ;;  %s1993_s12 = sphi %s2042_s12, %s2448_s12  }
   0x8   : > { %p55_p0 = scmp.ne.s32.totalorder %s2001_s14, %s1997_s13  ;;  %p61_p1 = scmp.ne.s32.totalorder %s1997_s13, %s1993_s12 }
   0x9   : > { %p2432_p2 = scmp.eq.s32.totalorder %s2071_s18, 0  ;;  %p1405_p3 = scmp.ge.s32.totalorder %s2013_s17, 1 }
   0xa   : > { %p154_p4 = scmp.lt.s32.totalorder %s2013_s17, 10  ;;  %s2015_s22 = smov [#allocation7]  }
   0xb   : > { %p2082_p5 = por %p2432_p2, %p61_p1  ;;  %s170_s23 = sshll.u32 %s2015_s22, 4  ;;  %s171_s23 = int_to_ptr.vmem [resolvable:$true] %s170_s23 }
   0xc   : > { %p2086_p6 = pnand %p1405_p3, %p154_p4  ;;  %p56_p8 = scmp.eq.s32.totalorder %s2013_s17, 0 }
   0xd   : > { %s2435_s20 = scalar_select %p2082_p5, 1, 0 }
   0xe   : > { %s2436_s21 = scalar_select %p2086_p6, 1, 0 }
   0xf   : > { %p1572_p7 = pneg %p2086_p6  ;;  %s32_s25 = sadd.s32 1, %s2009_s16 }
  0x10   : > { %p2100_p10 = scmp.ge.s32.totalorder %s32_s25, 9  ;;  %p2107_p11 = por %p56_p8, %p55_p0 }
  0x11   : > { %p2095_p9 = pnand %p1572_p7, %p2432_p2  ;;  %s1837_s30 = scalar_lea.hbm %s2430_s2, 64 }
  0x12   : > { %s2438_s26 = scalar_select %p2100_p10, 1, 0 }
  0x13   : > { %s2439_s27 = scalar_select %p2107_p11, 1, 0 }
  0x14   : > { %p1838_p13 = scmp.ne.s32.totalorder %s2430_s2, %s1837_s30  ;;  %p1839_p1 = pneg %p2095_p9 }
  0x15   : > { %p1844_p0 = scmp.lt.u32.totalorder %s1837_s30, %s2430_s2 }
  0x16   : > { %p1840_p3 = pnand %p1839_p1, %p1838_p13 }
  0x18   : > { %p1841_p4 = pneg %p1840_p3 }
  0x1a   : > { %p1846_p7 = pnand %p1844_p0, %p1841_p4 }
  0x1c   : > { %1849 = shalt.err (!%p1846_p7)
}
  0x1d   : > { %s1850_s8 = scalar_lea.vmem %s171_s23, 64  ;;  %p1858_p5 = scmp.lt.s32.totalorder %s171_s23, %s171_s23 }
  0x1e   : > { %p1851_p8 = scmp.ne.s32.totalorder %s171_s23, %s1850_s8  ;;  %p1859_p6 = scmp.lt.s32.totalorder %s1850_s8, %s1850_s8 }
  0x20   : > { %p1853_p2 = pnand %p1851_p8, %p1839_p1  ;;  %p1860_p11 = por %p1859_p6, %p1858_p5 }
  0x22   : > { %p1854_p12 = pneg %p1853_p2 }
  0x24   : > { %p1861_p10 = pnand %p1860_p11, %p1854_p12 }
  0x26   : > { %1864 = shalt.err (!%p1861_p10)
}
  0x27   : > { %1575 = dma.hbm_to_vmem [thread:$0]  (!%p2095_p9), %s2430_s2, 64, %s171_s23, [#allocation6]  }
  0x28   : > { %p2440_p2 = scmp.ne.s32.totalorder %s2438_s26, 0  ;;  %s2133_s11 = sand.u32 1, %s2001_s14  }
  0x29   : > { %s1557_s12 = sshll.u32 %s2009_s16, 8  ;;  %s1408_s24 = sshll.u32 %s2133_s11, 4 }
  0x2a   : > { %s2454_s25 = smov (%p2440_p2, %s32_s25), 0  ;;  %s2142_s30 = scalar_lea.hbm %s2428_s0, %s1557_s12 }
  0x2b   : > { %s44_s22 = ssub.s32 %s2009_s16, %s2454_s25  ;;  %s185_s26 = scalar_lea.vmem [#allocation2], %s1408_s24 }
  0x2c   : > { %p46_p5 = scmp.eq.s32.totalorder %s44_s22, 0  ;;  %s195_s4 = sshll.u32 %s185_s26, 4  ;;  %s2157_s4 = int_to_ptr.vmem [resolvable:$true] %s195_s4 }
  0x2d   : > { %p2441_p6 = scmp.ne.s32.totalorder %s2439_s27, 0  ;;  %p2442_p9 = scmp.lt.s32.totalorder %s2013_s17, 9 }
  0x2e   : > { %s2147_s23 = scalar_select %p46_p5, %s2001_s14, %s48_s19  }
  0x2f   : > { %p2153_p10 = pnand %p2442_p9, %p2441_p6  ;;  %s1411_s6 = sshll.u32 %s2133_s11, 10 }
  0x30   : > { %s182_s7 = scalar_lea.sflag [#allocation3], %s2133_s11  ;;  %s1865_s8 = scalar_lea.hbm %s2142_s30, 256 }
  0x31   : > { %p1866_p11 = scmp.ne.s32.totalorder %s2142_s30, %s1865_s8  ;;  %p1867_p12 = pneg %p2153_p10 }
  0x32   : > { %s1870_s9 = scalar_lea.hbm %s2428_s0, 2304  ;;  %p1871_p3 = scmp.lt.u32.totalorder %s2142_s30, %s2428_s0 }
  0x33   : > { %p1868_p13 = pnand %p1867_p12, %p1866_p11  ;;  %p1872_p4 = scmp.lt.u32.totalorder %s1870_s9, %s1865_s8 }
  0x34   : > { %p1874_p7 = scmp.lt.u32.totalorder %s1865_s8, %s2142_s30 }
  0x35   : > { %p1869_p1 = pneg %p1868_p13  ;;  %p1873_p0 = por %p1872_p4, %p1871_p3 }
  0x37   : > { %p1875_p8 = por %p1874_p7, %p1873_p0 }
  0x39   : > { %p1876_p2 = pnand %p1875_p8, %p1869_p1 }
  0x3b   : > { %1879 = shalt.err (!%p1876_p2)
}
  0x3c   : > { %s1880_s22 = scalar_lea.vmem %s2157_s4, 256  ;;  %s2016_s24 = smov [#allocation2]  }
  0x3d   : > { %p1881_p5 = scmp.ne.s32.totalorder %s2157_s4, %s1880_s22  ;;  %s1885_s28 = sshll.u32 %s2016_s24, 4  ;;  %s1886_s28 = int_to_ptr.vmem [resolvable:$false] %s1885_s28 }
  0x3e   : > { %s1887_s29 = scalar_lea.vmem %s1886_s28, 512  ;;  %p1888_p11 = scmp.lt.s32.totalorder %s2157_s4, %s1886_s28 }
  0x3f   : > { %p1883_p6 = pnand %p1881_p5, %p1867_p12  ;;  %p1889_p13 = scmp.lt.s32.totalorder %s1887_s29, %s1880_s22 }
  0x41   : > { %p1884_p9 = pneg %p1883_p6  ;;  %p1890_p3 = por %p1889_p13, %p1888_p11 }
  0x43   : > { %p1891_p4 = pnand %p1890_p3, %p1884_p9 }
  0x45   : > { %1894 = shalt.err (!%p1891_p4)
}
  0x46   : > { %1579 = dma.hbm_to_vmem [thread:$0]  (!%p2153_p10), %s2142_s30, 256, %s2157_s4, %s182_s7  }
  0x47   : > { %s1559_s26 = sshll.u32 %s2009_s16, 14  ;;  %s206_s8 = scalar_lea.vmem [#allocation5], %s1411_s6 }
  0x48   : > { %s216_s19 = sshll.u32 %s206_s8, 4  ;;  %s202_s27 = sand.u32 1, %s2013_s17   ;;  %s2189_s19 = int_to_ptr.vmem [resolvable:$true] %s216_s19 }
  0x49   : > { %s2195_s12 = scalar_lea.hbm %s2429_s1, %s1559_s26  ;;  %s2197_s22 = scalar_lea.sflag [#allocation6], %s202_s27 }
  0x4a   : > { %s1895_s24 = scalar_lea.hbm %s2195_s12, 16384  ;;  %s1900_s4 = scalar_lea.hbm %s2429_s1, 147456 }
  0x4b   : > { %p1896_p1 = scmp.ne.s32.totalorder %s2195_s12, %s1895_s24  ;;  %p1901_p8 = scmp.lt.u32.totalorder %s2195_s12, %s2429_s1 }
  0x4c   : > { %p1902_p2 = scmp.lt.u32.totalorder %s1900_s4, %s1895_s24  ;;  %p1904_p6 = scmp.lt.u32.totalorder %s1895_s24, %s2195_s12 }
  0x4d   : > { %p1898_p0 = pnand %p1896_p1, %p1867_p12 }
  0x4e   : > { %p1903_p5 = por %p1902_p2, %p1901_p8 }
  0x4f   : > { %p1899_p7 = pneg %p1898_p0 }
  0x50   : > { %p1905_p9 = por %p1904_p6, %p1903_p5 }
  0x52   : > { %p1906_p11 = pnand %p1905_p9, %p1899_p7 }
  0x54   : > { %1909 = shalt.err (!%p1906_p11)
}
  0x55   : > { %s1910_s28 = scalar_lea.vmem %s2189_s19, 16384  ;;  %s2017_s29 = smov [#allocation5]  }
  0x56   : > { %p1911_p13 = scmp.ne.s32.totalorder %s2189_s19, %s1910_s28  ;;  %s1915_s26 = sshll.u32 %s2017_s29, 4  ;;  %s1916_s26 = int_to_ptr.vmem [resolvable:$false] %s1915_s26 }
  0x57   : > { %s1917_s8 = scalar_lea.vmem %s1916_s26, 32768  ;;  %p1918_p1 = scmp.lt.s32.totalorder %s2189_s19, %s1916_s26 }
  0x58   : > { %p1913_p3 = pnand %p1911_p13, %p1867_p12  ;;  %p1919_p0 = scmp.lt.s32.totalorder %s1917_s8, %s1910_s28 }
  0x5a   : > { %p1914_p4 = pneg %p1913_p3  ;;  %p1920_p8 = por %p1919_p0, %p1918_p1 }
  0x5c   : > { %p1921_p2 = pnand %p1920_p8, %p1914_p4 }
  0x5e   : > { %1924 = shalt.err (!%p1921_p2)
}
  0x5f   : > { %s2018_s27 = smov 256   ;;  %s2019_s9 = smov 16  }
  0x60   : > { %1582 = dma.hbm_to_vmem [thread:$0]  (!%p2153_p10), %s2195_s12, 16384, %s2189_s19, %s2197_s22, %s2018_s27, %s2018_s27, %s2019_s9  }
  0x61   : > { %p2444_p12 = scmp.ne.s32.totalorder %s2436_s21, 0 }
  0x62   : > { %s230_s10 = sand.u32 (!%p2444_p12), 1, %s1997_s13   ;;  %p2445_p7 = scmp.ne.s32.totalorder (!%p2444_p12), %s2435_s20, 0 }
  0x63   : > { %228 = sbr.rel (%p2444_p12) target bundleno = 507 (0x1fb), region = 32  ;;  %s1416_s24 = sshll.u32 (!%p2444_p12), %s230_s10, 4 }
  0x64   : > { %s231_s11 = scalar_lea.sflag (!%p2444_p12), [#allocation3], %s230_s10  ;;  %s2226_s30 = scalar_lea.vmem (!%p2444_p12), [#allocation2], %s1416_s24 }
  0x6a   : > { %1976 = dma.done.wait (%p2445_p7), %s231_s11, 256  }
  0x6b   : > { %1978 = vsyncadd (%p2445_p7), %s231_s11, 4294967040  ;;  %s239_s4 = sand.u32 1, %s2071_s18   ;;  %s1417_s5 = sshll.u32 %s230_s10, 10 }
  0x6c   : > { %s240_s19 = scalar_lea.sflag [#allocation6], %s239_s4  ;;  %s2233_s12 = scalar_lea.vmem [#allocation5], %s1417_s5 }
  0x6d   : > { %1980 = dma.done.wait (%p2445_p7), %s240_s19, 16384  }
  0x6e   : > { %1982 = vsyncadd (%p2445_p7), %s240_s19, 4294950912  ;;  %p2446_p10 = scmp.eq.s32.totalorder %s2071_s18, 0 }
  0x70   : > { %1984 = dma.done.wait (%p2446_p10), [#allocation6], 64   ;;  %p2447_p5 = pmov %p2446_p10 }
  0x71   : > { %p1419_p6 = scmp.ne.s32.totalorder %s2005_s15, 0 }
  0x72   : > { %1986 = vsyncadd (%p2447_p5), [#allocation6], 4294967232  ;;  %v2020_v0 = vmov (!%p1419_p6), 0.0  }
  0x73   : > { %278 = sbr.rel (%p1419_p6) target bundleno = 122 (0x7a), region = 48  ;;  %279 = vst [vmem:[#allocation8] sm:$0xff] (!%p1419_p6), %v2020_v0  ;;  %280 = vst [vmem:[#allocation8 + $0x8] sm:$0xff] (!%p1419_p6), %v2020_v0 }
  0x74   : > { %281 = vst [vmem:[#allocation8 + $0x10] sm:$0xff] (!%p1419_p6), %v2020_v0  ;;  %282 = vst [vmem:[#allocation8 + $0x18] sm:$0xff] (!%p1419_p6), %v2020_v0 }
  0x7a PF: > { %v1641_v1 = vld [vmem:[%s2233_s12 + $0x4] ss:$16 sps:$4 sm:$0xff]   ;;  %v1645_v3 = vld [vmem:[%s2233_s12] ss:$16 sps:$4 sm:$0xff]   ;;  %v288_v49 = vld [vmem:[%s2226_s30 + $0x8] sm:$0xff]  ;;  %p1552_p9 = scmp.ne.s32.totalorder %s2005_s15, 8 }
  0x7b   : > { %v1643_v2 = vld [vmem:[%s2233_s12 + $0x204] ss:$16 sps:$4 sm:$0xff]   ;;  %1071 = vmatprep.subr.bf16.mxu0 %v1641_v1  ;;  %v1646_v4 = vld [vmem:[%s2233_s12 + $0x200] ss:$16 sps:$4 sm:$0xff]   ;;  %v1423_v52 = vcombine.high %v288_v49, %v288_v49 }
  0x7c   : > { %1112 = vmatprep.subr.bf16.mxu1 %v1643_v2  ;;  %v1647_v5 = vld [vmem:[%s2233_s12 + $0x24] ss:$16 sps:$4 sm:$0xff]   ;;  %1072 = vmatpush1.bf16.msra.mxu0 %v1645_v3  ;;  %v1651_v7 = vld [vmem:[%s2233_s12 + $0x20] ss:$16 sps:$4 sm:$0xff]  }
  0x7d   : > { %1113 = vmatpush1.bf16.msra.mxu1 %v1646_v4  ;;  %v1649_v6 = vld [vmem:[%s2233_s12 + $0x224] ss:$16 sps:$4 sm:$0xff]   ;;  %1073 = vmatprep.subr.bf16.mxu0 %v1647_v5  ;;  %v1652_v8 = vld [vmem:[%s2233_s12 + $0x220] ss:$16 sps:$4 sm:$0xff]   ;;  %v1743_v5 = vld [vmem:[%s2233_s12 + $0xc] ss:$16 sps:$4 sm:$0xff]  }
  0x7e   : > { %1114 = vmatprep.subr.bf16.mxu1 %v1649_v6  ;;  %v1653_v9 = vld [vmem:[%s2233_s12 + $0x44] ss:$16 sps:$4 sm:$0xff]   ;;  %v1657_v11 = vld [vmem:[%s2233_s12 + $0x40] ss:$16 sps:$4 sm:$0xff]   ;;  %1144 = vmatprep.mubr.bf16.mxu1 %v1423_v52  ;;  %v1746_v6 = vld [vmem:[%s2233_s12 + $0x20c] ss:$16 sps:$4 sm:$0xff]  }
  0x7f   : > { %v1655_v10 = vld [vmem:[%s2233_s12 + $0x244] ss:$16 sps:$4 sm:$0xff]   ;;  %v1658_v12 = vld [vmem:[%s2233_s12 + $0x240] ss:$16 sps:$4 sm:$0xff]  }
  0x80   : > { %1074 = vmatpush1.bf16.msra.mxu0 %v1651_v7  ;;  %v1659_v13 = vld [vmem:[%s2233_s12 + $0x64] ss:$16 sps:$4 sm:$0xff]   ;;  %v1663_v15 = vld [vmem:[%s2233_s12 + $0x60] ss:$16 sps:$4 sm:$0xff]  }
  0x81   : > { %1115 = vmatpush1.bf16.msra.mxu1 %v1652_v8  ;;  %1075 = vmatprep.subr.bf16.mxu0 %v1653_v9  ;;  %v1661_v14 = vld [vmem:[%s2233_s12 + $0x264] ss:$16 sps:$4 sm:$0xff]   ;;  %v1664_v16 = vld [vmem:[%s2233_s12 + $0x260] ss:$16 sps:$4 sm:$0xff]   ;;  %v2317_v8 = vcombine.low %v288_v49, %v288_v49  ;;  %v1741_v9 = vld [vmem:[%s2233_s12 + $0x8] ss:$16 sps:$4 sm:$0xff]  }
  0x82   : > { %1116 = vmatprep.subr.bf16.mxu1 %v1655_v10  ;;  %v1665_v17 = vld [vmem:[%s2233_s12 + $0x84] ss:$16 sps:$4 sm:$0xff]   ;;  %v1669_v19 = vld [vmem:[%s2233_s12 + $0x80] ss:$16 sps:$4 sm:$0xff]   ;;  %v1744_v10 = vld [vmem:[%s2233_s12 + $0x208] ss:$16 sps:$4 sm:$0xff]  }
  0x83   : > { %v1667_v18 = vld [vmem:[%s2233_s12 + $0x284] ss:$16 sps:$4 sm:$0xff]   ;;  %v1670_v20 = vld [vmem:[%s2233_s12 + $0x280] ss:$16 sps:$4 sm:$0xff]   ;;  %v1801_v49 = vld [vmem:[%s2233_s12 + $0x148] ss:$16 sps:$4 sm:$0xff]  }
  0x84   : > { %1076 = vmatpush1.bf16.msra.mxu0 %v1657_v11  ;;  %v1671_v21 = vld [vmem:[%s2233_s12 + $0xa4] ss:$16 sps:$4 sm:$0xff]   ;;  %v1675_v23 = vld [vmem:[%s2233_s12 + $0xa0] ss:$16 sps:$4 sm:$0xff]   ;;  %v1749_v11 = vld [vmem:[%s2233_s12 + $0x2c] ss:$16 sps:$4 sm:$0xff]  }
  0x85   : > { %1117 = vmatpush1.bf16.msra.mxu1 %v1658_v12  ;;  %1077 = vmatprep.subr.bf16.mxu0 %v1659_v13  ;;  %v1673_v22 = vld [vmem:[%s2233_s12 + $0x2a4] ss:$16 sps:$4 sm:$0xff]   ;;  %v1676_v24 = vld [vmem:[%s2233_s12 + $0x2a0] ss:$16 sps:$4 sm:$0xff]   ;;  %v1752_v12 = vld [vmem:[%s2233_s12 + $0x22c] ss:$16 sps:$4 sm:$0xff]  }
  0x86   : > { %1118 = vmatprep.subr.bf16.mxu1 %v1661_v14  ;;  %v1677_v25 = vld [vmem:[%s2233_s12 + $0xc4] ss:$16 sps:$4 sm:$0xff]   ;;  %v1681_v27 = vld [vmem:[%s2233_s12 + $0xc0] ss:$16 sps:$4 sm:$0xff]   ;;  %v1747_v13 = vld [vmem:[%s2233_s12 + $0x28] ss:$16 sps:$4 sm:$0xff]  }
  0x87   : > { %v1679_v26 = vld [vmem:[%s2233_s12 + $0x2c4] ss:$16 sps:$4 sm:$0xff]   ;;  %v1682_v28 = vld [vmem:[%s2233_s12 + $0x2c0] ss:$16 sps:$4 sm:$0xff]   ;;  %v1750_v14 = vld [vmem:[%s2233_s12 + $0x228] ss:$16 sps:$4 sm:$0xff]  }
  0x88   : > { %1078 = vmatpush1.bf16.msra.mxu0 %v1663_v15  ;;  %v1683_v29 = vld [vmem:[%s2233_s12 + $0xe4] ss:$16 sps:$4 sm:$0xff]   ;;  %v1687_v31 = vld [vmem:[%s2233_s12 + $0xe0] ss:$16 sps:$4 sm:$0xff]   ;;  %v1755_v15 = vld [vmem:[%s2233_s12 + $0x4c] ss:$16 sps:$4 sm:$0xff]  }
  0x89   : > { %1119 = vmatpush1.bf16.msra.mxu1 %v1664_v16  ;;  %1079 = vmatprep.subr.bf16.mxu0 %v1665_v17  ;;  %v1685_v30 = vld [vmem:[%s2233_s12 + $0x2e4] ss:$16 sps:$4 sm:$0xff]   ;;  %v1688_v32 = vld [vmem:[%s2233_s12 + $0x2e0] ss:$16 sps:$4 sm:$0xff]   ;;  %v1758_v16 = vld [vmem:[%s2233_s12 + $0x24c] ss:$16 sps:$4 sm:$0xff]  }
  0x8a   : > { %1120 = vmatprep.subr.bf16.mxu1 %v1667_v18  ;;  %v1689_v33 = vld [vmem:[%s2233_s12 + $0x104] ss:$16 sps:$4 sm:$0xff]   ;;  %v1693_v35 = vld [vmem:[%s2233_s12 + $0x100] ss:$16 sps:$4 sm:$0xff]   ;;  %v1753_v17 = vld [vmem:[%s2233_s12 + $0x48] ss:$16 sps:$4 sm:$0xff]  }
  0x8b   : > { %v1691_v34 = vld [vmem:[%s2233_s12 + $0x304] ss:$16 sps:$4 sm:$0xff]   ;;  %v1694_v36 = vld [vmem:[%s2233_s12 + $0x300] ss:$16 sps:$4 sm:$0xff]   ;;  %v1756_v18 = vld [vmem:[%s2233_s12 + $0x248] ss:$16 sps:$4 sm:$0xff]  }
  0x8c   : > { %1080 = vmatpush1.bf16.msra.mxu0 %v1669_v19  ;;  %v1695_v37 = vld [vmem:[%s2233_s12 + $0x124] ss:$16 sps:$4 sm:$0xff]   ;;  %v1699_v39 = vld [vmem:[%s2233_s12 + $0x120] ss:$16 sps:$4 sm:$0xff]   ;;  %v1761_v19 = vld [vmem:[%s2233_s12 + $0x6c] ss:$16 sps:$4 sm:$0xff]  }
  0x8d   : > { %1121 = vmatpush1.bf16.msra.mxu1 %v1670_v20  ;;  %1081 = vmatprep.subr.bf16.mxu0 %v1671_v21  ;;  %v1697_v38 = vld [vmem:[%s2233_s12 + $0x324] ss:$16 sps:$4 sm:$0xff]   ;;  %v1700_v40 = vld [vmem:[%s2233_s12 + $0x320] ss:$16 sps:$4 sm:$0xff]   ;;  %v1764_v20 = vld [vmem:[%s2233_s12 + $0x26c] ss:$16 sps:$4 sm:$0xff]  }
  0x8e   : > { %1122 = vmatprep.subr.bf16.mxu1 %v1673_v22  ;;  %v1701_v41 = vld [vmem:[%s2233_s12 + $0x144] ss:$16 sps:$4 sm:$0xff]   ;;  %v1705_v43 = vld [vmem:[%s2233_s12 + $0x140] ss:$16 sps:$4 sm:$0xff]   ;;  %v1759_v21 = vld [vmem:[%s2233_s12 + $0x68] ss:$16 sps:$4 sm:$0xff]  }
  0x8f   : > { %v1703_v42 = vld [vmem:[%s2233_s12 + $0x344] ss:$16 sps:$4 sm:$0xff]   ;;  %v1706_v44 = vld [vmem:[%s2233_s12 + $0x340] ss:$16 sps:$4 sm:$0xff]   ;;  %v1762_v22 = vld [vmem:[%s2233_s12 + $0x268] ss:$16 sps:$4 sm:$0xff]  }
  0x90   : > { %1082 = vmatpush1.bf16.msra.mxu0 %v1675_v23  ;;  %v1707_v45 = vld [vmem:[%s2233_s12 + $0x164] ss:$16 sps:$4 sm:$0xff]   ;;  %v1711_v50 = vld [vmem:[%s2233_s12 + $0x160] ss:$16 sps:$4 sm:$0xff]   ;;  %v1767_v23 = vld [vmem:[%s2233_s12 + $0x8c] ss:$16 sps:$4 sm:$0xff]  }
  0x91   : > { %1123 = vmatpush1.bf16.msra.mxu1 %v1676_v24  ;;  %1083 = vmatprep.subr.bf16.mxu0 %v1677_v25  ;;  %v1709_v46 = vld [vmem:[%s2233_s12 + $0x364] ss:$16 sps:$4 sm:$0xff]   ;;  %v1712_v51 = vld [vmem:[%s2233_s12 + $0x360] ss:$16 sps:$4 sm:$0xff]   ;;  %v1770_v24 = vld [vmem:[%s2233_s12 + $0x28c] ss:$16 sps:$4 sm:$0xff]  }
  0x92   : > { %1124 = vmatprep.subr.bf16.mxu1 %v1679_v26  ;;  %v287_v47 = vld [vmem:[%s2226_s30] sm:$0xff]  ;;  %v1765_v25 = vld [vmem:[%s2233_s12 + $0x88] ss:$16 sps:$4 sm:$0xff]  }
  0x93   : > { %v2291_v48 = vcombine.high %v287_v47, %v287_v47  ;;  %v1713_v53 = vld [vmem:[%s2233_s12 + $0x184] ss:$16 sps:$4 sm:$0xff]   ;;  %v1717_v55 = vld [vmem:[%s2233_s12 + $0x180] ss:$16 sps:$4 sm:$0xff]   ;;  %v2315_v7 = vcombine.low %v287_v47, %v287_v47  ;;  %v1768_v26 = vld [vmem:[%s2233_s12 + $0x288] ss:$16 sps:$4 sm:$0xff]  }
  0x94   : > { %1084 = vmatpush1.bf16.msra.mxu0 %v1681_v27  ;;  %v1715_v54 = vld [vmem:[%s2233_s12 + $0x384] ss:$16 sps:$4 sm:$0xff]   ;;  %v1718_v56 = vld [vmem:[%s2233_s12 + $0x380] ss:$16 sps:$4 sm:$0xff]   ;;  %v1773_v27 = vld [vmem:[%s2233_s12 + $0xac] ss:$16 sps:$4 sm:$0xff]  }
  0x95   : > { %1125 = vmatpush1.bf16.msra.mxu1 %v1682_v28  ;;  %1085 = vmatprep.subr.bf16.mxu0 %v1683_v29  ;;  %v1719_v57 = vld [vmem:[%s2233_s12 + $0x1a4] ss:$16 sps:$4 sm:$0xff]   ;;  %v1723_v59 = vld [vmem:[%s2233_s12 + $0x1a0] ss:$16 sps:$4 sm:$0xff]   ;;  %v1776_v28 = vld [vmem:[%s2233_s12 + $0x2ac] ss:$16 sps:$4 sm:$0xff]  }
  0x96   : > { %1126 = vmatprep.subr.bf16.mxu1 %v1685_v30  ;;  %1103 = vmatprep.mubr.bf16.mxu0 %v2291_v48  ;;  %v1721_v58 = vld [vmem:[%s2233_s12 + $0x3a4] ss:$16 sps:$4 sm:$0xff]   ;;  %v1724_v60 = vld [vmem:[%s2233_s12 + $0x3a0] ss:$16 sps:$4 sm:$0xff]   ;;  %v1771_v29 = vld [vmem:[%s2233_s12 + $0xa8] ss:$16 sps:$4 sm:$0xff]  }
  0x97   : > { %v1725_v61 = vld [vmem:[%s2233_s12 + $0x1c4] ss:$16 sps:$4 sm:$0xff]   ;;  %v1729_v63 = vld [vmem:[%s2233_s12 + $0x1c0] ss:$16 sps:$4 sm:$0xff]   ;;  %v1774_v30 = vld [vmem:[%s2233_s12 + $0x2a8] ss:$16 sps:$4 sm:$0xff]  }
  0x98   : > { %1086 = vmatpush1.bf16.msra.mxu0 %v1687_v31  ;;  %v1727_v62 = vld [vmem:[%s2233_s12 + $0x3c4] ss:$16 sps:$4 sm:$0xff]   ;;  %v1730_v0 = vld [vmem:[%s2233_s12 + $0x3c0] ss:$16 sps:$4 sm:$0xff]   ;;  %v1779_v31 = vld [vmem:[%s2233_s12 + $0xcc] ss:$16 sps:$4 sm:$0xff]  }
  0x99   : > { %1127 = vmatpush1.bf16.msra.mxu1 %v1688_v32  ;;  %1087 = vmatprep.subr.bf16.mxu0 %v1689_v33  ;;  %v1731_v1 = vld [vmem:[%s2233_s12 + $0x1e4] ss:$16 sps:$4 sm:$0xff]   ;;  %v1735_v3 = vld [vmem:[%s2233_s12 + $0x1e0] ss:$16 sps:$4 sm:$0xff]   ;;  %v1782_v32 = vld [vmem:[%s2233_s12 + $0x2cc] ss:$16 sps:$4 sm:$0xff]  }
  0x9a   : > { %1128 = vmatprep.subr.bf16.mxu1 %v1691_v34  ;;  %v1733_v2 = vld [vmem:[%s2233_s12 + $0x3e4] ss:$16 sps:$4 sm:$0xff]   ;;  %v1736_v4 = vld [vmem:[%s2233_s12 + $0x3e0] ss:$16 sps:$4 sm:$0xff]   ;;  %v1777_v33 = vld [vmem:[%s2233_s12 + $0xc8] ss:$16 sps:$4 sm:$0xff]  }
  0x9b   : > { %v1780_v34 = vld [vmem:[%s2233_s12 + $0x2c8] ss:$16 sps:$4 sm:$0xff]   ;;  %v1803_v47 = vld [vmem:[%s2233_s12 + $0x14c] ss:$16 sps:$4 sm:$0xff]  }
  0x9c   : > { %1088 = vmatpush1.bf16.msra.mxu0 %v1693_v35  ;;  %v1785_v35 = vld [vmem:[%s2233_s12 + $0xec] ss:$16 sps:$4 sm:$0xff]  }
  0x9d   : > { %1129 = vmatpush1.bf16.msra.mxu1 %v1694_v36  ;;  %1089 = vmatprep.subr.bf16.mxu0 %v1695_v37  ;;  %v1788_v36 = vld [vmem:[%s2233_s12 + $0x2ec] ss:$16 sps:$4 sm:$0xff]   ;;  %v1783_v37 = vld [vmem:[%s2233_s12 + $0xe8] ss:$16 sps:$4 sm:$0xff]  }
  0x9e   : > { %1130 = vmatprep.subr.bf16.mxu1 %v1697_v38  ;;  %v1786_v38 = vld [vmem:[%s2233_s12 + $0x2e8] ss:$16 sps:$4 sm:$0xff]  }
  0xa0   : > { %1090 = vmatpush1.bf16.msra.mxu0 %v1699_v39  ;;  %v1791_v39 = vld [vmem:[%s2233_s12 + $0x10c] ss:$16 sps:$4 sm:$0xff]  }
  0xa1   : > { %1131 = vmatpush1.bf16.msra.mxu1 %v1700_v40  ;;  %1091 = vmatprep.subr.bf16.mxu0 %v1701_v41  ;;  %v1794_v40 = vld [vmem:[%s2233_s12 + $0x30c] ss:$16 sps:$4 sm:$0xff]   ;;  %v1789_v41 = vld [vmem:[%s2233_s12 + $0x108] ss:$16 sps:$4 sm:$0xff]  }
  0xa2   : > { %1132 = vmatprep.subr.bf16.mxu1 %v1703_v42  ;;  %v1792_v42 = vld [vmem:[%s2233_s12 + $0x308] ss:$16 sps:$4 sm:$0xff]  }
  0xa4   : > { %1092 = vmatpush1.bf16.msra.mxu0 %v1705_v43  ;;  %v1797_v43 = vld [vmem:[%s2233_s12 + $0x12c] ss:$16 sps:$4 sm:$0xff]  }
  0xa5   : > { %1133 = vmatpush1.bf16.msra.mxu1 %v1706_v44  ;;  %1093 = vmatprep.subr.bf16.mxu0 %v1707_v45  ;;  %v1800_v44 = vld [vmem:[%s2233_s12 + $0x32c] ss:$16 sps:$4 sm:$0xff]   ;;  %v1795_v45 = vld [vmem:[%s2233_s12 + $0x128] ss:$16 sps:$4 sm:$0xff]  }
  0xa6   : > { %1134 = vmatprep.subr.bf16.mxu1 %v1709_v46  ;;  %v1798_v46 = vld [vmem:[%s2233_s12 + $0x328] ss:$16 sps:$4 sm:$0xff]  }
  0xa8   : > { %1094 = vmatpush1.bf16.msra.mxu0 %v1711_v50  ;;  %v1804_v50 = vld [vmem:[%s2233_s12 + $0x348] ss:$16 sps:$4 sm:$0xff]  }
  0xa9   : > { %1135 = vmatpush1.bf16.msra.mxu1 %v1712_v51  ;;  %1095 = vmatprep.subr.bf16.mxu0 %v1713_v53  ;;  %v1809_v51 = vld [vmem:[%s2233_s12 + $0x16c] ss:$16 sps:$4 sm:$0xff]   ;;  %v1807_v53 = vld [vmem:[%s2233_s12 + $0x168] ss:$16 sps:$4 sm:$0xff]  }
  0xaa   : > { %1136 = vmatprep.subr.bf16.mxu1 %v1715_v54  ;;  %v1810_v54 = vld [vmem:[%s2233_s12 + $0x368] ss:$16 sps:$4 sm:$0xff]  }
  0xac   : > { %1096 = vmatpush1.bf16.msra.mxu0 %v1717_v55  ;;  %v1815_v55 = vld [vmem:[%s2233_s12 + $0x18c] ss:$16 sps:$4 sm:$0xff]  }
  0xad   : > { %1137 = vmatpush1.bf16.msra.mxu1 %v1718_v56  ;;  %1097 = vmatprep.subr.bf16.mxu0 %v1719_v57  ;;  %v1818_v56 = vld [vmem:[%s2233_s12 + $0x38c] ss:$16 sps:$4 sm:$0xff]   ;;  %v1813_v57 = vld [vmem:[%s2233_s12 + $0x188] ss:$16 sps:$4 sm:$0xff]  }
  0xae   : > { %1138 = vmatprep.subr.bf16.mxu1 %v1721_v58  ;;  %v1816_v58 = vld [vmem:[%s2233_s12 + $0x388] ss:$16 sps:$4 sm:$0xff]  }
  0xb0   : > { %1098 = vmatpush1.bf16.msra.mxu0 %v1723_v59  ;;  %v1821_v59 = vld [vmem:[%s2233_s12 + $0x1ac] ss:$16 sps:$4 sm:$0xff]  }
  0xb1   : > { %1139 = vmatpush1.bf16.msra.mxu1 %v1724_v60  ;;  %1099 = vmatprep.subr.bf16.mxu0 %v1725_v61  ;;  %v1824_v60 = vld [vmem:[%s2233_s12 + $0x3ac] ss:$16 sps:$4 sm:$0xff]   ;;  %v1819_v61 = vld [vmem:[%s2233_s12 + $0x1a8] ss:$16 sps:$4 sm:$0xff]  }
  0xb2   : > { %1140 = vmatprep.subr.bf16.mxu1 %v1727_v62  ;;  %v1822_v62 = vld [vmem:[%s2233_s12 + $0x3a8] ss:$16 sps:$4 sm:$0xff]  }
  0xb4   : > { %1100 = vmatpush1.bf16.msra.mxu0 %v1729_v63  ;;  %v1827_v63 = vld [vmem:[%s2233_s12 + $0x1cc] ss:$16 sps:$4 sm:$0xff]  }
  0xb5   : > { %1141 = vmatpush1.bf16.msra.mxu1 %v1730_v0  ;;  %1101 = vmatprep.subr.bf16.mxu0 %v1731_v1  ;;  %v1830_v0 = vld [vmem:[%s2233_s12 + $0x3cc] ss:$16 sps:$4 sm:$0xff]   ;;  %v1825_v1 = vld [vmem:[%s2233_s12 + $0x1c8] ss:$16 sps:$4 sm:$0xff]  }
  0xb6   : > { %1142 = vmatprep.subr.bf16.mxu1 %v1733_v2  ;;  %v1828_v2 = vld [vmem:[%s2233_s12 + $0x3c8] ss:$16 sps:$4 sm:$0xff]  }
  0xb8   : > { %1102 = vmatpush1.bf16.msra.mxu0 %v1735_v3  ;;  %v1833_v3 = vld [vmem:[%s2233_s12 + $0x1ec] ss:$16 sps:$4 sm:$0xff]  }
  0xb9   : > { %1143 = vmatpush1.bf16.msra.mxu1 %v1736_v4  ;;  %1153 = vmatprep.subr.bf16.mxu0 %v1743_v5  ;;  %v1836_v4 = vld [vmem:[%s2233_s12 + $0x3ec] ss:$16 sps:$4 sm:$0xff]   ;;  %v1831_v5 = vld [vmem:[%s2233_s12 + $0x1e8] ss:$16 sps:$4 sm:$0xff]  }
  0xba   : > { %1194 = vmatprep.subr.bf16.mxu1 %v1746_v6  ;;  %v1834_v6 = vld [vmem:[%s2233_s12 + $0x3e8] ss:$16 sps:$4 sm:$0xff]  }
  0xbb   : > { %1104 = vmatmul.mubr.bf16.vlgmr.msra.gmra.mrb[0].mxu0 %v2315_v7 }
  0xbc   : > { %1145 = vmatmul.mubr.bf16.vlgmr.msra.gmra.mrb[0].mxu1 %v2317_v8  ;;  %1154 = vmatpush1.bf16.msra.mxu0 %v1741_v9 }
  0xbd   : > { %1195 = vmatpush1.bf16.msra.mxu1 %v1744_v10  ;;  %1155 = vmatprep.subr.bf16.mxu0 %v1749_v11  ;;  %v283_v10 = vld [vmem:[#allocation8] sm:$0xff] }
  0xbe   : > { %1196 = vmatprep.subr.bf16.mxu1 %v1752_v12  ;;  %1185 = vmatprep.mubr.bf16.mxu0 %v2291_v48  ;;  %v1806_v48 = vld [vmem:[%s2233_s12 + $0x34c] ss:$16 sps:$4 sm:$0xff]  }
  0xbf   : > { %1226 = vmatprep.mubr.bf16.mxu1 %v1423_v52  ;;  %v1812_v52 = vld [vmem:[%s2233_s12 + $0x36c] ss:$16 sps:$4 sm:$0xff]  }
  0xc0   : > { %1156 = vmatpush1.bf16.msra.mxu0 %v1747_v13 }
  0xc1   : > { %1197 = vmatpush1.bf16.msra.mxu1 %v1750_v14  ;;  %1157 = vmatprep.subr.bf16.mxu0 %v1755_v15  ;;  %v284_v14 = vld [vmem:[#allocation8 + $0x8] sm:$0xff] }
  0xc2   : > { %1198 = vmatprep.subr.bf16.mxu1 %v1758_v16 }
  0xc4   : > { %1158 = vmatpush1.bf16.msra.mxu0 %v1753_v17 }
  0xc5   : > { %1199 = vmatpush1.bf16.msra.mxu1 %v1756_v18  ;;  %1159 = vmatprep.subr.bf16.mxu0 %v1761_v19 }
  0xc6   : > { %1200 = vmatprep.subr.bf16.mxu1 %v1764_v20 }
  0xc8   : > { %1160 = vmatpush1.bf16.msra.mxu0 %v1759_v21 }
  0xc9   : > { %1201 = vmatpush1.bf16.msra.mxu1 %v1762_v22  ;;  %1161 = vmatprep.subr.bf16.mxu0 %v1767_v23 }
  0xca   : > { %1202 = vmatprep.subr.bf16.mxu1 %v1770_v24 }
  0xcc   : > { %1162 = vmatpush1.bf16.msra.mxu0 %v1765_v25 }
  0xcd   : > { %1203 = vmatpush1.bf16.msra.mxu1 %v1768_v26  ;;  %1163 = vmatprep.subr.bf16.mxu0 %v1773_v27  ;;  %v286_v26 = vld [vmem:[#allocation8 + $0x18] sm:$0xff] }
  0xce   : > { %1204 = vmatprep.subr.bf16.mxu1 %v1776_v28 }
  0xd0   : > { %1164 = vmatpush1.bf16.msra.mxu0 %v1771_v29 }
  0xd1   : > { %1205 = vmatpush1.bf16.msra.mxu1 %v1774_v30  ;;  %1165 = vmatprep.subr.bf16.mxu0 %v1779_v31 }
  0xd2   : > { %1206 = vmatprep.subr.bf16.mxu1 %v1782_v32 }
  0xd4   : > { %1166 = vmatpush1.bf16.msra.mxu0 %v1777_v33 }
  0xd5   : > { %1207 = vmatpush1.bf16.msra.mxu1 %v1780_v34  ;;  %1167 = vmatprep.subr.bf16.mxu0 %v1785_v35  ;;  %v1253_v35 = vlaneseq (!%p1552_p9) }
  0xd6   : > { %1208 = vmatprep.subr.bf16.mxu1 %v1788_v36 }
  0xd7   : > { %v1254_v36 = vshrl.u32 (!%p1552_p9), %v1253_v35, 7 }
  0xd8   : > { %1168 = vmatpush1.bf16.msra.mxu0 %v1783_v37  ;;  %v1251_v37 = vld [vmem:[#allocation7] sm:$0xf] (!%p1552_p9) }
  0xd9   : > { %1209 = vmatpush1.bf16.msra.mxu1 %v1786_v38  ;;  %1169 = vmatprep.subr.bf16.mxu0 %v1791_v39  ;;  %v1255_v39 = vsub.s32 (!%p1552_p9), 0, %v1254_v36 }
  0xda   : > { %1210 = vmatprep.subr.bf16.mxu1 %v1794_v40  ;;  %v1259_v40 = vsub.s32 (!%p1552_p9), 1, %v1254_v36 }
  0xdc   : > { %1170 = vmatpush1.bf16.msra.mxu0 %v1789_v41  ;;  %v1263_v41 = vsub.s32 (!%p1552_p9), 2, %v1254_v36 }
  0xdd   : > { %1211 = vmatpush1.bf16.msra.mxu1 %v1792_v42  ;;  %1171 = vmatprep.subr.bf16.mxu0 %v1797_v43  ;;  %v1267_v42 = vsub.s32 (!%p1552_p9), 3, %v1254_v36 }
  0xde   : > { %1212 = vmatprep.subr.bf16.mxu1 %v1800_v44 }
  0xe0   : > { %1172 = vmatpush1.bf16.msra.mxu0 %v1795_v45 }
  0xe1   : > { %1213 = vmatpush1.bf16.msra.mxu1 %v1798_v46  ;;  %1173 = vmatprep.subr.bf16.mxu0 %v1803_v47  ;;  %v1256_v46 = vrot.slane (!%p1552_p9), %v1251_v37, %v1255_v39  ;;  %v1260_v47 = vrot.slane (!%p1552_p9), %v1251_v37, %v1259_v40 }
  0xe2   : > { %1214 = vmatprep.subr.bf16.mxu1 %v1806_v48  ;;  %v1264_v48 = vrot.slane (!%p1552_p9), %v1251_v37, %v1263_v41 }
  0xe4   : > { %1174 = vmatpush1.bf16.msra.mxu0 %v1801_v49  ;;  %v1268_v49 = vrot.slane (!%p1552_p9), %v1251_v37, %v1267_v42 }
  0xe5   : > { %1215 = vmatpush1.bf16.msra.mxu1 %v1804_v50  ;;  %1175 = vmatprep.subr.bf16.mxu0 %v1809_v51 }
  0xe6   : > { %1216 = vmatprep.subr.bf16.mxu1 %v1812_v52 }
  0xe8   : > { %1176 = vmatpush1.bf16.msra.mxu0 %v1807_v53 }
  0xe9   : > { %1217 = vmatpush1.bf16.msra.mxu1 %v1810_v54  ;;  %1177 = vmatprep.subr.bf16.mxu0 %v1815_v55 }
  0xea   : > { %1218 = vmatprep.subr.bf16.mxu1 %v1818_v56 }
  0xec   : > { %1178 = vmatpush1.bf16.msra.mxu0 %v1813_v57 }
  0xed   : > { %1219 = vmatpush1.bf16.msra.mxu1 %v1816_v58  ;;  %1179 = vmatprep.subr.bf16.mxu0 %v1821_v59 }
  0xee   : > { %1220 = vmatprep.subr.bf16.mxu1 %v1824_v60 }
  0xf0   : > { %1180 = vmatpush1.bf16.msra.mxu0 %v1819_v61 }
  0xf1   : > { %1221 = vmatpush1.bf16.msra.mxu1 %v1822_v62  ;;  %1181 = vmatprep.subr.bf16.mxu0 %v1827_v63 }
  0xf2   : > { %1222 = vmatprep.subr.bf16.mxu1 %v1830_v0 }
  0xf4   : > { %1182 = vmatpush1.bf16.msra.mxu0 %v1825_v1 }
  0xf5   : > { %1223 = vmatpush1.bf16.msra.mxu1 %v1828_v2  ;;  %1183 = vmatprep.subr.bf16.mxu0 %v1833_v3 }
  0xf6   : > { %1224 = vmatprep.subr.bf16.mxu1 %v1836_v4 }
  0xf8   : > { %1184 = vmatpush1.bf16.msra.mxu0 %v1831_v5 }
  0xf9   : > { %1225 = vmatpush1.bf16.msra.mxu1 %v1834_v6 }
  0xfb   : > { %1186 = vmatmul.mubr.bf16.vlgmr.msra.gmra.mrb[4].mxu0 %v2315_v7  ;;  %v285_v7 = vld [vmem:[#allocation8 + $0x10] sm:$0xff] }
  0xfc   : > { %1227 = vmatmul.mubr.bf16.vlgmr.msra.gmra.mrb[4].mxu1 %v2317_v8 }
 0x18e   : > { %v1105_v9 = vpop.f32.mrb[0].mxu0 }
 0x18f   : > { %v1146_v11 = vpop.f32.mrb[0].mxu1  ;;  %v1107_v13 = vpop.f32.mrb[1].mxu0 }
 0x190   : > { %v1147_v12 = vadd.f32 %v1146_v11, %v1105_v9  ;;  %v1148_v15 = vpop.f32.mrb[1].mxu1  ;;  %v1109_v17 = vpop.f32.mrb[2].mxu0 }
 0x191   : > { %v1149_v16 = vadd.f32 %v1148_v15, %v1107_v13  ;;  %v1150_v18 = vpop.f32.mrb[2].mxu1  ;;  %v1110_v20 = vpop.f32.mrb[3].mxu0 }
 0x192   : > { %v1235_v19 = vadd.f32 %v1147_v12, %v283_v10  ;;  %v1151_v21 = vpop.f32.mrb[3].mxu1 }
 0x193   : > { %v1236_v22 = vadd.f32 %v1149_v16, %v284_v14 }
 0x194   : > { %1239 = vst [vmem:[#allocation8] sm:$0xff] %v1235_v19 }
 0x195   : > { %1240 = vst [vmem:[#allocation8 + $0x8] sm:$0xff] %v1236_v22 }
 0x19b   : > { %v1247_v38 = vld [vmem:[#allocation8] sm:$0xff] (!%p1552_p9) }
 0x19c   : > { %v1248_v43 = vld [vmem:[#allocation8 + $0x8] sm:$0xff] (!%p1552_p9)  ;;  %v1273_v50 = vadd.f32 (!%p1552_p9), %v1256_v46, %v1247_v38 }
 0x19d   : > { %v1274_v51 = vadd.f32 (!%p1552_p9), %v1260_v47, %v1248_v43 }
 0x19e   : > { %v1277_v54 = vmax.f32 (!%p1552_p9), %v1273_v50, 0.0 }
 0x19f   : > { %v1278_v55 = vmax.f32 (!%p1552_p9), %v1274_v51, 0.0 }
 0x1a0   : > { %1281 = vst [vmem:[#allocation8] sm:$0xff] (!%p1552_p9), %v1277_v54 }
 0x1a1   : > { %1282 = vst [vmem:[#allocation8 + $0x8] sm:$0xff] (!%p1552_p9), %v1278_v55 }
 0x1ce   : > { %v1187_v23 = vpop.f32.mrb[4].mxu0 }
 0x1cf   : > { %v1228_v24 = vpop.f32.mrb[4].mxu1  ;;  %v1189_v25 = vpop.f32.mrb[5].mxu0  ;;  %1246 = sbr.rel (%p1552_p9) target bundleno = 482 (0x1e2), region = 52 }
 0x1d0   : > { %v1229_v8 = vadd.f32 %v1228_v24, %v1187_v23  ;;  %v1230_v27 = vpop.f32.mrb[5].mxu1  ;;  %v1191_v29 = vpop.f32.mrb[6].mxu0 }
 0x1d1   : > { %v1231_v28 = vadd.f32 %v1230_v27, %v1189_v25  ;;  %v1232_v30 = vpop.f32.mrb[6].mxu1  ;;  %v1192_v32 = vpop.f32.mrb[7].mxu0 }
 0x1d2   : > { %v1237_v31 = vadd.f32 %v1229_v8, %v285_v7  ;;  %v1233_v33 = vpop.f32.mrb[7].mxu1 }
 0x1d3   : > { %v1238_v34 = vadd.f32 %v1231_v28, %v286_v26 }
 0x1d4   : > { %1241 = vst [vmem:[#allocation8 + $0x10] sm:$0xff] %v1237_v31 }
 0x1d5   : > { %1242 = vst [vmem:[#allocation8 + $0x18] sm:$0xff] %v1238_v34 }
 0x1db   : > { %v1249_v44 = vld [vmem:[#allocation8 + $0x10] sm:$0xff] }
 0x1dc   : > { %v1250_v45 = vld [vmem:[#allocation8 + $0x18] sm:$0xff]  ;;  %v1275_v52 = vadd.f32 %v1264_v48, %v1249_v44 }
 0x1dd   : > { %v1276_v53 = vadd.f32 %v1268_v49, %v1250_v45 }
 0x1de   : > { %v1279_v56 = vmax.f32 %v1275_v52, 0.0 }
 0x1df   : > { %v1280_v57 = vmax.f32 %v1276_v53, 0.0 }
 0x1e0   : > { %1283 = vst [vmem:[#allocation8 + $0x10] sm:$0xff] %v1279_v56 }
 0x1e1   : > { %1284 = vst [vmem:[#allocation8 + $0x18] sm:$0xff] %v1280_v57 }
 0x1e2 PF: > { %p1586_p11 = scmp.eq.s32.totalorder %s2071_s18, 8  ;;  %s2021_s15 = smov [#allocation8]  }
 0x1e3   : > { %s1297_s20 = sshll.u32 %s2021_s15, 4  ;;  %s1298_s20 = int_to_ptr.vmem [resolvable:$true] %s1297_s20 }
 0x1e4   : > { %s1925_s21 = scalar_lea.vmem %s1298_s20, 512  ;;  %p1932_p1 = scmp.lt.s32.totalorder %s1298_s20, %s1298_s20 }
 0x1e5   : > { %p1926_p13 = scmp.ne.s32.totalorder %s1298_s20, %s1925_s21  ;;  %p1933_p0 = scmp.lt.s32.totalorder %s1925_s21, %s1925_s21 }
 0x1e7   : > { %p1927_p3 = pnand %p1926_p13, %p1586_p11  ;;  %p1934_p8 = por %p1933_p0, %p1932_p1 }
 0x1e9   : > { %p1928_p4 = pneg %p1927_p3 }
 0x1eb   : > { %p1935_p2 = pnand %p1934_p8, %p1928_p4 }
 0x1ed   : > { %1938 = shalt.err (!%p1935_p2)
}
 0x1ee   : > { %s1939_s7 = scalar_lea.hbm %s2431_s3, 512 }
 0x1ef   : > { %p1940_p12 = scmp.ne.s32.totalorder %s2431_s3, %s1939_s7  ;;  %p1945_p5 = scmp.lt.u32.totalorder %s1939_s7, %s2431_s3 }
 0x1f1   : > { %p1941_p7 = pnand %p1940_p12, %p1586_p11 }
 0x1f3   : > { %p1942_p10 = pneg %p1941_p7 }
 0x1f5   : > { %p1947_p6 = pnand %p1945_p5, %p1942_p10 }
 0x1f7   : > { %1950 = shalt.err (!%p1947_p6)
}
 0x1f8   : > { %1569 = dma.vmem_to_hbm [thread:$0]  (%p1586_p11), %s1298_s20, 512, %s2431_s3, [#allocation4]  }
 0x1f9   : > { %1988 = dma.done.wait (%p1586_p11), [#allocation4], 512  }
 0x1fa   : > { %1990 = vsyncadd (%p1586_p11), [#allocation4], 4294966784 }
 0x1fb PF: > { %s20_s17 = sadd.s32 1, %s2013_s17   ;;  %s2448_s12 = smov %s1997_s13 }
 0x1fc   : > { %p17_p9 = scmp.ge.s32.totalorder %s20_s17, 11   ;;  %s2449_s13 = smov %s2001_s14 }
 0x1fd   : > { %s2450_s14 = smov %s2147_s23  ;;  %s2451_s15 = smov %s2009_s16 }
 0x1fe   : > { %s2452_s16 = smov %s2454_s25  ;;  %19 = sbr.rel (!%p17_p9) target bundleno = 7 (0x7), region = 96 }
 0x205   :  { %1310 = vsyncpa [#allocation3], 1 }
 0x206   :  { %1312 = vsyncpa [#allocation3 + $0x1], 1 }
 0x207   :  { %1313 = vsyncpa [#allocation6], 1 }
 0x208   :  { %1315 = vsyncpa [#allocation6 + $0x1], 1 }
 0x209   :  { %1316 = vsyncpa [#allocation4], 1 }
 0x20a   :  { %1318 = vsyncpa [#allocation4 + $0x1], 1 }

// kernel: e2e_cnn_forward.43
= control target key start
LH: loop header
LB: loop body
LE: loop exit
PB: predicated region body
PF: predicated region fallthrough
CT: control target
= control target key end

     0   :  { %12 = vsyncpa [#allocation3], 0  ;;  %s1301_s0 = inlined_call_operand.hbm [shape: bf16[8,512], index: 0, kind: input, shape index: {}]   ;;  %s1302_s1 = inlined_call_operand.hbm [shape: bf16[512,128], index: 1, kind: input, shape index: {}]   ;;  %s1303_s2 = inlined_call_operand.hbm [shape: f32[1,128], index: 2, kind: input, shape index: {}]   ;;  %s1304_s3 = inlined_call_operand.hbm [shape: bf16[128,128], index: 3, kind: input, shape index: {}]   ;;  %s1305_s4 = inlined_call_operand.hbm [shape: f32[1,128], index: 4, kind: input, shape index: {}]   ;;  %s1306_s5 = inlined_call_operand.hbm [shape: bf16[128,128], index: 5, kind: input, shape index: {}]   ;;  %s1307_s6 = inlined_call_operand.hbm [shape: f32[1,128], index: 6, kind: input, shape index: {}]   ;;  %s1308_s7 = inlined_call_operand.hbm [shape: f32[8,128], index: 7, kind: output, shape index: {}]  }
   0x1   :  { %13 = vsyncpa [#allocation6], 0 }
   0x2   :  { %14 = vsyncpa [#allocation9], 0 }
   0x3   :  { %15 = vsyncpa [#allocation12], 0 }
   0x4   :  { %16 = vsyncpa [#allocation4], 0  ;;  %s1126_s24 = smov [#allocation5]   ;;  %s940_s28 = scalar_lea.hbm %s1302_s1, 4096 }
   0x5   :  { %s32_s25 = sshll.u32 %s1126_s24, 4  ;;  %p941_p0 = scmp.ne.s32.totalorder %s1302_s1, %s940_s28  ;;  %s33_s25 = int_to_ptr.vmem [resolvable:$true] %s32_s25 }
   0x6   :  { %p944_p1 = scmp.lt.u32.totalorder %s940_s28, %s1302_s1 }
   0x8   :  { %p946_p2 = pnand %p944_p1, %p941_p0 }
   0xa   :  { %949 = shalt.err (!%p946_p2)
}
   0xb   :  { %s950_s10 = scalar_lea.vmem %s33_s25, 4096  ;;  %p955_p4 = scmp.lt.s32.totalorder %s33_s25, %s33_s25 }
   0xc   :  { %p951_p3 = scmp.ne.s32.totalorder %s33_s25, %s950_s10  ;;  %p956_p5 = scmp.lt.s32.totalorder %s950_s10, %s950_s10 }
   0xe   :  { %p957_p6 = por %p956_p5, %p955_p4 }
  0x10   :  { %p958_p7 = pnand %p957_p6, %p951_p3 }
  0x12   :  { %961 = shalt.err (!%p958_p7)
}
  0x13   :  { %s1127_s11 = smov 64   ;;  %s1128_s12 = smov 4  }
  0x14   :  { %38 = dma.hbm_to_vmem [thread:$0]  %s1302_s1, 4096, %s33_s25, [#allocation6], %s1127_s11, %s1127_s11, %s1128_s12  }
  0x15   :  { %s1129_s15 = smov [#allocation8]   ;;  %s1130_s17 = smov [#allocation11]  }
  0x16   :  { %s54_s16 = sshll.u32 %s1129_s15, 4  ;;  %s76_s18 = sshll.u32 %s1130_s17, 4  ;;  %s55_s16 = int_to_ptr.vmem [resolvable:$true] %s54_s16  ;;  %s77_s18 = int_to_ptr.vmem [resolvable:$true] %s76_s18 }
  0x17   :  { %s962_s21 = scalar_lea.hbm %s1304_s3, 1024 }
  0x18   :  { %p963_p8 = scmp.ne.s32.totalorder %s1304_s3, %s962_s21  ;;  %p966_p9 = scmp.lt.u32.totalorder %s962_s21, %s1304_s3 }
  0x1a   :  { %p968_p10 = pnand %p966_p9, %p963_p8 }
  0x1c   :  { %971 = shalt.err (!%p968_p10)
}
  0x1d   :  { %s972_s1 = scalar_lea.vmem %s55_s16, 1024  ;;  %p977_p12 = scmp.lt.s32.totalorder %s55_s16, %s55_s16 }
  0x1e   :  { %p973_p11 = scmp.ne.s32.totalorder %s55_s16, %s972_s1  ;;  %p978_p13 = scmp.lt.s32.totalorder %s972_s1, %s972_s1 }
  0x20   :  { %p979_p0 = por %p978_p13, %p977_p12 }
  0x22   :  { %p980_p1 = pnand %p979_p0, %p973_p11 }
  0x24   :  { %983 = shalt.err (!%p980_p1)
}
  0x25   :  { %60 = dma.hbm_to_vmem [thread:$0]  %s1304_s3, 1024, %s55_s16, [#allocation9], %s1127_s11, %s1127_s11, %s1128_s12  }
  0x26   :  { %s984_s30 = scalar_lea.hbm %s1306_s5, 1024 }
  0x27   :  { %p985_p2 = scmp.ne.s32.totalorder %s1306_s5, %s984_s30  ;;  %p988_p3 = scmp.lt.u32.totalorder %s984_s30, %s1306_s5 }
  0x29   :  { %p990_p4 = pnand %p988_p3, %p985_p2 }
  0x2b   :  { %993 = shalt.err (!%p990_p4)
}
  0x2c   :  { %s994_s14 = scalar_lea.vmem %s77_s18, 1024  ;;  %p999_p6 = scmp.lt.s32.totalorder %s77_s18, %s77_s18 }
  0x2d   :  { %p995_p5 = scmp.ne.s32.totalorder %s77_s18, %s994_s14  ;;  %p1000_p7 = scmp.lt.s32.totalorder %s994_s14, %s994_s14 }
  0x2f   :  { %p1001_p8 = por %p1000_p7, %p999_p6 }
  0x31   :  { %p1002_p9 = pnand %p1001_p8, %p995_p5 }
  0x33   :  { %1005 = shalt.err (!%p1002_p9)
}
  0x34   :  { %82 = dma.hbm_to_vmem [thread:$0]  %s1306_s5, 1024, %s77_s18, [#allocation12], %s1127_s11, %s1127_s11, %s1128_s12  }
  0x35   :  { %s1131_s16 = smov [#allocation2]   ;;  %s1132_s19 = smov [#allocation7]  }
  0x36   :  { %s23_s17 = sshll.u32 %s1131_s16, 4  ;;  %s45_s20 = sshll.u32 %s1132_s19, 4  ;;  %s24_s17 = int_to_ptr.vmem [resolvable:$true] %s23_s17  ;;  %s46_s20 = int_to_ptr.vmem [resolvable:$true] %s45_s20 }
  0x37   :  { %s1006_s23 = scalar_lea.hbm %s1301_s0, 256 }
  0x38   :  { %p1007_p10 = scmp.ne.s32.totalorder %s1301_s0, %s1006_s23  ;;  %p1010_p11 = scmp.lt.u32.totalorder %s1006_s23, %s1301_s0 }
  0x3a   :  { %p1012_p12 = pnand %p1010_p11, %p1007_p10 }
  0x3c   :  { %1015 = shalt.err (!%p1012_p12)
}
  0x3d   :  { %s1016_s5 = scalar_lea.vmem %s24_s17, 256  ;;  %p1021_p0 = scmp.lt.s32.totalorder %s24_s17, %s24_s17 }
  0x3e   :  { %p1017_p13 = scmp.ne.s32.totalorder %s24_s17, %s1016_s5  ;;  %p1022_p1 = scmp.lt.s32.totalorder %s1016_s5, %s1016_s5 }
  0x40   :  { %p1023_p2 = por %p1022_p1, %p1021_p0 }
  0x42   :  { %p1024_p3 = pnand %p1023_p2, %p1017_p13 }
  0x44   :  { %1027 = shalt.err (!%p1024_p3)
}
  0x45   :  { %26 = dma.hbm_to_vmem [thread:$0]  %s1301_s0, 256, %s24_s17, [#allocation3]  }
  0x46   :  { %s1028_s28 = scalar_lea.hbm %s1303_s2, 16 }
  0x47   :  { %p1029_p4 = scmp.ne.s32.totalorder %s1303_s2, %s1028_s28  ;;  %p1032_p5 = scmp.lt.u32.totalorder %s1028_s28, %s1303_s2 }
  0x49   :  { %p1034_p6 = pnand %p1032_p5, %p1029_p4 }
  0x4b   :  { %1037 = shalt.err (!%p1034_p6)
}
  0x4c   :  { %s1038_s10 = scalar_lea.vmem %s46_s20, 16  ;;  %s1042_s13 = scalar_lea.vmem %s46_s20, 32 }
  0x4d   :  { %p1039_p7 = scmp.ne.s32.totalorder %s46_s20, %s1038_s10  ;;  %p1043_p8 = scmp.lt.s32.totalorder %s46_s20, %s46_s20 }
  0x4e   :  { %p1044_p9 = scmp.lt.s32.totalorder %s1042_s13, %s1038_s10 }
  0x50   :  { %p1045_p10 = por %p1044_p9, %p1043_p8 }
  0x52   :  { %p1046_p11 = pnand %p1045_p10, %p1039_p7 }
  0x54   :  { %1049 = shalt.err (!%p1046_p11)
}
  0x55   :  { %48 = dma.hbm_to_vmem [thread:$0]  %s1303_s2, 16, %s46_s20, [#allocation6]  }
  0x56   :  { %s1133_s3 = smov [#allocation10]   ;;  %s1134_s16 = smov [#allocation13]  }
  0x57   :  { %s67_s15 = sshll.u32 %s1133_s3, 4  ;;  %s89_s17 = sshll.u32 %s1134_s16, 4  ;;  %s68_s15 = int_to_ptr.vmem [resolvable:$true] %s67_s15  ;;  %s90_s17 = int_to_ptr.vmem [resolvable:$true] %s89_s17 }
  0x58   :  { %s1050_s22 = scalar_lea.hbm %s1305_s4, 16 }
  0x59   :  { %p1051_p12 = scmp.ne.s32.totalorder %s1305_s4, %s1050_s22  ;;  %p1054_p13 = scmp.lt.u32.totalorder %s1050_s22, %s1305_s4 }
  0x5b   :  { %p1056_p0 = pnand %p1054_p13, %p1051_p12 }
  0x5d   :  { %1059 = shalt.err (!%p1056_p0)
}
  0x5e   :  { %s1060_s2 = scalar_lea.vmem %s68_s15, 16  ;;  %s1064_s20 = scalar_lea.vmem %s68_s15, 32 }
  0x5f   :  { %p1061_p1 = scmp.ne.s32.totalorder %s68_s15, %s1060_s2  ;;  %p1065_p2 = scmp.lt.s32.totalorder %s68_s15, %s68_s15 }
  0x60   :  { %p1066_p3 = scmp.lt.s32.totalorder %s1064_s20, %s1060_s2 }
  0x62   :  { %p1067_p4 = por %p1066_p3, %p1065_p2 }
  0x64   :  { %p1068_p5 = pnand %p1067_p4, %p1061_p1 }
  0x66   :  { %1071 = shalt.err (!%p1068_p5)
}
  0x67   :  { %70 = dma.hbm_to_vmem [thread:$0]  %s1305_s4, 16, %s68_s15, [#allocation9]  }
  0x68   :  { %s1072_s18 = scalar_lea.hbm %s1307_s6, 16 }
  0x69   :  { %p1073_p6 = scmp.ne.s32.totalorder %s1307_s6, %s1072_s18  ;;  %p1076_p7 = scmp.lt.u32.totalorder %s1072_s18, %s1307_s6 }
  0x6b   :  { %p1078_p8 = pnand %p1076_p7, %p1073_p6 }
  0x6d   :  { %1081 = shalt.err (!%p1078_p8)
}
  0x6e   :  { %s1082_s8 = scalar_lea.vmem %s90_s17, 16  ;;  %s1086_s9 = scalar_lea.vmem %s90_s17, 32 }
  0x6f   :  { %p1083_p9 = scmp.ne.s32.totalorder %s90_s17, %s1082_s8  ;;  %p1087_p10 = scmp.lt.s32.totalorder %s90_s17, %s90_s17 }
  0x70   :  { %p1088_p11 = scmp.lt.s32.totalorder %s1086_s9, %s1082_s8 }
  0x72   :  { %p1089_p12 = por %p1088_p11, %p1087_p10 }
  0x74   :  { %p1090_p13 = pnand %p1089_p12, %p1083_p9 }
  0x76   :  { %1093 = shalt.err (!%p1090_p13)
}
  0x77   :  { %92 = dma.hbm_to_vmem [thread:$0]  %s1307_s6, 16, %s90_s17, [#allocation12]  }
  0x78   :  { %1116 = dma.done.wait [#allocation3], 256  }
  0x79   :  { %1117 = vsyncadd [#allocation3], 4294967040 }
  0x7a   :  { %1118 = dma.done.wait [#allocation6], 4112  }
  0x7b   :  { %1119 = vsyncadd [#allocation6], 4294963184 }
  0x7c   :  { %1120 = dma.done.wait [#allocation9], 1040  }
  0x7d   :  { %1121 = vsyncadd [#allocation9], 4294966256 }
  0x7e   :  { %1122 = dma.done.wait [#allocation12], 1040  }
  0x7f   :  { %1123 = vsyncadd [#allocation12], 4294966256  ;;  %v888_v0 = vld [vmem:[#allocation5 + $0x40] sm:$0xff]   ;;  %v892_v4 = vld [vmem:[#allocation5 + $0x48] sm:$0xff]   ;;  %v1135_v39 = vmov 0.0   ;;  %vm1136_vm0 = vmmov 0  }
  0x80   :  { %v889_v1 = vld [vmem:[#allocation5 + $0xc0] sm:$0xff]   ;;  %774 = vmatprep.subr.bf16.mxu0 %v888_v0  ;;  %v893_v5 = vld [vmem:[#allocation5 + $0xc8] sm:$0xff]   ;;  %v896_v8 = vld [vmem:[#allocation5 + $0x50] sm:$0xff]   ;;  %s1137_s6 = smov [#allocation14]  }
  0x81   :  { %v890_v2 = vld [vmem:[#allocation5] sm:$0xff]   ;;  %796 = vmatprep.subr.bf16.mxu1 %v889_v1  ;;  %v894_v6 = vld [vmem:[#allocation5 + $0x8] sm:$0xff]   ;;  %v897_v9 = vld [vmem:[#allocation5 + $0xd0] sm:$0xff]   ;;  %s707_s13 = sshll.u32 %s1137_s6, 4  ;;  %s708_s13 = int_to_ptr.vmem [resolvable:$true] %s707_s13 }
  0x82   :  { %v891_v3 = vld [vmem:[#allocation5 + $0x80] sm:$0xff]   ;;  %775 = vmatpush3.bf16.msra.mxu0 %v890_v2  ;;  %v895_v7 = vld [vmem:[#allocation5 + $0x88] sm:$0xff]   ;;  %v898_v10 = vld [vmem:[#allocation5 + $0x10] sm:$0xff]   ;;  %s1094_s0 = scalar_lea.vmem %s708_s13, 128  ;;  %p1099_p1 = scmp.lt.s32.totalorder %s708_s13, %s708_s13 }
  0x83   :  { %797 = vmatpush3.bf16.msra.mxu1 %v891_v3  ;;  %776 = vmatprep.subr.bf16.mxu0 %v892_v4  ;;  %v899_v11 = vld [vmem:[#allocation5 + $0x90] sm:$0xff]   ;;  %v900_v12 = vld [vmem:[#allocation5 + $0x58] sm:$0xff]   ;;  %v904_v16 = vld [vmem:[#allocation5 + $0x60] sm:$0xff]   ;;  %p1095_p0 = scmp.ne.s32.totalorder %s708_s13, %s1094_s0  ;;  %p1100_p2 = scmp.lt.s32.totalorder %s1094_s0, %s1094_s0 }
  0x84   :  { %798 = vmatprep.subr.bf16.mxu1 %v893_v5  ;;  %v901_v13 = vld [vmem:[#allocation5 + $0xd8] sm:$0xff]   ;;  %v905_v17 = vld [vmem:[#allocation5 + $0xe0] sm:$0xff]   ;;  %v908_v20 = vld [vmem:[#allocation5 + $0x68] sm:$0xff]  }
  0x85   :  { %v902_v14 = vld [vmem:[#allocation5 + $0x18] sm:$0xff]   ;;  %v906_v18 = vld [vmem:[#allocation5 + $0x20] sm:$0xff]   ;;  %v909_v21 = vld [vmem:[#allocation5 + $0xe8] sm:$0xff]   ;;  %p1101_p3 = por %p1100_p2, %p1099_p1 }
  0x86   :  { %777 = vmatpush3.bf16.msra.mxu0 %v894_v6  ;;  %v903_v15 = vld [vmem:[#allocation5 + $0x98] sm:$0xff]   ;;  %v907_v19 = vld [vmem:[#allocation5 + $0xa0] sm:$0xff]   ;;  %v910_v22 = vld [vmem:[#allocation5 + $0x28] sm:$0xff]  }
  0x87   :  { %799 = vmatpush3.bf16.msra.mxu1 %v895_v7  ;;  %778 = vmatprep.subr.bf16.mxu0 %v896_v8  ;;  %v911_v23 = vld [vmem:[#allocation5 + $0xa8] sm:$0xff]   ;;  %v912_v24 = vld [vmem:[#allocation5 + $0x70] sm:$0xff]   ;;  %v916_v28 = vld [vmem:[#allocation5 + $0x78] sm:$0xff]   ;;  %p1102_p4 = pnand %p1101_p3, %p1095_p0 }
  0x88   :  { %800 = vmatprep.subr.bf16.mxu1 %v897_v9  ;;  %v913_v25 = vld [vmem:[#allocation5 + $0xf0] sm:$0xff]   ;;  %v917_v29 = vld [vmem:[#allocation5 + $0xf8] sm:$0xff]   ;;  %v924_v38 = vld [vmem:[#allocation8] sm:$0xff]  }
  0x89   :  { %v914_v26 = vld [vmem:[#allocation5 + $0x30] sm:$0xff]   ;;  %v918_v30 = vld [vmem:[#allocation5 + $0x38] sm:$0xff]   ;;  %v928_v43 = vld [vmem:[#allocation8 + $0x20] sm:$0xff]  }
  0x8a   :  { %779 = vmatpush3.bf16.msra.mxu0 %v898_v10  ;;  %v915_v27 = vld [vmem:[#allocation5 + $0xb0] sm:$0xff]   ;;  %v919_v31 = vld [vmem:[#allocation5 + $0xb8] sm:$0xff]   ;;  %v932_v47 = vld [vmem:[#allocation11] sm:$0xff]  }
  0x8b   :  { %801 = vmatpush3.bf16.msra.mxu1 %v899_v11  ;;  %780 = vmatprep.subr.bf16.mxu0 %v900_v12  ;;  %v115_v32 = vld [vmem:[#allocation2] sm:$0xff]  ;;  %v116_v33 = vld [vmem:[#allocation2 + $0x8] sm:$0xff]  ;;  %v936_v51 = vld [vmem:[#allocation11 + $0x20] sm:$0xff]  }
  0x8c   :  { %802 = vmatprep.subr.bf16.mxu1 %v901_v13  ;;  %v720_v34 = vcombine.low %v115_v32, %v115_v32  ;;  %v721_v35 = vcombine.high %v115_v32, %v115_v32  ;;  %v722_v36 = vcombine.low %v116_v33, %v116_v33  ;;  %v723_v37 = vcombine.high %v116_v33, %v116_v33  ;;  %v925_v40 = vld [vmem:[#allocation8 + $0x8] sm:$0xff]   ;;  %v926_v41 = vld [vmem:[#allocation8 + $0x10] sm:$0xff]   ;;  %v927_v42 = vld [vmem:[#allocation8 + $0x18] sm:$0xff]  }
  0x8d   :  { %v929_v44 = vld [vmem:[#allocation8 + $0x28] sm:$0xff]   ;;  %v930_v45 = vld [vmem:[#allocation8 + $0x30] sm:$0xff]   ;;  %v931_v46 = vld [vmem:[#allocation8 + $0x38] sm:$0xff]  }
  0x8e   :  { %781 = vmatpush3.bf16.msra.mxu0 %v902_v14  ;;  %426 = vmatprep.mubr.bf16.mxu0 %v721_v35  ;;  %v933_v48 = vld [vmem:[#allocation11 + $0x8] sm:$0xff]   ;;  %v934_v49 = vld [vmem:[#allocation11 + $0x10] sm:$0xff]   ;;  %v935_v50 = vld [vmem:[#allocation11 + $0x18] sm:$0xff]  }
  0x8f   :  { %803 = vmatpush3.bf16.msra.mxu1 %v903_v15  ;;  %782 = vmatprep.subr.bf16.mxu0 %v904_v16  ;;  %v937_v52 = vld [vmem:[#allocation11 + $0x28] sm:$0xff]   ;;  %v719_v55 = vld [vmem:[#allocation7] ss:$0 sm:$0xff]  ;;  %v938_v4 = vld [vmem:[#allocation11 + $0x30] sm:$0xff]  }
  0x90   :  { %804 = vmatprep.subr.bf16.mxu1 %v905_v17  ;;  %466 = vmatprep.mubr.bf16.mxu1 %v723_v37  ;;  %v939_v5 = vld [vmem:[#allocation11 + $0x38] sm:$0xff]   ;;  %v765_v14 = vld [vmem:[#allocation13] ss:$0 sm:$0xff] }
  0x91   :  { %v756_v6 = vld [vmem:[#allocation10] ss:$0 sm:$0xff] }
  0x92   :  { %783 = vmatpush3.bf16.msra.mxu0 %v906_v18 }
  0x93   :  { %805 = vmatpush3.bf16.msra.mxu1 %v907_v19  ;;  %784 = vmatprep.subr.bf16.mxu0 %v908_v20 }
  0x94   :  { %806 = vmatprep.subr.bf16.mxu1 %v909_v21 }
  0x96   :  { %785 = vmatpush3.bf16.msra.mxu0 %v910_v22 }
  0x97   :  { %807 = vmatpush3.bf16.msra.mxu1 %v911_v23  ;;  %786 = vmatprep.subr.bf16.mxu0 %v912_v24 }
  0x98   :  { %808 = vmatprep.subr.bf16.mxu1 %v913_v25 }
  0x9a   :  { %787 = vmatpush3.bf16.msra.mxu0 %v914_v26 }
  0x9b   :  { %809 = vmatpush3.bf16.msra.mxu1 %v915_v27  ;;  %788 = vmatprep.subr.bf16.mxu0 %v916_v28 }
  0x9c   :  { %810 = vmatprep.subr.bf16.mxu1 %v917_v29 }
  0x9e   :  { %789 = vmatpush3.bf16.msra.mxu0 %v918_v30 }
  0x9f   :  { %811 = vmatpush3.bf16.msra.mxu1 %v919_v31  ;;  %836 = vmatprep.subr.bf16.mxu0 %v1135_v39 }
  0xa0   :  { %856 = vmatprep.subr.bf16.mxu1 %v1135_v39 }
  0xa1   :  { %427 = vmatmul.mubr.bf16.vlgmr.msra.gmra.mrb[0].mxu0 %v720_v34 }
  0xa2   :  { %467 = vmatmul.mubr.bf16.vlgmr.msra.gmra.mrb[0].mxu1 %v722_v36  ;;  %837 = vmatpush3.bf16.msra.mxu0 %v924_v38 }
  0xa3   :  { %838 = vmatprep.subr.bf16.mxu0 %v1135_v39  ;;  %852 = vmatprep.mubr.msk.bf16.mxu0 %vm1136_vm0, %v1135_v39 }
  0xa4   :  { %872 = vmatprep.mubr.msk.bf16.mxu1 %vm1136_vm0, %v1135_v39  ;;  %857 = vmatpush3.bf16.msra.mxu1 %v932_v47 }
  0xa5   :  { %858 = vmatprep.subr.bf16.mxu1 %v1135_v39 }
  0xa6   :  { %839 = vmatpush3.bf16.msra.mxu0 %v925_v40 }
  0xa7   :  { %840 = vmatprep.subr.bf16.mxu0 %v1135_v39 }
  0xa8   :  { %859 = vmatpush3.bf16.msra.mxu1 %v933_v48 }
  0xa9   :  { %860 = vmatprep.subr.bf16.mxu1 %v1135_v39 }
  0xaa   :  { %841 = vmatpush3.bf16.msra.mxu0 %v926_v41 }
  0xab   :  { %842 = vmatprep.subr.bf16.mxu0 %v1135_v39 }
  0xac   :  { %861 = vmatpush3.bf16.msra.mxu1 %v934_v49 }
  0xad   :  { %862 = vmatprep.subr.bf16.mxu1 %v1135_v39 }
  0xae   :  { %843 = vmatpush3.bf16.msra.mxu0 %v927_v42 }
  0xaf   :  { %844 = vmatprep.subr.bf16.mxu0 %v1135_v39 }
  0xb0   :  { %863 = vmatpush3.bf16.msra.mxu1 %v935_v50 }
  0xb1   :  { %864 = vmatprep.subr.bf16.mxu1 %v1135_v39 }
  0xb2   :  { %845 = vmatpush3.bf16.msra.mxu0 %v928_v43 }
  0xb3   :  { %846 = vmatprep.subr.bf16.mxu0 %v1135_v39 }
  0xb4   :  { %865 = vmatpush3.bf16.msra.mxu1 %v936_v51 }
  0xb5   :  { %866 = vmatprep.subr.bf16.mxu1 %v1135_v39 }
  0xb6   :  { %847 = vmatpush3.bf16.msra.mxu0 %v929_v44 }
  0xb7   :  { %848 = vmatprep.subr.bf16.mxu0 %v1135_v39 }
  0xb8   :  { %867 = vmatpush3.bf16.msra.mxu1 %v937_v52 }
  0xb9   :  { %868 = vmatprep.subr.bf16.mxu1 %v1135_v39 }
  0xba   :  { %849 = vmatpush3.bf16.msra.mxu0 %v930_v45 }
  0xbb   :  { %850 = vmatprep.subr.bf16.mxu0 %v1135_v39 }
  0xbc   :  { %869 = vmatpush3.bf16.msra.mxu1 %v938_v4 }
  0xbd   :  { %870 = vmatprep.subr.bf16.mxu1 %v1135_v39 }
  0xbe   :  { %851 = vmatpush3.bf16.msra.mxu0 %v931_v46 }
  0xc0   :  { %871 = vmatpush3.bf16.msra.mxu1 %v939_v5 }
 0x174   :  { %v790_v53 = vpop.f32.mrb[0].mxu0 }
 0x175   :  { %v812_v54 = vpop.f32.mrb[0].mxu1  ;;  %v791_v56 = vpop.f32.mrb[1].mxu0 }
 0x176   :  { %v813_v57 = vpop.f32.mrb[1].mxu1  ;;  %v792_v58 = vadd.f32 %v791_v56, %v790_v53  ;;  %v793_v60 = vpop.f32.mrb[2].mxu0 }
 0x177   :  { %v814_v59 = vadd.f32 %v813_v57, %v812_v54  ;;  %v815_v61 = vpop.f32.mrb[2].mxu1  ;;  %v794_v62 = vpop.f32.mrb[3].mxu0 }
 0x178   :  { %v816_v63 = vpop.f32.mrb[3].mxu1  ;;  %v429_v0 = vadd.f32 %v792_v58, %v719_v55 }
 0x17a   :  { %v469_v1 = vadd.f32 %v814_v59, %v429_v0 }
 0x17c   :  { %v474_v2 = vmax.f32 %v469_v1, 0.0 }
 0x17e   :  { %v475_v3 = vpack.c.bf16 %v474_v2, %v474_v2 }
 0x180   :  { %853 = vmatmul.mubr.bf16.vlgmr.msra.gmra.mrb[4].mxu0 %v475_v3 }
 0x253   :  { %v581_v7 = vpop.f32.mrb[4].mxu0 }
 0x254   :  { %v582_v8 = vadd.f32 %v756_v6, %v581_v7  ;;  %v854_v9 = vpop.f32.mrb[5].mxu0 }
 0x255   :  { %v584_v10 = vpop.f32.mrb[6].mxu0 }
 0x256   :  { %v587_v11 = vmax.f32 %v582_v8, 0.0  ;;  %v855_v12 = vpop.f32.mrb[7].mxu0 }
 0x258   :  { %v588_v13 = vpack.c.bf16 %v587_v11, %v587_v11 }
 0x25a   :  { %873 = vmatmul.mubr.bf16.vlgmr.msra.gmra.mrb[4].mxu1 %v588_v13 }
 0x32d   :  { %v694_v15 = vpop.f32.mrb[4].mxu1 }
 0x32e   :  { %v695_v16 = vadd.f32 %v765_v14, %v694_v15  ;;  %v874_v17 = vpop.f32.mrb[5].mxu1 }
 0x32f   :  { %v697_v18 = vpop.f32.mrb[6].mxu1 }
 0x330   :  { %700 = vst [vmem:[#allocation14] sm:$0xff] %v695_v16  ;;  %v875_v19 = vpop.f32.mrb[7].mxu1 }
 0x331   :  { %1105 = shalt.err (!%p1102_p4)
}
 0x332   :  { %s1106_s15 = scalar_lea.hbm %s1308_s7, 128 }
 0x333   :  { %p1107_p5 = scmp.ne.s32.totalorder %s1308_s7, %s1106_s15  ;;  %p1110_p6 = scmp.lt.u32.totalorder %s1106_s15, %s1308_s7 }
 0x335   :  { %p1112_p7 = pnand %p1110_p6, %p1107_p5 }
 0x337   :  { %1115 = shalt.err (!%p1112_p7)
}
 0x338   :  { %710 = dma.vmem_to_hbm [thread:$0]  %s708_s13, 128, %s1308_s7, [#allocation4]  }
 0x339   :  { %1124 = dma.done.wait [#allocation4], 128  }
 0x33a   :  { %1125 = vsyncadd [#allocation4], 4294967168 }
 0x33b   :  { %714 = vsyncpa [#allocation3], 1 }
 0x33c   :  { %715 = vsyncpa [#allocation6], 1 }
 0x33d   :  { %716 = vsyncpa [#allocation9], 1 }
 0x33e   :  { %717 = vsyncpa [#allocation12], 1 }
 0x33f   :  { %718 = vsyncpa [#allocation4], 1 }

</bundles_post_ra>
